<compile_context>
chip_gen: v7x
topology: tpu7x:2x2x1
jax: 0.10.0
libtpu: 0.0.40
codegen_flags: <defaults>
</compile_context>

<pallas_src>
import functools
import math

import jax
import jax.numpy as jnp
from jax.experimental import pallas as pl
from jax.experimental.pallas import tpu as pltpu  # noqa: F401  (TPU backend)

# ---------------- small, module-consistent config ----------------
VOCAB = 50          # len(tokenizer)
SEP_ID = 1          # tokenizer.dictionary.token2id['<SEP>']
EMBED_DIM = 32      # embed_dim (small)
MAX_LEN = 64        # max_len (small)
DIM = (1, 1, 2, 2)  # dim=[1, 1, 2, 2]
NUM_HEADS = 8
BATCH = 2
SEQ = 8
NEG_INF = -1e30


def get_positional_encoding(d_model: int, max_len: int) -> jnp.ndarray:
    """Same math as the PyTorch helper; returns (max_len, d_model)."""
    position = jnp.arange(max_len, dtype=jnp.float32)[:, None]
    two_i = jnp.arange(0, d_model, 2, dtype=jnp.float32)
    div_term = jnp.exp(two_i * -(math.log(10000.0) / d_model))
    enc = jnp.zeros((max_len, d_model), dtype=jnp.float32)
    enc = enc.at[:, 0::2].set(jnp.sin(position * div_term))
    enc = enc.at[:, 1::2].set(jnp.cos(position * div_term))
    return enc


# ---------------- weight-slab layout (static Python ints) ----------------
def make_slab_layout(embed_dim, dim):
    """Row/lane offsets of every block weight inside one packed f32 slab.

    Regions are kept 8-row (sublane) aligned so in-kernel static slices never
    cross a (8,128) tile boundary on the sublane axis.
    """
    in_dim = (1,) + tuple(dim)
    width = 3 * embed_dim * max(in_dim)          # 192 lanes
    blocks = []
    r = 0
    for i in range(len(dim)):
        cin = embed_dim * in_dim[i]
        cout = embed_dim * dim[i]
        assert cin % 8 == 0 and cout % 8 == 0
        blk = dict(cin=cin, cout=cout,
                   wqkv_r=r,                      # (cin, 3*cin)
                   bqkv_r=r + cin,                # (1, 3*cin), padded to 8 rows
                   wo_r=r + cin + 8,              # (cin, cout)
                   bo_r=r + cin + 8 + cin)        # (1, cout), padded to 8 rows
        r = blk['bo_r'] + 8
        blocks.append(blk)
    return blocks, r, width


# ---------------- fused forward kernel (single launch, no grid) ----------------
def _fused_encoder_kernel(emb_ref, pe_ref, slab_ref, o_ref, *,
                          layout, num_heads, scale, valid_len, s_pad, batch):
    # scale-by-sqrt(embed_dim) + positional encoding (fused prologue)
    x = emb_ref[...] * scale + pe_ref[...]                      # (B*S_pad, C0) f32

    # Block-diagonal additive key mask: a query in batch b may only attend to
    # the first `valid_len` keys of batch b.  Built once (single launch).
    colpos = jax.lax.broadcasted_iota(jnp.int32, (s_pad, s_pad), 1)
    base = jnp.where(colpos < valid_len, 0.0, NEG_INF).astype(jnp.float32)
    neg = jnp.full((s_pad, s_pad), NEG_INF, dtype=jnp.float32)
    mask = jnp.concatenate(
        [jnp.concatenate([base if c == r else neg for c in range(batch)], axis=1)
         for r in range(batch)], axis=0)                        # (B*S_pad, B*S_pad)

    for lay in layout:                                          # static unroll (4)
        cin, cout = lay['cin'], lay['cout']
        hd = cin // num_heads
        inv_sqrt_hd = 1.0 / math.sqrt(hd)

        # static slices of the packed weight slab (resident in VMEM)
        wqkv = slab_ref[lay['wqkv_r']:lay['wqkv_r'] + cin, 0:3 * cin]   # (cin, 3*cin)
        bqkv = slab_ref[lay['bqkv_r']:lay['bqkv_r'] + 1, 0:3 * cin]     # (1, 3*cin)
        wo = slab_ref[lay['wo_r']:lay['wo_r'] + cin, 0:cout]            # (cin, cout)
        bo = slab_ref[lay['bo_r']:lay['bo_r'] + 1, 0:cout]              # (1, cout)

        # ONE lane-dense fused QKV matmul for all heads & both batch elements
        qkv = jnp.dot(x, wqkv, preferred_element_type=jnp.float32) + bqkv  # (R, 3*cin)

        # per-(batch,head) attention; heads are free static lane slices of qkv
        ctx_parts = []
        for h in range(num_heads):                              # static unroll (8)
            qh = qkv[:, h * hd:(h + 1) * hd]                    # (R, hd)
            kh = qkv[:, cin + h * hd:cin + (h + 1) * hd]
            vh = qkv[:, 2 * cin + h * hd:2 * cin + (h + 1) * hd]
            # Q @ K^T via contraction on the last axis of both (no explicit .T)
            s = jax.lax.dot_general(qh, kh, (((1,), (1,)), ((), ())),
                                    preferred_element_type=jnp.float32)
            s = s * inv_sqrt_hd + mask                          # (R, R)
            s = s - jnp.max(s, axis=-1, keepdims=True)
            p = jnp.exp(s)
            p = p * pl.reciprocal(jnp.sum(p, axis=-1, keepdims=True), approx=True)
            ctx_parts.append(jnp.dot(p, vh, preferred_element_type=jnp.float32))
        ctx = jnp.concatenate(ctx_parts, axis=-1)               # (R, cin) lane concat

        # ONE lane-dense output projection over all heads
        x = jnp.dot(ctx, wo, preferred_element_type=jnp.float32) + bo     # (R, cout)

    # lane-dense store: (S_pad, B*C_out) = (16, 128) -> unmasked 128-lane vst
    o_ref[...] = jnp.concatenate(
        [x[b * s_pad:(b + 1) * s_pad, :] for b in range(batch)], axis=-1
    ).astype(o_ref.dtype)


# ---------------- parameters (deterministic, in-script) ----------------
def init_text_encoder_params(key, vocab, embed_dim, dim):
    """PyTorch-shaped parameters (wq/wk/wv/wo + biases per block)."""
    kit = iter(jax.random.split(key, 64))
    params = {"embedding": jax.random.normal(next(kit), (vocab, embed_dim), jnp.float32)}
    blocks = []
    in_dim = (1,) + tuple(dim)
    for i in range(len(dim)):
        cin = embed_dim * in_dim[i]
        cout = embed_dim * dim[i]
        blocks.append({
            "wq": jax.random.normal(next(kit), (cin, cin), jnp.float32) / math.sqrt(cin),
            "wk": jax.random.normal(next(kit), (cin, cin), jnp.float32) / math.sqrt(cin),
            "wv": jax.random.normal(next(kit), (cin, cin), jnp.float32) / math.sqrt(cin),
            "wo": jax.random.normal(next(kit), (cin, cout), jnp.float32) / math.sqrt(cin),
            "bq": jnp.zeros((1, cin), jnp.float32),
            "bk": jnp.zeros((1, cin), jnp.float32),
            "bv": jnp.zeros((1, cin), jnp.float32),
            "bo": jnp.zeros((1, cout), jnp.float32),
        })
    params["blocks"] = blocks
    return params


def prep_params_for_kernel(params):
    """Pack all block weights/biases into ONE f32 slab (done once, outside kernel)."""
    layout, rows, width = make_slab_layout(EMBED_DIM, DIM)
    slab = jnp.zeros((rows, width), jnp.float32)
    for lay, p in zip(layout, params["blocks"]):
        cin, cout = lay['cin'], lay['cout']
        wqkv = jnp.concatenate([p["wq"], p["wk"], p["wv"]], axis=1)   # (cin, 3*cin)
        bqkv = jnp.concatenate([p["bq"], p["bk"], p["bv"]], axis=1)   # (1, 3*cin)
        slab = slab.at[lay['wqkv_r']:lay['wqkv_r'] + cin, 0:3 * cin].set(wqkv)
        slab = slab.at[lay['bqkv_r']:lay['bqkv_r'] + 1, 0:3 * cin].set(bqkv)
        slab = slab.at[lay['wo_r']:lay['wo_r'] + cin, 0:cout].set(p["wo"])
        slab = slab.at[lay['bo_r']:lay['bo_r'] + 1, 0:cout].set(p["bo"])
    return {"embedding": params["embedding"], "slab": slab}


# ---------------- forward (mirrors TextEncoder.forward) ----------------
def text_encoder_forward(params, tokens):
    # tokens: (B, S) int32 ids
    table = params["embedding"]                                   # (V, D)
    B, S = tokens.shape
    D = table.shape[1]
    S1 = S + 1
    S_pad = max(8, ((S1 + 7) // 8) * 8)                           # 9 -> 16
    assert S_pad <= MAX_LEN

    emb = jnp.take(table, tokens, axis=0)                         # (B, S, D)   == embedding(x)
    sep = jnp.broadcast_to(table[SEP_ID][None, None, :], (B, 1, D))
    emb = jnp.concatenate([emb, sep], axis=1)                     # (B, S+1, D) == cat([x, SEP])
    emb = jnp.pad(emb, ((0, 0), (0, S_pad - S1), (0, 0)))         # pad seq to 16 rows
    emb = emb.reshape(B * S_pad, D)                               # fold batch into sublane axis

    pe = jnp.tile(get_positional_encoding(D, MAX_LEN)[:S_pad], (B, 1))   # (B*S_pad, D)

    layout, _, _ = make_slab_layout(EMBED_DIM, DIM)
    c_out = layout[-1]['cout']

    kern = functools.partial(
        _fused_encoder_kernel,
        layout=tuple(layout), num_heads=NUM_HEADS,
        scale=math.sqrt(D), valid_len=S1, s_pad=S_pad, batch=B)

    # Single launch, no grid: every input lives whole in VMEM (<400 KB total).
    # (On v7x one could shard the batch across the 2 TensorCores with a
    #  core_map mesh, but this kernel is launch/overhead-bound either way.)
    out = pl.pallas_call(
        kern,
        out_shape=jax.ShapeDtypeStruct((S_pad, B * c_out), jnp.float32),
    )(emb, pe, params["slab"])

    out = out.reshape(S_pad, B, c_out)[:S1]                       # (S+1, B, C_out), seq-first
    return out


if __name__ == "__main__":
    key = jax.random.PRNGKey(0)
    pkey, tkey = jax.random.split(key)
    raw_params = init_text_encoder_params(pkey, VOCAB, EMBED_DIM, DIM)
    params = prep_params_for_kernel(raw_params)
    tokens = jax.random.randint(tkey, (BATCH, SEQ), 0, VOCAB, dtype=jnp.int32)

    fwd = jax.jit(text_encoder_forward)
    out = fwd(params, tokens)
    out = jax.block_until_ready(out)

    assert out.shape == (SEQ + 1, BATCH, EMBED_DIM * DIM[-1]), out.shape
    assert bool(jnp.all(jnp.isfinite(out)))
    print("KERNEL_OK")
</pallas_src>

<mosaic_0001>
module attributes {stable_mosaic.version = 11 : i64} {
  func.func @_fused_encoder_kernel(%arg0: memref<32x32xf32, #tpu.memory_space<vmem>>, %arg1: memref<32x32xf32, #tpu.memory_space<vmem>>, %arg2: memref<384x192xf32, #tpu.memory_space<vmem>>, %arg3: memref<16x128xf32, #tpu.memory_space<vmem>>) attributes {dimension_semantics = [], scalar_prefetch = 0 : i64, scratch_operands = 0 : i64, tpu.core_type = #tpu.core_type<tc>} {
    %c0 = arith.constant 0 : index
    %c0_0 = arith.constant 0 : index
    %0 = vector.load %arg0[%c0, %c0_0] : memref<32x32xf32, #tpu.memory_space<vmem>>, vector<32x32xf32>
    %cst = arith.constant 5.65685415 : f32
    %1 = vector.broadcast %cst : f32 to vector<32x32xf32>
    %2 = arith.mulf %0, %1 : vector<32x32xf32>
    %c0_1 = arith.constant 0 : index
    %c0_2 = arith.constant 0 : index
    %3 = vector.load %arg1[%c0_1, %c0_2] : memref<32x32xf32, #tpu.memory_space<vmem>>, vector<32x32xf32>
    %4 = arith.addf %2, %3 : vector<32x32xf32>
    %5 = tpu.iota {dimensions = array<i32: 1>} : vector<16x16xi32>
    %c9_i32 = arith.constant 9 : i32
    %6 = vector.broadcast %c9_i32 : i32 to vector<16x16xi32>
    %7 = arith.cmpi slt, %5, %6 : vector<16x16xi32>
    %cst_3 = arith.constant 0.000000e+00 : f32
    %cst_4 = arith.constant -1.000000e+30 : f32
    %8 = vector.broadcast %cst_3 : f32 to vector<16x16xf32>
    %9 = vector.broadcast %cst_4 : f32 to vector<16x16xf32>
    %10 = arith.select %7, %8, %9 : vector<16x16xi1>, vector<16x16xf32>
    %cst_5 = arith.constant -1.000000e+30 : f32
    %11 = vector.broadcast %cst_5 : f32 to vector<16x16xf32>
    %12 = tpu.concatenate %10, %11 in 1 : vector<16x16xf32>, vector<16x16xf32> -> vector<16x32xf32>
    %13 = tpu.concatenate %11, %10 in 1 : vector<16x16xf32>, vector<16x16xf32> -> vector<16x32xf32>
    %14 = tpu.concatenate %12, %13 in 0 : vector<16x32xf32>, vector<16x32xf32> -> vector<32x32xf32>
    %c0_6 = arith.constant 0 : index
    %c0_7 = arith.constant 0 : index
    %15 = vector.load %arg2[%c0_6, %c0_7] : memref<384x192xf32, #tpu.memory_space<vmem>>, vector<32x96xf32>
    %c32 = arith.constant 32 : index
    %c0_8 = arith.constant 0 : index
    %16 = vector.load %arg2[%c32, %c0_8] : memref<384x192xf32, #tpu.memory_space<vmem>>, vector<1x96xf32>
    %c40 = arith.constant 40 : index
    %c0_9 = arith.constant 0 : index
    %17 = vector.load %arg2[%c40, %c0_9] : memref<384x192xf32, #tpu.memory_space<vmem>>, vector<32x32xf32>
    %c72 = arith.constant 72 : index
    %c0_10 = arith.constant 0 : index
    %18 = vector.load %arg2[%c72, %c0_10] : memref<384x192xf32, #tpu.memory_space<vmem>>, vector<1x32xf32>
    %cst_11 = arith.constant dense<0.000000e+00> : vector<32x96xf32>
    %19 = tpu.matmul %4, %15, %cst_11 {dimension_numbers = #tpu.dot_dimension_numbers<[1], [0], [0], [1], [0, 0, 1, 1], [], []>} : vector<32x32xf32>, vector<32x96xf32>, vector<32x96xf32> -> vector<32x96xf32>
    %20 = vector.broadcast %16 : vector<1x96xf32> to vector<32x96xf32>
    %21 = arith.addf %19, %20 : vector<32x96xf32>
    %22 = vector.extract_strided_slice %21 {offsets = [0, 0], sizes = [32, 4], strides = [1, 1]} : vector<32x96xf32> to vector<32x4xf32>
    %23 = vector.extract_strided_slice %21 {offsets = [0, 32], sizes = [32, 4], strides = [1, 1]} : vector<32x96xf32> to vector<32x4xf32>
    %24 = vector.extract_strided_slice %21 {offsets = [0, 64], sizes = [32, 4], strides = [1, 1]} : vector<32x96xf32> to vector<32x4xf32>
    %cst_12 = arith.constant dense<0.000000e+00> : vector<32x32xf32>
    %25 = tpu.matmul %22, %23, %cst_12 {dimension_numbers = #tpu.dot_dimension_numbers<[1], [1], [0], [0], [0, 0, 1, 0], [], []>} : vector<32x4xf32>, vector<32x4xf32>, vector<32x32xf32> -> vector<32x32xf32>
    %cst_13 = arith.constant 5.000000e-01 : f32
    %26 = vector.broadcast %cst_13 : f32 to vector<32x32xf32>
    %27 = arith.mulf %25, %26 : vector<32x32xf32>
    %28 = arith.addf %27, %14 : vector<32x32xf32>
    %cst_14 = arith.constant dense<0xFF800000> : vector<32xf32>
    %29 = vector.multi_reduction <maximumf>, %28, %cst_14 [1] : vector<32x32xf32> to vector<32xf32>
    %30 = vector.shape_cast %29 : vector<32xf32> to vector<32x1xf32>
    %31 = vector.broadcast %30 : vector<32x1xf32> to vector<32x32xf32>
    %32 = arith.subf %28, %31 : vector<32x32xf32>
    %33 = math.exp %32 : vector<32x32xf32>
    %cst_15 = arith.constant dense<0.000000e+00> : vector<32xf32>
    %34 = vector.multi_reduction <add>, %33, %cst_15 [1] : vector<32x32xf32> to vector<32xf32>
    %35 = vector.shape_cast %34 : vector<32xf32> to vector<32x1xf32>
    %36 = tpu.reciprocal %35 {approx = true} : vector<32x1xf32> -> vector<32x1xf32>
    %37 = vector.broadcast %36 : vector<32x1xf32> to vector<32x32xf32>
    %38 = arith.mulf %33, %37 : vector<32x32xf32>
    %cst_16 = arith.constant dense<0.000000e+00> : vector<32x4xf32>
    %39 = tpu.matmul %38, %24, %cst_16 {dimension_numbers = #tpu.dot_dimension_numbers<[1], [0], [0], [1], [0, 0, 1, 1], [], []>} : vector<32x32xf32>, vector<32x4xf32>, vector<32x4xf32> -> vector<32x4xf32>
    %40 = vector.extract_strided_slice %21 {offsets = [0, 4], sizes = [32, 4], strides = [1, 1]} : vector<32x96xf32> to vector<32x4xf32>
    %41 = vector.extract_strided_slice %21 {offsets = [0, 36], sizes = [32, 4], strides = [1, 1]} : vector<32x96xf32> to vector<32x4xf32>
    %42 = vector.extract_strided_slice %21 {offsets = [0, 68], sizes = [32, 4], strides = [1, 1]} : vector<32x96xf32> to vector<32x4xf32>
    %cst_17 = arith.constant dense<0.000000e+00> : vector<32x32xf32>
    %43 = tpu.matmul %40, %41, %cst_17 {dimension_numbers = #tpu.dot_dimension_numbers<[1], [1], [0], [0], [0, 0, 1, 0], [], []>} : vector<32x4xf32>, vector<32x4xf32>, vector<32x32xf32> -> vector<32x32xf32>
    %cst_18 = arith.constant 5.000000e-01 : f32
    %44 = vector.broadcast %cst_18 : f32 to vector<32x32xf32>
    %45 = arith.mulf %43, %44 : vector<32x32xf32>
    %46 = arith.addf %45, %14 : vector<32x32xf32>
    %cst_19 = arith.constant dense<0xFF800000> : vector<32xf32>
    %47 = vector.multi_reduction <maximumf>, %46, %cst_19 [1] : vector<32x32xf32> to vector<32xf32>
    %48 = vector.shape_cast %47 : vector<32xf32> to vector<32x1xf32>
    %49 = vector.broadcast %48 : vector<32x1xf32> to vector<32x32xf32>
    %50 = arith.subf %46, %49 : vector<32x32xf32>
    %51 = math.exp %50 : vector<32x32xf32>
    %cst_20 = arith.constant dense<0.000000e+00> : vector<32xf32>
    %52 = vector.multi_reduction <add>, %51, %cst_20 [1] : vector<32x32xf32> to vector<32xf32>
    %53 = vector.shape_cast %52 : vector<32xf32> to vector<32x1xf32>
    %54 = tpu.reciprocal %53 {approx = true} : vector<32x1xf32> -> vector<32x1xf32>
    %55 = vector.broadcast %54 : vector<32x1xf32> to vector<32x32xf32>
    %56 = arith.mulf %51, %55 : vector<32x32xf32>
    %cst_21 = arith.constant dense<0.000000e+00> : vector<32x4xf32>
    %57 = tpu.matmul %56, %42, %cst_21 {dimension_numbers = #tpu.dot_dimension_numbers<[1], [0], [0], [1], [0, 0, 1, 1], [], []>} : vector<32x32xf32>, vector<32x4xf32>, vector<32x4xf32> -> vector<32x4xf32>
    %58 = vector.extract_strided_slice %21 {offsets = [0, 8], sizes = [32, 4], strides = [1, 1]} : vector<32x96xf32> to vector<32x4xf32>
    %59 = vector.extract_strided_slice %21 {offsets = [0, 40], sizes = [32, 4], strides = [1, 1]} : vector<32x96xf32> to vector<32x4xf32>
    %60 = vector.extract_strided_slice %21 {offsets = [0, 72], sizes = [32, 4], strides = [1, 1]} : vector<32x96xf32> to vector<32x4xf32>
    %cst_22 = arith.constant dense<0.000000e+00> : vector<32x32xf32>
    %61 = tpu.matmul %58, %59, %cst_22 {dimension_numbers = #tpu.dot_dimension_numbers<[1], [1], [0], [0], [0, 0, 1, 0], [], []>} : vector<32x4xf32>, vector<32x4xf32>, vector<32x32xf32> -> vector<32x32xf32>
    %cst_23 = arith.constant 5.000000e-01 : f32
    %62 = vector.broadcast %cst_23 : f32 to vector<32x32xf32>
    %63 = arith.mulf %61, %62 : vector<32x32xf32>
    %64 = arith.addf %63, %14 : vector<32x32xf32>
    %cst_24 = arith.constant dense<0xFF800000> : vector<32xf32>
    %65 = vector.multi_reduction <maximumf>, %64, %cst_24 [1] : vector<32x32xf32> to vector<32xf32>
    %66 = vector.shape_cast %65 : vector<32xf32> to vector<32x1xf32>
    %67 = vector.broadcast %66 : vector<32x1xf32> to vector<32x32xf32>
    %68 = arith.subf %64, %67 : vector<32x32xf32>
    %69 = math.exp %68 : vector<32x32xf32>
    %cst_25 = arith.constant dense<0.000000e+00> : vector<32xf32>
    %70 = vector.multi_reduction <add>, %69, %cst_25 [1] : vector<32x32xf32> to vector<32xf32>
    %71 = vector.shape_cast %70 : vector<32xf32> to vector<32x1xf32>
    %72 = tpu.reciprocal %71 {approx = true} : vector<32x1xf32> -> vector<32x1xf32>
    %73 = vector.broadcast %72 : vector<32x1xf32> to vector<32x32xf32>
    %74 = arith.mulf %69, %73 : vector<32x32xf32>
    %cst_26 = arith.constant dense<0.000000e+00> : vector<32x4xf32>
    %75 = tpu.matmul %74, %60, %cst_26 {dimension_numbers = #tpu.dot_dimension_numbers<[1], [0], [0], [1], [0, 0, 1, 1], [], []>} : vector<32x32xf32>, vector<32x4xf32>, vector<32x4xf32> -> vector<32x4xf32>
    %76 = vector.extract_strided_slice %21 {offsets = [0, 12], sizes = [32, 4], strides = [1, 1]} : vector<32x96xf32> to vector<32x4xf32>
    %77 = vector.extract_strided_slice %21 {offsets = [0, 44], sizes = [32, 4], strides = [1, 1]} : vector<32x96xf32> to vector<32x4xf32>
    %78 = vector.extract_strided_slice %21 {offsets = [0, 76], sizes = [32, 4], strides = [1, 1]} : vector<32x96xf32> to vector<32x4xf32>
    %cst_27 = arith.constant dense<0.000000e+00> : vector<32x32xf32>
    %79 = tpu.matmul %76, %77, %cst_27 {dimension_numbers = #tpu.dot_dimension_numbers<[1], [1], [0], [0], [0, 0, 1, 0], [], []>} : vector<32x4xf32>, vector<32x4xf32>, vector<32x32xf32> -> vector<32x32xf32>
    %cst_28 = arith.constant 5.000000e-01 : f32
    %80 = vector.broadcast %cst_28 : f32 to vector<32x32xf32>
    %81 = arith.mulf %79, %80 : vector<32x32xf32>
    %82 = arith.addf %81, %14 : vector<32x32xf32>
    %cst_29 = arith.constant dense<0xFF800000> : vector<32xf32>
    %83 = vector.multi_reduction <maximumf>, %82, %cst_29 [1] : vector<32x32xf32> to vector<32xf32>
    %84 = vector.shape_cast %83 : vector<32xf32> to vector<32x1xf32>
    %85 = vector.broadcast %84 : vector<32x1xf32> to vector<32x32xf32>
    %86 = arith.subf %82, %85 : vector<32x32xf32>
    %87 = math.exp %86 : vector<32x32xf32>
    %cst_30 = arith.constant dense<0.000000e+00> : vector<32xf32>
    %88 = vector.multi_reduction <add>, %87, %cst_30 [1] : vector<32x32xf32> to vector<32xf32>
    %89 = vector.shape_cast %88 : vector<32xf32> to vector<32x1xf32>
    %90 = tpu.reciprocal %89 {approx = true} : vector<32x1xf32> -> vector<32x1xf32>
    %91 = vector.broadcast %90 : vector<32x1xf32> to vector<32x32xf32>
    %92 = arith.mulf %87, %91 : vector<32x32xf32>
    %cst_31 = arith.constant dense<0.000000e+00> : vector<32x4xf32>
    %93 = tpu.matmul %92, %78, %cst_31 {dimension_numbers = #tpu.dot_dimension_numbers<[1], [0], [0], [1], [0, 0, 1, 1], [], []>} : vector<32x32xf32>, vector<32x4xf32>, vector<32x4xf32> -> vector<32x4xf32>
    %94 = vector.extract_strided_slice %21 {offsets = [0, 16], sizes = [32, 4], strides = [1, 1]} : vector<32x96xf32> to vector<32x4xf32>
    %95 = vector.extract_strided_slice %21 {offsets = [0, 48], sizes = [32, 4], strides = [1, 1]} : vector<32x96xf32> to vector<32x4xf32>
    %96 = vector.extract_strided_slice %21 {offsets = [0, 80], sizes = [32, 4], strides = [1, 1]} : vector<32x96xf32> to vector<32x4xf32>
    %cst_32 = arith.constant dense<0.000000e+00> : vector<32x32xf32>
    %97 = tpu.matmul %94, %95, %cst_32 {dimension_numbers = #tpu.dot_dimension_numbers<[1], [1], [0], [0], [0, 0, 1, 0], [], []>} : vector<32x4xf32>, vector<32x4xf32>, vector<32x32xf32> -> vector<32x32xf32>
    %cst_33 = arith.constant 5.000000e-01 : f32
    %98 = vector.broadcast %cst_33 : f32 to vector<32x32xf32>
    %99 = arith.mulf %97, %98 : vector<32x32xf32>
    %100 = arith.addf %99, %14 : vector<32x32xf32>
    %cst_34 = arith.constant dense<0xFF800000> : vector<32xf32>
    %101 = vector.multi_reduction <maximumf>, %100, %cst_34 [1] : vector<32x32xf32> to vector<32xf32>
    %102 = vector.shape_cast %101 : vector<32xf32> to vector<32x1xf32>
    %103 = vector.broadcast %102 : vector<32x1xf32> to vector<32x32xf32>
    %104 = arith.subf %100, %103 : vector<32x32xf32>
    %105 = math.exp %104 : vector<32x32xf32>
    %cst_35 = arith.constant dense<0.000000e+00> : vector<32xf32>
    %106 = vector.multi_reduction <add>, %105, %cst_35 [1] : vector<32x32xf32> to vector<32xf32>
    %107 = vector.shape_cast %106 : vector<32xf32> to vector<32x1xf32>
    %108 = tpu.reciprocal %107 {approx = true} : vector<32x1xf32> -> vector<32x1xf32>
    %109 = vector.broadcast %108 : vector<32x1xf32> to vector<32x32xf32>
    %110 = arith.mulf %105, %109 : vector<32x32xf32>
    %cst_36 = arith.constant dense<0.000000e+00> : vector<32x4xf32>
    %111 = tpu.matmul %110, %96, %cst_36 {dimension_numbers = #tpu.dot_dimension_numbers<[1], [0], [0], [1], [0, 0, 1, 1], [], []>} : vector<32x32xf32>, vector<32x4xf32>, vector<32x4xf32> -> vector<32x4xf32>
    %112 = vector.extract_strided_slice %21 {offsets = [0, 20], sizes = [32, 4], strides = [1, 1]} : vector<32x96xf32> to vector<32x4xf32>
    %113 = vector.extract_strided_slice %21 {offsets = [0, 52], sizes = [32, 4], strides = [1, 1]} : vector<32x96xf32> to vector<32x4xf32>
    %114 = vector.extract_strided_slice %21 {offsets = [0, 84], sizes = [32, 4], strides = [1, 1]} : vector<32x96xf32> to vector<32x4xf32>
    %cst_37 = arith.constant dense<0.000000e+00> : vector<32x32xf32>
    %115 = tpu.matmul %112, %113, %cst_37 {dimension_numbers = #tpu.dot_dimension_numbers<[1], [1], [0], [0], [0, 0, 1, 0], [], []>} : vector<32x4xf32>, vector<32x4xf32>, vector<32x32xf32> -> vector<32x32xf32>
    %cst_38 = arith.constant 5.000000e-01 : f32
    %116 = vector.broadcast %cst_38 : f32 to vector<32x32xf32>
    %117 = arith.mulf %115, %116 : vector<32x32xf32>
    %118 = arith.addf %117, %14 : vector<32x32xf32>
    %cst_39 = arith.constant dense<0xFF800000> : vector<32xf32>
    %119 = vector.multi_reduction <maximumf>, %118, %cst_39 [1] : vector<32x32xf32> to vector<32xf32>
    %120 = vector.shape_cast %119 : vector<32xf32> to vector<32x1xf32>
    %121 = vector.broadcast %120 : vector<32x1xf32> to vector<32x32xf32>
    %122 = arith.subf %118, %121 : vector<32x32xf32>
    %123 = math.exp %122 : vector<32x32xf32>
    %cst_40 = arith.constant dense<0.000000e+00> : vector<32xf32>
    %124 = vector.multi_reduction <add>, %123, %cst_40 [1] : vector<32x32xf32> to vector<32xf32>
    %125 = vector.shape_cast %124 : vector<32xf32> to vector<32x1xf32>
    %126 = tpu.reciprocal %125 {approx = true} : vector<32x1xf32> -> vector<32x1xf32>
    %127 = vector.broadcast %126 : vector<32x1xf32> to vector<32x32xf32>
    %128 = arith.mulf %123, %127 : vector<32x32xf32>
    %cst_41 = arith.constant dense<0.000000e+00> : vector<32x4xf32>
    %129 = tpu.matmul %128, %114, %cst_41 {dimension_numbers = #tpu.dot_dimension_numbers<[1], [0], [0], [1], [0, 0, 1, 1], [], []>} : vector<32x32xf32>, vector<32x4xf32>, vector<32x4xf32> -> vector<32x4xf32>
    %130 = vector.extract_strided_slice %21 {offsets = [0, 24], sizes = [32, 4], strides = [1, 1]} : vector<32x96xf32> to vector<32x4xf32>
    %131 = vector.extract_strided_slice %21 {offsets = [0, 56], sizes = [32, 4], strides = [1, 1]} : vector<32x96xf32> to vector<32x4xf32>
    %132 = vector.extract_strided_slice %21 {offsets = [0, 88], sizes = [32, 4], strides = [1, 1]} : vector<32x96xf32> to vector<32x4xf32>
    %cst_42 = arith.constant dense<0.000000e+00> : vector<32x32xf32>
    %133 = tpu.matmul %130, %131, %cst_42 {dimension_numbers = #tpu.dot_dimension_numbers<[1], [1], [0], [0], [0, 0, 1, 0], [], []>} : vector<32x4xf32>, vector<32x4xf32>, vector<32x32xf32> -> vector<32x32xf32>
    %cst_43 = arith.constant 5.000000e-01 : f32
    %134 = vector.broadcast %cst_43 : f32 to vector<32x32xf32>
    %135 = arith.mulf %133, %134 : vector<32x32xf32>
    %136 = arith.addf %135, %14 : vector<32x32xf32>
    %cst_44 = arith.constant dense<0xFF800000> : vector<32xf32>
    %137 = vector.multi_reduction <maximumf>, %136, %cst_44 [1] : vector<32x32xf32> to vector<32xf32>
    %138 = vector.shape_cast %137 : vector<32xf32> to vector<32x1xf32>
    %139 = vector.broadcast %138 : vector<32x1xf32> to vector<32x32xf32>
    %140 = arith.subf %136, %139 : vector<32x32xf32>
    %141 = math.exp %140 : vector<32x32xf32>
    %cst_45 = arith.constant dense<0.000000e+00> : vector<32xf32>
    %142 = vector.multi_reduction <add>, %141, %cst_45 [1] : vector<32x32xf32> to vector<32xf32>
    %143 = vector.shape_cast %142 : vector<32xf32> to vector<32x1xf32>
    %144 = tpu.reciprocal %143 {approx = true} : vector<32x1xf32> -> vector<32x1xf32>
    %145 = vector.broadcast %144 : vector<32x1xf32> to vector<32x32xf32>
    %146 = arith.mulf %141, %145 : vector<32x32xf32>
    %cst_46 = arith.constant dense<0.000000e+00> : vector<32x4xf32>
    %147 = tpu.matmul %146, %132, %cst_46 {dimension_numbers = #tpu.dot_dimension_numbers<[1], [0], [0], [1], [0, 0, 1, 1], [], []>} : vector<32x32xf32>, vector<32x4xf32>, vector<32x4xf32> -> vector<32x4xf32>
    %148 = vector.extract_strided_slice %21 {offsets = [0, 28], sizes = [32, 4], strides = [1, 1]} : vector<32x96xf32> to vector<32x4xf32>
    %149 = vector.extract_strided_slice %21 {offsets = [0, 60], sizes = [32, 4], strides = [1, 1]} : vector<32x96xf32> to vector<32x4xf32>
    %150 = vector.extract_strided_slice %21 {offsets = [0, 92], sizes = [32, 4], strides = [1, 1]} : vector<32x96xf32> to vector<32x4xf32>
    %cst_47 = arith.constant dense<0.000000e+00> : vector<32x32xf32>
    %151 = tpu.matmul %148, %149, %cst_47 {dimension_numbers = #tpu.dot_dimension_numbers<[1], [1], [0], [0], [0, 0, 1, 0], [], []>} : vector<32x4xf32>, vector<32x4xf32>, vector<32x32xf32> -> vector<32x32xf32>
    %cst_48 = arith.constant 5.000000e-01 : f32
    %152 = vector.broadcast %cst_48 : f32 to vector<32x32xf32>
    %153 = arith.mulf %151, %152 : vector<32x32xf32>
    %154 = arith.addf %153, %14 : vector<32x32xf32>
    %cst_49 = arith.constant dense<0xFF800000> : vector<32xf32>
    %155 = vector.multi_reduction <maximumf>, %154, %cst_49 [1] : vector<32x32xf32> to vector<32xf32>
    %156 = vector.shape_cast %155 : vector<32xf32> to vector<32x1xf32>
    %157 = vector.broadcast %156 : vector<32x1xf32> to vector<32x32xf32>
    %158 = arith.subf %154, %157 : vector<32x32xf32>
    %159 = math.exp %158 : vector<32x32xf32>
    %cst_50 = arith.constant dense<0.000000e+00> : vector<32xf32>
    %160 = vector.multi_reduction <add>, %159, %cst_50 [1] : vector<32x32xf32> to vector<32xf32>
    %161 = vector.shape_cast %160 : vector<32xf32> to vector<32x1xf32>
    %162 = tpu.reciprocal %161 {approx = true} : vector<32x1xf32> -> vector<32x1xf32>
    %163 = vector.broadcast %162 : vector<32x1xf32> to vector<32x32xf32>
    %164 = arith.mulf %159, %163 : vector<32x32xf32>
    %cst_51 = arith.constant dense<0.000000e+00> : vector<32x4xf32>
    %165 = tpu.matmul %164, %150, %cst_51 {dimension_numbers = #tpu.dot_dimension_numbers<[1], [0], [0], [1], [0, 0, 1, 1], [], []>} : vector<32x32xf32>, vector<32x4xf32>, vector<32x4xf32> -> vector<32x4xf32>
    %166 = tpu.concatenate %39, %57, %75, %93, %111, %129, %147, %165 in 1 : vector<32x4xf32>, vector<32x4xf32>, vector<32x4xf32>, vector<32x4xf32>, vector<32x4xf32>, vector<32x4xf32>, vector<32x4xf32>, vector<32x4xf32> -> vector<32x32xf32>
    %cst_52 = arith.constant dense<0.000000e+00> : vector<32x32xf32>
    %167 = tpu.matmul %166, %17, %cst_52 {dimension_numbers = #tpu.dot_dimension_numbers<[1], [0], [0], [1], [0, 0, 1, 1], [], []>} : vector<32x32xf32>, vector<32x32xf32>, vector<32x32xf32> -> vector<32x32xf32>
    %168 = vector.broadcast %18 : vector<1x32xf32> to vector<32x32xf32>
    %169 = arith.addf %167, %168 : vector<32x32xf32>
    %c80 = arith.constant 80 : index
    %c0_53 = arith.constant 0 : index
    %170 = vector.load %arg2[%c80, %c0_53] : memref<384x192xf32, #tpu.memory_space<vmem>>, vector<32x96xf32>
    %c112 = arith.constant 112 : index
    %c0_54 = arith.constant 0 : index
    %171 = vector.load %arg2[%c112, %c0_54] : memref<384x192xf32, #tpu.memory_space<vmem>>, vector<1x96xf32>
    %c120 = arith.constant 120 : index
    %c0_55 = arith.constant 0 : index
    %172 = vector.load %arg2[%c120, %c0_55] : memref<384x192xf32, #tpu.memory_space<vmem>>, vector<32x32xf32>
    %c152 = arith.constant 152 : index
    %c0_56 = arith.constant 0 : index
    %173 = vector.load %arg2[%c152, %c0_56] : memref<384x192xf32, #tpu.memory_space<vmem>>, vector<1x32xf32>
    %cst_57 = arith.constant dense<0.000000e+00> : vector<32x96xf32>
    %174 = tpu.matmul %169, %170, %cst_57 {dimension_numbers = #tpu.dot_dimension_numbers<[1], [0], [0], [1], [0, 0, 1, 1], [], []>} : vector<32x32xf32>, vector<32x96xf32>, vector<32x96xf32> -> vector<32x96xf32>
    %175 = vector.broadcast %171 : vector<1x96xf32> to vector<32x96xf32>
    %176 = arith.addf %174, %175 : vector<32x96xf32>
    %177 = vector.extract_strided_slice %176 {offsets = [0, 0], sizes = [32, 4], strides = [1, 1]} : vector<32x96xf32> to vector<32x4xf32>
    %178 = vector.extract_strided_slice %176 {offsets = [0, 32], sizes = [32, 4], strides = [1, 1]} : vector<32x96xf32> to vector<32x4xf32>
    %179 = vector.extract_strided_slice %176 {offsets = [0, 64], sizes = [32, 4], strides = [1, 1]} : vector<32x96xf32> to vector<32x4xf32>
    %cst_58 = arith.constant dense<0.000000e+00> : vector<32x32xf32>
    %180 = tpu.matmul %177, %178, %cst_58 {dimension_numbers = #tpu.dot_dimension_numbers<[1], [1], [0], [0], [0, 0, 1, 0], [], []>} : vector<32x4xf32>, vector<32x4xf32>, vector<32x32xf32> -> vector<32x32xf32>
    %cst_59 = arith.constant 5.000000e-01 : f32
    %181 = vector.broadcast %cst_59 : f32 to vector<32x32xf32>
    %182 = arith.mulf %180, %181 : vector<32x32xf32>
    %183 = arith.addf %182, %14 : vector<32x32xf32>
    %cst_60 = arith.constant dense<0xFF800000> : vector<32xf32>
    %184 = vector.multi_reduction <maximumf>, %183, %cst_60 [1] : vector<32x32xf32> to vector<32xf32>
    %185 = vector.shape_cast %184 : vector<32xf32> to vector<32x1xf32>
    %186 = vector.broadcast %185 : vector<32x1xf32> to vector<32x32xf32>
    %187 = arith.subf %183, %186 : vector<32x32xf32>
    %188 = math.exp %187 : vector<32x32xf32>
    %cst_61 = arith.constant dense<0.000000e+00> : vector<32xf32>
    %189 = vector.multi_reduction <add>, %188, %cst_61 [1] : vector<32x32xf32> to vector<32xf32>
    %190 = vector.shape_cast %189 : vector<32xf32> to vector<32x1xf32>
    %191 = tpu.reciprocal %190 {approx = true} : vector<32x1xf32> -> vector<32x1xf32>
    %192 = vector.broadcast %191 : vector<32x1xf32> to vector<32x32xf32>
    %193 = arith.mulf %188, %192 : vector<32x32xf32>
    %cst_62 = arith.constant dense<0.000000e+00> : vector<32x4xf32>
    %194 = tpu.matmul %193, %179, %cst_62 {dimension_numbers = #tpu.dot_dimension_numbers<[1], [0], [0], [1], [0, 0, 1, 1], [], []>} : vector<32x32xf32>, vector<32x4xf32>, vector<32x4xf32> -> vector<32x4xf32>
    %195 = vector.extract_strided_slice %176 {offsets = [0, 4], sizes = [32, 4], strides = [1, 1]} : vector<32x96xf32> to vector<32x4xf32>
    %196 = vector.extract_strided_slice %176 {offsets = [0, 36], sizes = [32, 4], strides = [1, 1]} : vector<32x96xf32> to vector<32x4xf32>
    %197 = vector.extract_strided_slice %176 {offsets = [0, 68], sizes = [32, 4], strides = [1, 1]} : vector<32x96xf32> to vector<32x4xf32>
    %cst_63 = arith.constant dense<0.000000e+00> : vector<32x32xf32>
    %198 = tpu.matmul %195, %196, %cst_63 {dimension_numbers = #tpu.dot_dimension_numbers<[1], [1], [0], [0], [0, 0, 1, 0], [], []>} : vector<32x4xf32>, vector<32x4xf32>, vector<32x32xf32> -> vector<32x32xf32>
    %cst_64 = arith.constant 5.000000e-01 : f32
    %199 = vector.broadcast %cst_64 : f32 to vector<32x32xf32>
    %200 = arith.mulf %198, %199 : vector<32x32xf32>
    %201 = arith.addf %200, %14 : vector<32x32xf32>
    %cst_65 = arith.constant dense<0xFF800000> : vector<32xf32>
    %202 = vector.multi_reduction <maximumf>, %201, %cst_65 [1] : vector<32x32xf32> to vector<32xf32>
    %203 = vector.shape_cast %202 : vector<32xf32> to vector<32x1xf32>
    %204 = vector.broadcast %203 : vector<32x1xf32> to vector<32x32xf32>
    %205 = arith.subf %201, %204 : vector<32x32xf32>
    %206 = math.exp %205 : vector<32x32xf32>
    %cst_66 = arith.constant dense<0.000000e+00> : vector<32xf32>
    %207 = vector.multi_reduction <add>, %206, %cst_66 [1] : vector<32x32xf32> to vector<32xf32>
    %208 = vector.shape_cast %207 : vector<32xf32> to vector<32x1xf32>
    %209 = tpu.reciprocal %208 {approx = true} : vector<32x1xf32> -> vector<32x1xf32>
    %210 = vector.broadcast %209 : vector<32x1xf32> to vector<32x32xf32>
    %211 = arith.mulf %206, %210 : vector<32x32xf32>
    %cst_67 = arith.constant dense<0.000000e+00> : vector<32x4xf32>
    %212 = tpu.matmul %211, %197, %cst_67 {dimension_numbers = #tpu.dot_dimension_numbers<[1], [0], [0], [1], [0, 0, 1, 1], [], []>} : vector<32x32xf32>, vector<32x4xf32>, vector<32x4xf32> -> vector<32x4xf32>
    %213 = vector.extract_strided_slice %176 {offsets = [0, 8], sizes = [32, 4], strides = [1, 1]} : vector<32x96xf32> to vector<32x4xf32>
    %214 = vector.extract_strided_slice %176 {offsets = [0, 40], sizes = [32, 4], strides = [1, 1]} : vector<32x96xf32> to vector<32x4xf32>
    %215 = vector.extract_strided_slice %176 {offsets = [0, 72], sizes = [32, 4], strides = [1, 1]} : vector<32x96xf32> to vector<32x4xf32>
    %cst_68 = arith.constant dense<0.000000e+00> : vector<32x32xf32>
    %216 = tpu.matmul %213, %214, %cst_68 {dimension_numbers = #tpu.dot_dimension_numbers<[1], [1], [0], [0], [0, 0, 1, 0], [], []>} : vector<32x4xf32>, vector<32x4xf32>, vector<32x32xf32> -> vector<32x32xf32>
    %cst_69 = arith.constant 5.000000e-01 : f32
    %217 = vector.broadcast %cst_69 : f32 to vector<32x32xf32>
    %218 = arith.mulf %216, %217 : vector<32x32xf32>
    %219 = arith.addf %218, %14 : vector<32x32xf32>
    %cst_70 = arith.constant dense<0xFF800000> : vector<32xf32>
    %220 = vector.multi_reduction <maximumf>, %219, %cst_70 [1] : vector<32x32xf32> to vector<32xf32>
    %221 = vector.shape_cast %220 : vector<32xf32> to vector<32x1xf32>
    %222 = vector.broadcast %221 : vector<32x1xf32> to vector<32x32xf32>
    %223 = arith.subf %219, %222 : vector<32x32xf32>
    %224 = math.exp %223 : vector<32x32xf32>
    %cst_71 = arith.constant dense<0.000000e+00> : vector<32xf32>
    %225 = vector.multi_reduction <add>, %224, %cst_71 [1] : vector<32x32xf32> to vector<32xf32>
    %226 = vector.shape_cast %225 : vector<32xf32> to vector<32x1xf32>
    %227 = tpu.reciprocal %226 {approx = true} : vector<32x1xf32> -> vector<32x1xf32>
    %228 = vector.broadcast %227 : vector<32x1xf32> to vector<32x32xf32>
    %229 = arith.mulf %224, %228 : vector<32x32xf32>
    %cst_72 = arith.constant dense<0.000000e+00> : vector<32x4xf32>
    %230 = tpu.matmul %229, %215, %cst_72 {dimension_numbers = #tpu.dot_dimension_numbers<[1], [0], [0], [1], [0, 0, 1, 1], [], []>} : vector<32x32xf32>, vector<32x4xf32>, vector<32x4xf32> -> vector<32x4xf32>
    %231 = vector.extract_strided_slice %176 {offsets = [0, 12], sizes = [32, 4], strides = [1, 1]} : vector<32x96xf32> to vector<32x4xf32>
    %232 = vector.extract_strided_slice %176 {offsets = [0, 44], sizes = [32, 4], strides = [1, 1]} : vector<32x96xf32> to vector<32x4xf32>
    %233 = vector.extract_strided_slice %176 {offsets = [0, 76], sizes = [32, 4], strides = [1, 1]} : vector<32x96xf32> to vector<32x4xf32>
    %cst_73 = arith.constant dense<0.000000e+00> : vector<32x32xf32>
    %234 = tpu.matmul %231, %232, %cst_73 {dimension_numbers = #tpu.dot_dimension_numbers<[1], [1], [0], [0], [0, 0, 1, 0], [], []>} : vector<32x4xf32>, vector<32x4xf32>, vector<32x32xf32> -> vector<32x32xf32>
    %cst_74 = arith.constant 5.000000e-01 : f32
    %235 = vector.broadcast %cst_74 : f32 to vector<32x32xf32>
    %236 = arith.mulf %234, %235 : vector<32x32xf32>
    %237 = arith.addf %236, %14 : vector<32x32xf32>
    %cst_75 = arith.constant dense<0xFF800000> : vector<32xf32>
    %238 = vector.multi_reduction <maximumf>, %237, %cst_75 [1] : vector<32x32xf32> to vector<32xf32>
    %239 = vector.shape_cast %238 : vector<32xf32> to vector<32x1xf32>
    %240 = vector.broadcast %239 : vector<32x1xf32> to vector<32x32xf32>
    %241 = arith.subf %237, %240 : vector<32x32xf32>
    %242 = math.exp %241 : vector<32x32xf32>
    %cst_76 = arith.constant dense<0.000000e+00> : vector<32xf32>
    %243 = vector.multi_reduction <add>, %242, %cst_76 [1] : vector<32x32xf32> to vector<32xf32>
    %244 = vector.shape_cast %243 : vector<32xf32> to vector<32x1xf32>
    %245 = tpu.reciprocal %244 {approx = true} : vector<32x1xf32> -> vector<32x1xf32>
    %246 = vector.broadcast %245 : vector<32x1xf32> to vector<32x32xf32>
    %247 = arith.mulf %242, %246 : vector<32x32xf32>
    %cst_77 = arith.constant dense<0.000000e+00> : vector<32x4xf32>
    %248 = tpu.matmul %247, %233, %cst_77 {dimension_numbers = #tpu.dot_dimension_numbers<[1], [0], [0], [1], [0, 0, 1, 1], [], []>} : vector<32x32xf32>, vector<32x4xf32>, vector<32x4xf32> -> vector<32x4xf32>
    %249 = vector.extract_strided_slice %176 {offsets = [0, 16], sizes = [32, 4], strides = [1, 1]} : vector<32x96xf32> to vector<32x4xf32>
    %250 = vector.extract_strided_slice %176 {offsets = [0, 48], sizes = [32, 4], strides = [1, 1]} : vector<32x96xf32> to vector<32x4xf32>
    %251 = vector.extract_strided_slice %176 {offsets = [0, 80], sizes = [32, 4], strides = [1, 1]} : vector<32x96xf32> to vector<32x4xf32>
    %cst_78 = arith.constant dense<0.000000e+00> : vector<32x32xf32>
    %252 = tpu.matmul %249, %250, %cst_78 {dimension_numbers = #tpu.dot_dimension_numbers<[1], [1], [0], [0], [0, 0, 1, 0], [], []>} : vector<32x4xf32>, vector<32x4xf32>, vector<32x32xf32> -> vector<32x32xf32>
    %cst_79 = arith.constant 5.000000e-01 : f32
    %253 = vector.broadcast %cst_79 : f32 to vector<32x32xf32>
    %254 = arith.mulf %252, %253 : vector<32x32xf32>
    %255 = arith.addf %254, %14 : vector<32x32xf32>
    %cst_80 = arith.constant dense<0xFF800000> : vector<32xf32>
    %256 = vector.multi_reduction <maximumf>, %255, %cst_80 [1] : vector<32x32xf32> to vector<32xf32>
    %257 = vector.shape_cast %256 : vector<32xf32> to vector<32x1xf32>
    %258 = vector.broadcast %257 : vector<32x1xf32> to vector<32x32xf32>
    %259 = arith.subf %255, %258 : vector<32x32xf32>
    %260 = math.exp %259 : vector<32x32xf32>
    %cst_81 = arith.constant dense<0.000000e+00> : vector<32xf32>
    %261 = vector.multi_reduction <add>, %260, %cst_81 [1] : vector<32x32xf32> to vector<32xf32>
    %262 = vector.shape_cast %261 : vector<32xf32> to vector<32x1xf32>
    %263 = tpu.reciprocal %262 {approx = true} : vector<32x1xf32> -> vector<32x1xf32>
    %264 = vector.broadcast %263 : vector<32x1xf32> to vector<32x32xf32>
    %265 = arith.mulf %260, %264 : vector<32x32xf32>
    %cst_82 = arith.constant dense<0.000000e+00> : vector<32x4xf32>
    %266 = tpu.matmul %265, %251, %cst_82 {dimension_numbers = #tpu.dot_dimension_numbers<[1], [0], [0], [1], [0, 0, 1, 1], [], []>} : vector<32x32xf32>, vector<32x4xf32>, vector<32x4xf32> -> vector<32x4xf32>
    %267 = vector.extract_strided_slice %176 {offsets = [0, 20], sizes = [32, 4], strides = [1, 1]} : vector<32x96xf32> to vector<32x4xf32>
    %268 = vector.extract_strided_slice %176 {offsets = [0, 52], sizes = [32, 4], strides = [1, 1]} : vector<32x96xf32> to vector<32x4xf32>
    %269 = vector.extract_strided_slice %176 {offsets = [0, 84], sizes = [32, 4], strides = [1, 1]} : vector<32x96xf32> to vector<32x4xf32>
    %cst_83 = arith.constant dense<0.000000e+00> : vector<32x32xf32>
    %270 = tpu.matmul %267, %268, %cst_83 {dimension_numbers = #tpu.dot_dimension_numbers<[1], [1], [0], [0], [0, 0, 1, 0], [], []>} : vector<32x4xf32>, vector<32x4xf32>, vector<32x32xf32> -> vector<32x32xf32>
    %cst_84 = arith.constant 5.000000e-01 : f32
    %271 = vector.broadcast %cst_84 : f32 to vector<32x32xf32>
    %272 = arith.mulf %270, %271 : vector<32x32xf32>
    %273 = arith.addf %272, %14 : vector<32x32xf32>
    %cst_85 = arith.constant dense<0xFF800000> : vector<32xf32>
    %274 = vector.multi_reduction <maximumf>, %273, %cst_85 [1] : vector<32x32xf32> to vector<32xf32>
    %275 = vector.shape_cast %274 : vector<32xf32> to vector<32x1xf32>
    %276 = vector.broadcast %275 : vector<32x1xf32> to vector<32x32xf32>
    %277 = arith.subf %273, %276 : vector<32x32xf32>
    %278 = math.exp %277 : vector<32x32xf32>
    %cst_86 = arith.constant dense<0.000000e+00> : vector<32xf32>
    %279 = vector.multi_reduction <add>, %278, %cst_86 [1] : vector<32x32xf32> to vector<32xf32>
    %280 = vector.shape_cast %279 : vector<32xf32> to vector<32x1xf32>
    %281 = tpu.reciprocal %280 {approx = true} : vector<32x1xf32> -> vector<32x1xf32>
    %282 = vector.broadcast %281 : vector<32x1xf32> to vector<32x32xf32>
    %283 = arith.mulf %278, %282 : vector<32x32xf32>
    %cst_87 = arith.constant dense<0.000000e+00> : vector<32x4xf32>
    %284 = tpu.matmul %283, %269, %cst_87 {dimension_numbers = #tpu.dot_dimension_numbers<[1], [0], [0], [1], [0, 0, 1, 1], [], []>} : vector<32x32xf32>, vector<32x4xf32>, vector<32x4xf32> -> vector<32x4xf32>
    %285 = vector.extract_strided_slice %176 {offsets = [0, 24], sizes = [32, 4], strides = [1, 1]} : vector<32x96xf32> to vector<32x4xf32>
    %286 = vector.extract_strided_slice %176 {offsets = [0, 56], sizes = [32, 4], strides = [1, 1]} : vector<32x96xf32> to vector<32x4xf32>
    %287 = vector.extract_strided_slice %176 {offsets = [0, 88], sizes = [32, 4], strides = [1, 1]} : vector<32x96xf32> to vector<32x4xf32>
    %cst_88 = arith.constant dense<0.000000e+00> : vector<32x32xf32>
    %288 = tpu.matmul %285, %286, %cst_88 {dimension_numbers = #tpu.dot_dimension_numbers<[1], [1], [0], [0], [0, 0, 1, 0], [], []>} : vector<32x4xf32>, vector<32x4xf32>, vector<32x32xf32> -> vector<32x32xf32>
    %cst_89 = arith.constant 5.000000e-01 : f32
    %289 = vector.broadcast %cst_89 : f32 to vector<32x32xf32>
    %290 = arith.mulf %288, %289 : vector<32x32xf32>
    %291 = arith.addf %290, %14 : vector<32x32xf32>
    %cst_90 = arith.constant dense<0xFF800000> : vector<32xf32>
    %292 = vector.multi_reduction <maximumf>, %291, %cst_90 [1] : vector<32x32xf32> to vector<32xf32>
    %293 = vector.shape_cast %292 : vector<32xf32> to vector<32x1xf32>
    %294 = vector.broadcast %293 : vector<32x1xf32> to vector<32x32xf32>
    %295 = arith.subf %291, %294 : vector<32x32xf32>
    %296 = math.exp %295 : vector<32x32xf32>
    %cst_91 = arith.constant dense<0.000000e+00> : vector<32xf32>
    %297 = vector.multi_reduction <add>, %296, %cst_91 [1] : vector<32x32xf32> to vector<32xf32>
    %298 = vector.shape_cast %297 : vector<32xf32> to vector<32x1xf32>
    %299 = tpu.reciprocal %298 {approx = true} : vector<32x1xf32> -> vector<32x1xf32>
    %300 = vector.broadcast %299 : vector<32x1xf32> to vector<32x32xf32>
    %301 = arith.mulf %296, %300 : vector<32x32xf32>
    %cst_92 = arith.constant dense<0.000000e+00> : vector<32x4xf32>
    %302 = tpu.matmul %301, %287, %cst_92 {dimension_numbers = #tpu.dot_dimension_numbers<[1], [0], [0], [1], [0, 0, 1, 1], [], []>} : vector<32x32xf32>, vector<32x4xf32>, vector<32x4xf32> -> vector<32x4xf32>
    %303 = vector.extract_strided_slice %176 {offsets = [0, 28], sizes = [32, 4], strides = [1, 1]} : vector<32x96xf32> to vector<32x4xf32>
    %304 = vector.extract_strided_slice %176 {offsets = [0, 60], sizes = [32, 4], strides = [1, 1]} : vector<32x96xf32> to vector<32x4xf32>
    %305 = vector.extract_strided_slice %176 {offsets = [0, 92], sizes = [32, 4], strides = [1, 1]} : vector<32x96xf32> to vector<32x4xf32>
    %cst_93 = arith.constant dense<0.000000e+00> : vector<32x32xf32>
    %306 = tpu.matmul %303, %304, %cst_93 {dimension_numbers = #tpu.dot_dimension_numbers<[1], [1], [0], [0], [0, 0, 1, 0], [], []>} : vector<32x4xf32>, vector<32x4xf32>, vector<32x32xf32> -> vector<32x32xf32>
    %cst_94 = arith.constant 5.000000e-01 : f32
    %307 = vector.broadcast %cst_94 : f32 to vector<32x32xf32>
    %308 = arith.mulf %306, %307 : vector<32x32xf32>
    %309 = arith.addf %308, %14 : vector<32x32xf32>
    %cst_95 = arith.constant dense<0xFF800000> : vector<32xf32>
    %310 = vector.multi_reduction <maximumf>, %309, %cst_95 [1] : vector<32x32xf32> to vector<32xf32>
    %311 = vector.shape_cast %310 : vector<32xf32> to vector<32x1xf32>
    %312 = vector.broadcast %311 : vector<32x1xf32> to vector<32x32xf32>
    %313 = arith.subf %309, %312 : vector<32x32xf32>
    %314 = math.exp %313 : vector<32x32xf32>
    %cst_96 = arith.constant dense<0.000000e+00> : vector<32xf32>
    %315 = vector.multi_reduction <add>, %314, %cst_96 [1] : vector<32x32xf32> to vector<32xf32>
    %316 = vector.shape_cast %315 : vector<32xf32> to vector<32x1xf32>
    %317 = tpu.reciprocal %316 {approx = true} : vector<32x1xf32> -> vector<32x1xf32>
    %318 = vector.broadcast %317 : vector<32x1xf32> to vector<32x32xf32>
    %319 = arith.mulf %314, %318 : vector<32x32xf32>
    %cst_97 = arith.constant dense<0.000000e+00> : vector<32x4xf32>
    %320 = tpu.matmul %319, %305, %cst_97 {dimension_numbers = #tpu.dot_dimension_numbers<[1], [0], [0], [1], [0, 0, 1, 1], [], []>} : vector<32x32xf32>, vector<32x4xf32>, vector<32x4xf32> -> vector<32x4xf32>
    %321 = tpu.concatenate %194, %212, %230, %248, %266, %284, %302, %320 in 1 : vector<32x4xf32>, vector<32x4xf32>, vector<32x4xf32>, vector<32x4xf32>, vector<32x4xf32>, vector<32x4xf32>, vector<32x4xf32>, vector<32x4xf32> -> vector<32x32xf32>
    %cst_98 = arith.constant dense<0.000000e+00> : vector<32x32xf32>
    %322 = tpu.matmul %321, %172, %cst_98 {dimension_numbers = #tpu.dot_dimension_numbers<[1], [0], [0], [1], [0, 0, 1, 1], [], []>} : vector<32x32xf32>, vector<32x32xf32>, vector<32x32xf32> -> vector<32x32xf32>
    %323 = vector.broadcast %173 : vector<1x32xf32> to vector<32x32xf32>
    %324 = arith.addf %322, %323 : vector<32x32xf32>
    %c160 = arith.constant 160 : index
    %c0_99 = arith.constant 0 : index
    %325 = vector.load %arg2[%c160, %c0_99] : memref<384x192xf32, #tpu.memory_space<vmem>>, vector<32x96xf32>
    %c192 = arith.constant 192 : index
    %c0_100 = arith.constant 0 : index
    %326 = vector.load %arg2[%c192, %c0_100] : memref<384x192xf32, #tpu.memory_space<vmem>>, vector<1x96xf32>
    %c200 = arith.constant 200 : index
    %c0_101 = arith.constant 0 : index
    %327 = vector.load %arg2[%c200, %c0_101] : memref<384x192xf32, #tpu.memory_space<vmem>>, vector<32x64xf32>
    %c232 = arith.constant 232 : index
    %c0_102 = arith.constant 0 : index
    %328 = vector.load %arg2[%c232, %c0_102] : memref<384x192xf32, #tpu.memory_space<vmem>>, vector<1x64xf32>
    %cst_103 = arith.constant dense<0.000000e+00> : vector<32x96xf32>
    %329 = tpu.matmul %324, %325, %cst_103 {dimension_numbers = #tpu.dot_dimension_numbers<[1], [0], [0], [1], [0, 0, 1, 1], [], []>} : vector<32x32xf32>, vector<32x96xf32>, vector<32x96xf32> -> vector<32x96xf32>
    %330 = vector.broadcast %326 : vector<1x96xf32> to vector<32x96xf32>
    %331 = arith.addf %329, %330 : vector<32x96xf32>
    %332 = vector.extract_strided_slice %331 {offsets = [0, 0], sizes = [32, 4], strides = [1, 1]} : vector<32x96xf32> to vector<32x4xf32>
    %333 = vector.extract_strided_slice %331 {offsets = [0, 32], sizes = [32, 4], strides = [1, 1]} : vector<32x96xf32> to vector<32x4xf32>
    %334 = vector.extract_strided_slice %331 {offsets = [0, 64], sizes = [32, 4], strides = [1, 1]} : vector<32x96xf32> to vector<32x4xf32>
    %cst_104 = arith.constant dense<0.000000e+00> : vector<32x32xf32>
    %335 = tpu.matmul %332, %333, %cst_104 {dimension_numbers = #tpu.dot_dimension_numbers<[1], [1], [0], [0], [0, 0, 1, 0], [], []>} : vector<32x4xf32>, vector<32x4xf32>, vector<32x32xf32> -> vector<32x32xf32>
    %cst_105 = arith.constant 5.000000e-01 : f32
    %336 = vector.broadcast %cst_105 : f32 to vector<32x32xf32>
    %337 = arith.mulf %335, %336 : vector<32x32xf32>
    %338 = arith.addf %337, %14 : vector<32x32xf32>
    %cst_106 = arith.constant dense<0xFF800000> : vector<32xf32>
    %339 = vector.multi_reduction <maximumf>, %338, %cst_106 [1] : vector<32x32xf32> to vector<32xf32>
    %340 = vector.shape_cast %339 : vector<32xf32> to vector<32x1xf32>
    %341 = vector.broadcast %340 : vector<32x1xf32> to vector<32x32xf32>
    %342 = arith.subf %338, %341 : vector<32x32xf32>
    %343 = math.exp %342 : vector<32x32xf32>
    %cst_107 = arith.constant dense<0.000000e+00> : vector<32xf32>
    %344 = vector.multi_reduction <add>, %343, %cst_107 [1] : vector<32x32xf32> to vector<32xf32>
    %345 = vector.shape_cast %344 : vector<32xf32> to vector<32x1xf32>
    %346 = tpu.reciprocal %345 {approx = true} : vector<32x1xf32> -> vector<32x1xf32>
    %347 = vector.broadcast %346 : vector<32x1xf32> to vector<32x32xf32>
    %348 = arith.mulf %343, %347 : vector<32x32xf32>
    %cst_108 = arith.constant dense<0.000000e+00> : vector<32x4xf32>
    %349 = tpu.matmul %348, %334, %cst_108 {dimension_numbers = #tpu.dot_dimension_numbers<[1], [0], [0], [1], [0, 0, 1, 1], [], []>} : vector<32x32xf32>, vector<32x4xf32>, vector<32x4xf32> -> vector<32x4xf32>
    %350 = vector.extract_strided_slice %331 {offsets = [0, 4], sizes = [32, 4], strides = [1, 1]} : vector<32x96xf32> to vector<32x4xf32>
    %351 = vector.extract_strided_slice %331 {offsets = [0, 36], sizes = [32, 4], strides = [1, 1]} : vector<32x96xf32> to vector<32x4xf32>
    %352 = vector.extract_strided_slice %331 {offsets = [0, 68], sizes = [32, 4], strides = [1, 1]} : vector<32x96xf32> to vector<32x4xf32>
    %cst_109 = arith.constant dense<0.000000e+00> : vector<32x32xf32>
    %353 = tpu.matmul %350, %351, %cst_109 {dimension_numbers = #tpu.dot_dimension_numbers<[1], [1], [0], [0], [0, 0, 1, 0], [], []>} : vector<32x4xf32>, vector<32x4xf32>, vector<32x32xf32> -> vector<32x32xf32>
    %cst_110 = arith.constant 5.000000e-01 : f32
    %354 = vector.broadcast %cst_110 : f32 to vector<32x32xf32>
    %355 = arith.mulf %353, %354 : vector<32x32xf32>
    %356 = arith.addf %355, %14 : vector<32x32xf32>
    %cst_111 = arith.constant dense<0xFF800000> : vector<32xf32>
    %357 = vector.multi_reduction <maximumf>, %356, %cst_111 [1] : vector<32x32xf32> to vector<32xf32>
    %358 = vector.shape_cast %357 : vector<32xf32> to vector<32x1xf32>
    %359 = vector.broadcast %358 : vector<32x1xf32> to vector<32x32xf32>
    %360 = arith.subf %356, %359 : vector<32x32xf32>
    %361 = math.exp %360 : vector<32x32xf32>
    %cst_112 = arith.constant dense<0.000000e+00> : vector<32xf32>
    %362 = vector.multi_reduction <add>, %361, %cst_112 [1] : vector<32x32xf32> to vector<32xf32>
    %363 = vector.shape_cast %362 : vector<32xf32> to vector<32x1xf32>
    %364 = tpu.reciprocal %363 {approx = true} : vector<32x1xf32> -> vector<32x1xf32>
    %365 = vector.broadcast %364 : vector<32x1xf32> to vector<32x32xf32>
    %366 = arith.mulf %361, %365 : vector<32x32xf32>
    %cst_113 = arith.constant dense<0.000000e+00> : vector<32x4xf32>
    %367 = tpu.matmul %366, %352, %cst_113 {dimension_numbers = #tpu.dot_dimension_numbers<[1], [0], [0], [1], [0, 0, 1, 1], [], []>} : vector<32x32xf32>, vector<32x4xf32>, vector<32x4xf32> -> vector<32x4xf32>
    %368 = vector.extract_strided_slice %331 {offsets = [0, 8], sizes = [32, 4], strides = [1, 1]} : vector<32x96xf32> to vector<32x4xf32>
    %369 = vector.extract_strided_slice %331 {offsets = [0, 40], sizes = [32, 4], strides = [1, 1]} : vector<32x96xf32> to vector<32x4xf32>
    %370 = vector.extract_strided_slice %331 {offsets = [0, 72], sizes = [32, 4], strides = [1, 1]} : vector<32x96xf32> to vector<32x4xf32>
    %cst_114 = arith.constant dense<0.000000e+00> : vector<32x32xf32>
    %371 = tpu.matmul %368, %369, %cst_114 {dimension_numbers = #tpu.dot_dimension_numbers<[1], [1], [0], [0], [0, 0, 1, 0], [], []>} : vector<32x4xf32>, vector<32x4xf32>, vector<32x32xf32> -> vector<32x32xf32>
    %cst_115 = arith.constant 5.000000e-01 : f32
    %372 = vector.broadcast %cst_115 : f32 to vector<32x32xf32>
    %373 = arith.mulf %371, %372 : vector<32x32xf32>
    %374 = arith.addf %373, %14 : vector<32x32xf32>
    %cst_116 = arith.constant dense<0xFF800000> : vector<32xf32>
    %375 = vector.multi_reduction <maximumf>, %374, %cst_116 [1] : vector<32x32xf32> to vector<32xf32>
    %376 = vector.shape_cast %375 : vector<32xf32> to vector<32x1xf32>
    %377 = vector.broadcast %376 : vector<32x1xf32> to vector<32x32xf32>
    %378 = arith.subf %374, %377 : vector<32x32xf32>
    %379 = math.exp %378 : vector<32x32xf32>
    %cst_117 = arith.constant dense<0.000000e+00> : vector<32xf32>
    %380 = vector.multi_reduction <add>, %379, %cst_117 [1] : vector<32x32xf32> to vector<32xf32>
    %381 = vector.shape_cast %380 : vector<32xf32> to vector<32x1xf32>
    %382 = tpu.reciprocal %381 {approx = true} : vector<32x1xf32> -> vector<32x1xf32>
    %383 = vector.broadcast %382 : vector<32x1xf32> to vector<32x32xf32>
    %384 = arith.mulf %379, %383 : vector<32x32xf32>
    %cst_118 = arith.constant dense<0.000000e+00> : vector<32x4xf32>
    %385 = tpu.matmul %384, %370, %cst_118 {dimension_numbers = #tpu.dot_dimension_numbers<[1], [0], [0], [1], [0, 0, 1, 1], [], []>} : vector<32x32xf32>, vector<32x4xf32>, vector<32x4xf32> -> vector<32x4xf32>
    %386 = vector.extract_strided_slice %331 {offsets = [0, 12], sizes = [32, 4], strides = [1, 1]} : vector<32x96xf32> to vector<32x4xf32>
    %387 = vector.extract_strided_slice %331 {offsets = [0, 44], sizes = [32, 4], strides = [1, 1]} : vector<32x96xf32> to vector<32x4xf32>
    %388 = vector.extract_strided_slice %331 {offsets = [0, 76], sizes = [32, 4], strides = [1, 1]} : vector<32x96xf32> to vector<32x4xf32>
    %cst_119 = arith.constant dense<0.000000e+00> : vector<32x32xf32>
    %389 = tpu.matmul %386, %387, %cst_119 {dimension_numbers = #tpu.dot_dimension_numbers<[1], [1], [0], [0], [0, 0, 1, 0], [], []>} : vector<32x4xf32>, vector<32x4xf32>, vector<32x32xf32> -> vector<32x32xf32>
    %cst_120 = arith.constant 5.000000e-01 : f32
    %390 = vector.broadcast %cst_120 : f32 to vector<32x32xf32>
    %391 = arith.mulf %389, %390 : vector<32x32xf32>
    %392 = arith.addf %391, %14 : vector<32x32xf32>
    %cst_121 = arith.constant dense<0xFF800000> : vector<32xf32>
    %393 = vector.multi_reduction <maximumf>, %392, %cst_121 [1] : vector<32x32xf32> to vector<32xf32>
    %394 = vector.shape_cast %393 : vector<32xf32> to vector<32x1xf32>
    %395 = vector.broadcast %394 : vector<32x1xf32> to vector<32x32xf32>
    %396 = arith.subf %392, %395 : vector<32x32xf32>
    %397 = math.exp %396 : vector<32x32xf32>
    %cst_122 = arith.constant dense<0.000000e+00> : vector<32xf32>
    %398 = vector.multi_reduction <add>, %397, %cst_122 [1] : vector<32x32xf32> to vector<32xf32>
    %399 = vector.shape_cast %398 : vector<32xf32> to vector<32x1xf32>
    %400 = tpu.reciprocal %399 {approx = true} : vector<32x1xf32> -> vector<32x1xf32>
    %401 = vector.broadcast %400 : vector<32x1xf32> to vector<32x32xf32>
    %402 = arith.mulf %397, %401 : vector<32x32xf32>
    %cst_123 = arith.constant dense<0.000000e+00> : vector<32x4xf32>
    %403 = tpu.matmul %402, %388, %cst_123 {dimension_numbers = #tpu.dot_dimension_numbers<[1], [0], [0], [1], [0, 0, 1, 1], [], []>} : vector<32x32xf32>, vector<32x4xf32>, vector<32x4xf32> -> vector<32x4xf32>
    %404 = vector.extract_strided_slice %331 {offsets = [0, 16], sizes = [32, 4], strides = [1, 1]} : vector<32x96xf32> to vector<32x4xf32>
    %405 = vector.extract_strided_slice %331 {offsets = [0, 48], sizes = [32, 4], strides = [1, 1]} : vector<32x96xf32> to vector<32x4xf32>
    %406 = vector.extract_strided_slice %331 {offsets = [0, 80], sizes = [32, 4], strides = [1, 1]} : vector<32x96xf32> to vector<32x4xf32>
    %cst_124 = arith.constant dense<0.000000e+00> : vector<32x32xf32>
    %407 = tpu.matmul %404, %405, %cst_124 {dimension_numbers = #tpu.dot_dimension_numbers<[1], [1], [0], [0], [0, 0, 1, 0], [], []>} : vector<32x4xf32>, vector<32x4xf32>, vector<32x32xf32> -> vector<32x32xf32>
    %cst_125 = arith.constant 5.000000e-01 : f32
    %408 = vector.broadcast %cst_125 : f32 to vector<32x32xf32>
    %409 = arith.mulf %407, %408 : vector<32x32xf32>
    %410 = arith.addf %409, %14 : vector<32x32xf32>
    %cst_126 = arith.constant dense<0xFF800000> : vector<32xf32>
    %411 = vector.multi_reduction <maximumf>, %410, %cst_126 [1] : vector<32x32xf32> to vector<32xf32>
    %412 = vector.shape_cast %411 : vector<32xf32> to vector<32x1xf32>
    %413 = vector.broadcast %412 : vector<32x1xf32> to vector<32x32xf32>
    %414 = arith.subf %410, %413 : vector<32x32xf32>
    %415 = math.exp %414 : vector<32x32xf32>
    %cst_127 = arith.constant dense<0.000000e+00> : vector<32xf32>
    %416 = vector.multi_reduction <add>, %415, %cst_127 [1] : vector<32x32xf32> to vector<32xf32>
    %417 = vector.shape_cast %416 : vector<32xf32> to vector<32x1xf32>
    %418 = tpu.reciprocal %417 {approx = true} : vector<32x1xf32> -> vector<32x1xf32>
    %419 = vector.broadcast %418 : vector<32x1xf32> to vector<32x32xf32>
    %420 = arith.mulf %415, %419 : vector<32x32xf32>
    %cst_128 = arith.constant dense<0.000000e+00> : vector<32x4xf32>
    %421 = tpu.matmul %420, %406, %cst_128 {dimension_numbers = #tpu.dot_dimension_numbers<[1], [0], [0], [1], [0, 0, 1, 1], [], []>} : vector<32x32xf32>, vector<32x4xf32>, vector<32x4xf32> -> vector<32x4xf32>
    %422 = vector.extract_strided_slice %331 {offsets = [0, 20], sizes = [32, 4], strides = [1, 1]} : vector<32x96xf32> to vector<32x4xf32>
    %423 = vector.extract_strided_slice %331 {offsets = [0, 52], sizes = [32, 4], strides = [1, 1]} : vector<32x96xf32> to vector<32x4xf32>
    %424 = vector.extract_strided_slice %331 {offsets = [0, 84], sizes = [32, 4], strides = [1, 1]} : vector<32x96xf32> to vector<32x4xf32>
    %cst_129 = arith.constant dense<0.000000e+00> : vector<32x32xf32>
    %425 = tpu.matmul %422, %423, %cst_129 {dimension_numbers = #tpu.dot_dimension_numbers<[1], [1], [0], [0], [0, 0, 1, 0], [], []>} : vector<32x4xf32>, vector<32x4xf32>, vector<32x32xf32> -> vector<32x32xf32>
    %cst_130 = arith.constant 5.000000e-01 : f32
    %426 = vector.broadcast %cst_130 : f32 to vector<32x32xf32>
    %427 = arith.mulf %425, %426 : vector<32x32xf32>
    %428 = arith.addf %427, %14 : vector<32x32xf32>
    %cst_131 = arith.constant dense<0xFF800000> : vector<32xf32>
    %429 = vector.multi_reduction <maximumf>, %428, %cst_131 [1] : vector<32x32xf32> to vector<32xf32>
    %430 = vector.shape_cast %429 : vector<32xf32> to vector<32x1xf32>
    %431 = vector.broadcast %430 : vector<32x1xf32> to vector<32x32xf32>
    %432 = arith.subf %428, %431 : vector<32x32xf32>
    %433 = math.exp %432 : vector<32x32xf32>
    %cst_132 = arith.constant dense<0.000000e+00> : vector<32xf32>
    %434 = vector.multi_reduction <add>, %433, %cst_132 [1] : vector<32x32xf32> to vector<32xf32>
    %435 = vector.shape_cast %434 : vector<32xf32> to vector<32x1xf32>
    %436 = tpu.reciprocal %435 {approx = true} : vector<32x1xf32> -> vector<32x1xf32>
    %437 = vector.broadcast %436 : vector<32x1xf32> to vector<32x32xf32>
    %438 = arith.mulf %433, %437 : vector<32x32xf32>
    %cst_133 = arith.constant dense<0.000000e+00> : vector<32x4xf32>
    %439 = tpu.matmul %438, %424, %cst_133 {dimension_numbers = #tpu.dot_dimension_numbers<[1], [0], [0], [1], [0, 0, 1, 1], [], []>} : vector<32x32xf32>, vector<32x4xf32>, vector<32x4xf32> -> vector<32x4xf32>
    %440 = vector.extract_strided_slice %331 {offsets = [0, 24], sizes = [32, 4], strides = [1, 1]} : vector<32x96xf32> to vector<32x4xf32>
    %441 = vector.extract_strided_slice %331 {offsets = [0, 56], sizes = [32, 4], strides = [1, 1]} : vector<32x96xf32> to vector<32x4xf32>
    %442 = vector.extract_strided_slice %331 {offsets = [0, 88], sizes = [32, 4], strides = [1, 1]} : vector<32x96xf32> to vector<32x4xf32>
    %cst_134 = arith.constant dense<0.000000e+00> : vector<32x32xf32>
    %443 = tpu.matmul %440, %441, %cst_134 {dimension_numbers = #tpu.dot_dimension_numbers<[1], [1], [0], [0], [0, 0, 1, 0], [], []>} : vector<32x4xf32>, vector<32x4xf32>, vector<32x32xf32> -> vector<32x32xf32>
    %cst_135 = arith.constant 5.000000e-01 : f32
    %444 = vector.broadcast %cst_135 : f32 to vector<32x32xf32>
    %445 = arith.mulf %443, %444 : vector<32x32xf32>
    %446 = arith.addf %445, %14 : vector<32x32xf32>
    %cst_136 = arith.constant dense<0xFF800000> : vector<32xf32>
    %447 = vector.multi_reduction <maximumf>, %446, %cst_136 [1] : vector<32x32xf32> to vector<32xf32>
    %448 = vector.shape_cast %447 : vector<32xf32> to vector<32x1xf32>
    %449 = vector.broadcast %448 : vector<32x1xf32> to vector<32x32xf32>
    %450 = arith.subf %446, %449 : vector<32x32xf32>
    %451 = math.exp %450 : vector<32x32xf32>
    %cst_137 = arith.constant dense<0.000000e+00> : vector<32xf32>
    %452 = vector.multi_reduction <add>, %451, %cst_137 [1] : vector<32x32xf32> to vector<32xf32>
    %453 = vector.shape_cast %452 : vector<32xf32> to vector<32x1xf32>
    %454 = tpu.reciprocal %453 {approx = true} : vector<32x1xf32> -> vector<32x1xf32>
    %455 = vector.broadcast %454 : vector<32x1xf32> to vector<32x32xf32>
    %456 = arith.mulf %451, %455 : vector<32x32xf32>
    %cst_138 = arith.constant dense<0.000000e+00> : vector<32x4xf32>
    %457 = tpu.matmul %456, %442, %cst_138 {dimension_numbers = #tpu.dot_dimension_numbers<[1], [0], [0], [1], [0, 0, 1, 1], [], []>} : vector<32x32xf32>, vector<32x4xf32>, vector<32x4xf32> -> vector<32x4xf32>
    %458 = vector.extract_strided_slice %331 {offsets = [0, 28], sizes = [32, 4], strides = [1, 1]} : vector<32x96xf32> to vector<32x4xf32>
    %459 = vector.extract_strided_slice %331 {offsets = [0, 60], sizes = [32, 4], strides = [1, 1]} : vector<32x96xf32> to vector<32x4xf32>
    %460 = vector.extract_strided_slice %331 {offsets = [0, 92], sizes = [32, 4], strides = [1, 1]} : vector<32x96xf32> to vector<32x4xf32>
    %cst_139 = arith.constant dense<0.000000e+00> : vector<32x32xf32>
    %461 = tpu.matmul %458, %459, %cst_139 {dimension_numbers = #tpu.dot_dimension_numbers<[1], [1], [0], [0], [0, 0, 1, 0], [], []>} : vector<32x4xf32>, vector<32x4xf32>, vector<32x32xf32> -> vector<32x32xf32>
    %cst_140 = arith.constant 5.000000e-01 : f32
    %462 = vector.broadcast %cst_140 : f32 to vector<32x32xf32>
    %463 = arith.mulf %461, %462 : vector<32x32xf32>
    %464 = arith.addf %463, %14 : vector<32x32xf32>
    %cst_141 = arith.constant dense<0xFF800000> : vector<32xf32>
    %465 = vector.multi_reduction <maximumf>, %464, %cst_141 [1] : vector<32x32xf32> to vector<32xf32>
    %466 = vector.shape_cast %465 : vector<32xf32> to vector<32x1xf32>
    %467 = vector.broadcast %466 : vector<32x1xf32> to vector<32x32xf32>
    %468 = arith.subf %464, %467 : vector<32x32xf32>
    %469 = math.exp %468 : vector<32x32xf32>
    %cst_142 = arith.constant dense<0.000000e+00> : vector<32xf32>
    %470 = vector.multi_reduction <add>, %469, %cst_142 [1] : vector<32x32xf32> to vector<32xf32>
    %471 = vector.shape_cast %470 : vector<32xf32> to vector<32x1xf32>
    %472 = tpu.reciprocal %471 {approx = true} : vector<32x1xf32> -> vector<32x1xf32>
    %473 = vector.broadcast %472 : vector<32x1xf32> to vector<32x32xf32>
    %474 = arith.mulf %469, %473 : vector<32x32xf32>
    %cst_143 = arith.constant dense<0.000000e+00> : vector<32x4xf32>
    %475 = tpu.matmul %474, %460, %cst_143 {dimension_numbers = #tpu.dot_dimension_numbers<[1], [0], [0], [1], [0, 0, 1, 1], [], []>} : vector<32x32xf32>, vector<32x4xf32>, vector<32x4xf32> -> vector<32x4xf32>
    %476 = tpu.concatenate %349, %367, %385, %403, %421, %439, %457, %475 in 1 : vector<32x4xf32>, vector<32x4xf32>, vector<32x4xf32>, vector<32x4xf32>, vector<32x4xf32>, vector<32x4xf32>, vector<32x4xf32>, vector<32x4xf32> -> vector<32x32xf32>
    %cst_144 = arith.constant dense<0.000000e+00> : vector<32x64xf32>
    %477 = tpu.matmul %476, %327, %cst_144 {dimension_numbers = #tpu.dot_dimension_numbers<[1], [0], [0], [1], [0, 0, 1, 1], [], []>} : vector<32x32xf32>, vector<32x64xf32>, vector<32x64xf32> -> vector<32x64xf32>
    %478 = vector.broadcast %328 : vector<1x64xf32> to vector<32x64xf32>
    %479 = arith.addf %477, %478 : vector<32x64xf32>
    %c240 = arith.constant 240 : index
    %c0_145 = arith.constant 0 : index
    %480 = vector.load %arg2[%c240, %c0_145] : memref<384x192xf32, #tpu.memory_space<vmem>>, vector<64x192xf32>
    %c304 = arith.constant 304 : index
    %c0_146 = arith.constant 0 : index
    %481 = vector.load %arg2[%c304, %c0_146] : memref<384x192xf32, #tpu.memory_space<vmem>>, vector<1x192xf32>
    %c312 = arith.constant 312 : index
    %c0_147 = arith.constant 0 : index
    %482 = vector.load %arg2[%c312, %c0_147] : memref<384x192xf32, #tpu.memory_space<vmem>>, vector<64x64xf32>
    %c376 = arith.constant 376 : index
    %c0_148 = arith.constant 0 : index
    %483 = vector.load %arg2[%c376, %c0_148] : memref<384x192xf32, #tpu.memory_space<vmem>>, vector<1x64xf32>
    %cst_149 = arith.constant dense<0.000000e+00> : vector<32x192xf32>
    %484 = tpu.matmul %479, %480, %cst_149 {dimension_numbers = #tpu.dot_dimension_numbers<[1], [0], [0], [1], [0, 0, 1, 1], [], []>} : vector<32x64xf32>, vector<64x192xf32>, vector<32x192xf32> -> vector<32x192xf32>
    %485 = vector.broadcast %481 : vector<1x192xf32> to vector<32x192xf32>
    %486 = arith.addf %484, %485 : vector<32x192xf32>
    %487 = vector.extract_strided_slice %486 {offsets = [0, 0], sizes = [32, 8], strides = [1, 1]} : vector<32x192xf32> to vector<32x8xf32>
    %488 = vector.extract_strided_slice %486 {offsets = [0, 64], sizes = [32, 8], strides = [1, 1]} : vector<32x192xf32> to vector<32x8xf32>
    %489 = vector.extract_strided_slice %486 {offsets = [0, 128], sizes = [32, 8], strides = [1, 1]} : vector<32x192xf32> to vector<32x8xf32>
    %cst_150 = arith.constant dense<0.000000e+00> : vector<32x32xf32>
    %490 = tpu.matmul %487, %488, %cst_150 {dimension_numbers = #tpu.dot_dimension_numbers<[1], [1], [0], [0], [0, 0, 1, 0], [], []>} : vector<32x8xf32>, vector<32x8xf32>, vector<32x32xf32> -> vector<32x32xf32>
    %cst_151 = arith.constant 0.353553385 : f32
    %491 = vector.broadcast %cst_151 : f32 to vector<32x32xf32>
    %492 = arith.mulf %490, %491 : vector<32x32xf32>
    %493 = arith.addf %492, %14 : vector<32x32xf32>
    %cst_152 = arith.constant dense<0xFF800000> : vector<32xf32>
    %494 = vector.multi_reduction <maximumf>, %493, %cst_152 [1] : vector<32x32xf32> to vector<32xf32>
    %495 = vector.shape_cast %494 : vector<32xf32> to vector<32x1xf32>
    %496 = vector.broadcast %495 : vector<32x1xf32> to vector<32x32xf32>
    %497 = arith.subf %493, %496 : vector<32x32xf32>
    %498 = math.exp %497 : vector<32x32xf32>
    %cst_153 = arith.constant dense<0.000000e+00> : vector<32xf32>
    %499 = vector.multi_reduction <add>, %498, %cst_153 [1] : vector<32x32xf32> to vector<32xf32>
    %500 = vector.shape_cast %499 : vector<32xf32> to vector<32x1xf32>
    %501 = tpu.reciprocal %500 {approx = true} : vector<32x1xf32> -> vector<32x1xf32>
    %502 = vector.broadcast %501 : vector<32x1xf32> to vector<32x32xf32>
    %503 = arith.mulf %498, %502 : vector<32x32xf32>
    %cst_154 = arith.constant dense<0.000000e+00> : vector<32x8xf32>
    %504 = tpu.matmul %503, %489, %cst_154 {dimension_numbers = #tpu.dot_dimension_numbers<[1], [0], [0], [1], [0, 0, 1, 1], [], []>} : vector<32x32xf32>, vector<32x8xf32>, vector<32x8xf32> -> vector<32x8xf32>
    %505 = vector.extract_strided_slice %486 {offsets = [0, 8], sizes = [32, 8], strides = [1, 1]} : vector<32x192xf32> to vector<32x8xf32>
    %506 = vector.extract_strided_slice %486 {offsets = [0, 72], sizes = [32, 8], strides = [1, 1]} : vector<32x192xf32> to vector<32x8xf32>
    %507 = vector.extract_strided_slice %486 {offsets = [0, 136], sizes = [32, 8], strides = [1, 1]} : vector<32x192xf32> to vector<32x8xf32>
    %cst_155 = arith.constant dense<0.000000e+00> : vector<32x32xf32>
    %508 = tpu.matmul %505, %506, %cst_155 {dimension_numbers = #tpu.dot_dimension_numbers<[1], [1], [0], [0], [0, 0, 1, 0], [], []>} : vector<32x8xf32>, vector<32x8xf32>, vector<32x32xf32> -> vector<32x32xf32>
    %cst_156 = arith.constant 0.353553385 : f32
    %509 = vector.broadcast %cst_156 : f32 to vector<32x32xf32>
    %510 = arith.mulf %508, %509 : vector<32x32xf32>
    %511 = arith.addf %510, %14 : vector<32x32xf32>
    %cst_157 = arith.constant dense<0xFF800000> : vector<32xf32>
    %512 = vector.multi_reduction <maximumf>, %511, %cst_157 [1] : vector<32x32xf32> to vector<32xf32>
    %513 = vector.shape_cast %512 : vector<32xf32> to vector<32x1xf32>
    %514 = vector.broadcast %513 : vector<32x1xf32> to vector<32x32xf32>
    %515 = arith.subf %511, %514 : vector<32x32xf32>
    %516 = math.exp %515 : vector<32x32xf32>
    %cst_158 = arith.constant dense<0.000000e+00> : vector<32xf32>
    %517 = vector.multi_reduction <add>, %516, %cst_158 [1] : vector<32x32xf32> to vector<32xf32>
    %518 = vector.shape_cast %517 : vector<32xf32> to vector<32x1xf32>
    %519 = tpu.reciprocal %518 {approx = true} : vector<32x1xf32> -> vector<32x1xf32>
    %520 = vector.broadcast %519 : vector<32x1xf32> to vector<32x32xf32>
    %521 = arith.mulf %516, %520 : vector<32x32xf32>
    %cst_159 = arith.constant dense<0.000000e+00> : vector<32x8xf32>
    %522 = tpu.matmul %521, %507, %cst_159 {dimension_numbers = #tpu.dot_dimension_numbers<[1], [0], [0], [1], [0, 0, 1, 1], [], []>} : vector<32x32xf32>, vector<32x8xf32>, vector<32x8xf32> -> vector<32x8xf32>
    %523 = vector.extract_strided_slice %486 {offsets = [0, 16], sizes = [32, 8], strides = [1, 1]} : vector<32x192xf32> to vector<32x8xf32>
    %524 = vector.extract_strided_slice %486 {offsets = [0, 80], sizes = [32, 8], strides = [1, 1]} : vector<32x192xf32> to vector<32x8xf32>
    %525 = vector.extract_strided_slice %486 {offsets = [0, 144], sizes = [32, 8], strides = [1, 1]} : vector<32x192xf32> to vector<32x8xf32>
    %cst_160 = arith.constant dense<0.000000e+00> : vector<32x32xf32>
    %526 = tpu.matmul %523, %524, %cst_160 {dimension_numbers = #tpu.dot_dimension_numbers<[1], [1], [0], [0], [0, 0, 1, 0], [], []>} : vector<32x8xf32>, vector<32x8xf32>, vector<32x32xf32> -> vector<32x32xf32>
    %cst_161 = arith.constant 0.353553385 : f32
    %527 = vector.broadcast %cst_161 : f32 to vector<32x32xf32>
    %528 = arith.mulf %526, %527 : vector<32x32xf32>
    %529 = arith.addf %528, %14 : vector<32x32xf32>
    %cst_162 = arith.constant dense<0xFF800000> : vector<32xf32>
    %530 = vector.multi_reduction <maximumf>, %529, %cst_162 [1] : vector<32x32xf32> to vector<32xf32>
    %531 = vector.shape_cast %530 : vector<32xf32> to vector<32x1xf32>
    %532 = vector.broadcast %531 : vector<32x1xf32> to vector<32x32xf32>
    %533 = arith.subf %529, %532 : vector<32x32xf32>
    %534 = math.exp %533 : vector<32x32xf32>
    %cst_163 = arith.constant dense<0.000000e+00> : vector<32xf32>
    %535 = vector.multi_reduction <add>, %534, %cst_163 [1] : vector<32x32xf32> to vector<32xf32>
    %536 = vector.shape_cast %535 : vector<32xf32> to vector<32x1xf32>
    %537 = tpu.reciprocal %536 {approx = true} : vector<32x1xf32> -> vector<32x1xf32>
    %538 = vector.broadcast %537 : vector<32x1xf32> to vector<32x32xf32>
    %539 = arith.mulf %534, %538 : vector<32x32xf32>
    %cst_164 = arith.constant dense<0.000000e+00> : vector<32x8xf32>
    %540 = tpu.matmul %539, %525, %cst_164 {dimension_numbers = #tpu.dot_dimension_numbers<[1], [0], [0], [1], [0, 0, 1, 1], [], []>} : vector<32x32xf32>, vector<32x8xf32>, vector<32x8xf32> -> vector<32x8xf32>
    %541 = vector.extract_strided_slice %486 {offsets = [0, 24], sizes = [32, 8], strides = [1, 1]} : vector<32x192xf32> to vector<32x8xf32>
    %542 = vector.extract_strided_slice %486 {offsets = [0, 88], sizes = [32, 8], strides = [1, 1]} : vector<32x192xf32> to vector<32x8xf32>
    %543 = vector.extract_strided_slice %486 {offsets = [0, 152], sizes = [32, 8], strides = [1, 1]} : vector<32x192xf32> to vector<32x8xf32>
    %cst_165 = arith.constant dense<0.000000e+00> : vector<32x32xf32>
    %544 = tpu.matmul %541, %542, %cst_165 {dimension_numbers = #tpu.dot_dimension_numbers<[1], [1], [0], [0], [0, 0, 1, 0], [], []>} : vector<32x8xf32>, vector<32x8xf32>, vector<32x32xf32> -> vector<32x32xf32>
    %cst_166 = arith.constant 0.353553385 : f32
    %545 = vector.broadcast %cst_166 : f32 to vector<32x32xf32>
    %546 = arith.mulf %544, %545 : vector<32x32xf32>
    %547 = arith.addf %546, %14 : vector<32x32xf32>
    %cst_167 = arith.constant dense<0xFF800000> : vector<32xf32>
    %548 = vector.multi_reduction <maximumf>, %547, %cst_167 [1] : vector<32x32xf32> to vector<32xf32>
    %549 = vector.shape_cast %548 : vector<32xf32> to vector<32x1xf32>
    %550 = vector.broadcast %549 : vector<32x1xf32> to vector<32x32xf32>
    %551 = arith.subf %547, %550 : vector<32x32xf32>
    %552 = math.exp %551 : vector<32x32xf32>
    %cst_168 = arith.constant dense<0.000000e+00> : vector<32xf32>
    %553 = vector.multi_reduction <add>, %552, %cst_168 [1] : vector<32x32xf32> to vector<32xf32>
    %554 = vector.shape_cast %553 : vector<32xf32> to vector<32x1xf32>
    %555 = tpu.reciprocal %554 {approx = true} : vector<32x1xf32> -> vector<32x1xf32>
    %556 = vector.broadcast %555 : vector<32x1xf32> to vector<32x32xf32>
    %557 = arith.mulf %552, %556 : vector<32x32xf32>
    %cst_169 = arith.constant dense<0.000000e+00> : vector<32x8xf32>
    %558 = tpu.matmul %557, %543, %cst_169 {dimension_numbers = #tpu.dot_dimension_numbers<[1], [0], [0], [1], [0, 0, 1, 1], [], []>} : vector<32x32xf32>, vector<32x8xf32>, vector<32x8xf32> -> vector<32x8xf32>
    %559 = vector.extract_strided_slice %486 {offsets = [0, 32], sizes = [32, 8], strides = [1, 1]} : vector<32x192xf32> to vector<32x8xf32>
    %560 = vector.extract_strided_slice %486 {offsets = [0, 96], sizes = [32, 8], strides = [1, 1]} : vector<32x192xf32> to vector<32x8xf32>
    %561 = vector.extract_strided_slice %486 {offsets = [0, 160], sizes = [32, 8], strides = [1, 1]} : vector<32x192xf32> to vector<32x8xf32>
    %cst_170 = arith.constant dense<0.000000e+00> : vector<32x32xf32>
    %562 = tpu.matmul %559, %560, %cst_170 {dimension_numbers = #tpu.dot_dimension_numbers<[1], [1], [0], [0], [0, 0, 1, 0], [], []>} : vector<32x8xf32>, vector<32x8xf32>, vector<32x32xf32> -> vector<32x32xf32>
    %cst_171 = arith.constant 0.353553385 : f32
    %563 = vector.broadcast %cst_171 : f32 to vector<32x32xf32>
    %564 = arith.mulf %562, %563 : vector<32x32xf32>
    %565 = arith.addf %564, %14 : vector<32x32xf32>
    %cst_172 = arith.constant dense<0xFF800000> : vector<32xf32>
    %566 = vector.multi_reduction <maximumf>, %565, %cst_172 [1] : vector<32x32xf32> to vector<32xf32>
    %567 = vector.shape_cast %566 : vector<32xf32> to vector<32x1xf32>
    %568 = vector.broadcast %567 : vector<32x1xf32> to vector<32x32xf32>
    %569 = arith.subf %565, %568 : vector<32x32xf32>
    %570 = math.exp %569 : vector<32x32xf32>
    %cst_173 = arith.constant dense<0.000000e+00> : vector<32xf32>
    %571 = vector.multi_reduction <add>, %570, %cst_173 [1] : vector<32x32xf32> to vector<32xf32>
    %572 = vector.shape_cast %571 : vector<32xf32> to vector<32x1xf32>
    %573 = tpu.reciprocal %572 {approx = true} : vector<32x1xf32> -> vector<32x1xf32>
    %574 = vector.broadcast %573 : vector<32x1xf32> to vector<32x32xf32>
    %575 = arith.mulf %570, %574 : vector<32x32xf32>
    %cst_174 = arith.constant dense<0.000000e+00> : vector<32x8xf32>
    %576 = tpu.matmul %575, %561, %cst_174 {dimension_numbers = #tpu.dot_dimension_numbers<[1], [0], [0], [1], [0, 0, 1, 1], [], []>} : vector<32x32xf32>, vector<32x8xf32>, vector<32x8xf32> -> vector<32x8xf32>
    %577 = vector.extract_strided_slice %486 {offsets = [0, 40], sizes = [32, 8], strides = [1, 1]} : vector<32x192xf32> to vector<32x8xf32>
    %578 = vector.extract_strided_slice %486 {offsets = [0, 104], sizes = [32, 8], strides = [1, 1]} : vector<32x192xf32> to vector<32x8xf32>
    %579 = vector.extract_strided_slice %486 {offsets = [0, 168], sizes = [32, 8], strides = [1, 1]} : vector<32x192xf32> to vector<32x8xf32>
    %cst_175 = arith.constant dense<0.000000e+00> : vector<32x32xf32>
    %580 = tpu.matmul %577, %578, %cst_175 {dimension_numbers = #tpu.dot_dimension_numbers<[1], [1], [0], [0], [0, 0, 1, 0], [], []>} : vector<32x8xf32>, vector<32x8xf32>, vector<32x32xf32> -> vector<32x32xf32>
    %cst_176 = arith.constant 0.353553385 : f32
    %581 = vector.broadcast %cst_176 : f32 to vector<32x32xf32>
    %582 = arith.mulf %580, %581 : vector<32x32xf32>
    %583 = arith.addf %582, %14 : vector<32x32xf32>
    %cst_177 = arith.constant dense<0xFF800000> : vector<32xf32>
    %584 = vector.multi_reduction <maximumf>, %583, %cst_177 [1] : vector<32x32xf32> to vector<32xf32>
    %585 = vector.shape_cast %584 : vector<32xf32> to vector<32x1xf32>
    %586 = vector.broadcast %585 : vector<32x1xf32> to vector<32x32xf32>
    %587 = arith.subf %583, %586 : vector<32x32xf32>
    %588 = math.exp %587 : vector<32x32xf32>
    %cst_178 = arith.constant dense<0.000000e+00> : vector<32xf32>
    %589 = vector.multi_reduction <add>, %588, %cst_178 [1] : vector<32x32xf32> to vector<32xf32>
    %590 = vector.shape_cast %589 : vector<32xf32> to vector<32x1xf32>
    %591 = tpu.reciprocal %590 {approx = true} : vector<32x1xf32> -> vector<32x1xf32>
    %592 = vector.broadcast %591 : vector<32x1xf32> to vector<32x32xf32>
    %593 = arith.mulf %588, %592 : vector<32x32xf32>
    %cst_179 = arith.constant dense<0.000000e+00> : vector<32x8xf32>
    %594 = tpu.matmul %593, %579, %cst_179 {dimension_numbers = #tpu.dot_dimension_numbers<[1], [0], [0], [1], [0, 0, 1, 1], [], []>} : vector<32x32xf32>, vector<32x8xf32>, vector<32x8xf32> -> vector<32x8xf32>
    %595 = vector.extract_strided_slice %486 {offsets = [0, 48], sizes = [32, 8], strides = [1, 1]} : vector<32x192xf32> to vector<32x8xf32>
    %596 = vector.extract_strided_slice %486 {offsets = [0, 112], sizes = [32, 8], strides = [1, 1]} : vector<32x192xf32> to vector<32x8xf32>
    %597 = vector.extract_strided_slice %486 {offsets = [0, 176], sizes = [32, 8], strides = [1, 1]} : vector<32x192xf32> to vector<32x8xf32>
    %cst_180 = arith.constant dense<0.000000e+00> : vector<32x32xf32>
    %598 = tpu.matmul %595, %596, %cst_180 {dimension_numbers = #tpu.dot_dimension_numbers<[1], [1], [0], [0], [0, 0, 1, 0], [], []>} : vector<32x8xf32>, vector<32x8xf32>, vector<32x32xf32> -> vector<32x32xf32>
    %cst_181 = arith.constant 0.353553385 : f32
    %599 = vector.broadcast %cst_181 : f32 to vector<32x32xf32>
    %600 = arith.mulf %598, %599 : vector<32x32xf32>
    %601 = arith.addf %600, %14 : vector<32x32xf32>
    %cst_182 = arith.constant dense<0xFF800000> : vector<32xf32>
    %602 = vector.multi_reduction <maximumf>, %601, %cst_182 [1] : vector<32x32xf32> to vector<32xf32>
    %603 = vector.shape_cast %602 : vector<32xf32> to vector<32x1xf32>
    %604 = vector.broadcast %603 : vector<32x1xf32> to vector<32x32xf32>
    %605 = arith.subf %601, %604 : vector<32x32xf32>
    %606 = math.exp %605 : vector<32x32xf32>
    %cst_183 = arith.constant dense<0.000000e+00> : vector<32xf32>
    %607 = vector.multi_reduction <add>, %606, %cst_183 [1] : vector<32x32xf32> to vector<32xf32>
    %608 = vector.shape_cast %607 : vector<32xf32> to vector<32x1xf32>
    %609 = tpu.reciprocal %608 {approx = true} : vector<32x1xf32> -> vector<32x1xf32>
    %610 = vector.broadcast %609 : vector<32x1xf32> to vector<32x32xf32>
    %611 = arith.mulf %606, %610 : vector<32x32xf32>
    %cst_184 = arith.constant dense<0.000000e+00> : vector<32x8xf32>
    %612 = tpu.matmul %611, %597, %cst_184 {dimension_numbers = #tpu.dot_dimension_numbers<[1], [0], [0], [1], [0, 0, 1, 1], [], []>} : vector<32x32xf32>, vector<32x8xf32>, vector<32x8xf32> -> vector<32x8xf32>
    %613 = vector.extract_strided_slice %486 {offsets = [0, 56], sizes = [32, 8], strides = [1, 1]} : vector<32x192xf32> to vector<32x8xf32>
    %614 = vector.extract_strided_slice %486 {offsets = [0, 120], sizes = [32, 8], strides = [1, 1]} : vector<32x192xf32> to vector<32x8xf32>
    %615 = vector.extract_strided_slice %486 {offsets = [0, 184], sizes = [32, 8], strides = [1, 1]} : vector<32x192xf32> to vector<32x8xf32>
    %cst_185 = arith.constant dense<0.000000e+00> : vector<32x32xf32>
    %616 = tpu.matmul %613, %614, %cst_185 {dimension_numbers = #tpu.dot_dimension_numbers<[1], [1], [0], [0], [0, 0, 1, 0], [], []>} : vector<32x8xf32>, vector<32x8xf32>, vector<32x32xf32> -> vector<32x32xf32>
    %cst_186 = arith.constant 0.353553385 : f32
    %617 = vector.broadcast %cst_186 : f32 to vector<32x32xf32>
    %618 = arith.mulf %616, %617 : vector<32x32xf32>
    %619 = arith.addf %618, %14 : vector<32x32xf32>
    %cst_187 = arith.constant dense<0xFF800000> : vector<32xf32>
    %620 = vector.multi_reduction <maximumf>, %619, %cst_187 [1] : vector<32x32xf32> to vector<32xf32>
    %621 = vector.shape_cast %620 : vector<32xf32> to vector<32x1xf32>
    %622 = vector.broadcast %621 : vector<32x1xf32> to vector<32x32xf32>
    %623 = arith.subf %619, %622 : vector<32x32xf32>
    %624 = math.exp %623 : vector<32x32xf32>
    %cst_188 = arith.constant dense<0.000000e+00> : vector<32xf32>
    %625 = vector.multi_reduction <add>, %624, %cst_188 [1] : vector<32x32xf32> to vector<32xf32>
    %626 = vector.shape_cast %625 : vector<32xf32> to vector<32x1xf32>
    %627 = tpu.reciprocal %626 {approx = true} : vector<32x1xf32> -> vector<32x1xf32>
    %628 = vector.broadcast %627 : vector<32x1xf32> to vector<32x32xf32>
    %629 = arith.mulf %624, %628 : vector<32x32xf32>
    %cst_189 = arith.constant dense<0.000000e+00> : vector<32x8xf32>
    %630 = tpu.matmul %629, %615, %cst_189 {dimension_numbers = #tpu.dot_dimension_numbers<[1], [0], [0], [1], [0, 0, 1, 1], [], []>} : vector<32x32xf32>, vector<32x8xf32>, vector<32x8xf32> -> vector<32x8xf32>
    %631 = tpu.concatenate %504, %522, %540, %558, %576, %594, %612, %630 in 1 : vector<32x8xf32>, vector<32x8xf32>, vector<32x8xf32>, vector<32x8xf32>, vector<32x8xf32>, vector<32x8xf32>, vector<32x8xf32>, vector<32x8xf32> -> vector<32x64xf32>
    %cst_190 = arith.constant dense<0.000000e+00> : vector<32x64xf32>
    %632 = tpu.matmul %631, %482, %cst_190 {dimension_numbers = #tpu.dot_dimension_numbers<[1], [0], [0], [1], [0, 0, 1, 1], [], []>} : vector<32x64xf32>, vector<64x64xf32>, vector<32x64xf32> -> vector<32x64xf32>
    %633 = vector.broadcast %483 : vector<1x64xf32> to vector<32x64xf32>
    %634 = arith.addf %632, %633 : vector<32x64xf32>
    %635 = vector.extract_strided_slice %634 {offsets = [0, 0], sizes = [16, 64], strides = [1, 1]} : vector<32x64xf32> to vector<16x64xf32>
    %636 = vector.extract_strided_slice %634 {offsets = [16, 0], sizes = [16, 64], strides = [1, 1]} : vector<32x64xf32> to vector<16x64xf32>
    %637 = tpu.concatenate %635, %636 in 1 : vector<16x64xf32>, vector<16x64xf32> -> vector<16x128xf32>
    %c0_191 = arith.constant 0 : index
    %c0_192 = arith.constant 0 : index
    %638 = vector.load %arg3[%c0_191, %c0_192] : memref<16x128xf32, #tpu.memory_space<vmem>>, vector<16x128xf32>
    tpu.vector_store %arg3[%c0_191, %c0_192], %637 {strides = array<i32>} : memref<16x128xf32, #tpu.memory_space<vmem>>, vector<16x128xf32>,
    return
  }
}

</mosaic_0001>

<bundles_post_ra>
// kernel: text_encoder_forward.1
= control target key start
LH: loop header
LB: loop body
LE: loop exit
PB: predicated region body
PF: predicated region fallthrough
CT: control target
= control target key end

     0   :  { %vm51_vm0 = vcmask 261120   ;;  %vm161_vm1 = vcmask 31744   ;;  %v30_v33 = vlaneseq  ;;  %v14235_v35 = vmov -1e+30   ;;  %s16650_s10 = smov 16   ;;  %s14237_s11 = smov 64   ;;  %s16644_s2 = inlined_call_operand.vmem [shape: f32[384,192], index: 2, kind: input, shape index: {}]   ;;  %s16645_s0 = inlined_call_operand.vmem [shape: f32[32,32], index: 0, kind: input, shape index: {}]   ;;  %s16646_s1 = inlined_call_operand.vmem [shape: f32[32,32], index: 1, kind: input, shape index: {}]   ;;  %s16647_s3 = inlined_call_operand.vmem [shape: f32[16,128], index: 3, kind: output, shape index: {}]  }
   0x1   :  { %v41_v0 = vld [vmem:[%s16644_s2] sm:$0xff]  ;;  %v42_v1 = vld [vmem:[%s16644_s2 + $0x10] sm:$0xff]  ;;  %v15_v9 = vld [vmem:[%s16645_s0 + $0x8] sm:$0xff]  ;;  %vm34_vm4 = vcmask 130048   ;;  %s14238_s12 = smov 92   ;;  %s14239_s13 = smov 124  }
   0x2   :  { %v43_v2 = vld [vmem:[%s16644_s2 + $0x20] sm:$0xff]  ;;  %v12339_v3 = vpack.c.bf16 %v42_v1, %v41_v0  ;;  %v44_v4 = vld [vmem:[%s16644_s2 + $0x30] sm:$0xff]  ;;  %v19_v11 = vmul.f32 5.656854, %v15_v9  ;;  %v23_v13 = vld [vmem:[%s16646_s1 + $0x8] sm:$0xff]  ;;  %v31_v34 = vand.u32 127, %v30_v33 }
   0x3   :  { %v14_v5 = vld [vmem:[%s16645_s0] sm:$0xff]  ;;  %v12343_v7 = vpack.c.bf16 %v44_v4, %v43_v2  ;;  %v16_v10 = vld [vmem:[%s16645_s0 + $0x10] sm:$0xff]  ;;  %v17_v15 = vld [vmem:[%s16645_s0 + $0x18] sm:$0xff]  ;;  %s14240_s14 = smov 60   ;;  %s14241_s15 = smov 88   ;;  %vm2486_vm5 = vcmask 64512  }
   0x4   :  { %v22_v6 = vld [vmem:[%s16646_s1] sm:$0xff]  ;;  %v18_v8 = vmul.f32 5.656854, %v14_v5  ;;  %12340 = vmatprep.subr.bf16.mxu1 %v12339_v3  ;;  %v20_v14 = vmul.f32 5.656854, %v16_v10  ;;  %v24_v16 = vld [vmem:[%s16646_s1 + $0x10] sm:$0xff]  ;;  %v27_v17 = vadd.f32 %v23_v13, %v19_v11  ;;  %vm14356_vm3 = vmpackc.low %vm161_vm1, %vm161_vm1 }
   0x5   :  { %12342 = vmatpush3.bf16.msra.mxu1 %v12339_v3  ;;  %v21_v18 = vmul.f32 5.656854, %v17_v15  ;;  %v25_v20 = vld [vmem:[%s16646_s1 + $0x18] sm:$0xff]  ;;  %v45_v22 = vld [vmem:[%s16644_s2 + $0x40] ss:$0 sm:$0xff]  ;;  %s14234_s1 = smov 96   ;;  %vm16069_vm11 = vmpackc.low %vm2486_vm5, %vm2486_vm5 }
   0x6   :  { %v26_v12 = vadd.f32 %v22_v6, %v18_v8  ;;  %12344 = vmatprep.subr.bf16.mxu1 %v12343_v7  ;;  %v28_v19 = vadd.f32 %v24_v16, %v20_v14  ;;  %vm32_vm2 = vcmp.lt.s32.totalorder %v31_v34, 9  ;;  %s14242_s16 = smov 120   ;;  %s14243_s17 = smov 56   ;;  %vm2491_vm6 = vcmask 97280  }
   0x7   :  { %v29_v21 = vadd.f32 %v25_v20, %v21_v18  ;;  %v33_v36 = vsel %vm32_vm2, 0.0, %v14235_v35  ;;  %s14244_s18 = smov 84   ;;  %s14245_s19 = smov 116   ;;  %vm2500_vm7 = vcmask 162816   ;;  %vm2505_vm8 = vcmask 195584  }
   0x8   :  { %11345 = vmatprep.mubr.msk.f32.mxu1 %vm51_vm0, %v26_v12  ;;  %37 = vrot.lane.b32.xlu1 %v33_v36, %s16650_s10  ;;  %v14375_v46 = vsel %vm34_vm4, %v33_v36, -1e+30  ;;  %s14246_s20 = smov 52   ;;  %s16680_s21 = smov 80   ;;  %vm2510_vm9 = vcmask 228352   ;;  %vm7778_vm10 = vcmask 523264  }
   0x9   :  { %12346 = vmatpush3.bf16.msra.mxu1 %v12343_v7  ;;  %s16678_s22 = smov 112   ;;  %s16676_s23 = smov 48   ;;  %vm10220_vm12 = vcmask 326656   ;;  %vm10225_vm13 = vcmask 392192   ;;  %vm10230_vm14 = vcmask 457728  }
   0xa   :  { %s16674_s24 = smov 76   ;;  %s16672_s25 = smov 108  }
   0xb   :  { %s16670_s26 = smov 44   ;;  %s16668_s27 = smov 72  }
   0xc   :  { %11346 = vmatmul.mubr.msk.f32.vlgmr.msra.gmra.mrb[0].mxu1 %vm51_vm0, %v27_v17  ;;  %s16666_s28 = smov 104   ;;  %s16664_s29 = smov 40  }
   0xd   :  { %11348 = vmatprep.mubr.msk.f32.mxu1 %vm51_vm0, %v28_v19  ;;  %s16662_s30 = smov 68   ;;  %s16660_s4 = smov 100  }
   0xe   :  { %s16658_s5 = smov 36   ;;  %s16656_s6 = smov 4  }
   0xf   :  { %s16654_s7 = smov 8   ;;  %s16652_s8 = smov 12  }
  0x10   :  { %11349 = vmatmul.mubr.msk.f32.gmra.mrb[2].mxu1 %vm51_vm0, %v29_v21  ;;  %s16648_s0 = smov 20   ;;  %s14263_s9 = smov 24  }
  0x7a   :  { %v38_v50 = vpop.permute.xlu1 %37 }
  0x7b   :  { %v14379_v54 = vsel %vm34_vm4, -1e+30, %v38_v50 }
  0xdf   :  { %v11347_v23 = vpop.f32.mrb[0].mxu1 }
  0xe0   :  { %v14330_v24 = vadd.f32 %v11347_v23, %v45_v22  ;;  %v130_v25 = vpop.f32.mrb[1].mxu1 }
  0xe1   :  { %v14332_v26 = vadd.f32 %v130_v25, %v45_v22 }
  0xe3   :  { %11359 = vmatprep.mubr.msk.f32.mxu1 %vm161_vm1, %v14332_v26  ;;  %v14338_v27 = vpack.i.bf16 %v14330_v24, %v14332_v26  ;;  %v11350_v28 = vpop.f32.mrb[2].mxu1 }
  0xe4   :  { %v14340_v29 = vadd.f32 %v11350_v28, %v45_v22  ;;  %v140_v30 = vpop.f32.mrb[3].mxu1 }
  0xe5   :  { %13093 = vrot.lane.b32.xlu0 %v14338_v27, %s14234_s1  ;;  %v14344_v31 = vadd.f32 %v140_v30, %v45_v22 }
  0xe7   :  { %v14348_v32 = vpack.i.bf16 %v14340_v29, %v14344_v31 }
  0xe9   :  { %13098 = vrot.lane.b32.xlu0 %v14348_v32, %s14234_s1 }
 0x157   :  { %v13094_v37 = vpop.permute.xlu0 %13093 }
 0x158   :  { %v13096_v38 = vunpack.i.h.bf16 %v13094_v37  ;;  %v13095_v39 = vunpack.i.l.bf16 %v13094_v37 }
 0x15a   :  { %v12347_v41 = vpack.c.bf16 %v13096_v38, %v13095_v39 }
 0x15b   :  { %v13099_v42 = vpop.permute.xlu0 %13098 }
 0x15c   :  { %12349 = vmatprep.subr.msk.bf16.mxu1 %vm14356_vm3, %v12347_v41  ;;  %v13101_v43 = vunpack.i.h.bf16 %v13099_v42  ;;  %v13100_v44 = vunpack.i.l.bf16 %v13099_v42 }
 0x15d   :  { %12352 = vmatpush3.bf16.xpose.msk.msra.mxu1 %vm14356_vm3, %v12347_v41 }
 0x15e   :  { %v12353_v45 = vpack.c.bf16 %v13101_v43, %v13100_v44 }
 0x160   :  { %12355 = vmatprep.subr.msk.bf16.mxu1 %vm14356_vm3, %v12353_v45 }
 0x165   :  { %12358 = vmatpush3.bf16.xpose.msk.msra.mxu1 %vm14356_vm3, %v12353_v45 }
 0x16c   :  { %11360 = vmatmul.mubr.msk.f32.vlgmr.msra.gmra.mrb[4].mxu1 %vm161_vm1, %v14330_v24 }
 0x16d   :  { %11362 = vmatprep.mubr.msk.f32.mxu1 %vm161_vm1, %v14344_v31 }
 0x170   :  { %11363 = vmatmul.mubr.msk.f32.gmra.mrb[6].mxu1 %vm161_vm1, %v14340_v29 }
 0x23f   :  { %v11361_v47 = vpop.f32.mrb[4].mxu1 }
 0x240   :  { %v264_v48 = vmul.f32 0.5, %v11361_v47  ;;  %v244_v49 = vpop.f32.mrb[5].mxu1 }
 0x241   :  { %v263_v51 = vmul.f32 0.5, %v244_v49 }
 0x242   :  { %v268_v52 = vadd.f32 %v264_v48, %v14375_v46 }
 0x243   :  { %v11364_v53 = vpop.f32.mrb[6].mxu1  ;;  %v267_v55 = vadd.f32 %v263_v51, %v14375_v46 }
 0x244   :  { %v266_v56 = vmul.f32 0.5, %v11364_v53  ;;  %v254_v57 = vpop.f32.mrb[7].mxu1  ;;  %v274_v58 = vsel %vm51_vm0, %v268_v52, -inf }
 0x245   :  { %v265_v59 = vmul.f32 0.5, %v254_v57  ;;  %275 = vmax.xlane.f32.xlu0 %v274_v58  ;;  %v271_v60 = vsel %vm51_vm0, %v267_v55, -inf }
 0x246   :  { %272 = vmax.xlane.f32.xlu1 %v271_v60  ;;  %v270_v61 = vadd.f32 %v266_v56, %v14379_v54 }
 0x247   :  { %v269_v62 = vadd.f32 %v265_v59, %v14379_v54 }
 0x248   :  { %v280_v63 = vsel %vm51_vm0, %v270_v61, -inf }
 0x249   :  { %v277_v0 = vsel %vm51_vm0, %v269_v62, -inf }
 0x24a   :  { %281 = vmax.xlane.f32.xlu1 %v280_v63  ;;  %278 = vmax.xlane.f32.xlu0 %v277_v0 }
 0x25b   :  { %13108 = vrot.lane.b32.xlu1 %v14348_v32, %s14237_s11 }
 0x260   :  { %13103 = vrot.lane.b32.xlu0 %v14338_v27, %s14237_s11 }
 0x2d2   :  { %v276_v1 = vpop.xlane.xlu0 %275 }
 0x2d3   :  { %v284_v2 = vsub.f32 %v268_v52, %v276_v1  ;;  %v273_v3 = vpop.xlane.xlu1 %272 }
 0x2d4   :  { %v283_v4 = vsub.f32 %v267_v55, %v273_v3 }
 0x2d5   :  { %v289_v5 = vmul.f32 1.442695, %v284_v2 }
 0x2d6   :  { %v287_v6 = vmul.f32 1.442695, %v283_v4 }
 0x2d7   :  { %13722 = vpow2.f32 %v289_v5  ;;  %v282_v7 = vpop.xlane.xlu1 %281  ;;  %v279_v8 = vpop.xlane.xlu0 %278 }
 0x2d8   :  { %13724 = vpow2.f32 %v287_v6  ;;  %v285_v9 = vsub.f32 %v269_v62, %v279_v8  ;;  %v286_v28 = vsub.f32 %v270_v61, %v282_v7 }
 0x2da   :  { %v291_v10 = vmul.f32 1.442695, %v285_v9  ;;  %v293_v30 = vmul.f32 1.442695, %v286_v28 }
 0x2db   :  { %v13109_v11 = vpop.permute.xlu1 %13108  ;;  %v13104_v12 = vpop.permute.xlu0 %13103 }
 0x2dc   :  { %v13106_v13 = vunpack.i.h.bf16 %v13104_v12  ;;  %13726 = vpow2.f32 %v291_v10  ;;  %v13111_v14 = vunpack.i.h.bf16 %v13109_v11  ;;  %v13110_v15 = vunpack.i.l.bf16 %v13109_v11 }
 0x2dd   :  { %v13105_v16 = vunpack.i.l.bf16 %v13104_v12  ;;  %13728 = vpow2.f32 %v293_v30 }
 0x2de   :  { %v12363_v19 = vpack.c.bf16 %v13111_v14, %v13110_v15 }
 0x2df   :  { %v12359_v17 = vpack.c.bf16 %v13106_v13, %v13105_v16 }
 0x2e1   :  { %v13723_v18 = vpop.eup %13722  ;;  %12360 = vmatprep.subr.bf16.mxu0 %v12359_v17 }
 0x2e2   :  { %v13725_v20 = vpop.eup %13724  ;;  %12362 = vmatpush3.bf16.msra.mxu0 %v12359_v17  ;;  %v298_v21 = vsel %vm51_vm0, %v13723_v18, 0.0 }
 0x2e3   :  { %12364 = vmatprep.subr.bf16.mxu0 %v12363_v19  ;;  %299 = vadd.xlane.f32.xlu1 %v298_v21  ;;  %v295_v22 = vsel %vm51_vm0, %v13725_v20, 0.0 }
 0x2e4   :  { %296 = vadd.xlane.f32.xlu0 %v295_v22 }
 0x2e6   :  { %12366 = vmatpush3.bf16.msra.mxu0 %v12363_v19  ;;  %v13727_v23 = vpop.eup %13726 }
 0x2e7   :  { %v301_v25 = vsel %vm51_vm0, %v13727_v23, 0.0  ;;  %v13729_v34 = vpop.eup %13728 }
 0x2e8   :  { %302 = vadd.xlane.f32.xlu0 %v301_v25  ;;  %v304_v35 = vsel %vm51_vm0, %v13729_v34, 0.0 }
 0x2f4   :  { %13113 = vrot.lane.b32.xlu1 %v14338_v27, %s14238_s12 }
 0x2fe   :  { %13118 = vrot.lane.b32.xlu0 %v14348_v32, %s14238_s12 }
 0x302   :  { %426 = vrot.lane.b32.xlu0 %v14330_v24, %s14239_s13 }
 0x306   :  { %430 = vrot.lane.b32.xlu0 %v14340_v29, %s14239_s13 }
 0x318   :  { %305 = vadd.xlane.f32.xlu1 %v304_v35 }
 0x329   :  { %424 = vrot.lane.b32.xlu1 %v14332_v26, %s14239_s13 }
 0x32d   :  { %428 = vrot.lane.b32.xlu1 %v14344_v31, %s14239_s13 }
 0x370   :  { %v300_v36 = vpop.xlane.xlu1 %299 }
 0x371   :  { %13730 = vrcp.f32 %v300_v36  ;;  %v297_v37 = vpop.xlane.xlu0 %296 }
 0x372   :  { %13732 = vrcp.f32 %v297_v37 }
 0x374   :  { %v13114_v38 = vpop.permute.xlu1 %13113 }
 0x375   :  { %v13116_v39 = vunpack.i.h.bf16 %v13114_v38  ;;  %v13115_v41 = vunpack.i.l.bf16 %v13114_v38  ;;  %v303_v42 = vpop.xlane.xlu0 %302 }
 0x376   :  { %13734 = vrcp.f32 %v303_v42 }
 0x377   :  { %v12367_v43 = vpack.c.bf16 %v13116_v39, %v13115_v41 }
 0x379   :  { %12369 = vmatprep.subr.msk.bf16.mxu0 %vm14356_vm3, %v12367_v43  ;;  %v13119_v44 = vpop.permute.xlu0 %13118 }
 0x37a   :  { %v13121_v48 = vunpack.i.h.bf16 %v13119_v44  ;;  %v13120_v49 = vunpack.i.l.bf16 %v13119_v44 }
 0x37b   :  { %v13731_v45 = vpop.eup %13730 }
 0x37c   :  { %v13733_v47 = vpop.eup %13732  ;;  %v312_v51 = vmul.f32 %v13731_v45, %v13723_v18  ;;  %v12373_v52 = vpack.c.bf16 %v13121_v48, %v13120_v49 }
 0x37d   :  { %v311_v50 = vmul.f32 %v13733_v47, %v13725_v20  ;;  %v427_v60 = vpop.permute.xlu0 %426 }
 0x37f   :  { %11373 = vmatprep.mubr.msk.f32.mxu0 %vm51_vm0, %v311_v50 }
 0x380   :  { %11374 = vmatmul.mubr.msk.f32.vlgmr.msra.gmra.mrb[0].mxu0 %vm51_vm0, %v312_v51  ;;  %v13735_v53 = vpop.eup %13734 }
 0x381   :  { %12372 = vmatpush3.bf16.xpose.msk.msra.mxu0 %vm14356_vm3, %v12367_v43  ;;  %v313_v55 = vmul.f32 %v13735_v53, %v13727_v23  ;;  %v431_v62 = vpop.permute.xlu0 %430 }
 0x382   :  { %12375 = vmatprep.subr.msk.bf16.mxu0 %vm14356_vm3, %v12373_v52 }
 0x383   :  { %11376 = vmatprep.mubr.msk.f32.mxu0 %vm51_vm0, %v313_v55 }
 0x389   :  { %12378 = vmatpush3.bf16.xpose.msk.msra.mxu0 %vm14356_vm3, %v12373_v52 }
 0x3a5   :  { %v306_v56 = vpop.xlane.xlu1 %305 }
 0x3a6   :  { %13736 = vrcp.f32 %v306_v56 }
 0x3a9   :  { %v425_v58 = vpop.permute.xlu1 %424 }
 0x3ad   :  { %v429_v61 = vpop.permute.xlu1 %428 }
 0x3b0   :  { %v13737_v57 = vpop.eup %13736 }
 0x3b1   :  { %v314_v59 = vmul.f32 %v13737_v57, %v13729_v34 }
 0x3b3   :  { %11377 = vmatmul.mubr.msk.f32.gmra.mrb[2].mxu0 %vm51_vm0, %v314_v59 }
 0x3b4   :  { %11387 = vmatprep.mubr.msk.f32.mxu0 %vm161_vm1, %v425_v58 }
 0x3b7   :  { %11388 = vmatmul.mubr.msk.f32.vlgmr.msra.gmra.mrb[4].mxu0 %vm161_vm1, %v427_v60 }
 0x3b8   :  { %11390 = vmatprep.mubr.msk.f32.mxu0 %vm161_vm1, %v429_v61 }
 0x3bb   :  { %11391 = vmatmul.mubr.msk.f32.gmra.mrb[6].mxu0 %vm161_vm1, %v431_v62 }
 0x453   :  { %v14424_v63 = vpop.f32.mrb[0].mxu0 }
 0x454   :  { %v14426_v0 = vpop.f32.mrb[1].mxu0 }
 0x486   :  { %v14428_v1 = vpop.f32.mrb[2].mxu0 }
 0x487   :  { %v14430_v2 = vpop.f32.mrb[3].mxu0 }
 0x48a   :  { %v11389_v3 = vpop.f32.mrb[4].mxu0 }
 0x48b   :  { %v542_v4 = vmul.f32 0.5, %v11389_v3  ;;  %v522_v5 = vpop.f32.mrb[5].mxu0 }
 0x48c   :  { %v541_v6 = vmul.f32 0.5, %v522_v5 }
 0x48d   :  { %v546_v7 = vadd.f32 %v542_v4, %v14375_v46 }
 0x48e   :  { %v11392_v8 = vpop.f32.mrb[6].mxu0  ;;  %v545_v9 = vadd.f32 %v541_v6, %v14375_v46 }
 0x48f   :  { %v544_v10 = vmul.f32 0.5, %v11392_v8  ;;  %v532_v11 = vpop.f32.mrb[7].mxu0  ;;  %v552_v12 = vsel %vm51_vm0, %v546_v7, -inf }
 0x490   :  { %v543_v13 = vmul.f32 0.5, %v532_v11  ;;  %553 = vmax.xlane.f32.xlu0 %v552_v12  ;;  %v549_v14 = vsel %vm51_vm0, %v545_v9, -inf }
 0x491   :  { %550 = vmax.xlane.f32.xlu1 %v549_v14  ;;  %v548_v15 = vadd.f32 %v544_v10, %v14379_v54 }
 0x492   :  { %v547_v16 = vadd.f32 %v543_v13, %v14379_v54 }
 0x493   :  { %v558_v17 = vsel %vm51_vm0, %v548_v15, -inf }
 0x494   :  { %v555_v18 = vsel %vm51_vm0, %v547_v16, -inf }
 0x495   :  { %559 = vmax.xlane.f32.xlu1 %v558_v17  ;;  %556 = vmax.xlane.f32.xlu0 %v555_v18 }
 0x4a6   :  { %13128 = vrot.lane.b32.xlu1 %v14348_v32, %s14240_s14 }
 0x4ab   :  { %13123 = vrot.lane.b32.xlu0 %v14338_v27, %s14240_s14 }
 0x51d   :  { %v554_v19 = vpop.xlane.xlu0 %553 }
 0x51e   :  { %v562_v20 = vsub.f32 %v546_v7, %v554_v19  ;;  %v551_v21 = vpop.xlane.xlu1 %550 }
 0x51f   :  { %v561_v22 = vsub.f32 %v545_v9, %v551_v21 }
 0x520   :  { %v567_v23 = vmul.f32 1.442695, %v562_v20 }
 0x521   :  { %v565_v25 = vmul.f32 1.442695, %v561_v22 }
 0x522   :  { %13738 = vpow2.f32 %v567_v23  ;;  %v560_v28 = vpop.xlane.xlu1 %559  ;;  %v557_v30 = vpop.xlane.xlu0 %556 }
 0x523   :  { %13740 = vpow2.f32 %v565_v25  ;;  %v563_v34 = vsub.f32 %v547_v16, %v557_v30  ;;  %v564_v52 = vsub.f32 %v548_v15, %v560_v28 }
 0x525   :  { %v569_v35 = vmul.f32 1.442695, %v563_v34  ;;  %v571_v53 = vmul.f32 1.442695, %v564_v52 }
 0x526   :  { %v13129_v36 = vpop.permute.xlu1 %13128  ;;  %v13124_v37 = vpop.permute.xlu0 %13123 }
 0x527   :  { %v13126_v38 = vunpack.i.h.bf16 %v13124_v37  ;;  %13742 = vpow2.f32 %v569_v35  ;;  %v13131_v39 = vunpack.i.h.bf16 %v13129_v36  ;;  %v13130_v41 = vunpack.i.l.bf16 %v13129_v36 }
 0x528   :  { %v13125_v42 = vunpack.i.l.bf16 %v13124_v37  ;;  %13744 = vpow2.f32 %v571_v53 }
 0x529   :  { %v12383_v45 = vpack.c.bf16 %v13131_v39, %v13130_v41 }
 0x52a   :  { %v12379_v43 = vpack.c.bf16 %v13126_v38, %v13125_v42 }
 0x52c   :  { %v13739_v44 = vpop.eup %13738  ;;  %12380 = vmatprep.subr.bf16.mxu1 %v12379_v43 }
 0x52d   :  { %v13741_v47 = vpop.eup %13740  ;;  %12382 = vmatpush3.bf16.msra.mxu1 %v12379_v43  ;;  %v576_v48 = vsel %vm51_vm0, %v13739_v44, 0.0 }
 0x52e   :  { %12384 = vmatprep.subr.bf16.mxu1 %v12383_v45  ;;  %577 = vadd.xlane.f32.xlu1 %v576_v48  ;;  %v573_v49 = vsel %vm51_vm0, %v13741_v47, 0.0 }
 0x52f   :  { %574 = vadd.xlane.f32.xlu0 %v573_v49 }
 0x531   :  { %12386 = vmatpush3.bf16.msra.mxu1 %v12383_v45  ;;  %v13743_v50 = vpop.eup %13742 }
 0x532   :  { %v579_v51 = vsel %vm51_vm0, %v13743_v50, 0.0  ;;  %v13745_v55 = vpop.eup %13744 }
 0x533   :  { %580 = vadd.xlane.f32.xlu0 %v579_v51  ;;  %v582_v56 = vsel %vm51_vm0, %v13745_v55, 0.0 }
 0x53f   :  { %13133 = vrot.lane.b32.xlu1 %v14338_v27, %s14241_s15 }
 0x549   :  { %13138 = vrot.lane.b32.xlu0 %v14348_v32, %s14241_s15 }
 0x54d   :  { %704 = vrot.lane.b32.xlu0 %v14330_v24, %s14242_s16 }
 0x551   :  { %708 = vrot.lane.b32.xlu0 %v14340_v29, %s14242_s16 }
 0x563   :  { %583 = vadd.xlane.f32.xlu1 %v582_v56 }
 0x574   :  { %702 = vrot.lane.b32.xlu1 %v14332_v26, %s14242_s16 }
 0x578   :  { %706 = vrot.lane.b32.xlu1 %v14344_v31, %s14242_s16 }
 0x5bb   :  { %v578_v57 = vpop.xlane.xlu1 %577 }
 0x5bc   :  { %13746 = vrcp.f32 %v578_v57  ;;  %v575_v58 = vpop.xlane.xlu0 %574 }
 0x5bd   :  { %13748 = vrcp.f32 %v575_v58 }
 0x5bf   :  { %v13134_v59 = vpop.permute.xlu1 %13133 }
 0x5c0   :  { %v13136_v60 = vunpack.i.h.bf16 %v13134_v59  ;;  %v13135_v61 = vunpack.i.l.bf16 %v13134_v59  ;;  %v581_v62 = vpop.xlane.xlu0 %580 }
 0x5c1   :  { %13750 = vrcp.f32 %v581_v62 }
 0x5c2   :  { %v12387_v3 = vpack.c.bf16 %v13136_v60, %v13135_v61 }
 0x5c4   :  { %12389 = vmatprep.subr.msk.bf16.mxu1 %vm14356_vm3, %v12387_v3  ;;  %v13139_v4 = vpop.permute.xlu0 %13138 }
 0x5c5   :  { %v13141_v7 = vunpack.i.h.bf16 %v13139_v4  ;;  %v13140_v8 = vunpack.i.l.bf16 %v13139_v4 }
 0x5c6   :  { %v13747_v5 = vpop.eup %13746 }
 0x5c7   :  { %v13749_v6 = vpop.eup %13748  ;;  %v590_v10 = vmul.f32 %v13747_v5, %v13739_v44  ;;  %v12393_v11 = vpack.c.bf16 %v13141_v7, %v13140_v8 }
 0x5c8   :  { %v589_v9 = vmul.f32 %v13749_v6, %v13741_v47  ;;  %v705_v18 = vpop.permute.xlu0 %704 }
 0x5ca   :  { %11401 = vmatprep.mubr.msk.f32.mxu1 %vm51_vm0, %v589_v9 }
 0x5cb   :  { %11402 = vmatmul.mubr.msk.f32.vlgmr.msra.gmra.mrb[8].mxu1 %vm51_vm0, %v590_v10  ;;  %v13751_v12 = vpop.eup %13750 }
 0x5cc   :  { %12392 = vmatpush3.bf16.xpose.msk.msra.mxu1 %vm14356_vm3, %v12387_v3  ;;  %v591_v13 = vmul.f32 %v13751_v12, %v13743_v50  ;;  %v709_v20 = vpop.permute.xlu0 %708 }
 0x5cd   :  { %12395 = vmatprep.subr.msk.bf16.mxu1 %vm14356_vm3, %v12393_v11 }
 0x5ce   :  { %11404 = vmatprep.mubr.msk.f32.mxu1 %vm51_vm0, %v591_v13 }
 0x5d4   :  { %12398 = vmatpush3.bf16.xpose.msk.msra.mxu1 %vm14356_vm3, %v12393_v11 }
 0x5f0   :  { %v584_v14 = vpop.xlane.xlu1 %583 }
 0x5f1   :  { %13752 = vrcp.f32 %v584_v14 }
 0x5f4   :  { %v703_v16 = vpop.permute.xlu1 %702 }
 0x5f8   :  { %v707_v19 = vpop.permute.xlu1 %706 }
 0x5fb   :  { %v13753_v15 = vpop.eup %13752 }
 0x5fc   :  { %v592_v17 = vmul.f32 %v13753_v15, %v13745_v55 }
 0x5fe   :  { %11405 = vmatmul.mubr.msk.f32.gmra.mrb[10].mxu1 %vm51_vm0, %v592_v17 }
 0x5ff   :  { %11415 = vmatprep.mubr.msk.f32.mxu1 %vm161_vm1, %v703_v16 }
 0x602   :  { %11416 = vmatmul.mubr.msk.f32.vlgmr.msra.gmra.mrb[12].mxu1 %vm161_vm1, %v705_v18 }
 0x603   :  { %11418 = vmatprep.mubr.msk.f32.mxu1 %vm161_vm1, %v707_v19 }
 0x606   :  { %11419 = vmatmul.mubr.msk.f32.gmra.mrb[14].mxu1 %vm161_vm1, %v709_v20 }
 0x69e   :  { %v14476_v21 = vpop.f32.mrb[8].mxu1 }
 0x69f   :  { %v14478_v22 = vpop.f32.mrb[9].mxu1 }
 0x6d1   :  { %v14480_v23 = vpop.f32.mrb[10].mxu1 }
 0x6d2   :  { %v14482_v25 = vpop.f32.mrb[11].mxu1 }
 0x6d5   :  { %v11417_v28 = vpop.f32.mrb[12].mxu1 }
 0x6d6   :  { %v820_v30 = vmul.f32 0.5, %v11417_v28  ;;  %v800_v34 = vpop.f32.mrb[13].mxu1 }
 0x6d7   :  { %v819_v35 = vmul.f32 0.5, %v800_v34 }
 0x6d8   :  { %v824_v36 = vadd.f32 %v820_v30, %v14375_v46 }
 0x6d9   :  { %v11420_v37 = vpop.f32.mrb[14].mxu1  ;;  %v823_v38 = vadd.f32 %v819_v35, %v14375_v46 }
 0x6da   :  { %v822_v39 = vmul.f32 0.5, %v11420_v37  ;;  %v810_v41 = vpop.f32.mrb[15].mxu1  ;;  %v830_v42 = vsel %vm51_vm0, %v824_v36, -inf }
 0x6db   :  { %v821_v43 = vmul.f32 0.5, %v810_v41  ;;  %831 = vmax.xlane.f32.xlu0 %v830_v42  ;;  %v827_v44 = vsel %vm51_vm0, %v823_v38, -inf }
 0x6dc   :  { %828 = vmax.xlane.f32.xlu1 %v827_v44  ;;  %v826_v45 = vadd.f32 %v822_v39, %v14379_v54 }
 0x6dd   :  { %v825_v47 = vadd.f32 %v821_v43, %v14379_v54 }
 0x6de   :  { %v836_v48 = vsel %vm51_vm0, %v826_v45, -inf }
 0x6df   :  { %v833_v49 = vsel %vm51_vm0, %v825_v47, -inf }
 0x6e0   :  { %837 = vmax.xlane.f32.xlu1 %v836_v48  ;;  %834 = vmax.xlane.f32.xlu0 %v833_v49 }
 0x6f1   :  { %13148 = vrot.lane.b32.xlu1 %v14348_v32, %s14243_s17 }
 0x6f6   :  { %13143 = vrot.lane.b32.xlu0 %v14338_v27, %s14243_s17 }
 0x768   :  { %v832_v50 = vpop.xlane.xlu0 %831 }
 0x769   :  { %v840_v51 = vsub.f32 %v824_v36, %v832_v50  ;;  %v829_v52 = vpop.xlane.xlu1 %828 }
 0x76a   :  { %v839_v53 = vsub.f32 %v823_v38, %v829_v52 }
 0x76b   :  { %v845_v55 = vmul.f32 1.442695, %v840_v51 }
 0x76c   :  { %v843_v56 = vmul.f32 1.442695, %v839_v53 }
 0x76d   :  { %13754 = vpow2.f32 %v845_v55  ;;  %v838_v57 = vpop.xlane.xlu1 %837  ;;  %v835_v58 = vpop.xlane.xlu0 %834 }
 0x76e   :  { %13756 = vpow2.f32 %v843_v56  ;;  %v841_v59 = vsub.f32 %v825_v47, %v835_v58  ;;  %v842_v15 = vsub.f32 %v826_v45, %v838_v57 }
 0x770   :  { %v847_v60 = vmul.f32 1.442695, %v841_v59  ;;  %v849_v16 = vmul.f32 1.442695, %v842_v15 }
 0x771   :  { %v13149_v61 = vpop.permute.xlu1 %13148  ;;  %v13144_v62 = vpop.permute.xlu0 %13143 }
 0x772   :  { %v13146_v3 = vunpack.i.h.bf16 %v13144_v62  ;;  %13758 = vpow2.f32 %v847_v60  ;;  %v13151_v4 = vunpack.i.h.bf16 %v13149_v61  ;;  %v13150_v5 = vunpack.i.l.bf16 %v13149_v61 }
 0x773   :  { %v13145_v6 = vunpack.i.l.bf16 %v13144_v62  ;;  %13760 = vpow2.f32 %v849_v16 }
 0x774   :  { %v12403_v9 = vpack.c.bf16 %v13151_v4, %v13150_v5 }
 0x775   :  { %v12399_v7 = vpack.c.bf16 %v13146_v3, %v13145_v6 }
 0x777   :  { %v13755_v8 = vpop.eup %13754  ;;  %12400 = vmatprep.subr.bf16.mxu0 %v12399_v7 }
 0x778   :  { %v13757_v10 = vpop.eup %13756  ;;  %12402 = vmatpush3.bf16.msra.mxu0 %v12399_v7  ;;  %v854_v11 = vsel %vm51_vm0, %v13755_v8, 0.0 }
 0x779   :  { %12404 = vmatprep.subr.bf16.mxu0 %v12403_v9  ;;  %855 = vadd.xlane.f32.xlu1 %v854_v11  ;;  %v851_v12 = vsel %vm51_vm0, %v13757_v10, 0.0 }
 0x77a   :  { %852 = vadd.xlane.f32.xlu0 %v851_v12 }
 0x77c   :  { %12406 = vmatpush3.bf16.msra.mxu0 %v12403_v9  ;;  %v13759_v13 = vpop.eup %13758 }
 0x77d   :  { %v857_v14 = vsel %vm51_vm0, %v13759_v13, 0.0  ;;  %v13761_v17 = vpop.eup %13760 }
 0x77e   :  { %858 = vadd.xlane.f32.xlu0 %v857_v14  ;;  %v860_v18 = vsel %vm51_vm0, %v13761_v17, 0.0 }
 0x78a   :  { %13153 = vrot.lane.b32.xlu1 %v14338_v27, %s14244_s18 }
 0x794   :  { %13158 = vrot.lane.b32.xlu0 %v14348_v32, %s14244_s18 }
 0x798   :  { %982 = vrot.lane.b32.xlu0 %v14330_v24, %s14245_s19 }
 0x79c   :  { %986 = vrot.lane.b32.xlu0 %v14340_v29, %s14245_s19 }
 0x7ae   :  { %861 = vadd.xlane.f32.xlu1 %v860_v18 }
 0x7bf   :  { %980 = vrot.lane.b32.xlu1 %v14332_v26, %s14245_s19 }
 0x7c3   :  { %984 = vrot.lane.b32.xlu1 %v14344_v31, %s14245_s19 }
 0x806   :  { %v856_v19 = vpop.xlane.xlu1 %855 }
 0x807   :  { %13762 = vrcp.f32 %v856_v19  ;;  %v853_v20 = vpop.xlane.xlu0 %852 }
 0x808   :  { %13764 = vrcp.f32 %v853_v20 }
 0x80a   :  { %v13154_v28 = vpop.permute.xlu1 %13153 }
 0x80b   :  { %v13156_v30 = vunpack.i.h.bf16 %v13154_v28  ;;  %v13155_v34 = vunpack.i.l.bf16 %v13154_v28  ;;  %v859_v35 = vpop.xlane.xlu0 %858 }
 0x80c   :  { %13766 = vrcp.f32 %v859_v35 }
 0x80d   :  { %v12407_v36 = vpack.c.bf16 %v13156_v30, %v13155_v34 }
 0x80f   :  { %12409 = vmatprep.subr.msk.bf16.mxu0 %vm14356_vm3, %v12407_v36  ;;  %v13159_v37 = vpop.permute.xlu0 %13158 }
 0x810   :  { %v13161_v41 = vunpack.i.h.bf16 %v13159_v37  ;;  %v13160_v42 = vunpack.i.l.bf16 %v13159_v37 }
 0x811   :  { %v13763_v38 = vpop.eup %13762 }
 0x812   :  { %v13765_v39 = vpop.eup %13764  ;;  %v868_v44 = vmul.f32 %v13763_v38, %v13755_v8  ;;  %v12413_v45 = vpack.c.bf16 %v13161_v41, %v13160_v42 }
 0x813   :  { %v867_v43 = vmul.f32 %v13765_v39, %v13757_v10  ;;  %v983_v53 = vpop.permute.xlu0 %982 }
 0x815   :  { %11429 = vmatprep.mubr.msk.f32.mxu0 %vm51_vm0, %v867_v43 }
 0x816   :  { %11430 = vmatmul.mubr.msk.f32.vlgmr.msra.gmra.mrb[8].mxu0 %vm51_vm0, %v868_v44  ;;  %v13767_v47 = vpop.eup %13766 }
 0x817   :  { %12412 = vmatpush3.bf16.xpose.msk.msra.mxu0 %vm14356_vm3, %v12407_v36  ;;  %v869_v48 = vmul.f32 %v13767_v47, %v13759_v13  ;;  %v987_v56 = vpop.permute.xlu0 %986 }
 0x818   :  { %12415 = vmatprep.subr.msk.bf16.mxu0 %vm14356_vm3, %v12413_v45 }
 0x819   :  { %11432 = vmatprep.mubr.msk.f32.mxu0 %vm51_vm0, %v869_v48 }
 0x81f   :  { %12418 = vmatpush3.bf16.xpose.msk.msra.mxu0 %vm14356_vm3, %v12413_v45 }
 0x83b   :  { %v862_v49 = vpop.xlane.xlu1 %861 }
 0x83c   :  { %13768 = vrcp.f32 %v862_v49 }
 0x83f   :  { %v981_v51 = vpop.permute.xlu1 %980 }
 0x843   :  { %v985_v55 = vpop.permute.xlu1 %984 }
 0x846   :  { %v13769_v50 = vpop.eup %13768 }
 0x847   :  { %v870_v52 = vmul.f32 %v13769_v50, %v13761_v17 }
 0x849   :  { %11433 = vmatmul.mubr.msk.f32.gmra.mrb[10].mxu0 %vm51_vm0, %v870_v52 }
 0x84a   :  { %11443 = vmatprep.mubr.msk.f32.mxu0 %vm161_vm1, %v981_v51 }
 0x84d   :  { %11444 = vmatmul.mubr.msk.f32.vlgmr.msra.gmra.mrb[12].mxu0 %vm161_vm1, %v983_v53 }
 0x84e   :  { %11446 = vmatprep.mubr.msk.f32.mxu0 %vm161_vm1, %v985_v55 }
 0x851   :  { %11447 = vmatmul.mubr.msk.f32.gmra.mrb[14].mxu0 %vm161_vm1, %v987_v56 }
 0x8e9   :  { %v14528_v57 = vpop.f32.mrb[8].mxu0 }
 0x8ea   :  { %v14530_v58 = vpop.f32.mrb[9].mxu0 }
 0x91c   :  { %v14532_v59 = vpop.f32.mrb[10].mxu0 }
 0x91d   :  { %v14534_v60 = vpop.f32.mrb[11].mxu0 }
 0x920   :  { %v11445_v61 = vpop.f32.mrb[12].mxu0 }
 0x921   :  { %v1098_v62 = vmul.f32 0.5, %v11445_v61  ;;  %v1078_v3 = vpop.f32.mrb[13].mxu0 }
 0x922   :  { %v1097_v4 = vmul.f32 0.5, %v1078_v3 }
 0x923   :  { %v1102_v5 = vadd.f32 %v1098_v62, %v14375_v46 }
 0x924   :  { %v11448_v6 = vpop.f32.mrb[14].mxu0  ;;  %v1101_v7 = vadd.f32 %v1097_v4, %v14375_v46 }
 0x925   :  { %v1100_v8 = vmul.f32 0.5, %v11448_v6  ;;  %v1088_v9 = vpop.f32.mrb[15].mxu0  ;;  %v1108_v10 = vsel %vm51_vm0, %v1102_v5, -inf }
 0x926   :  { %v1099_v11 = vmul.f32 0.5, %v1088_v9  ;;  %1109 = vmax.xlane.f32.xlu0 %v1108_v10  ;;  %v1105_v12 = vsel %vm51_vm0, %v1101_v7, -inf }
 0x927   :  { %1106 = vmax.xlane.f32.xlu1 %v1105_v12  ;;  %v1104_v13 = vadd.f32 %v1100_v8, %v14379_v54 }
 0x928   :  { %v1103_v14 = vadd.f32 %v1099_v11, %v14379_v54 }
 0x929   :  { %v1114_v15 = vsel %vm51_vm0, %v1104_v13, -inf }
 0x92a   :  { %v1111_v16 = vsel %vm51_vm0, %v1103_v14, -inf }
 0x92b   :  { %1115 = vmax.xlane.f32.xlu1 %v1114_v15  ;;  %1112 = vmax.xlane.f32.xlu0 %v1111_v16 }
 0x93c   :  { %13168 = vrot.lane.b32.xlu1 %v14348_v32, %s14246_s20 }
 0x941   :  { %13163 = vrot.lane.b32.xlu0 %v14338_v27, %s14246_s20 }
 0x9b3   :  { %v1110_v17 = vpop.xlane.xlu0 %1109 }
 0x9b4   :  { %v1118_v18 = vsub.f32 %v1102_v5, %v1110_v17  ;;  %v1107_v19 = vpop.xlane.xlu1 %1106 }
 0x9b5   :  { %v1117_v20 = vsub.f32 %v1101_v7, %v1107_v19 }
 0x9b6   :  { %v1123_v28 = vmul.f32 1.442695, %v1118_v18 }
 0x9b7   :  { %v1121_v30 = vmul.f32 1.442695, %v1117_v20 }
 0x9b8   :  { %13770 = vpow2.f32 %v1123_v28  ;;  %v1116_v34 = vpop.xlane.xlu1 %1115  ;;  %v1113_v35 = vpop.xlane.xlu0 %1112 }
 0x9b9   :  { %13772 = vpow2.f32 %v1121_v30  ;;  %v1119_v36 = vsub.f32 %v1103_v14, %v1113_v35  ;;  %v1120_v55 = vsub.f32 %v1104_v13, %v1116_v34 }
 0x9bb   :  { %v1125_v37 = vmul.f32 1.442695, %v1119_v36  ;;  %v1127_v56 = vmul.f32 1.442695, %v1120_v55 }
 0x9bc   :  { %v13169_v38 = vpop.permute.xlu1 %13168  ;;  %v13164_v39 = vpop.permute.xlu0 %13163 }
 0x9bd   :  { %v13166_v41 = vunpack.i.h.bf16 %v13164_v39  ;;  %13774 = vpow2.f32 %v1125_v37  ;;  %v13171_v42 = vunpack.i.h.bf16 %v13169_v38  ;;  %v13170_v43 = vunpack.i.l.bf16 %v13169_v38 }
 0x9be   :  { %v13165_v44 = vunpack.i.l.bf16 %v13164_v39  ;;  %13776 = vpow2.f32 %v1127_v56 }
 0x9bf   :  { %v12423_v48 = vpack.c.bf16 %v13171_v42, %v13170_v43 }
 0x9c0   :  { %v12419_v45 = vpack.c.bf16 %v13166_v41, %v13165_v44 }
 0x9c2   :  { %v13771_v47 = vpop.eup %13770  ;;  %12420 = vmatprep.subr.bf16.mxu1 %v12419_v45 }
 0x9c3   :  { %v13773_v49 = vpop.eup %13772  ;;  %12422 = vmatpush3.bf16.msra.mxu1 %v12419_v45  ;;  %v1132_v50 = vsel %vm51_vm0, %v13771_v47, 0.0 }
 0x9c4   :  { %12424 = vmatprep.subr.bf16.mxu1 %v12423_v48  ;;  %1133 = vadd.xlane.f32.xlu1 %v1132_v50  ;;  %v1129_v51 = vsel %vm51_vm0, %v13773_v49, 0.0 }
 0x9c5   :  { %1130 = vadd.xlane.f32.xlu0 %v1129_v51 }
 0x9c7   :  { %12426 = vmatpush3.bf16.msra.mxu1 %v12423_v48  ;;  %v13775_v52 = vpop.eup %13774 }
 0x9c8   :  { %v1135_v53 = vsel %vm51_vm0, %v13775_v52, 0.0  ;;  %v13777_v61 = vpop.eup %13776 }
 0x9c9   :  { %1136 = vadd.xlane.f32.xlu0 %v1135_v53  ;;  %v1138_v62 = vsel %vm51_vm0, %v13777_v61, 0.0 }
 0x9d5   :  { %13173 = vrot.lane.b32.xlu1 %v14338_v27, %s16680_s21 }
 0x9df   :  { %13178 = vrot.lane.b32.xlu0 %v14348_v32, %s16680_s21 }
 0x9e3   :  { %1260 = vrot.lane.b32.xlu0 %v14330_v24, %s16678_s22 }
 0x9e7   :  { %1264 = vrot.lane.b32.xlu0 %v14340_v29, %s16678_s22 }
 0x9f9   :  { %1139 = vadd.xlane.f32.xlu1 %v1138_v62 }
 0xa0a   :  { %1258 = vrot.lane.b32.xlu1 %v14332_v26, %s16678_s22 }
 0xa0e   :  { %1262 = vrot.lane.b32.xlu1 %v14344_v31, %s16678_s22 }
 0xa51   :  { %v1134_v3 = vpop.xlane.xlu1 %1133 }
 0xa52   :  { %13778 = vrcp.f32 %v1134_v3  ;;  %v1131_v4 = vpop.xlane.xlu0 %1130 }
 0xa53   :  { %13780 = vrcp.f32 %v1131_v4 }
 0xa55   :  { %v13174_v5 = vpop.permute.xlu1 %13173 }
 0xa56   :  { %v13176_v6 = vunpack.i.h.bf16 %v13174_v5  ;;  %v13175_v7 = vunpack.i.l.bf16 %v13174_v5  ;;  %v1137_v8 = vpop.xlane.xlu0 %1136 }
 0xa57   :  { %13782 = vrcp.f32 %v1137_v8 }
 0xa58   :  { %v12427_v9 = vpack.c.bf16 %v13176_v6, %v13175_v7 }
 0xa5a   :  { %12429 = vmatprep.subr.msk.bf16.mxu1 %vm14356_vm3, %v12427_v9  ;;  %v13179_v10 = vpop.permute.xlu0 %13178 }
 0xa5b   :  { %v13181_v13 = vunpack.i.h.bf16 %v13179_v10  ;;  %v13180_v14 = vunpack.i.l.bf16 %v13179_v10 }
 0xa5c   :  { %v13779_v11 = vpop.eup %13778 }
 0xa5d   :  { %v13781_v12 = vpop.eup %13780  ;;  %v1146_v16 = vmul.f32 %v13779_v11, %v13771_v47  ;;  %v12433_v17 = vpack.c.bf16 %v13181_v13, %v13180_v14 }
 0xa5e   :  { %v1145_v15 = vmul.f32 %v13781_v12, %v13773_v49  ;;  %v1261_v35 = vpop.permute.xlu0 %1260 }
 0xa60   :  { %11457 = vmatprep.mubr.msk.f32.mxu1 %vm51_vm0, %v1145_v15 }
 0xa61   :  { %11458 = vmatmul.mubr.msk.f32.vlgmr.msra.gmra.mrb[16].mxu1 %vm51_vm0, %v1146_v16  ;;  %v13783_v18 = vpop.eup %13782 }
 0xa62   :  { %12432 = vmatpush3.bf16.xpose.msk.msra.mxu1 %vm14356_vm3, %v12427_v9  ;;  %v1147_v19 = vmul.f32 %v13783_v18, %v13775_v52  ;;  %v1265_v37 = vpop.permute.xlu0 %1264 }
 0xa63   :  { %12435 = vmatprep.subr.msk.bf16.mxu1 %vm14356_vm3, %v12433_v17 }
 0xa64   :  { %11460 = vmatprep.mubr.msk.f32.mxu1 %vm51_vm0, %v1147_v19 }
 0xa6a   :  { %12438 = vmatpush3.bf16.xpose.msk.msra.mxu1 %vm14356_vm3, %v12433_v17 }
 0xa86   :  { %v1140_v20 = vpop.xlane.xlu1 %1139 }
 0xa87   :  { %13784 = vrcp.f32 %v1140_v20 }
 0xa8a   :  { %v1259_v30 = vpop.permute.xlu1 %1258 }
 0xa8e   :  { %v1263_v36 = vpop.permute.xlu1 %1262 }
 0xa91   :  { %v13785_v28 = vpop.eup %13784 }
 0xa92   :  { %v1148_v34 = vmul.f32 %v13785_v28, %v13777_v61 }
 0xa94   :  { %11461 = vmatmul.mubr.msk.f32.gmra.mrb[18].mxu1 %vm51_vm0, %v1148_v34 }
 0xa95   :  { %11471 = vmatprep.mubr.msk.f32.mxu1 %vm161_vm1, %v1259_v30 }
 0xa98   :  { %11472 = vmatmul.mubr.msk.f32.vlgmr.msra.gmra.mrb[20].mxu1 %vm161_vm1, %v1261_v35 }
 0xa99   :  { %11474 = vmatprep.mubr.msk.f32.mxu1 %vm161_vm1, %v1263_v36 }
 0xa9c   :  { %11475 = vmatmul.mubr.msk.f32.gmra.mrb[22].mxu1 %vm161_vm1, %v1265_v37 }
 0xb34   :  { %v14580_v38 = vpop.f32.mrb[16].mxu1 }
 0xb35   :  { %v14582_v39 = vpop.f32.mrb[17].mxu1 }
 0xb67   :  { %v14584_v41 = vpop.f32.mrb[18].mxu1 }
 0xb68   :  { %v14586_v42 = vpop.f32.mrb[19].mxu1 }
 0xb6b   :  { %v11473_v43 = vpop.f32.mrb[20].mxu1 }
 0xb6c   :  { %v1376_v44 = vmul.f32 0.5, %v11473_v43  ;;  %v1356_v45 = vpop.f32.mrb[21].mxu1 }
 0xb6d   :  { %v1375_v47 = vmul.f32 0.5, %v1356_v45 }
 0xb6e   :  { %v1380_v48 = vadd.f32 %v1376_v44, %v14375_v46 }
 0xb6f   :  { %v11476_v49 = vpop.f32.mrb[22].mxu1  ;;  %v1379_v50 = vadd.f32 %v1375_v47, %v14375_v46 }
 0xb70   :  { %v1378_v51 = vmul.f32 0.5, %v11476_v49  ;;  %v1366_v52 = vpop.f32.mrb[23].mxu1  ;;  %v1386_v53 = vsel %vm51_vm0, %v1380_v48, -inf }
 0xb71   :  { %v1377_v55 = vmul.f32 0.5, %v1366_v52  ;;  %1387 = vmax.xlane.f32.xlu0 %v1386_v53  ;;  %v1383_v56 = vsel %vm51_vm0, %v1379_v50, -inf }
 0xb72   :  { %1384 = vmax.xlane.f32.xlu1 %v1383_v56  ;;  %v1382_v61 = vadd.f32 %v1378_v51, %v14379_v54 }
 0xb73   :  { %v1381_v62 = vadd.f32 %v1377_v55, %v14379_v54 }
 0xb74   :  { %v1392_v3 = vsel %vm51_vm0, %v1382_v61, -inf }
 0xb75   :  { %v1389_v4 = vsel %vm51_vm0, %v1381_v62, -inf }
 0xb76   :  { %1393 = vmax.xlane.f32.xlu1 %v1392_v3  ;;  %1390 = vmax.xlane.f32.xlu0 %v1389_v4 }
 0xb87   :  { %13188 = vrot.lane.b32.xlu1 %v14348_v32, %s16676_s23 }
 0xb8c   :  { %13183 = vrot.lane.b32.xlu0 %v14338_v27, %s16676_s23 }
 0xbfe   :  { %v1388_v5 = vpop.xlane.xlu0 %1387 }
 0xbff   :  { %v1396_v6 = vsub.f32 %v1380_v48, %v1388_v5  ;;  %v1385_v7 = vpop.xlane.xlu1 %1384 }
 0xc00   :  { %v1395_v8 = vsub.f32 %v1379_v50, %v1385_v7 }
 0xc01   :  { %v1401_v9 = vmul.f32 1.442695, %v1396_v6 }
 0xc02   :  { %v1399_v10 = vmul.f32 1.442695, %v1395_v8 }
 0xc03   :  { %13786 = vpow2.f32 %v1401_v9  ;;  %v1394_v11 = vpop.xlane.xlu1 %1393  ;;  %v1391_v12 = vpop.xlane.xlu0 %1390 }
 0xc04   :  { %13788 = vpow2.f32 %v1399_v10  ;;  %v1397_v13 = vsub.f32 %v1381_v62, %v1391_v12  ;;  %v1398_v45 = vsub.f32 %v1382_v61, %v1394_v11 }
 0xc06   :  { %v1403_v14 = vmul.f32 1.442695, %v1397_v13  ;;  %v1405_v47 = vmul.f32 1.442695, %v1398_v45 }
 0xc07   :  { %v13189_v15 = vpop.permute.xlu1 %13188  ;;  %v13184_v16 = vpop.permute.xlu0 %13183 }
 0xc08   :  { %v13186_v17 = vunpack.i.h.bf16 %v13184_v16  ;;  %13790 = vpow2.f32 %v1403_v14  ;;  %v13191_v18 = vunpack.i.h.bf16 %v13189_v15  ;;  %v13190_v19 = vunpack.i.l.bf16 %v13189_v15 }
 0xc09   :  { %v13185_v20 = vunpack.i.l.bf16 %v13184_v16  ;;  %13792 = vpow2.f32 %v1405_v47 }
 0xc0a   :  { %v12443_v34 = vpack.c.bf16 %v13191_v18, %v13190_v19 }
 0xc0b   :  { %v12439_v28 = vpack.c.bf16 %v13186_v17, %v13185_v20 }
 0xc0d   :  { %v13787_v30 = vpop.eup %13786  ;;  %12440 = vmatprep.subr.bf16.mxu0 %v12439_v28 }
 0xc0e   :  { %v13789_v35 = vpop.eup %13788  ;;  %12442 = vmatpush3.bf16.msra.mxu0 %v12439_v28  ;;  %v1410_v36 = vsel %vm51_vm0, %v13787_v30, 0.0 }
 0xc0f   :  { %12444 = vmatprep.subr.bf16.mxu0 %v12443_v34  ;;  %1411 = vadd.xlane.f32.xlu1 %v1410_v36  ;;  %v1407_v37 = vsel %vm51_vm0, %v13789_v35, 0.0 }
 0xc10   :  { %1408 = vadd.xlane.f32.xlu0 %v1407_v37 }
 0xc12   :  { %12446 = vmatpush3.bf16.msra.mxu0 %v12443_v34  ;;  %v13791_v43 = vpop.eup %13790 }
 0xc13   :  { %v1413_v44 = vsel %vm51_vm0, %v13791_v43, 0.0  ;;  %v13793_v48 = vpop.eup %13792 }
 0xc14   :  { %1414 = vadd.xlane.f32.xlu0 %v1413_v44  ;;  %v1416_v49 = vsel %vm51_vm0, %v13793_v48, 0.0 }
 0xc20   :  { %13193 = vrot.lane.b32.xlu1 %v14338_v27, %s16674_s24 }
 0xc2a   :  { %13198 = vrot.lane.b32.xlu0 %v14348_v32, %s16674_s24 }
 0xc2e   :  { %1538 = vrot.lane.b32.xlu0 %v14330_v24, %s16672_s25 }
 0xc32   :  { %1542 = vrot.lane.b32.xlu0 %v14340_v29, %s16672_s25 }
 0xc44   :  { %1417 = vadd.xlane.f32.xlu1 %v1416_v49 }
 0xc55   :  { %1536 = vrot.lane.b32.xlu1 %v14332_v26, %s16672_s25 }
 0xc59   :  { %1540 = vrot.lane.b32.xlu1 %v14344_v31, %s16672_s25 }
 0xc9c   :  { %v1412_v50 = vpop.xlane.xlu1 %1411 }
 0xc9d   :  { %13794 = vrcp.f32 %v1412_v50  ;;  %v1409_v51 = vpop.xlane.xlu0 %1408 }
 0xc9e   :  { %13796 = vrcp.f32 %v1409_v51 }
 0xca0   :  { %v13194_v52 = vpop.permute.xlu1 %13193 }
 0xca1   :  { %v13196_v53 = vunpack.i.h.bf16 %v13194_v52  ;;  %v13195_v55 = vunpack.i.l.bf16 %v13194_v52  ;;  %v1415_v56 = vpop.xlane.xlu0 %1414 }
 0xca2   :  { %13798 = vrcp.f32 %v1415_v56 }
 0xca3   :  { %v12447_v61 = vpack.c.bf16 %v13196_v53, %v13195_v55 }
 0xca5   :  { %12449 = vmatprep.subr.msk.bf16.mxu0 %vm14356_vm3, %v12447_v61  ;;  %v13199_v62 = vpop.permute.xlu0 %13198 }
 0xca6   :  { %v13201_v5 = vunpack.i.h.bf16 %v13199_v62  ;;  %v13200_v6 = vunpack.i.l.bf16 %v13199_v62 }
 0xca7   :  { %v13795_v3 = vpop.eup %13794 }
 0xca8   :  { %v13797_v4 = vpop.eup %13796  ;;  %v1424_v8 = vmul.f32 %v13795_v3, %v13787_v30  ;;  %v12453_v9 = vpack.c.bf16 %v13201_v5, %v13200_v6 }
 0xca9   :  { %v1423_v7 = vmul.f32 %v13797_v4, %v13789_v35  ;;  %v1539_v16 = vpop.permute.xlu0 %1538 }
 0xcab   :  { %11485 = vmatprep.mubr.msk.f32.mxu0 %vm51_vm0, %v1423_v7 }
 0xcac   :  { %11486 = vmatmul.mubr.msk.f32.vlgmr.msra.gmra.mrb[16].mxu0 %vm51_vm0, %v1424_v8  ;;  %v13799_v10 = vpop.eup %13798 }
 0xcad   :  { %12452 = vmatpush3.bf16.xpose.msk.msra.mxu0 %vm14356_vm3, %v12447_v61  ;;  %v1425_v11 = vmul.f32 %v13799_v10, %v13791_v43  ;;  %v1543_v18 = vpop.permute.xlu0 %1542 }
 0xcae   :  { %12455 = vmatprep.subr.msk.bf16.mxu0 %vm14356_vm3, %v12453_v9 }
 0xcaf   :  { %11488 = vmatprep.mubr.msk.f32.mxu0 %vm51_vm0, %v1425_v11 }
 0xcb5   :  { %12458 = vmatpush3.bf16.xpose.msk.msra.mxu0 %vm14356_vm3, %v12453_v9 }
 0xcd1   :  { %v1418_v12 = vpop.xlane.xlu1 %1417 }
 0xcd2   :  { %13800 = vrcp.f32 %v1418_v12 }
 0xcd5   :  { %v1537_v14 = vpop.permute.xlu1 %1536 }
 0xcd9   :  { %v1541_v17 = vpop.permute.xlu1 %1540 }
 0xcdc   :  { %v13801_v13 = vpop.eup %13800 }
 0xcdd   :  { %v1426_v15 = vmul.f32 %v13801_v13, %v13793_v48 }
 0xcdf   :  { %11489 = vmatmul.mubr.msk.f32.gmra.mrb[18].mxu0 %vm51_vm0, %v1426_v15 }
 0xce0   :  { %11499 = vmatprep.mubr.msk.f32.mxu0 %vm161_vm1, %v1537_v14 }
 0xce3   :  { %11500 = vmatmul.mubr.msk.f32.vlgmr.msra.gmra.mrb[20].mxu0 %vm161_vm1, %v1539_v16 }
 0xce4   :  { %11502 = vmatprep.mubr.msk.f32.mxu0 %vm161_vm1, %v1541_v17 }
 0xce7   :  { %11503 = vmatmul.mubr.msk.f32.gmra.mrb[22].mxu0 %vm161_vm1, %v1543_v18 }
 0xd7f   :  { %v14632_v19 = vpop.f32.mrb[16].mxu0 }
 0xd80   :  { %v14634_v20 = vpop.f32.mrb[17].mxu0 }
 0xdb2   :  { %v14636_v28 = vpop.f32.mrb[18].mxu0 }
 0xdb3   :  { %v14638_v30 = vpop.f32.mrb[19].mxu0 }
 0xdb6   :  { %v11501_v34 = vpop.f32.mrb[20].mxu0 }
 0xdb7   :  { %v1654_v35 = vmul.f32 0.5, %v11501_v34  ;;  %v1634_v36 = vpop.f32.mrb[21].mxu0 }
 0xdb8   :  { %v1653_v37 = vmul.f32 0.5, %v1634_v36 }
 0xdb9   :  { %v1658_v43 = vadd.f32 %v1654_v35, %v14375_v46 }
 0xdba   :  { %v11504_v44 = vpop.f32.mrb[22].mxu0  ;;  %v1657_v45 = vadd.f32 %v1653_v37, %v14375_v46 }
 0xdbb   :  { %v1656_v47 = vmul.f32 0.5, %v11504_v44  ;;  %v1644_v48 = vpop.f32.mrb[23].mxu0  ;;  %v1664_v49 = vsel %vm51_vm0, %v1658_v43, -inf }
 0xdbc   :  { %v1655_v50 = vmul.f32 0.5, %v1644_v48  ;;  %1665 = vmax.xlane.f32.xlu0 %v1664_v49  ;;  %v1661_v51 = vsel %vm51_vm0, %v1657_v45, -inf }
 0xdbd   :  { %1662 = vmax.xlane.f32.xlu1 %v1661_v51  ;;  %v1660_v52 = vadd.f32 %v1656_v47, %v14379_v54 }
 0xdbe   :  { %v1659_v53 = vadd.f32 %v1655_v50, %v14379_v54 }
 0xdbf   :  { %v1670_v55 = vsel %vm51_vm0, %v1660_v52, -inf }
 0xdc0   :  { %v1667_v56 = vsel %vm51_vm0, %v1659_v53, -inf }
 0xdc1   :  { %1671 = vmax.xlane.f32.xlu1 %v1670_v55  ;;  %1668 = vmax.xlane.f32.xlu0 %v1667_v56 }
 0xdd2   :  { %13208 = vrot.lane.b32.xlu1 %v14348_v32, %s16670_s26 }
 0xdd7   :  { %13203 = vrot.lane.b32.xlu0 %v14338_v27, %s16670_s26 }
 0xe49   :  { %v1666_v61 = vpop.xlane.xlu0 %1665 }
 0xe4a   :  { %v1674_v62 = vsub.f32 %v1658_v43, %v1666_v61  ;;  %v1663_v3 = vpop.xlane.xlu1 %1662 }
 0xe4b   :  { %v1673_v4 = vsub.f32 %v1657_v45, %v1663_v3 }
 0xe4c   :  { %v1679_v5 = vmul.f32 1.442695, %v1674_v62 }
 0xe4d   :  { %v1677_v6 = vmul.f32 1.442695, %v1673_v4 }
 0xe4e   :  { %13802 = vpow2.f32 %v1679_v5  ;;  %v1672_v7 = vpop.xlane.xlu1 %1671  ;;  %v1669_v8 = vpop.xlane.xlu0 %1668 }
 0xe4f   :  { %13804 = vpow2.f32 %v1677_v6  ;;  %v1675_v9 = vsub.f32 %v1659_v53, %v1669_v8  ;;  %v1676_v45 = vsub.f32 %v1660_v52, %v1672_v7 }
 0xe51   :  { %v1681_v10 = vmul.f32 1.442695, %v1675_v9  ;;  %v1683_v47 = vmul.f32 1.442695, %v1676_v45 }
 0xe52   :  { %v13209_v11 = vpop.permute.xlu1 %13208  ;;  %v13204_v12 = vpop.permute.xlu0 %13203 }
 0xe53   :  { %v13206_v13 = vunpack.i.h.bf16 %v13204_v12  ;;  %13806 = vpow2.f32 %v1681_v10  ;;  %v13211_v14 = vunpack.i.h.bf16 %v13209_v11  ;;  %v13210_v15 = vunpack.i.l.bf16 %v13209_v11 }
 0xe54   :  { %v13205_v16 = vunpack.i.l.bf16 %v13204_v12  ;;  %13808 = vpow2.f32 %v1683_v47 }
 0xe55   :  { %v12463_v34 = vpack.c.bf16 %v13211_v14, %v13210_v15 }
 0xe56   :  { %v12459_v17 = vpack.c.bf16 %v13206_v13, %v13205_v16 }
 0xe58   :  { %v13803_v18 = vpop.eup %13802  ;;  %12460 = vmatprep.subr.bf16.mxu1 %v12459_v17 }
 0xe59   :  { %v13805_v35 = vpop.eup %13804  ;;  %12462 = vmatpush3.bf16.msra.mxu1 %v12459_v17  ;;  %v1688_v36 = vsel %vm51_vm0, %v13803_v18, 0.0 }
 0xe5a   :  { %12464 = vmatprep.subr.bf16.mxu1 %v12463_v34  ;;  %1689 = vadd.xlane.f32.xlu1 %v1688_v36  ;;  %v1685_v37 = vsel %vm51_vm0, %v13805_v35, 0.0 }
 0xe5b   :  { %1686 = vadd.xlane.f32.xlu0 %v1685_v37 }
 0xe5d   :  { %12466 = vmatpush3.bf16.msra.mxu1 %v12463_v34  ;;  %v13807_v43 = vpop.eup %13806 }
 0xe5e   :  { %v1691_v44 = vsel %vm51_vm0, %v13807_v43, 0.0  ;;  %v13809_v48 = vpop.eup %13808 }
 0xe5f   :  { %1692 = vadd.xlane.f32.xlu0 %v1691_v44  ;;  %v1694_v49 = vsel %vm51_vm0, %v13809_v48, 0.0 }
 0xe6b   :  { %13213 = vrot.lane.b32.xlu1 %v14338_v27, %s16668_s27 }
 0xe75   :  { %13218 = vrot.lane.b32.xlu0 %v14348_v32, %s16668_s27 }
 0xe79   :  { %1816 = vrot.lane.b32.xlu0 %v14330_v24, %s16666_s28 }
 0xe7d   :  { %1820 = vrot.lane.b32.xlu0 %v14340_v29, %s16666_s28 }
 0xe8f   :  { %1695 = vadd.xlane.f32.xlu1 %v1694_v49 }
 0xea0   :  { %1814 = vrot.lane.b32.xlu1 %v14332_v26, %s16666_s28 }
 0xea4   :  { %1818 = vrot.lane.b32.xlu1 %v14344_v31, %s16666_s28 }
 0xee7   :  { %v1690_v50 = vpop.xlane.xlu1 %1689 }
 0xee8   :  { %13810 = vrcp.f32 %v1690_v50  ;;  %v1687_v51 = vpop.xlane.xlu0 %1686 }
 0xee9   :  { %13812 = vrcp.f32 %v1687_v51 }
 0xeeb   :  { %v13214_v52 = vpop.permute.xlu1 %13213 }
 0xeec   :  { %v13216_v53 = vunpack.i.h.bf16 %v13214_v52  ;;  %v13215_v55 = vunpack.i.l.bf16 %v13214_v52  ;;  %v1693_v56 = vpop.xlane.xlu0 %1692 }
 0xeed   :  { %13814 = vrcp.f32 %v1693_v56 }
 0xeee   :  { %v12467_v61 = vpack.c.bf16 %v13216_v53, %v13215_v55 }
 0xef0   :  { %12469 = vmatprep.subr.msk.bf16.mxu1 %vm14356_vm3, %v12467_v61  ;;  %v13219_v62 = vpop.permute.xlu0 %13218 }
 0xef1   :  { %v13221_v5 = vunpack.i.h.bf16 %v13219_v62  ;;  %v13220_v6 = vunpack.i.l.bf16 %v13219_v62 }
 0xef2   :  { %v13811_v3 = vpop.eup %13810 }
 0xef3   :  { %v13813_v4 = vpop.eup %13812  ;;  %v1702_v8 = vmul.f32 %v13811_v3, %v13803_v18  ;;  %v12473_v9 = vpack.c.bf16 %v13221_v5, %v13220_v6 }
 0xef4   :  { %v1701_v7 = vmul.f32 %v13813_v4, %v13805_v35  ;;  %v1817_v16 = vpop.permute.xlu0 %1816 }
 0xef6   :  { %11513 = vmatprep.mubr.msk.f32.mxu1 %vm51_vm0, %v1701_v7 }
 0xef7   :  { %11514 = vmatmul.mubr.msk.f32.vlgmr.msra.gmra.mrb[24].mxu1 %vm51_vm0, %v1702_v8  ;;  %v13815_v10 = vpop.eup %13814 }
 0xef8   :  { %12472 = vmatpush3.bf16.xpose.msk.msra.mxu1 %vm14356_vm3, %v12467_v61  ;;  %v1703_v11 = vmul.f32 %v13815_v10, %v13807_v43  ;;  %v1821_v18 = vpop.permute.xlu0 %1820 }
 0xef9   :  { %12475 = vmatprep.subr.msk.bf16.mxu1 %vm14356_vm3, %v12473_v9 }
 0xefa   :  { %11516 = vmatprep.mubr.msk.f32.mxu1 %vm51_vm0, %v1703_v11 }
 0xf00   :  { %12478 = vmatpush3.bf16.xpose.msk.msra.mxu1 %vm14356_vm3, %v12473_v9 }
 0xf1c   :  { %v1696_v12 = vpop.xlane.xlu1 %1695 }
 0xf1d   :  { %13816 = vrcp.f32 %v1696_v12 }
 0xf20   :  { %v1815_v14 = vpop.permute.xlu1 %1814 }
 0xf24   :  { %v1819_v17 = vpop.permute.xlu1 %1818 }
 0xf27   :  { %v13817_v13 = vpop.eup %13816 }
 0xf28   :  { %v1704_v15 = vmul.f32 %v13817_v13, %v13809_v48 }
 0xf2a   :  { %11517 = vmatmul.mubr.msk.f32.gmra.mrb[26].mxu1 %vm51_vm0, %v1704_v15 }
 0xf2b   :  { %11527 = vmatprep.mubr.msk.f32.mxu1 %vm161_vm1, %v1815_v14 }
 0xf2e   :  { %11528 = vmatmul.mubr.msk.f32.vlgmr.msra.gmra.mrb[28].mxu1 %vm161_vm1, %v1817_v16 }
 0xf2f   :  { %11530 = vmatprep.mubr.msk.f32.mxu1 %vm161_vm1, %v1819_v17 }
 0xf32   :  { %11531 = vmatmul.mubr.msk.f32.gmra.mrb[30].mxu1 %vm161_vm1, %v1821_v18 }
 0xfca   :  { %v14684_v34 = vpop.f32.mrb[24].mxu1 }
 0xfcb   :  { %v14686_v35 = vpop.f32.mrb[25].mxu1 }
 0xffd   :  { %v14688_v36 = vpop.f32.mrb[26].mxu1 }
 0xffe   :  { %v14690_v37 = vpop.f32.mrb[27].mxu1 }
0x1001   :  { %v11529_v43 = vpop.f32.mrb[28].mxu1 }
0x1002   :  { %v1932_v44 = vmul.f32 0.5, %v11529_v43  ;;  %v1912_v45 = vpop.f32.mrb[29].mxu1 }
0x1003   :  { %v1931_v47 = vmul.f32 0.5, %v1912_v45 }
0x1004   :  { %v1936_v48 = vadd.f32 %v1932_v44, %v14375_v46 }
0x1005   :  { %v1935_v49 = vadd.f32 %v1931_v47, %v14375_v46  ;;  %v11532_v50 = vpop.f32.mrb[30].mxu1 }
0x1006   :  { %v1934_v51 = vmul.f32 0.5, %v11532_v50  ;;  %v1922_v52 = vpop.f32.mrb[31].mxu1  ;;  %v1942_v53 = vsel %vm51_vm0, %v1936_v48, -inf }
0x1007   :  { %v1933_v55 = vmul.f32 0.5, %v1922_v52  ;;  %1943 = vmax.xlane.f32.xlu0 %v1942_v53  ;;  %v1939_v56 = vsel %vm51_vm0, %v1935_v49, -inf }
0x1008   :  { %v1938_v61 = vadd.f32 %v1934_v51, %v14379_v54  ;;  %1940 = vmax.xlane.f32.xlu1 %v1939_v56 }
0x1009   :  { %v1937_v62 = vadd.f32 %v1933_v55, %v14379_v54 }
0x100a   :  { %v1948_v3 = vsel %vm51_vm0, %v1938_v61, -inf }
0x100b   :  { %v1945_v4 = vsel %vm51_vm0, %v1937_v62, -inf }
0x100c   :  { %1949 = vmax.xlane.f32.xlu1 %v1948_v3  ;;  %1946 = vmax.xlane.f32.xlu0 %v1945_v4 }
0x101d   :  { %13228 = vrot.lane.b32.xlu1 %v14348_v32, %s16664_s29 }
0x1022   :  { %13223 = vrot.lane.b32.xlu0 %v14338_v27, %s16664_s29 }
0x1094   :  { %v1944_v5 = vpop.xlane.xlu0 %1943 }
0x1095   :  { %v1952_v6 = vsub.f32 %v1936_v48, %v1944_v5  ;;  %v1941_v7 = vpop.xlane.xlu1 %1940 }
0x1096   :  { %v1951_v8 = vsub.f32 %v1935_v49, %v1941_v7 }
0x1097   :  { %v1957_v9 = vmul.f32 1.442695, %v1952_v6 }
0x1098   :  { %v1955_v10 = vmul.f32 1.442695, %v1951_v8 }
0x1099   :  { %13818 = vpow2.f32 %v1957_v9  ;;  %v1950_v11 = vpop.xlane.xlu1 %1949  ;;  %v1947_v12 = vpop.xlane.xlu0 %1946 }
0x109a   :  { %13820 = vpow2.f32 %v1955_v10  ;;  %v1953_v13 = vsub.f32 %v1937_v62, %v1947_v12  ;;  %v1954_v55 = vsub.f32 %v1938_v61, %v1950_v11 }
0x109c   :  { %v1959_v14 = vmul.f32 1.442695, %v1953_v13  ;;  %v1961_v56 = vmul.f32 1.442695, %v1954_v55 }
0x109d   :  { %v13229_v15 = vpop.permute.xlu1 %13228  ;;  %v13224_v16 = vpop.permute.xlu0 %13223 }
0x109e   :  { %v13226_v17 = vunpack.i.h.bf16 %v13224_v16  ;;  %13822 = vpow2.f32 %v1959_v14  ;;  %v13231_v18 = vunpack.i.h.bf16 %v13229_v15  ;;  %v13230_v43 = vunpack.i.l.bf16 %v13229_v15 }
0x109f   :  { %v13225_v44 = vunpack.i.l.bf16 %v13224_v16  ;;  %13824 = vpow2.f32 %v1961_v56 }
0x10a0   :  { %v12483_v48 = vpack.c.bf16 %v13231_v18, %v13230_v43 }
0x10a1   :  { %v12479_v45 = vpack.c.bf16 %v13226_v17, %v13225_v44 }
0x10a3   :  { %v13819_v47 = vpop.eup %13818  ;;  %12480 = vmatprep.subr.bf16.mxu0 %v12479_v45 }
0x10a4   :  { %v13821_v49 = vpop.eup %13820  ;;  %12482 = vmatpush3.bf16.msra.mxu0 %v12479_v45  ;;  %v1966_v50 = vsel %vm51_vm0, %v13819_v47, 0.0 }
0x10a5   :  { %12484 = vmatprep.subr.bf16.mxu0 %v12483_v48  ;;  %1967 = vadd.xlane.f32.xlu1 %v1966_v50  ;;  %v1963_v51 = vsel %vm51_vm0, %v13821_v49, 0.0 }
0x10a6   :  { %1964 = vadd.xlane.f32.xlu0 %v1963_v51 }
0x10a8   :  { %12486 = vmatpush3.bf16.msra.mxu0 %v12483_v48  ;;  %v13823_v52 = vpop.eup %13822 }
0x10a9   :  { %v1969_v53 = vsel %vm51_vm0, %v13823_v52, 0.0  ;;  %v13825_v62 = vpop.eup %13824 }
0x10aa   :  { %1970 = vadd.xlane.f32.xlu0 %v1969_v53  ;;  %v1972_v3 = vsel %vm51_vm0, %v13825_v62, 0.0 }
0x10b6   :  { %13233 = vrot.lane.b32.xlu1 %v14338_v27, %s16662_s30 }
0x10c0   :  { %13238 = vrot.lane.b32.xlu0 %v14348_v32, %s16662_s30  ;;  %s16690_s30 = smov 16  }
0x10c4   :  { %2094 = vrot.lane.b32.xlu0 %v14330_v24, %s16660_s4 }
0x10c8   :  { %2098 = vrot.lane.b32.xlu0 %v14340_v29, %s16660_s4 }
0x10da   :  { %1973 = vadd.xlane.f32.xlu1 %v1972_v3 }
0x10eb   :  { %2092 = vrot.lane.b32.xlu1 %v14332_v26, %s16660_s4 }
0x10ef   :  { %2096 = vrot.lane.b32.xlu1 %v14344_v31, %s16660_s4  ;;  %s16684_s4 = smov 68  }
0x1132   :  { %v1968_v61 = vpop.xlane.xlu1 %1967 }
0x1133   :  { %13826 = vrcp.f32 %v1968_v61  ;;  %v1965_v4 = vpop.xlane.xlu0 %1964 }
0x1134   :  { %13828 = vrcp.f32 %v1965_v4 }
0x1136   :  { %v13234_v24 = vpop.permute.xlu1 %13233 }
0x1137   :  { %v13236_v5 = vunpack.i.h.bf16 %v13234_v24  ;;  %v13235_v6 = vunpack.i.l.bf16 %v13234_v24  ;;  %v1971_v7 = vpop.xlane.xlu0 %1970 }
0x1138   :  { %13830 = vrcp.f32 %v1971_v7 }
0x1139   :  { %v12487_v29 = vpack.c.bf16 %v13236_v5, %v13235_v6 }
0x113b   :  { %12489 = vmatprep.subr.msk.bf16.mxu0 %vm14356_vm3, %v12487_v29  ;;  %v13239_v8 = vpop.permute.xlu0 %13238 }
0x113c   :  { %v13241_v26 = vunpack.i.h.bf16 %v13239_v8  ;;  %v13240_v11 = vunpack.i.l.bf16 %v13239_v8 }
0x113d   :  { %v13827_v9 = vpop.eup %13826 }
0x113e   :  { %v13829_v10 = vpop.eup %13828  ;;  %v1980_v31 = vmul.f32 %v13827_v9, %v13819_v47  ;;  %v12493_v13 = vpack.c.bf16 %v13241_v26, %v13240_v11 }
0x113f   :  { %v1979_v12 = vmul.f32 %v13829_v10, %v13821_v49  ;;  %v2095_v44 = vpop.permute.xlu0 %2094 }
0x1141   :  { %11541 = vmatprep.mubr.msk.f32.mxu0 %vm51_vm0, %v1979_v12 }
0x1142   :  { %11542 = vmatmul.mubr.msk.f32.vlgmr.msra.gmra.mrb[24].mxu0 %vm51_vm0, %v1980_v31  ;;  %v13831_v14 = vpop.eup %13830 }
0x1143   :  { %12492 = vmatpush3.bf16.xpose.msk.msra.mxu0 %vm14356_vm3, %v12487_v29  ;;  %v1981_v15 = vmul.f32 %v13831_v14, %v13823_v52  ;;  %v2099_v47 = vpop.permute.xlu0 %2098 }
0x1144   :  { %12495 = vmatprep.subr.msk.bf16.mxu0 %vm14356_vm3, %v12493_v13 }
0x1145   :  { %11544 = vmatprep.mubr.msk.f32.mxu0 %vm51_vm0, %v1981_v15 }
0x114b   :  { %12498 = vmatpush3.bf16.xpose.msk.msra.mxu0 %vm14356_vm3, %v12493_v13 }
0x1167   :  { %v1974_v16 = vpop.xlane.xlu1 %1973 }
0x1168   :  { %13832 = vrcp.f32 %v1974_v16 }
0x116b   :  { %v2093_v18 = vpop.permute.xlu1 %2092 }
0x116f   :  { %v2097_v45 = vpop.permute.xlu1 %2096 }
0x1172   :  { %v13833_v17 = vpop.eup %13832 }
0x1173   :  { %v1982_v43 = vmul.f32 %v13833_v17, %v13825_v62 }
0x1175   :  { %11545 = vmatmul.mubr.msk.f32.gmra.mrb[26].mxu0 %vm51_vm0, %v1982_v43 }
0x1176   :  { %11555 = vmatprep.mubr.msk.f32.mxu0 %vm161_vm1, %v2093_v18 }
0x1179   :  { %11556 = vmatmul.mubr.msk.f32.vlgmr.msra.gmra.mrb[28].mxu0 %vm161_vm1, %v2095_v44 }
0x117a   :  { %11558 = vmatprep.mubr.msk.f32.mxu0 %vm161_vm1, %v2097_v45 }
0x117d   :  { %11559 = vmatmul.mubr.msk.f32.gmra.mrb[30].mxu0 %vm161_vm1, %v2099_v47 }
0x1215   :  { %v14736_v48 = vpop.f32.mrb[24].mxu0 }
0x1216   :  { %v14738_v49 = vpop.f32.mrb[25].mxu0 }
0x1248   :  { %v14740_v50 = vpop.f32.mrb[26].mxu0 }
0x1249   :  { %v14742_v51 = vpop.f32.mrb[27].mxu0 }
0x124c   :  { %v11557_v52 = vpop.f32.mrb[28].mxu0 }
0x124d   :  { %v2210_v53 = vmul.f32 0.5, %v11557_v52  ;;  %v2190_v55 = vpop.f32.mrb[29].mxu0 }
0x124e   :  { %v2209_v56 = vmul.f32 0.5, %v2190_v55 }
0x124f   :  { %v2214_v62 = vadd.f32 %v2210_v53, %v14375_v46 }
0x1250   :  { %v2213_v3 = vadd.f32 %v2209_v56, %v14375_v46  ;;  %v11560_v61 = vpop.f32.mrb[30].mxu0 }
0x1251   :  { %v2212_v4 = vmul.f32 0.5, %v11560_v61  ;;  %v2200_v24 = vpop.f32.mrb[31].mxu0  ;;  %v2220_v5 = vsel %vm51_vm0, %v2214_v62, -inf  ;;  %v49_v61 = vld [vmem:[%s16644_s2 + $0x80] sm:$0xff] }
0x1252   :  { %v2211_v6 = vmul.f32 0.5, %v2200_v24  ;;  %2221 = vmax.xlane.f32.xlu0 %v2220_v5  ;;  %v2217_v7 = vsel %vm51_vm0, %v2213_v3, -inf  ;;  %v2612_v24 = vld [vmem:[%s16644_s2 + $0xa0] sm:$0xff]  ;;  %v2613_v5 = vld [vmem:[%s16644_s2 + $0xb0] sm:$0xff] }
0x1253   :  { %v2216_v29 = vadd.f32 %v2212_v4, %v14379_v54  ;;  %2218 = vmax.xlane.f32.xlu1 %v2217_v7  ;;  %v12515_v7 = vpack.c.bf16 %v2613_v5, %v2612_v24 }
0x1254   :  { %v2215_v8 = vadd.f32 %v2211_v6, %v14379_v54 }
0x1255   :  { %v2226_v9 = vsel %vm51_vm0, %v2216_v29, -inf  ;;  %12516 = vmatprep.subr.bf16.mxu0 %v12515_v7 }
0x1256   :  { %v2223_v10 = vsel %vm51_vm0, %v2215_v8, -inf  ;;  %12518 = vmatpush3.bf16.msra.mxu0 %v12515_v7  ;;  %v2614_v7 = vld [vmem:[%s16644_s2 + $0xc0] sm:$0xff] }
0x1257   :  { %2227 = vmax.xlane.f32.xlu1 %v2226_v9  ;;  %2224 = vmax.xlane.f32.xlu0 %v2223_v10 }
0x12df   :  { %v2222_v26 = vpop.xlane.xlu0 %2221 }
0x12e0   :  { %v2230_v11 = vsub.f32 %v2214_v62, %v2222_v26  ;;  %v2219_v12 = vpop.xlane.xlu1 %2218 }
0x12e1   :  { %v2229_v31 = vsub.f32 %v2213_v3, %v2219_v12 }
0x12e2   :  { %v2235_v13 = vmul.f32 1.442695, %v2230_v11 }
0x12e3   :  { %v2233_v14 = vmul.f32 1.442695, %v2229_v31 }
0x12e4   :  { %13834 = vpow2.f32 %v2235_v13  ;;  %v2228_v15 = vpop.xlane.xlu1 %2227  ;;  %v2225_v16 = vpop.xlane.xlu0 %2224 }
0x12e5   :  { %13836 = vpow2.f32 %v2233_v14  ;;  %v2232_v17 = vsub.f32 %v2216_v29, %v2228_v15  ;;  %v2231_v18 = vsub.f32 %v2215_v8, %v2225_v16 }
0x12e7   :  { %v2239_v43 = vmul.f32 1.442695, %v2232_v17  ;;  %v2237_v44 = vmul.f32 1.442695, %v2231_v18 }
0x12e9   :  { %13838 = vpow2.f32 %v2239_v43 }
0x12ea   :  { %13840 = vpow2.f32 %v2237_v44 }
0x12ee   :  { %v14752_v45 = vpop.eup %13834 }
0x12ef   :  { %v13837_v47 = vpop.eup %13836  ;;  %v2244_v52 = vsel %vm51_vm0, %v14752_v45, 0.0 }
0x12f0   :  { %2245 = vadd.xlane.f32.xlu1 %v2244_v52  ;;  %v2241_v53 = vsel %vm51_vm0, %v13837_v47, 0.0 }
0x12f1   :  { %2242 = vadd.xlane.f32.xlu0 %v2241_v53 }
0x12f3   :  { %v14757_v55 = vpop.eup %13838 }
0x12f4   :  { %v13841_v56 = vpop.eup %13840  ;;  %v2250_v62 = vsel %vm51_vm0, %v14757_v55, 0.0 }
0x12f5   :  { %2251 = vadd.xlane.f32.xlu1 %v2250_v62  ;;  %v2247_v3 = vsel %vm51_vm0, %v13841_v56, 0.0 }
0x12f6   :  { %2248 = vadd.xlane.f32.xlu0 %v2247_v3 }
0x1306   :  { %13248 = vrot.lane.b32.xlu1 %v14348_v32, %s16658_s5 }
0x130a   :  { %2374 = vrot.lane.b32.xlu1 %v14478_v22, %s16656_s6 }
0x130c   :  { %13243 = vrot.lane.b32.xlu0 %v14338_v27, %s16658_s5  ;;  %s14264_s5 = smov 28  }
0x130e   :  { %2390 = vrot.lane.b32.xlu1 %v14530_v58, %s16654_s7 }
0x1310   :  { %2376 = vrot.lane.b32.xlu0 %v14476_v21, %s16656_s6 }
0x1312   :  { %2406 = vrot.lane.b32.xlu1 %v14582_v39, %s16652_s8 }
0x1314   :  { %2392 = vrot.lane.b32.xlu0 %v14528_v57, %s16654_s7 }
0x1316   :  { %2422 = vrot.lane.b32.xlu1 %v14634_v20, %s16650_s10 }
0x1318   :  { %2408 = vrot.lane.b32.xlu0 %v14580_v38, %s16652_s8 }
0x131a   :  { %2438 = vrot.lane.b32.xlu1 %v14686_v35, %s16648_s0 }
0x131c   :  { %2424 = vrot.lane.b32.xlu0 %v14632_v19, %s16650_s10 }
0x131e   :  { %2454 = vrot.lane.b32.xlu1 %v14738_v49, %s14263_s9 }
0x1320   :  { %2440 = vrot.lane.b32.xlu0 %v14684_v34, %s16648_s0 }
0x1322   :  { %2378 = vrot.lane.b32.xlu1 %v14482_v25, %s16656_s6 }
0x1324   :  { %2456 = vrot.lane.b32.xlu0 %v14736_v48, %s14263_s9  ;;  %v48_v48 = vld [vmem:[%s16644_s2 + $0x70] sm:$0xff] }
0x1325   :  { %v12511_v4 = vpack.c.bf16 %v49_v61, %v48_v48 }
0x1326   :  { %2394 = vrot.lane.b32.xlu1 %v14534_v60, %s16654_s7 }
0x1328   :  { %2380 = vrot.lane.b32.xlu0 %v14480_v23, %s16656_s6  ;;  %s16685_s6 = smov 100  }
0x132a   :  { %2410 = vrot.lane.b32.xlu1 %v14586_v42, %s16652_s8 }
0x132c   :  { %2396 = vrot.lane.b32.xlu0 %v14532_v59, %s16654_s7  ;;  %s16688_s7 = smov 8  }
0x132e   :  { %2426 = vrot.lane.b32.xlu1 %v14638_v30, %s16650_s10 }
0x1330   :  { %2412 = vrot.lane.b32.xlu0 %v14584_v41, %s16652_s8  ;;  %s16689_s8 = smov 12  }
0x1332   :  { %2442 = vrot.lane.b32.xlu1 %v14690_v37, %s16648_s0  ;;  %v47_v37 = vld [vmem:[%s16644_s2 + $0x60] sm:$0xff] }
0x1334   :  { %2428 = vrot.lane.b32.xlu0 %v14636_v28, %s16650_s10  ;;  %s16686_s10 = smov 36  }
0x1338   :  { %2444 = vrot.lane.b32.xlu0 %v14688_v36, %s16648_s0  ;;  %v46_v36 = vld [vmem:[%s16644_s2 + $0x50] sm:$0xff]  ;;  %s16687_s0 = smov 4  }
0x1339   :  { %v12507_v49 = vpack.c.bf16 %v47_v37, %v46_v36 }
0x137d   :  { %v2246_v27 = vpop.xlane.xlu1 %2245 }
0x137e   :  { %v2243_v32 = vpop.xlane.xlu0 %2242 }
0x137f   :  { %13842 = vrcp.f32 %v2243_v32 }
0x1380   :  { %13844 = vrcp.f32 %v2246_v27 }
0x1382   :  { %v2252_v21 = vpop.xlane.xlu1 %2251 }
0x1383   :  { %v2249_v22 = vpop.xlane.xlu0 %2248 }
0x1384   :  { %13846 = vrcp.f32 %v2249_v22 }
0x1385   :  { %13848 = vrcp.f32 %v2252_v21 }
0x1386   :  { %v13249_v23 = vpop.permute.xlu1 %13248 }
0x1387   :  { %v13244_v25 = vpop.permute.xlu0 %13243  ;;  %v13251_v57 = vunpack.i.h.bf16 %v13249_v23  ;;  %v13250_v58 = vunpack.i.l.bf16 %v13249_v23 }
0x1388   :  { %v13246_v59 = vunpack.i.h.bf16 %v13244_v25  ;;  %v13245_v60 = vunpack.i.l.bf16 %v13244_v25 }
0x1389   :  { %v13843_v38 = vpop.eup %13842  ;;  %v12503_v42 = vpack.c.bf16 %v13251_v57, %v13250_v58 }
0x138a   :  { %v12499_v39 = vpack.c.bf16 %v13246_v59, %v13245_v60  ;;  %v2257_v41 = vmul.f32 %v13843_v38, %v13837_v47  ;;  %v13845_v19 = vpop.eup %13844  ;;  %v2375_v26 = vpop.permute.xlu1 %2374 }
0x138b   :  { %v2258_v28 = vmul.f32 %v13845_v19, %v14752_v45  ;;  %v2377_v10 = vpop.permute.xlu0 %2376 }
0x138c   :  { %12500 = vmatprep.subr.bf16.mxu1 %v12499_v39  ;;  %11569 = vmatprep.mubr.msk.f32.mxu1 %vm51_vm0, %v2257_v41  ;;  %v2483_v3 = vsel %vm161_vm1, %v14424_v63, %v2377_v10 }
0x138d   :  { %12502 = vmatpush3.bf16.msra.mxu1 %v12499_v39 }
0x138e   :  { %12504 = vmatprep.subr.bf16.mxu1 %v12503_v42  ;;  %v13847_v20 = vpop.eup %13846  ;;  %v2391_v12 = vpop.permute.xlu1 %2390 }
0x138f   :  { %v13849_v30 = vpop.eup %13848  ;;  %v2259_v34 = vmul.f32 %v13847_v20, %v13841_v56  ;;  %v2393_v11 = vpop.permute.xlu0 %2392  ;;  %v2482_v56 = vsel %vm161_vm1, %v14426_v0, %v2375_v26 }
0x1390   :  { %v2260_v35 = vmul.f32 %v13849_v30, %v14757_v55  ;;  %v2487_v27 = vsel %vm2486_vm5, %v2482_v56, %v2391_v12  ;;  %v2488_v21 = vsel %vm2486_vm5, %v2483_v3, %v2393_v11 }
0x1391   :  { %12506 = vmatpush3.bf16.msra.mxu1 %v12503_v42 }
0x1392   :  { %12508 = vmatprep.subr.bf16.mxu1 %v12507_v49  ;;  %v2407_v13 = vpop.permute.xlu1 %2406 }
0x1393   :  { %v2409_v31 = vpop.permute.xlu0 %2408  ;;  %v2492_v22 = vsel %vm2491_vm6, %v2487_v27, %v2407_v13 }
0x1394   :  { %11570 = vmatmul.mubr.msk.f32.vlgmr.msra.gmra.mrb[32].mxu1 %vm51_vm0, %v2258_v28  ;;  %v2493_v23 = vsel %vm2491_vm6, %v2488_v21, %v2409_v31 }
0x1395   :  { %11572 = vmatprep.mubr.msk.f32.mxu1 %vm51_vm0, %v2259_v34  ;;  %12510 = vmatpush3.bf16.msra.mxu1 %v12507_v49 }
0x1396   :  { %12512 = vmatprep.subr.bf16.mxu1 %v12511_v4  ;;  %v2423_v15 = vpop.permute.xlu1 %2422 }
0x1397   :  { %v2425_v14 = vpop.permute.xlu0 %2424  ;;  %v2496_v25 = vsel %vm34_vm4, %v2492_v22, %v2423_v15 }
0x1398   :  { %11573 = vmatmul.mubr.msk.f32.gmra.mrb[34].mxu1 %vm51_vm0, %v2260_v35  ;;  %v2497_v0 = vsel %vm34_vm4, %v2493_v23, %v2425_v14 }
0x1399   :  { %12514 = vmatpush3.bf16.msra.mxu1 %v12511_v4 }
0x139a   :  { %v2439_v17 = vpop.permute.xlu1 %2438 }
0x139b   :  { %v2441_v16 = vpop.permute.xlu0 %2440  ;;  %v2501_v57 = vsel %vm2500_vm7, %v2496_v25, %v2439_v17 }
0x139c   :  { %v2502_v63 = vsel %vm2500_vm7, %v2497_v0, %v2441_v16  ;;  %v2616_v16 = vld [vmem:[%s16644_s2 + $0xe0] ss:$0 sm:$0xff] }
0x139f   :  { %v2457_v18 = vpop.permute.xlu0 %2456 }
0x13a0   :  { %v2507_v38 = vsel %vm2505_vm8, %v2502_v63, %v2457_v18 }
0x13a3   :  { %v2381_v43 = vpop.permute.xlu0 %2380 }
0x13a4   :  { %v2485_v20 = vsel %vm161_vm1, %v14428_v1, %v2381_v43 }
0x13a7   :  { %v2397_v45 = vpop.permute.xlu0 %2396 }
0x13a8   :  { %v2490_v34 = vsel %vm2486_vm5, %v2485_v20, %v2397_v45 }
0x13ab   :  { %v2413_v47 = vpop.permute.xlu0 %2412 }
0x13ac   :  { %v2495_v36 = vsel %vm2491_vm6, %v2490_v34, %v2413_v47 }
0x13af   :  { %v2429_v53 = vpop.permute.xlu0 %2428 }
0x13b0   :  { %v2499_v48 = vsel %vm34_vm4, %v2495_v36, %v2429_v53 }
0x13b3   :  { %v2445_v62 = vpop.permute.xlu0 %2444 }
0x13b4   :  { %v2504_v61 = vsel %vm2500_vm7, %v2499_v48, %v2445_v62 }
0x1467   :  { %v11571_v6 = vpop.f32.mrb[32].mxu1 }
0x1468   :  { %2472 = vrot.lane.b32.xlu0 %v11571_v6, %s14264_s5  ;;  %v2351_v29 = vpop.f32.mrb[33].mxu1 }
0x1469   :  { %2470 = vrot.lane.b32.xlu1 %v2351_v29, %s14264_s5  ;;  %v2615_v29 = vld [vmem:[%s16644_s2 + $0xd0] sm:$0xff] }
0x146b   :  { %v11574_v8 = vpop.f32.mrb[34].mxu1 }
0x146c   :  { %2460 = vrot.lane.b32.xlu0 %v14740_v50, %s14263_s9  ;;  %v2361_v9 = vpop.f32.mrb[35].mxu1  ;;  %v2455_v50 = vpop.permute.xlu1 %2454 }
0x146d   :  { %2458 = vrot.lane.b32.xlu1 %v14742_v51, %s14263_s9  ;;  %v2506_v59 = vsel %vm2505_vm8, %v2501_v57, %v2455_v50 }
0x1470   :  { %2476 = vrot.lane.b32.xlu0 %v11574_v8, %s14264_s5  ;;  %v2379_v44 = vpop.permute.xlu1 %2378  ;;  %v12519_v8 = vpack.c.bf16 %v2615_v29, %v2614_v7 }
0x1471   :  { %2474 = vrot.lane.b32.xlu1 %v2361_v9, %s14264_s5  ;;  %v2484_v42 = vsel %vm161_vm1, %v14430_v2, %v2379_v44  ;;  %v50_v9 = vld [vmem:[%s16644_s2 + $0x90] ss:$0 sm:$0xff] }
0x1472   :  { %12520 = vmatprep.subr.bf16.mxu0 %v12519_v8 }
0x1473   :  { %12522 = vmatpush3.bf16.msra.mxu0 %v12519_v8 }
0x1474   :  { %v2395_v51 = vpop.permute.xlu1 %2394 }
0x1475   :  { %v2489_v28 = vsel %vm2486_vm5, %v2484_v42, %v2395_v51 }
0x1478   :  { %v2411_v52 = vpop.permute.xlu1 %2410 }
0x1479   :  { %v2494_v35 = vsel %vm2491_vm6, %v2489_v28, %v2411_v52 }
0x147c   :  { %v2427_v55 = vpop.permute.xlu1 %2426 }
0x147d   :  { %v2498_v37 = vsel %vm34_vm4, %v2494_v35, %v2427_v55 }
0x1480   :  { %v2443_v32 = vpop.permute.xlu1 %2442 }
0x1481   :  { %v2503_v2 = vsel %vm2500_vm7, %v2498_v37, %v2443_v32 }
0x14da   :  { %v2473_v58 = vpop.permute.xlu0 %2472 }
0x14db   :  { %v2471_v60 = vpop.permute.xlu1 %2470  ;;  %v2512_v41 = vsel %vm2510_vm9, %v2507_v38, %v2473_v58 }
0x14dc   :  { %v2511_v39 = vsel %vm2510_vm9, %v2506_v59, %v2471_v60 }
0x14dd   :  { %11583 = vmatprep.mubr.msk.f32.mxu1 %vm51_vm0, %v2511_v39 }
0x14de   :  { %v2461_v19 = vpop.permute.xlu0 %2460  ;;  %11584 = vmatmul.mubr.msk.f32.vlgmr.msra.gmra.mrb[36].mxu1 %vm51_vm0, %v2512_v41 }
0x14df   :  { %v2459_v30 = vpop.permute.xlu1 %2458  ;;  %v2509_v24 = vsel %vm2505_vm8, %v2504_v61, %v2461_v19 }
0x14e0   :  { %v2508_v1 = vsel %vm2505_vm8, %v2503_v2, %v2459_v30 }
0x14e2   :  { %v2477_v49 = vpop.permute.xlu0 %2476 }
0x14e3   :  { %v2475_v4 = vpop.permute.xlu1 %2474  ;;  %v2514_v6 = vsel %vm2510_vm9, %v2509_v24, %v2477_v49 }
0x14e4   :  { %v2513_v5 = vsel %vm2510_vm9, %v2508_v1, %v2475_v4 }
0x14e5   :  { %11586 = vmatprep.mubr.msk.f32.mxu1 %vm51_vm0, %v2513_v5 }
0x14e6   :  { %11587 = vmatmul.mubr.msk.f32.gmra.mrb[38].mxu1 %vm51_vm0, %v2514_v6 }
0x15b1   :  { %v11585_v10 = vpop.f32.mrb[36].mxu1 }
0x15b2   :  { %v2593_v26 = vpop.f32.mrb[37].mxu1  ;;  %v2599_v12 = vadd.f32 %v11585_v10, %v50_v9 }
0x15b3   :  { %v2594_v11 = vadd.f32 %v2593_v26, %v50_v9 }
0x15b5   :  { %11597 = vmatprep.mubr.msk.f32.mxu0 %vm51_vm0, %v2594_v11 }
0x15b6   :  { %11598 = vmatmul.mubr.msk.f32.vlgmr.msra.gmra.mrb[32].mxu0 %vm51_vm0, %v2599_v12 }
0x15b9   :  { %v11588_v31 = vpop.f32.mrb[38].mxu1 }
0x15ba   :  { %v2603_v13 = vpop.f32.mrb[39].mxu1  ;;  %v2609_v15 = vadd.f32 %v11588_v31, %v50_v9 }
0x15bb   :  { %v2604_v14 = vadd.f32 %v2603_v13, %v50_v9 }
0x15bd   :  { %11600 = vmatprep.mubr.msk.f32.mxu0 %vm51_vm0, %v2604_v14 }
0x15be   :  { %11601 = vmatmul.mubr.msk.f32.gmra.mrb[34].mxu0 %vm51_vm0, %v2609_v15 }
0x1689   :  { %v11599_v17 = vpop.f32.mrb[32].mxu0 }
0x168a   :  { %v14894_v18 = vadd.f32 %v11599_v17, %v2616_v16  ;;  %v2700_v50 = vpop.f32.mrb[33].mxu0 }
0x168b   :  { %v14896_v43 = vadd.f32 %v2700_v50, %v2616_v16 }
0x168d   :  { %11611 = vmatprep.mubr.msk.f32.mxu1 %vm161_vm1, %v14896_v43  ;;  %v14902_v44 = vpack.i.bf16 %v14894_v18, %v14896_v43 }
0x168f   :  { %13253 = vrot.lane.b32.xlu1 %v14902_v44, %s14234_s1 }
0x1691   :  { %v11602_v45 = vpop.f32.mrb[34].mxu0 }
0x1692   :  { %v14906_v51 = vadd.f32 %v11602_v45, %v2616_v16  ;;  %v2710_v47 = vpop.f32.mrb[35].mxu0 }
0x1693   :  { %v14908_v52 = vadd.f32 %v2710_v47, %v2616_v16 }
0x1695   :  { %v14912_v53 = vpack.i.bf16 %v14906_v51, %v14908_v52 }
0x1697   :  { %13258 = vrot.lane.b32.xlu0 %v14912_v53, %s14234_s1 }
0x1701   :  { %v13254_v55 = vpop.permute.xlu1 %13253 }
0x1702   :  { %v13256_v56 = vunpack.i.h.bf16 %v13254_v55  ;;  %v13255_v62 = vunpack.i.l.bf16 %v13254_v55 }
0x1704   :  { %v12523_v3 = vpack.c.bf16 %v13256_v56, %v13255_v62 }
0x1706   :  { %12525 = vmatprep.subr.msk.bf16.mxu1 %vm14356_vm3, %v12523_v3 }
0x1707   :  { %12528 = vmatpush3.bf16.xpose.msk.msra.mxu1 %vm14356_vm3, %v12523_v3 }
0x1709   :  { %v13259_v27 = vpop.permute.xlu0 %13258 }
0x170a   :  { %v13261_v32 = vunpack.i.h.bf16 %v13259_v27  ;;  %v13260_v21 = vunpack.i.l.bf16 %v13259_v27 }
0x170c   :  { %v12529_v22 = vpack.c.bf16 %v13261_v32, %v13260_v21 }
0x170e   :  { %12531 = vmatprep.subr.msk.bf16.mxu1 %vm14356_vm3, %v12529_v22 }
0x170f   :  { %12534 = vmatpush3.bf16.xpose.msk.msra.mxu1 %vm14356_vm3, %v12529_v22 }
0x1716   :  { %11612 = vmatmul.mubr.msk.f32.vlgmr.msra.gmra.mrb[40].mxu1 %vm161_vm1, %v14894_v18 }
0x1717   :  { %11614 = vmatprep.mubr.msk.f32.mxu1 %vm161_vm1, %v14908_v52 }
0x171a   :  { %11615 = vmatmul.mubr.msk.f32.gmra.mrb[42].mxu1 %vm161_vm1, %v14906_v51 }
0x17e9   :  { %v11613_v23 = vpop.f32.mrb[40].mxu1 }
0x17ea   :  { %v2833_v25 = vmul.f32 0.5, %v11613_v23  ;;  %v2813_v0 = vpop.f32.mrb[41].mxu1 }
0x17eb   :  { %v2832_v57 = vmul.f32 0.5, %v2813_v0 }
0x17ec   :  { %v2837_v58 = vadd.f32 %v2833_v25, %v14375_v46 }
0x17ed   :  { %v2836_v63 = vadd.f32 %v2832_v57, %v14375_v46  ;;  %v11616_v59 = vpop.f32.mrb[42].mxu1 }
0x17ee   :  { %v2835_v60 = vmul.f32 0.5, %v11616_v59  ;;  %v2823_v38 = vpop.f32.mrb[43].mxu1  ;;  %v2843_v39 = vsel %vm51_vm0, %v2837_v58, -inf }
0x17ef   :  { %v2834_v41 = vmul.f32 0.5, %v2823_v38  ;;  %2844 = vmax.xlane.f32.xlu0 %v2843_v39  ;;  %v2840_v42 = vsel %vm51_vm0, %v2836_v63, -inf }
0x17f0   :  { %v2839_v19 = vadd.f32 %v2835_v60, %v14379_v54  ;;  %2841 = vmax.xlane.f32.xlu1 %v2840_v42 }
0x17f1   :  { %v2838_v20 = vadd.f32 %v2834_v41, %v14379_v54 }
0x17f2   :  { %v2849_v28 = vsel %vm51_vm0, %v2839_v19, -inf }
0x17f3   :  { %v2846_v30 = vsel %vm51_vm0, %v2838_v20, -inf }
0x17f4   :  { %2850 = vmax.xlane.f32.xlu1 %v2849_v28  ;;  %2847 = vmax.xlane.f32.xlu0 %v2846_v30 }
0x1805   :  { %13268 = vrot.lane.b32.xlu1 %v14912_v53, %s14237_s11 }
0x180a   :  { %13263 = vrot.lane.b32.xlu0 %v14902_v44, %s14237_s11 }
0x187c   :  { %v2845_v34 = vpop.xlane.xlu0 %2844 }
0x187d   :  { %v2853_v35 = vsub.f32 %v2837_v58, %v2845_v34  ;;  %v2842_v36 = vpop.xlane.xlu1 %2841 }
0x187e   :  { %v2852_v37 = vsub.f32 %v2836_v63, %v2842_v36 }
0x187f   :  { %v2858_v48 = vmul.f32 1.442695, %v2853_v35 }
0x1880   :  { %v2856_v2 = vmul.f32 1.442695, %v2852_v37 }
0x1881   :  { %13850 = vpow2.f32 %v2858_v48  ;;  %v2851_v49 = vpop.xlane.xlu1 %2850  ;;  %v2848_v61 = vpop.xlane.xlu0 %2847 }
0x1882   :  { %13852 = vpow2.f32 %v2856_v2  ;;  %v2854_v1 = vsub.f32 %v2838_v20, %v2848_v61  ;;  %v2855_v15 = vsub.f32 %v2839_v19, %v2851_v49 }
0x1884   :  { %v2860_v4 = vmul.f32 1.442695, %v2854_v1  ;;  %v2862_v16 = vmul.f32 1.442695, %v2855_v15 }
0x1885   :  { %v13269_v24 = vpop.permute.xlu1 %13268  ;;  %v13264_v5 = vpop.permute.xlu0 %13263 }
0x1886   :  { %v13266_v6 = vunpack.i.h.bf16 %v13264_v5  ;;  %13854 = vpow2.f32 %v2860_v4  ;;  %v13271_v7 = vunpack.i.h.bf16 %v13269_v24  ;;  %v13270_v29 = vunpack.i.l.bf16 %v13269_v24 }
0x1887   :  { %v13265_v8 = vunpack.i.l.bf16 %v13264_v5  ;;  %13856 = vpow2.f32 %v2862_v16 }
0x1888   :  { %v12539_v26 = vpack.c.bf16 %v13271_v7, %v13270_v29 }
0x1889   :  { %v12535_v9 = vpack.c.bf16 %v13266_v6, %v13265_v8 }
0x188b   :  { %v13851_v10 = vpop.eup %13850  ;;  %12536 = vmatprep.subr.bf16.mxu0 %v12535_v9 }
0x188c   :  { %v13853_v11 = vpop.eup %13852  ;;  %12538 = vmatpush3.bf16.msra.mxu0 %v12535_v9  ;;  %v2867_v12 = vsel %vm51_vm0, %v13851_v10, 0.0 }
0x188d   :  { %12540 = vmatprep.subr.bf16.mxu0 %v12539_v26  ;;  %2868 = vadd.xlane.f32.xlu1 %v2867_v12  ;;  %v2864_v31 = vsel %vm51_vm0, %v13853_v11, 0.0 }
0x188e   :  { %2865 = vadd.xlane.f32.xlu0 %v2864_v31 }
0x1890   :  { %12542 = vmatpush3.bf16.msra.mxu0 %v12539_v26  ;;  %v13855_v13 = vpop.eup %13854 }
0x1891   :  { %v2870_v14 = vsel %vm51_vm0, %v13855_v13, 0.0  ;;  %v13857_v17 = vpop.eup %13856 }
0x1892   :  { %2871 = vadd.xlane.f32.xlu0 %v2870_v14  ;;  %v2873_v50 = vsel %vm51_vm0, %v13857_v17, 0.0 }
0x189e   :  { %13273 = vrot.lane.b32.xlu1 %v14902_v44, %s14238_s12 }
0x18a8   :  { %13278 = vrot.lane.b32.xlu0 %v14912_v53, %s14238_s12 }
0x18ac   :  { %2995 = vrot.lane.b32.xlu0 %v14894_v18, %s14239_s13 }
0x18b0   :  { %2999 = vrot.lane.b32.xlu0 %v14906_v51, %s14239_s13 }
0x18c2   :  { %2874 = vadd.xlane.f32.xlu1 %v2873_v50 }
0x18d3   :  { %2993 = vrot.lane.b32.xlu1 %v14896_v43, %s14239_s13 }
0x18d7   :  { %2997 = vrot.lane.b32.xlu1 %v14908_v52, %s14239_s13 }
0x191a   :  { %v2869_v45 = vpop.xlane.xlu1 %2868 }
0x191b   :  { %13858 = vrcp.f32 %v2869_v45  ;;  %v2866_v47 = vpop.xlane.xlu0 %2865 }
0x191c   :  { %13860 = vrcp.f32 %v2866_v47 }
0x191e   :  { %v13274_v55 = vpop.permute.xlu1 %13273 }
0x191f   :  { %v13276_v56 = vunpack.i.h.bf16 %v13274_v55  ;;  %v13275_v62 = vunpack.i.l.bf16 %v13274_v55  ;;  %v2872_v3 = vpop.xlane.xlu0 %2871 }
0x1920   :  { %13862 = vrcp.f32 %v2872_v3 }
0x1921   :  { %v12543_v27 = vpack.c.bf16 %v13276_v56, %v13275_v62 }
0x1923   :  { %12545 = vmatprep.subr.msk.bf16.mxu0 %vm14356_vm3, %v12543_v27  ;;  %v13279_v32 = vpop.permute.xlu0 %13278 }
0x1924   :  { %v13281_v23 = vunpack.i.h.bf16 %v13279_v32  ;;  %v13280_v25 = vunpack.i.l.bf16 %v13279_v32 }
0x1925   :  { %v13859_v21 = vpop.eup %13858 }
0x1926   :  { %v13861_v22 = vpop.eup %13860  ;;  %v2881_v57 = vmul.f32 %v13859_v21, %v13851_v10  ;;  %v12549_v58 = vpack.c.bf16 %v13281_v23, %v13280_v25 }
0x1927   :  { %v2880_v0 = vmul.f32 %v13861_v22, %v13853_v11  ;;  %v2996_v42 = vpop.permute.xlu0 %2995 }
0x1929   :  { %11625 = vmatprep.mubr.msk.f32.mxu0 %vm51_vm0, %v2880_v0 }
0x192a   :  { %11626 = vmatmul.mubr.msk.f32.vlgmr.msra.gmra.mrb[36].mxu0 %vm51_vm0, %v2881_v57  ;;  %v13863_v63 = vpop.eup %13862 }
0x192b   :  { %12548 = vmatpush3.bf16.xpose.msk.msra.mxu0 %vm14356_vm3, %v12543_v27  ;;  %v2882_v59 = vmul.f32 %v13863_v63, %v13855_v13  ;;  %v3000_v20 = vpop.permute.xlu0 %2999 }
0x192c   :  { %12551 = vmatprep.subr.msk.bf16.mxu0 %vm14356_vm3, %v12549_v58 }
0x192d   :  { %11628 = vmatprep.mubr.msk.f32.mxu0 %vm51_vm0, %v2882_v59 }
0x1933   :  { %12554 = vmatpush3.bf16.xpose.msk.msra.mxu0 %vm14356_vm3, %v12549_v58 }
0x194f   :  { %v2875_v60 = vpop.xlane.xlu1 %2874 }
0x1950   :  { %13864 = vrcp.f32 %v2875_v60 }
0x1953   :  { %v2994_v39 = vpop.permute.xlu1 %2993 }
0x1957   :  { %v2998_v19 = vpop.permute.xlu1 %2997 }
0x195a   :  { %v13865_v38 = vpop.eup %13864 }
0x195b   :  { %v2883_v41 = vmul.f32 %v13865_v38, %v13857_v17 }
0x195d   :  { %11629 = vmatmul.mubr.msk.f32.gmra.mrb[38].mxu0 %vm51_vm0, %v2883_v41 }
0x195e   :  { %11639 = vmatprep.mubr.msk.f32.mxu0 %vm161_vm1, %v2994_v39 }
0x1961   :  { %11640 = vmatmul.mubr.msk.f32.vlgmr.msra.gmra.mrb[40].mxu0 %vm161_vm1, %v2996_v42 }
0x1962   :  { %11642 = vmatprep.mubr.msk.f32.mxu0 %vm161_vm1, %v2998_v19 }
0x1965   :  { %11643 = vmatmul.mubr.msk.f32.gmra.mrb[42].mxu0 %vm161_vm1, %v3000_v20 }
0x19fd   :  { %v14974_v28 = vpop.f32.mrb[36].mxu0 }
0x19fe   :  { %v14976_v30 = vpop.f32.mrb[37].mxu0 }
0x1a30   :  { %v14978_v34 = vpop.f32.mrb[38].mxu0 }
0x1a31   :  { %v14980_v35 = vpop.f32.mrb[39].mxu0 }
0x1a34   :  { %v11641_v36 = vpop.f32.mrb[40].mxu0 }
0x1a35   :  { %v3111_v37 = vmul.f32 0.5, %v11641_v36  ;;  %v3091_v48 = vpop.f32.mrb[41].mxu0 }
0x1a36   :  { %v3110_v2 = vmul.f32 0.5, %v3091_v48 }
0x1a37   :  { %v3115_v49 = vadd.f32 %v3111_v37, %v14375_v46 }
0x1a38   :  { %v3114_v61 = vadd.f32 %v3110_v2, %v14375_v46  ;;  %v11644_v1 = vpop.f32.mrb[42].mxu0 }
0x1a39   :  { %v3113_v4 = vmul.f32 0.5, %v11644_v1  ;;  %v3101_v24 = vpop.f32.mrb[43].mxu0  ;;  %v3121_v5 = vsel %vm51_vm0, %v3115_v49, -inf }
0x1a3a   :  { %v3112_v6 = vmul.f32 0.5, %v3101_v24  ;;  %3122 = vmax.xlane.f32.xlu0 %v3121_v5  ;;  %v3118_v7 = vsel %vm51_vm0, %v3114_v61, -inf }
0x1a3b   :  { %v3117_v29 = vadd.f32 %v3113_v4, %v14379_v54  ;;  %3119 = vmax.xlane.f32.xlu1 %v3118_v7 }
0x1a3c   :  { %v3116_v8 = vadd.f32 %v3112_v6, %v14379_v54 }
0x1a3d   :  { %v3127_v9 = vsel %vm51_vm0, %v3117_v29, -inf }
0x1a3e   :  { %v3124_v10 = vsel %vm51_vm0, %v3116_v8, -inf }
0x1a3f   :  { %3128 = vmax.xlane.f32.xlu1 %v3127_v9  ;;  %3125 = vmax.xlane.f32.xlu0 %v3124_v10 }
0x1a50   :  { %13288 = vrot.lane.b32.xlu1 %v14912_v53, %s14240_s14 }
0x1a55   :  { %13283 = vrot.lane.b32.xlu0 %v14902_v44, %s14240_s14 }
0x1ac7   :  { %v3123_v26 = vpop.xlane.xlu0 %3122 }
0x1ac8   :  { %v3131_v11 = vsub.f32 %v3115_v49, %v3123_v26  ;;  %v3120_v12 = vpop.xlane.xlu1 %3119 }
0x1ac9   :  { %v3130_v31 = vsub.f32 %v3114_v61, %v3120_v12 }
0x1aca   :  { %v3136_v13 = vmul.f32 1.442695, %v3131_v11 }
0x1acb   :  { %v3134_v14 = vmul.f32 1.442695, %v3130_v31 }
0x1acc   :  { %13866 = vpow2.f32 %v3136_v13  ;;  %v3129_v15 = vpop.xlane.xlu1 %3128  ;;  %v3126_v16 = vpop.xlane.xlu0 %3125 }
0x1acd   :  { %13868 = vpow2.f32 %v3134_v14  ;;  %v3132_v17 = vsub.f32 %v3116_v8, %v3126_v16  ;;  %v3133_v58 = vsub.f32 %v3117_v29, %v3129_v15 }
0x1acf   :  { %v3138_v50 = vmul.f32 1.442695, %v3132_v17  ;;  %v3140_v63 = vmul.f32 1.442695, %v3133_v58 }
0x1ad0   :  { %v13289_v45 = vpop.permute.xlu1 %13288  ;;  %v13284_v47 = vpop.permute.xlu0 %13283 }
0x1ad1   :  { %v13286_v55 = vunpack.i.h.bf16 %v13284_v47  ;;  %13870 = vpow2.f32 %v3138_v50  ;;  %v13291_v56 = vunpack.i.h.bf16 %v13289_v45  ;;  %v13290_v62 = vunpack.i.l.bf16 %v13289_v45 }
0x1ad2   :  { %v13285_v3 = vunpack.i.l.bf16 %v13284_v47  ;;  %13872 = vpow2.f32 %v3140_v63 }
0x1ad3   :  { %v12559_v21 = vpack.c.bf16 %v13291_v56, %v13290_v62 }
0x1ad4   :  { %v12555_v27 = vpack.c.bf16 %v13286_v55, %v13285_v3 }
0x1ad6   :  { %v13867_v32 = vpop.eup %13866  ;;  %12556 = vmatprep.subr.bf16.mxu1 %v12555_v27 }
0x1ad7   :  { %v13869_v22 = vpop.eup %13868  ;;  %12558 = vmatpush3.bf16.msra.mxu1 %v12555_v27  ;;  %v3145_v23 = vsel %vm51_vm0, %v13867_v32, 0.0 }
0x1ad8   :  { %12560 = vmatprep.subr.bf16.mxu1 %v12559_v21  ;;  %3146 = vadd.xlane.f32.xlu1 %v3145_v23  ;;  %v3142_v25 = vsel %vm51_vm0, %v13869_v22, 0.0 }
0x1ad9   :  { %3143 = vadd.xlane.f32.xlu0 %v3142_v25 }
0x1adb   :  { %12562 = vmatpush3.bf16.msra.mxu1 %v12559_v21  ;;  %v13871_v0 = vpop.eup %13870 }
0x1adc   :  { %v3148_v57 = vsel %vm51_vm0, %v13871_v0, 0.0  ;;  %v13873_v59 = vpop.eup %13872 }
0x1add   :  { %3149 = vadd.xlane.f32.xlu0 %v3148_v57  ;;  %v3151_v60 = vsel %vm51_vm0, %v13873_v59, 0.0 }
0x1ae9   :  { %13293 = vrot.lane.b32.xlu1 %v14902_v44, %s14241_s15 }
0x1af3   :  { %13298 = vrot.lane.b32.xlu0 %v14912_v53, %s14241_s15 }
0x1af7   :  { %3273 = vrot.lane.b32.xlu0 %v14894_v18, %s14242_s16 }
0x1afb   :  { %3277 = vrot.lane.b32.xlu0 %v14906_v51, %s14242_s16 }
0x1b0d   :  { %3152 = vadd.xlane.f32.xlu1 %v3151_v60 }
0x1b1e   :  { %3271 = vrot.lane.b32.xlu1 %v14896_v43, %s14242_s16 }
0x1b22   :  { %3275 = vrot.lane.b32.xlu1 %v14908_v52, %s14242_s16 }
0x1b65   :  { %v3147_v38 = vpop.xlane.xlu1 %3146 }
0x1b66   :  { %13874 = vrcp.f32 %v3147_v38  ;;  %v3144_v39 = vpop.xlane.xlu0 %3143 }
0x1b67   :  { %13876 = vrcp.f32 %v3144_v39 }
0x1b69   :  { %v13294_v41 = vpop.permute.xlu1 %13293 }
0x1b6a   :  { %v13296_v42 = vunpack.i.h.bf16 %v13294_v41  ;;  %v13295_v19 = vunpack.i.l.bf16 %v13294_v41  ;;  %v3150_v20 = vpop.xlane.xlu0 %3149 }
0x1b6b   :  { %13878 = vrcp.f32 %v3150_v20 }
0x1b6c   :  { %v12563_v36 = vpack.c.bf16 %v13296_v42, %v13295_v19 }
0x1b6e   :  { %12565 = vmatprep.subr.msk.bf16.mxu1 %vm14356_vm3, %v12563_v36  ;;  %v13299_v37 = vpop.permute.xlu0 %13298 }
0x1b6f   :  { %v13301_v49 = vunpack.i.h.bf16 %v13299_v37  ;;  %v13300_v61 = vunpack.i.l.bf16 %v13299_v37 }
0x1b70   :  { %v13875_v48 = vpop.eup %13874 }
0x1b71   :  { %v13877_v2 = vpop.eup %13876  ;;  %v3159_v4 = vmul.f32 %v13875_v48, %v13867_v32  ;;  %v12569_v24 = vpack.c.bf16 %v13301_v49, %v13300_v61 }
0x1b72   :  { %v3158_v1 = vmul.f32 %v13877_v2, %v13869_v22  ;;  %v3274_v10 = vpop.permute.xlu0 %3273 }
0x1b74   :  { %11653 = vmatprep.mubr.msk.f32.mxu1 %vm51_vm0, %v3158_v1 }
0x1b75   :  { %11654 = vmatmul.mubr.msk.f32.vlgmr.msra.gmra.mrb[44].mxu1 %vm51_vm0, %v3159_v4  ;;  %v13879_v5 = vpop.eup %13878 }
0x1b76   :  { %12568 = vmatpush3.bf16.xpose.msk.msra.mxu1 %vm14356_vm3, %v12563_v36  ;;  %v3160_v6 = vmul.f32 %v13879_v5, %v13871_v0  ;;  %v3278_v11 = vpop.permute.xlu0 %3277 }
0x1b77   :  { %12571 = vmatprep.subr.msk.bf16.mxu1 %vm14356_vm3, %v12569_v24 }
0x1b78   :  { %11656 = vmatprep.mubr.msk.f32.mxu1 %vm51_vm0, %v3160_v6 }
0x1b7e   :  { %12574 = vmatpush3.bf16.xpose.msk.msra.mxu1 %vm14356_vm3, %v12569_v24 }
0x1b9a   :  { %v3153_v7 = vpop.xlane.xlu1 %3152 }
0x1b9b   :  { %13880 = vrcp.f32 %v3153_v7 }
0x1b9e   :  { %v3272_v8 = vpop.permute.xlu1 %3271 }
0x1ba2   :  { %v3276_v26 = vpop.permute.xlu1 %3275 }
0x1ba5   :  { %v13881_v29 = vpop.eup %13880 }
0x1ba6   :  { %v3161_v9 = vmul.f32 %v13881_v29, %v13873_v59 }
0x1ba8   :  { %11657 = vmatmul.mubr.msk.f32.gmra.mrb[46].mxu1 %vm51_vm0, %v3161_v9 }
0x1ba9   :  { %11667 = vmatprep.mubr.msk.f32.mxu1 %vm161_vm1, %v3272_v8 }
0x1bac   :  { %11668 = vmatmul.mubr.msk.f32.vlgmr.msra.gmra.mrb[48].mxu1 %vm161_vm1, %v3274_v10 }
0x1bad   :  { %11670 = vmatprep.mubr.msk.f32.mxu1 %vm161_vm1, %v3276_v26 }
0x1bb0   :  { %11671 = vmatmul.mubr.msk.f32.gmra.mrb[50].mxu1 %vm161_vm1, %v3278_v11 }
0x1c48   :  { %v15026_v12 = vpop.f32.mrb[44].mxu1 }
0x1c49   :  { %v15028_v31 = vpop.f32.mrb[45].mxu1 }
0x1c7b   :  { %v15030_v13 = vpop.f32.mrb[46].mxu1 }
0x1c7c   :  { %v15032_v14 = vpop.f32.mrb[47].mxu1 }
0x1c7f   :  { %v11669_v15 = vpop.f32.mrb[48].mxu1 }
0x1c80   :  { %v3389_v16 = vmul.f32 0.5, %v11669_v15  ;;  %v3369_v17 = vpop.f32.mrb[49].mxu1 }
0x1c81   :  { %v3388_v50 = vmul.f32 0.5, %v3369_v17 }
0x1c82   :  { %v3393_v45 = vadd.f32 %v3389_v16, %v14375_v46 }
0x1c83   :  { %v3392_v47 = vadd.f32 %v3388_v50, %v14375_v46  ;;  %v11672_v55 = vpop.f32.mrb[50].mxu1 }
0x1c84   :  { %v3391_v56 = vmul.f32 0.5, %v11672_v55  ;;  %v3379_v62 = vpop.f32.mrb[51].mxu1  ;;  %v3399_v3 = vsel %vm51_vm0, %v3393_v45, -inf }
0x1c85   :  { %v3390_v27 = vmul.f32 0.5, %v3379_v62  ;;  %3400 = vmax.xlane.f32.xlu0 %v3399_v3  ;;  %v3396_v32 = vsel %vm51_vm0, %v3392_v47, -inf }
0x1c86   :  { %v3395_v21 = vadd.f32 %v3391_v56, %v14379_v54  ;;  %3397 = vmax.xlane.f32.xlu1 %v3396_v32 }
0x1c87   :  { %v3394_v22 = vadd.f32 %v3390_v27, %v14379_v54 }
0x1c88   :  { %v3405_v23 = vsel %vm51_vm0, %v3395_v21, -inf }
0x1c89   :  { %v3402_v25 = vsel %vm51_vm0, %v3394_v22, -inf }
0x1c8a   :  { %3406 = vmax.xlane.f32.xlu1 %v3405_v23  ;;  %3403 = vmax.xlane.f32.xlu0 %v3402_v25 }
0x1c9b   :  { %13308 = vrot.lane.b32.xlu1 %v14912_v53, %s14243_s17 }
0x1ca0   :  { %13303 = vrot.lane.b32.xlu0 %v14902_v44, %s14243_s17 }
0x1d12   :  { %v3401_v0 = vpop.xlane.xlu0 %3400 }
0x1d13   :  { %v3409_v57 = vsub.f32 %v3393_v45, %v3401_v0  ;;  %v3398_v58 = vpop.xlane.xlu1 %3397 }
0x1d14   :  { %v3408_v63 = vsub.f32 %v3392_v47, %v3398_v58 }
0x1d15   :  { %v3414_v59 = vmul.f32 1.442695, %v3409_v57 }
0x1d16   :  { %v3412_v60 = vmul.f32 1.442695, %v3408_v63 }
0x1d17   :  { %13882 = vpow2.f32 %v3414_v59  ;;  %v3407_v38 = vpop.xlane.xlu1 %3406  ;;  %v3404_v39 = vpop.xlane.xlu0 %3403 }
0x1d18   :  { %13884 = vpow2.f32 %v3412_v60  ;;  %v3410_v41 = vsub.f32 %v3394_v22, %v3404_v39  ;;  %v3411_v29 = vsub.f32 %v3395_v21, %v3407_v38 }
0x1d1a   :  { %v3416_v42 = vmul.f32 1.442695, %v3410_v41  ;;  %v3418_v8 = vmul.f32 1.442695, %v3411_v29 }
0x1d1b   :  { %v13309_v19 = vpop.permute.xlu1 %13308  ;;  %v13304_v20 = vpop.permute.xlu0 %13303 }
0x1d1c   :  { %v13306_v36 = vunpack.i.h.bf16 %v13304_v20  ;;  %13886 = vpow2.f32 %v3416_v42  ;;  %v13311_v37 = vunpack.i.h.bf16 %v13309_v19  ;;  %v13310_v48 = vunpack.i.l.bf16 %v13309_v19 }
0x1d1d   :  { %v13305_v2 = vunpack.i.l.bf16 %v13304_v20  ;;  %13888 = vpow2.f32 %v3418_v8 }
0x1d1e   :  { %v12579_v1 = vpack.c.bf16 %v13311_v37, %v13310_v48 }
0x1d1f   :  { %v12575_v49 = vpack.c.bf16 %v13306_v36, %v13305_v2 }
0x1d21   :  { %v13883_v61 = vpop.eup %13882  ;;  %12576 = vmatprep.subr.bf16.mxu0 %v12575_v49 }
0x1d22   :  { %v13885_v4 = vpop.eup %13884  ;;  %12578 = vmatpush3.bf16.msra.mxu0 %v12575_v49  ;;  %v3423_v24 = vsel %vm51_vm0, %v13883_v61, 0.0 }
0x1d23   :  { %12580 = vmatprep.subr.bf16.mxu0 %v12579_v1  ;;  %3424 = vadd.xlane.f32.xlu1 %v3423_v24  ;;  %v3420_v5 = vsel %vm51_vm0, %v13885_v4, 0.0 }
0x1d24   :  { %3421 = vadd.xlane.f32.xlu0 %v3420_v5 }
0x1d26   :  { %12582 = vmatpush3.bf16.msra.mxu0 %v12579_v1  ;;  %v13887_v6 = vpop.eup %13886 }
0x1d27   :  { %v3426_v7 = vsel %vm51_vm0, %v13887_v6, 0.0  ;;  %v13889_v9 = vpop.eup %13888 }
0x1d28   :  { %3427 = vadd.xlane.f32.xlu0 %v3426_v7  ;;  %v3429_v10 = vsel %vm51_vm0, %v13889_v9, 0.0 }
0x1d34   :  { %13313 = vrot.lane.b32.xlu1 %v14902_v44, %s14244_s18 }
0x1d3e   :  { %13318 = vrot.lane.b32.xlu0 %v14912_v53, %s14244_s18 }
0x1d42   :  { %3551 = vrot.lane.b32.xlu0 %v14894_v18, %s14245_s19 }
0x1d46   :  { %3555 = vrot.lane.b32.xlu0 %v14906_v51, %s14245_s19 }
0x1d58   :  { %3430 = vadd.xlane.f32.xlu1 %v3429_v10 }
0x1d69   :  { %3549 = vrot.lane.b32.xlu1 %v14896_v43, %s14245_s19 }
0x1d6d   :  { %3553 = vrot.lane.b32.xlu1 %v14908_v52, %s14245_s19 }
0x1db0   :  { %v3425_v26 = vpop.xlane.xlu1 %3424 }
0x1db1   :  { %13890 = vrcp.f32 %v3425_v26  ;;  %v3422_v11 = vpop.xlane.xlu0 %3421 }
0x1db2   :  { %13892 = vrcp.f32 %v3422_v11 }
0x1db4   :  { %v13314_v15 = vpop.permute.xlu1 %13313 }
0x1db5   :  { %v13316_v16 = vunpack.i.h.bf16 %v13314_v15  ;;  %v13315_v17 = vunpack.i.l.bf16 %v13314_v15  ;;  %v3428_v50 = vpop.xlane.xlu0 %3427 }
0x1db6   :  { %13894 = vrcp.f32 %v3428_v50 }
0x1db7   :  { %v12583_v45 = vpack.c.bf16 %v13316_v16, %v13315_v17 }
0x1db9   :  { %12585 = vmatprep.subr.msk.bf16.mxu0 %vm14356_vm3, %v12583_v45  ;;  %v13319_v47 = vpop.permute.xlu0 %13318 }
0x1dba   :  { %v13321_v62 = vunpack.i.h.bf16 %v13319_v47  ;;  %v13320_v3 = vunpack.i.l.bf16 %v13319_v47 }
0x1dbb   :  { %v13891_v55 = vpop.eup %13890 }
0x1dbc   :  { %v13893_v56 = vpop.eup %13892  ;;  %v3437_v32 = vmul.f32 %v13891_v55, %v13883_v61  ;;  %v12589_v21 = vpack.c.bf16 %v13321_v62, %v13320_v3 }
0x1dbd   :  { %v3436_v27 = vmul.f32 %v13893_v56, %v13885_v4  ;;  %v3552_v63 = vpop.permute.xlu0 %3551 }
0x1dbf   :  { %11681 = vmatprep.mubr.msk.f32.mxu0 %vm51_vm0, %v3436_v27 }
0x1dc0   :  { %11682 = vmatmul.mubr.msk.f32.vlgmr.msra.gmra.mrb[44].mxu0 %vm51_vm0, %v3437_v32  ;;  %v13895_v22 = vpop.eup %13894 }
0x1dc1   :  { %12588 = vmatpush3.bf16.xpose.msk.msra.mxu0 %vm14356_vm3, %v12583_v45  ;;  %v3438_v23 = vmul.f32 %v13895_v22, %v13887_v6  ;;  %v3556_v60 = vpop.permute.xlu0 %3555 }
0x1dc2   :  { %12591 = vmatprep.subr.msk.bf16.mxu0 %vm14356_vm3, %v12589_v21 }
0x1dc3   :  { %11684 = vmatprep.mubr.msk.f32.mxu0 %vm51_vm0, %v3438_v23 }
0x1dc9   :  { %12594 = vmatpush3.bf16.xpose.msk.msra.mxu0 %vm14356_vm3, %v12589_v21 }
0x1de5   :  { %v3431_v25 = vpop.xlane.xlu1 %3430 }
0x1de6   :  { %13896 = vrcp.f32 %v3431_v25 }
0x1de9   :  { %v3550_v57 = vpop.permute.xlu1 %3549 }
0x1ded   :  { %v3554_v59 = vpop.permute.xlu1 %3553 }
0x1df0   :  { %v13897_v0 = vpop.eup %13896 }
0x1df1   :  { %v3439_v58 = vmul.f32 %v13897_v0, %v13889_v9 }
0x1df3   :  { %11685 = vmatmul.mubr.msk.f32.gmra.mrb[46].mxu0 %vm51_vm0, %v3439_v58 }
0x1df4   :  { %11695 = vmatprep.mubr.msk.f32.mxu0 %vm161_vm1, %v3550_v57 }
0x1df7   :  { %11696 = vmatmul.mubr.msk.f32.vlgmr.msra.gmra.mrb[48].mxu0 %vm161_vm1, %v3552_v63 }
0x1df8   :  { %11698 = vmatprep.mubr.msk.f32.mxu0 %vm161_vm1, %v3554_v59 }
0x1dfb   :  { %11699 = vmatmul.mubr.msk.f32.gmra.mrb[50].mxu0 %vm161_vm1, %v3556_v60 }
0x1e93   :  { %v15078_v38 = vpop.f32.mrb[44].mxu0 }
0x1e94   :  { %v15080_v39 = vpop.f32.mrb[45].mxu0 }
0x1ec6   :  { %v15082_v41 = vpop.f32.mrb[46].mxu0 }
0x1ec7   :  { %v15084_v42 = vpop.f32.mrb[47].mxu0 }
0x1eca   :  { %v11697_v19 = vpop.f32.mrb[48].mxu0 }
0x1ecb   :  { %v3667_v20 = vmul.f32 0.5, %v11697_v19  ;;  %v3647_v36 = vpop.f32.mrb[49].mxu0 }
0x1ecc   :  { %v3666_v37 = vmul.f32 0.5, %v3647_v36 }
0x1ecd   :  { %v3671_v48 = vadd.f32 %v3667_v20, %v14375_v46 }
0x1ece   :  { %v3670_v2 = vadd.f32 %v3666_v37, %v14375_v46  ;;  %v11700_v49 = vpop.f32.mrb[50].mxu0 }
0x1ecf   :  { %v3669_v61 = vmul.f32 0.5, %v11700_v49  ;;  %v3657_v1 = vpop.f32.mrb[51].mxu0  ;;  %v3677_v4 = vsel %vm51_vm0, %v3671_v48, -inf }
0x1ed0   :  { %v3668_v24 = vmul.f32 0.5, %v3657_v1  ;;  %3678 = vmax.xlane.f32.xlu0 %v3677_v4  ;;  %v3674_v5 = vsel %vm51_vm0, %v3670_v2, -inf }
0x1ed1   :  { %v3673_v6 = vadd.f32 %v3669_v61, %v14379_v54  ;;  %3675 = vmax.xlane.f32.xlu1 %v3674_v5 }
0x1ed2   :  { %v3672_v7 = vadd.f32 %v3668_v24, %v14379_v54 }
0x1ed3   :  { %v3683_v29 = vsel %vm51_vm0, %v3673_v6, -inf }
0x1ed4   :  { %v3680_v8 = vsel %vm51_vm0, %v3672_v7, -inf }
0x1ed5   :  { %3684 = vmax.xlane.f32.xlu1 %v3683_v29  ;;  %3681 = vmax.xlane.f32.xlu0 %v3680_v8 }
0x1ee6   :  { %13328 = vrot.lane.b32.xlu1 %v14912_v53, %s14246_s20 }
0x1eeb   :  { %13323 = vrot.lane.b32.xlu0 %v14902_v44, %s14246_s20 }
0x1f5d   :  { %v3679_v9 = vpop.xlane.xlu0 %3678 }
0x1f5e   :  { %v3687_v10 = vsub.f32 %v3671_v48, %v3679_v9  ;;  %v3676_v26 = vpop.xlane.xlu1 %3675 }
0x1f5f   :  { %v3686_v11 = vsub.f32 %v3670_v2, %v3676_v26 }
0x1f60   :  { %v3692_v15 = vmul.f32 1.442695, %v3687_v10 }
0x1f61   :  { %v3690_v16 = vmul.f32 1.442695, %v3686_v11 }
0x1f62   :  { %13898 = vpow2.f32 %v3692_v15  ;;  %v3685_v17 = vpop.xlane.xlu1 %3684  ;;  %v3682_v50 = vpop.xlane.xlu0 %3681 }
0x1f63   :  { %13900 = vpow2.f32 %v3690_v16  ;;  %v3688_v45 = vsub.f32 %v3672_v7, %v3682_v50  ;;  %v3689_v59 = vsub.f32 %v3673_v6, %v3685_v17 }
0x1f65   :  { %v3694_v47 = vmul.f32 1.442695, %v3688_v45  ;;  %v3696_v60 = vmul.f32 1.442695, %v3689_v59 }
0x1f66   :  { %v13329_v55 = vpop.permute.xlu1 %13328  ;;  %v13324_v56 = vpop.permute.xlu0 %13323 }
0x1f67   :  { %v13326_v62 = vunpack.i.h.bf16 %v13324_v56  ;;  %13902 = vpow2.f32 %v3694_v47  ;;  %v13331_v3 = vunpack.i.h.bf16 %v13329_v55  ;;  %v13330_v27 = vunpack.i.l.bf16 %v13329_v55 }
0x1f68   :  { %v13325_v32 = vunpack.i.l.bf16 %v13324_v56  ;;  %13904 = vpow2.f32 %v3696_v60 }
0x1f69   :  { %v12599_v23 = vpack.c.bf16 %v13331_v3, %v13330_v27 }
0x1f6a   :  { %v12595_v21 = vpack.c.bf16 %v13326_v62, %v13325_v32 }
0x1f6c   :  { %v13899_v22 = vpop.eup %13898  ;;  %12596 = vmatprep.subr.bf16.mxu1 %v12595_v21 }
0x1f6d   :  { %v13901_v25 = vpop.eup %13900  ;;  %12598 = vmatpush3.bf16.msra.mxu1 %v12595_v21  ;;  %v3701_v0 = vsel %vm51_vm0, %v13899_v22, 0.0 }
0x1f6e   :  { %12600 = vmatprep.subr.bf16.mxu1 %v12599_v23  ;;  %3702 = vadd.xlane.f32.xlu1 %v3701_v0  ;;  %v3698_v57 = vsel %vm51_vm0, %v13901_v25, 0.0 }
0x1f6f   :  { %3699 = vadd.xlane.f32.xlu0 %v3698_v57 }
0x1f71   :  { %12602 = vmatpush3.bf16.msra.mxu1 %v12599_v23  ;;  %v13903_v58 = vpop.eup %13902 }
0x1f72   :  { %v3704_v63 = vsel %vm51_vm0, %v13903_v58, 0.0  ;;  %v13905_v19 = vpop.eup %13904 }
0x1f73   :  { %3705 = vadd.xlane.f32.xlu0 %v3704_v63  ;;  %v3707_v20 = vsel %vm51_vm0, %v13905_v19, 0.0 }
0x1f7f   :  { %13333 = vrot.lane.b32.xlu1 %v14902_v44, %s16680_s21 }
0x1f89   :  { %13338 = vrot.lane.b32.xlu0 %v14912_v53, %s16680_s21  ;;  %s16698_s21 = smov 72  }
0x1f8d   :  { %3829 = vrot.lane.b32.xlu0 %v14894_v18, %s16678_s22 }
0x1f91   :  { %3833 = vrot.lane.b32.xlu0 %v14906_v51, %s16678_s22 }
0x1fa3   :  { %3708 = vadd.xlane.f32.xlu1 %v3707_v20 }
0x1fb4   :  { %3827 = vrot.lane.b32.xlu1 %v14896_v43, %s16678_s22 }
0x1fb8   :  { %3831 = vrot.lane.b32.xlu1 %v14908_v52, %s16678_s22  ;;  %s16699_s22 = smov 104  }
0x1ffb   :  { %v3703_v36 = vpop.xlane.xlu1 %3702 }
0x1ffc   :  { %13906 = vrcp.f32 %v3703_v36  ;;  %v3700_v37 = vpop.xlane.xlu0 %3699 }
0x1ffd   :  { %13908 = vrcp.f32 %v3700_v37 }
0x1fff   :  { %v13334_v48 = vpop.permute.xlu1 %13333 }
0x2000   :  { %v13336_v2 = vunpack.i.h.bf16 %v13334_v48  ;;  %v13335_v49 = vunpack.i.l.bf16 %v13334_v48  ;;  %v3706_v61 = vpop.xlane.xlu0 %3705 }
0x2001   :  { %13910 = vrcp.f32 %v3706_v61 }
0x2002   :  { %v12603_v1 = vpack.c.bf16 %v13336_v2, %v13335_v49 }
0x2004   :  { %12605 = vmatprep.subr.msk.bf16.mxu1 %vm14356_vm3, %v12603_v1  ;;  %v13339_v4 = vpop.permute.xlu0 %13338 }
0x2005   :  { %v13341_v6 = vunpack.i.h.bf16 %v13339_v4  ;;  %v13340_v7 = vunpack.i.l.bf16 %v13339_v4 }
0x2006   :  { %v13907_v24 = vpop.eup %13906 }
0x2007   :  { %v13909_v5 = vpop.eup %13908  ;;  %v3715_v8 = vmul.f32 %v13907_v24, %v13899_v22  ;;  %v12609_v9 = vpack.c.bf16 %v13341_v6, %v13340_v7 }
0x2008   :  { %v3714_v29 = vmul.f32 %v13909_v5, %v13901_v25  ;;  %v3830_v50 = vpop.permute.xlu0 %3829 }
0x200a   :  { %11709 = vmatprep.mubr.msk.f32.mxu1 %vm51_vm0, %v3714_v29 }
0x200b   :  { %11710 = vmatmul.mubr.msk.f32.vlgmr.msra.gmra.mrb[52].mxu1 %vm51_vm0, %v3715_v8  ;;  %v13911_v10 = vpop.eup %13910 }
0x200c   :  { %12608 = vmatpush3.bf16.xpose.msk.msra.mxu1 %vm14356_vm3, %v12603_v1  ;;  %v3716_v26 = vmul.f32 %v13911_v10, %v13903_v58  ;;  %v3834_v47 = vpop.permute.xlu0 %3833 }
0x200d   :  { %12611 = vmatprep.subr.msk.bf16.mxu1 %vm14356_vm3, %v12609_v9 }
0x200e   :  { %11712 = vmatprep.mubr.msk.f32.mxu1 %vm51_vm0, %v3716_v26 }
0x2014   :  { %12614 = vmatpush3.bf16.xpose.msk.msra.mxu1 %vm14356_vm3, %v12609_v9 }
0x2030   :  { %v3709_v11 = vpop.xlane.xlu1 %3708 }
0x2031   :  { %13912 = vrcp.f32 %v3709_v11 }
0x2034   :  { %v3828_v16 = vpop.permute.xlu1 %3827 }
0x2038   :  { %v3832_v45 = vpop.permute.xlu1 %3831 }
0x203b   :  { %v13913_v15 = vpop.eup %13912 }
0x203c   :  { %v3717_v17 = vmul.f32 %v13913_v15, %v13905_v19 }
0x203e   :  { %11713 = vmatmul.mubr.msk.f32.gmra.mrb[54].mxu1 %vm51_vm0, %v3717_v17 }
0x203f   :  { %11723 = vmatprep.mubr.msk.f32.mxu1 %vm161_vm1, %v3828_v16 }
0x2042   :  { %11724 = vmatmul.mubr.msk.f32.vlgmr.msra.gmra.mrb[56].mxu1 %vm161_vm1, %v3830_v50 }
0x2043   :  { %11726 = vmatprep.mubr.msk.f32.mxu1 %vm161_vm1, %v3832_v45 }
0x2046   :  { %11727 = vmatmul.mubr.msk.f32.gmra.mrb[58].mxu1 %vm161_vm1, %v3834_v47 }
0x20de   :  { %v15130_v55 = vpop.f32.mrb[52].mxu1 }
0x20df   :  { %v15132_v56 = vpop.f32.mrb[53].mxu1 }
0x2111   :  { %v15134_v62 = vpop.f32.mrb[54].mxu1 }
0x2112   :  { %v15136_v3 = vpop.f32.mrb[55].mxu1 }
0x2115   :  { %v11725_v27 = vpop.f32.mrb[56].mxu1 }
0x2116   :  { %v3945_v32 = vmul.f32 0.5, %v11725_v27  ;;  %v3925_v21 = vpop.f32.mrb[57].mxu1 }
0x2117   :  { %v3944_v22 = vmul.f32 0.5, %v3925_v21 }
0x2118   :  { %v3949_v23 = vadd.f32 %v3945_v32, %v14375_v46 }
0x2119   :  { %v3948_v25 = vadd.f32 %v3944_v22, %v14375_v46  ;;  %v11728_v0 = vpop.f32.mrb[58].mxu1 }
0x211a   :  { %v3947_v57 = vmul.f32 0.5, %v11728_v0  ;;  %v3935_v58 = vpop.f32.mrb[59].mxu1  ;;  %v3955_v63 = vsel %vm51_vm0, %v3949_v23, -inf }
0x211b   :  { %v3946_v59 = vmul.f32 0.5, %v3935_v58  ;;  %3956 = vmax.xlane.f32.xlu0 %v3955_v63  ;;  %v3952_v60 = vsel %vm51_vm0, %v3948_v25, -inf }
0x211c   :  { %v3951_v19 = vadd.f32 %v3947_v57, %v14379_v54  ;;  %3953 = vmax.xlane.f32.xlu1 %v3952_v60 }
0x211d   :  { %v3950_v20 = vadd.f32 %v3946_v59, %v14379_v54 }
0x211e   :  { %v3961_v36 = vsel %vm51_vm0, %v3951_v19, -inf }
0x211f   :  { %v3958_v37 = vsel %vm51_vm0, %v3950_v20, -inf }
0x2120   :  { %3962 = vmax.xlane.f32.xlu1 %v3961_v36  ;;  %3959 = vmax.xlane.f32.xlu0 %v3958_v37 }
0x2131   :  { %13348 = vrot.lane.b32.xlu1 %v14912_v53, %s16676_s23 }
0x2136   :  { %13343 = vrot.lane.b32.xlu0 %v14902_v44, %s16676_s23  ;;  %s16700_s23 = smov 40  }
0x21a8   :  { %v3957_v48 = vpop.xlane.xlu0 %3956 }
0x21a9   :  { %v3965_v2 = vsub.f32 %v3949_v23, %v3957_v48  ;;  %v3954_v49 = vpop.xlane.xlu1 %3953 }
0x21aa   :  { %v3964_v61 = vsub.f32 %v3948_v25, %v3954_v49 }
0x21ab   :  { %v3970_v1 = vmul.f32 1.442695, %v3965_v2 }
0x21ac   :  { %v3968_v4 = vmul.f32 1.442695, %v3964_v61 }
0x21ad   :  { %13914 = vpow2.f32 %v3970_v1  ;;  %v3963_v24 = vpop.xlane.xlu1 %3962  ;;  %v3960_v5 = vpop.xlane.xlu0 %3959 }
0x21ae   :  { %13916 = vpow2.f32 %v3968_v4  ;;  %v3966_v6 = vsub.f32 %v3950_v20, %v3960_v5  ;;  %v3967_v21 = vsub.f32 %v3951_v19, %v3963_v24 }
0x21b0   :  { %v3972_v7 = vmul.f32 1.442695, %v3966_v6  ;;  %v3974_v22 = vmul.f32 1.442695, %v3967_v21 }
0x21b1   :  { %v13349_v29 = vpop.permute.xlu1 %13348  ;;  %v13344_v8 = vpop.permute.xlu0 %13343 }
0x21b2   :  { %v13346_v9 = vunpack.i.h.bf16 %v13344_v8  ;;  %13918 = vpow2.f32 %v3972_v7  ;;  %v13351_v10 = vunpack.i.h.bf16 %v13349_v29  ;;  %v13350_v26 = vunpack.i.l.bf16 %v13349_v29 }
0x21b3   :  { %v13345_v11 = vunpack.i.l.bf16 %v13344_v8  ;;  %13920 = vpow2.f32 %v3974_v22 }
0x21b4   :  { %v12619_v17 = vpack.c.bf16 %v13351_v10, %v13350_v26 }
0x21b5   :  { %v12615_v15 = vpack.c.bf16 %v13346_v9, %v13345_v11 }
0x21b7   :  { %v13915_v16 = vpop.eup %13914  ;;  %12616 = vmatprep.subr.bf16.mxu0 %v12615_v15 }
0x21b8   :  { %v13917_v50 = vpop.eup %13916  ;;  %12618 = vmatpush3.bf16.msra.mxu0 %v12615_v15  ;;  %v3979_v45 = vsel %vm51_vm0, %v13915_v16, 0.0 }
0x21b9   :  { %12620 = vmatprep.subr.bf16.mxu0 %v12619_v17  ;;  %3980 = vadd.xlane.f32.xlu1 %v3979_v45  ;;  %v3976_v47 = vsel %vm51_vm0, %v13917_v50, 0.0 }
0x21ba   :  { %3977 = vadd.xlane.f32.xlu0 %v3976_v47 }
0x21bc   :  { %12622 = vmatpush3.bf16.msra.mxu0 %v12619_v17  ;;  %v13919_v27 = vpop.eup %13918 }
0x21bd   :  { %v3982_v32 = vsel %vm51_vm0, %v13919_v27, 0.0  ;;  %v13921_v23 = vpop.eup %13920 }
0x21be   :  { %3983 = vadd.xlane.f32.xlu0 %v3982_v32  ;;  %v3985_v25 = vsel %vm51_vm0, %v13921_v23, 0.0 }
0x21ca   :  { %13353 = vrot.lane.b32.xlu1 %v14902_v44, %s16674_s24 }
0x21d4   :  { %13358 = vrot.lane.b32.xlu0 %v14912_v53, %s16674_s24 }
0x21d8   :  { %4107 = vrot.lane.b32.xlu0 %v14894_v18, %s16672_s25 }
0x21dc   :  { %4111 = vrot.lane.b32.xlu0 %v14906_v51, %s16672_s25 }
0x21ee   :  { %3986 = vadd.xlane.f32.xlu1 %v3985_v25 }
0x21ff   :  { %4105 = vrot.lane.b32.xlu1 %v14896_v43, %s16672_s25 }
0x2203   :  { %4109 = vrot.lane.b32.xlu1 %v14908_v52, %s16672_s25 }
0x2246   :  { %v3981_v0 = vpop.xlane.xlu1 %3980 }
0x2247   :  { %13922 = vrcp.f32 %v3981_v0  ;;  %v3978_v57 = vpop.xlane.xlu0 %3977 }
0x2248   :  { %13924 = vrcp.f32 %v3978_v57 }
0x224a   :  { %v13354_v58 = vpop.permute.xlu1 %13353 }
0x224b   :  { %v13356_v63 = vunpack.i.h.bf16 %v13354_v58  ;;  %v13355_v59 = vunpack.i.l.bf16 %v13354_v58  ;;  %v3984_v60 = vpop.xlane.xlu0 %3983 }
0x224c   :  { %13926 = vrcp.f32 %v3984_v60 }
0x224d   :  { %v12623_v19 = vpack.c.bf16 %v13356_v63, %v13355_v59 }
0x224f   :  { %12625 = vmatprep.subr.msk.bf16.mxu0 %vm14356_vm3, %v12623_v19  ;;  %v13359_v20 = vpop.permute.xlu0 %13358 }
0x2250   :  { %v13361_v48 = vunpack.i.h.bf16 %v13359_v20  ;;  %v13360_v2 = vunpack.i.l.bf16 %v13359_v20 }
0x2251   :  { %v13923_v36 = vpop.eup %13922 }
0x2252   :  { %v13925_v37 = vpop.eup %13924  ;;  %v3993_v61 = vmul.f32 %v13923_v36, %v13915_v16  ;;  %v12629_v1 = vpack.c.bf16 %v13361_v48, %v13360_v2 }
0x2253   :  { %v3992_v49 = vmul.f32 %v13925_v37, %v13917_v50  ;;  %v4108_v8 = vpop.permute.xlu0 %4107 }
0x2255   :  { %11737 = vmatprep.mubr.msk.f32.mxu0 %vm51_vm0, %v3992_v49 }
0x2256   :  { %11738 = vmatmul.mubr.msk.f32.vlgmr.msra.gmra.mrb[52].mxu0 %vm51_vm0, %v3993_v61  ;;  %v13927_v4 = vpop.eup %13926 }
0x2257   :  { %12628 = vmatpush3.bf16.xpose.msk.msra.mxu0 %vm14356_vm3, %v12623_v19  ;;  %v3994_v24 = vmul.f32 %v13927_v4, %v13919_v27  ;;  %v4112_v10 = vpop.permute.xlu0 %4111 }
0x2258   :  { %12631 = vmatprep.subr.msk.bf16.mxu0 %vm14356_vm3, %v12629_v1 }
0x2259   :  { %11740 = vmatprep.mubr.msk.f32.mxu0 %vm51_vm0, %v3994_v24 }
0x225f   :  { %12634 = vmatpush3.bf16.xpose.msk.msra.mxu0 %vm14356_vm3, %v12629_v1 }
0x227b   :  { %v3987_v5 = vpop.xlane.xlu1 %3986 }
0x227c   :  { %13928 = vrcp.f32 %v3987_v5 }
0x227f   :  { %v4106_v7 = vpop.permute.xlu1 %4105 }
0x2283   :  { %v4110_v9 = vpop.permute.xlu1 %4109 }
0x2286   :  { %v13929_v6 = vpop.eup %13928 }
0x2287   :  { %v3995_v29 = vmul.f32 %v13929_v6, %v13921_v23 }
0x2289   :  { %11741 = vmatmul.mubr.msk.f32.gmra.mrb[54].mxu0 %vm51_vm0, %v3995_v29 }
0x228a   :  { %11751 = vmatprep.mubr.msk.f32.mxu0 %vm161_vm1, %v4106_v7 }
0x228d   :  { %11752 = vmatmul.mubr.msk.f32.vlgmr.msra.gmra.mrb[56].mxu0 %vm161_vm1, %v4108_v8 }
0x228e   :  { %11754 = vmatprep.mubr.msk.f32.mxu0 %vm161_vm1, %v4110_v9 }
0x2291   :  { %11755 = vmatmul.mubr.msk.f32.gmra.mrb[58].mxu0 %vm161_vm1, %v4112_v10 }
0x2329   :  { %v15182_v26 = vpop.f32.mrb[52].mxu0 }
0x232a   :  { %v15184_v11 = vpop.f32.mrb[53].mxu0 }
0x235c   :  { %v15186_v15 = vpop.f32.mrb[54].mxu0 }
0x235d   :  { %v15188_v16 = vpop.f32.mrb[55].mxu0 }
0x2360   :  { %v11753_v17 = vpop.f32.mrb[56].mxu0 }
0x2361   :  { %v4223_v50 = vmul.f32 0.5, %v11753_v17  ;;  %v4203_v45 = vpop.f32.mrb[57].mxu0 }
0x2362   :  { %v4222_v47 = vmul.f32 0.5, %v4203_v45 }
0x2363   :  { %v4227_v27 = vadd.f32 %v4223_v50, %v14375_v46 }
0x2364   :  { %v4226_v32 = vadd.f32 %v4222_v47, %v14375_v46  ;;  %v11756_v21 = vpop.f32.mrb[58].mxu0 }
0x2365   :  { %v4225_v22 = vmul.f32 0.5, %v11756_v21  ;;  %v4213_v23 = vpop.f32.mrb[59].mxu0  ;;  %v4233_v25 = vsel %vm51_vm0, %v4227_v27, -inf }
0x2366   :  { %v4224_v0 = vmul.f32 0.5, %v4213_v23  ;;  %4234 = vmax.xlane.f32.xlu0 %v4233_v25  ;;  %v4230_v57 = vsel %vm51_vm0, %v4226_v32, -inf }
0x2367   :  { %v4229_v58 = vadd.f32 %v4225_v22, %v14379_v54  ;;  %4231 = vmax.xlane.f32.xlu1 %v4230_v57 }
0x2368   :  { %v4228_v63 = vadd.f32 %v4224_v0, %v14379_v54 }
0x2369   :  { %v4239_v59 = vsel %vm51_vm0, %v4229_v58, -inf }
0x236a   :  { %v4236_v60 = vsel %vm51_vm0, %v4228_v63, -inf }
0x236b   :  { %4240 = vmax.xlane.f32.xlu1 %v4239_v59  ;;  %4237 = vmax.xlane.f32.xlu0 %v4236_v60 }
0x237c   :  { %13368 = vrot.lane.b32.xlu1 %v14912_v53, %s16670_s26 }
0x2381   :  { %13363 = vrot.lane.b32.xlu0 %v14902_v44, %s16670_s26 }
0x23f3   :  { %v4235_v19 = vpop.xlane.xlu0 %4234 }
0x23f4   :  { %v4243_v20 = vsub.f32 %v4227_v27, %v4235_v19  ;;  %v4232_v36 = vpop.xlane.xlu1 %4231 }
0x23f5   :  { %v4242_v37 = vsub.f32 %v4226_v32, %v4232_v36 }
0x23f6   :  { %v4248_v48 = vmul.f32 1.442695, %v4243_v20 }
0x23f7   :  { %v4246_v2 = vmul.f32 1.442695, %v4242_v37 }
0x23f8   :  { %13930 = vpow2.f32 %v4248_v48  ;;  %v4241_v49 = vpop.xlane.xlu1 %4240  ;;  %v4238_v61 = vpop.xlane.xlu0 %4237 }
0x23f9   :  { %13932 = vpow2.f32 %v4246_v2  ;;  %v4244_v1 = vsub.f32 %v4228_v63, %v4238_v61  ;;  %v4245_v21 = vsub.f32 %v4229_v58, %v4241_v49 }
0x23fb   :  { %v4250_v4 = vmul.f32 1.442695, %v4244_v1  ;;  %v4252_v22 = vmul.f32 1.442695, %v4245_v21 }
0x23fc   :  { %v13369_v24 = vpop.permute.xlu1 %13368  ;;  %v13364_v5 = vpop.permute.xlu0 %13363 }
0x23fd   :  { %v13366_v6 = vunpack.i.h.bf16 %v13364_v5  ;;  %13934 = vpow2.f32 %v4250_v4  ;;  %v13371_v7 = vunpack.i.h.bf16 %v13369_v24  ;;  %v13370_v29 = vunpack.i.l.bf16 %v13369_v24 }
0x23fe   :  { %v13365_v8 = vunpack.i.l.bf16 %v13364_v5  ;;  %13936 = vpow2.f32 %v4252_v22 }
0x23ff   :  { %v12639_v17 = vpack.c.bf16 %v13371_v7, %v13370_v29 }
0x2400   :  { %v12635_v9 = vpack.c.bf16 %v13366_v6, %v13365_v8 }
0x2402   :  { %v13931_v10 = vpop.eup %13930  ;;  %12636 = vmatprep.subr.bf16.mxu1 %v12635_v9 }
0x2403   :  { %v13933_v50 = vpop.eup %13932  ;;  %12638 = vmatpush3.bf16.msra.mxu1 %v12635_v9  ;;  %v4257_v45 = vsel %vm51_vm0, %v13931_v10, 0.0 }
0x2404   :  { %12640 = vmatprep.subr.bf16.mxu1 %v12639_v17  ;;  %4258 = vadd.xlane.f32.xlu1 %v4257_v45  ;;  %v4254_v47 = vsel %vm51_vm0, %v13933_v50, 0.0 }
0x2405   :  { %4255 = vadd.xlane.f32.xlu0 %v4254_v47 }
0x2407   :  { %12642 = vmatpush3.bf16.msra.mxu1 %v12639_v17  ;;  %v13935_v27 = vpop.eup %13934 }
0x2408   :  { %v4260_v32 = vsel %vm51_vm0, %v13935_v27, 0.0  ;;  %v13937_v23 = vpop.eup %13936 }
0x2409   :  { %4261 = vadd.xlane.f32.xlu0 %v4260_v32  ;;  %v4263_v25 = vsel %vm51_vm0, %v13937_v23, 0.0 }
0x2415   :  { %13373 = vrot.lane.b32.xlu1 %v14902_v44, %s16668_s27 }
0x241f   :  { %13378 = vrot.lane.b32.xlu0 %v14912_v53, %s16668_s27 }
0x2423   :  { %4385 = vrot.lane.b32.xlu0 %v14894_v18, %s16666_s28 }
0x2427   :  { %4389 = vrot.lane.b32.xlu0 %v14906_v51, %s16666_s28 }
0x2439   :  { %4264 = vadd.xlane.f32.xlu1 %v4263_v25 }
0x244a   :  { %4383 = vrot.lane.b32.xlu1 %v14896_v43, %s16666_s28 }
0x244e   :  { %4387 = vrot.lane.b32.xlu1 %v14908_v52, %s16666_s28 }
0x2491   :  { %v4259_v0 = vpop.xlane.xlu1 %4258 }
0x2492   :  { %13938 = vrcp.f32 %v4259_v0  ;;  %v4256_v57 = vpop.xlane.xlu0 %4255 }
0x2493   :  { %13940 = vrcp.f32 %v4256_v57 }
0x2495   :  { %v13374_v58 = vpop.permute.xlu1 %13373 }
0x2496   :  { %v13376_v63 = vunpack.i.h.bf16 %v13374_v58  ;;  %v13375_v59 = vunpack.i.l.bf16 %v13374_v58  ;;  %v4262_v60 = vpop.xlane.xlu0 %4261 }
0x2497   :  { %13942 = vrcp.f32 %v4262_v60 }
0x2498   :  { %v12643_v19 = vpack.c.bf16 %v13376_v63, %v13375_v59 }
0x249a   :  { %12645 = vmatprep.subr.msk.bf16.mxu1 %vm14356_vm3, %v12643_v19  ;;  %v13379_v20 = vpop.permute.xlu0 %13378 }
0x249b   :  { %v13381_v48 = vunpack.i.h.bf16 %v13379_v20  ;;  %v13380_v2 = vunpack.i.l.bf16 %v13379_v20 }
0x249c   :  { %v13939_v36 = vpop.eup %13938 }
0x249d   :  { %v13941_v37 = vpop.eup %13940  ;;  %v4271_v61 = vmul.f32 %v13939_v36, %v13931_v10  ;;  %v12649_v1 = vpack.c.bf16 %v13381_v48, %v13380_v2 }
0x249e   :  { %v4270_v49 = vmul.f32 %v13941_v37, %v13933_v50  ;;  %v4386_v8 = vpop.permute.xlu0 %4385 }
0x24a0   :  { %11765 = vmatprep.mubr.msk.f32.mxu1 %vm51_vm0, %v4270_v49 }
0x24a1   :  { %11766 = vmatmul.mubr.msk.f32.vlgmr.msra.gmra.mrb[60].mxu1 %vm51_vm0, %v4271_v61  ;;  %v13943_v4 = vpop.eup %13942 }
0x24a2   :  { %12648 = vmatpush3.bf16.xpose.msk.msra.mxu1 %vm14356_vm3, %v12643_v19  ;;  %v4272_v24 = vmul.f32 %v13943_v4, %v13935_v27  ;;  %v4390_v10 = vpop.permute.xlu0 %4389 }
0x24a3   :  { %12651 = vmatprep.subr.msk.bf16.mxu1 %vm14356_vm3, %v12649_v1 }
0x24a4   :  { %11768 = vmatprep.mubr.msk.f32.mxu1 %vm51_vm0, %v4272_v24 }
0x24aa   :  { %12654 = vmatpush3.bf16.xpose.msk.msra.mxu1 %vm14356_vm3, %v12649_v1 }
0x24c6   :  { %v4265_v5 = vpop.xlane.xlu1 %4264 }
0x24c7   :  { %13944 = vrcp.f32 %v4265_v5 }
0x24ca   :  { %v4384_v7 = vpop.permute.xlu1 %4383 }
0x24ce   :  { %v4388_v9 = vpop.permute.xlu1 %4387 }
0x24d1   :  { %v13945_v6 = vpop.eup %13944 }
0x24d2   :  { %v4273_v29 = vmul.f32 %v13945_v6, %v13937_v23 }
0x24d4   :  { %11769 = vmatmul.mubr.msk.f32.gmra.mrb[62].mxu1 %vm51_vm0, %v4273_v29 }
0x24d5   :  { %11779 = vmatprep.mubr.msk.f32.mxu1 %vm161_vm1, %v4384_v7 }
0x24d8   :  { %11780 = vmatmul.mubr.msk.f32.vlgmr.msra.gmra.mrb[64].mxu1 %vm161_vm1, %v4386_v8 }
0x24d9   :  { %11782 = vmatprep.mubr.msk.f32.mxu1 %vm161_vm1, %v4388_v9 }
0x24dc   :  { %11783 = vmatmul.mubr.msk.f32.gmra.mrb[66].mxu1 %vm161_vm1, %v4390_v10 }
0x2574   :  { %v15234_v17 = vpop.f32.mrb[60].mxu1 }
0x2575   :  { %v15236_v50 = vpop.f32.mrb[61].mxu1 }
0x25a7   :  { %v15238_v45 = vpop.f32.mrb[62].mxu1 }
0x25a8   :  { %v15240_v47 = vpop.f32.mrb[63].mxu1 }
0x25ab   :  { %v11781_v27 = vpop.f32.mrb[64].mxu1 }
0x25ac   :  { %v4501_v32 = vmul.f32 0.5, %v11781_v27  ;;  %v4481_v21 = vpop.f32.mrb[65].mxu1 }
0x25ad   :  { %v4500_v22 = vmul.f32 0.5, %v4481_v21 }
0x25ae   :  { %v4505_v23 = vadd.f32 %v4501_v32, %v14375_v46 }
0x25af   :  { %v4504_v25 = vadd.f32 %v4500_v22, %v14375_v46  ;;  %v11784_v0 = vpop.f32.mrb[66].mxu1 }
0x25b0   :  { %v4503_v57 = vmul.f32 0.5, %v11784_v0  ;;  %v4491_v58 = vpop.f32.mrb[67].mxu1  ;;  %v4511_v63 = vsel %vm51_vm0, %v4505_v23, -inf }
0x25b1   :  { %v4502_v59 = vmul.f32 0.5, %v4491_v58  ;;  %4512 = vmax.xlane.f32.xlu0 %v4511_v63  ;;  %v4508_v60 = vsel %vm51_vm0, %v4504_v25, -inf }
0x25b2   :  { %v4507_v19 = vadd.f32 %v4503_v57, %v14379_v54  ;;  %4509 = vmax.xlane.f32.xlu1 %v4508_v60 }
0x25b3   :  { %v4506_v20 = vadd.f32 %v4502_v59, %v14379_v54 }
0x25b4   :  { %v4517_v36 = vsel %vm51_vm0, %v4507_v19, -inf }
0x25b5   :  { %v4514_v37 = vsel %vm51_vm0, %v4506_v20, -inf }
0x25b6   :  { %4518 = vmax.xlane.f32.xlu1 %v4517_v36  ;;  %4515 = vmax.xlane.f32.xlu0 %v4514_v37 }
0x25c7   :  { %13388 = vrot.lane.b32.xlu1 %v14912_v53, %s16664_s29 }
0x25cc   :  { %13383 = vrot.lane.b32.xlu0 %v14902_v44, %s16664_s29  ;;  %s16691_s29 = smov 20  }
0x263e   :  { %v4513_v48 = vpop.xlane.xlu0 %4512 }
0x263f   :  { %v4521_v2 = vsub.f32 %v4505_v23, %v4513_v48  ;;  %v4510_v49 = vpop.xlane.xlu1 %4509 }
0x2640   :  { %v4520_v61 = vsub.f32 %v4504_v25, %v4510_v49 }
0x2641   :  { %v4526_v1 = vmul.f32 1.442695, %v4521_v2 }
0x2642   :  { %v4524_v4 = vmul.f32 1.442695, %v4520_v61 }
0x2643   :  { %13946 = vpow2.f32 %v4526_v1  ;;  %v4519_v24 = vpop.xlane.xlu1 %4518  ;;  %v4516_v5 = vpop.xlane.xlu0 %4515 }
0x2644   :  { %13948 = vpow2.f32 %v4524_v4  ;;  %v4522_v6 = vsub.f32 %v4506_v20, %v4516_v5  ;;  %v4523_v59 = vsub.f32 %v4507_v19, %v4519_v24 }
0x2646   :  { %v4528_v7 = vmul.f32 1.442695, %v4522_v6  ;;  %v4530_v60 = vmul.f32 1.442695, %v4523_v59 }
0x2647   :  { %v13389_v29 = vpop.permute.xlu1 %13388  ;;  %v13384_v8 = vpop.permute.xlu0 %13383 }
0x2648   :  { %v13386_v9 = vunpack.i.h.bf16 %v13384_v8  ;;  %13950 = vpow2.f32 %v4528_v7  ;;  %v13391_v10 = vunpack.i.h.bf16 %v13389_v29  ;;  %v13390_v27 = vunpack.i.l.bf16 %v13389_v29 }
0x2649   :  { %v13385_v32 = vunpack.i.l.bf16 %v13384_v8  ;;  %13952 = vpow2.f32 %v4530_v60 }
0x264a   :  { %v12659_v23 = vpack.c.bf16 %v13391_v10, %v13390_v27 }
0x264b   :  { %v12655_v21 = vpack.c.bf16 %v13386_v9, %v13385_v32 }
0x264d   :  { %v13947_v22 = vpop.eup %13946  ;;  %12656 = vmatprep.subr.bf16.mxu0 %v12655_v21 }
0x264e   :  { %v13949_v25 = vpop.eup %13948  ;;  %12658 = vmatpush3.bf16.msra.mxu0 %v12655_v21  ;;  %v4535_v0 = vsel %vm51_vm0, %v13947_v22, 0.0 }
0x264f   :  { %12660 = vmatprep.subr.bf16.mxu0 %v12659_v23  ;;  %4536 = vadd.xlane.f32.xlu1 %v4535_v0  ;;  %v4532_v57 = vsel %vm51_vm0, %v13949_v25, 0.0 }
0x2650   :  { %4533 = vadd.xlane.f32.xlu0 %v4532_v57 }
0x2652   :  { %12662 = vmatpush3.bf16.msra.mxu0 %v12659_v23  ;;  %v13951_v58 = vpop.eup %13950 }
0x2653   :  { %v4538_v63 = vsel %vm51_vm0, %v13951_v58, 0.0  ;;  %v13953_v20 = vpop.eup %13952 }
0x2654   :  { %4539 = vadd.xlane.f32.xlu0 %v4538_v63  ;;  %v4541_v36 = vsel %vm51_vm0, %v13953_v20, 0.0 }
0x2660   :  { %13393 = vrot.lane.b32.xlu1 %v14902_v44, %s16684_s4 }
0x266a   :  { %13398 = vrot.lane.b32.xlu0 %v14912_v53, %s16684_s4 }
0x266e   :  { %4663 = vrot.lane.b32.xlu0 %v14894_v18, %s16685_s6 }
0x2672   :  { %4667 = vrot.lane.b32.xlu0 %v14906_v51, %s16685_s6 }
0x2684   :  { %4542 = vadd.xlane.f32.xlu1 %v4541_v36 }
0x2695   :  { %4661 = vrot.lane.b32.xlu1 %v14896_v43, %s16685_s6 }
0x2699   :  { %4665 = vrot.lane.b32.xlu1 %v14908_v52, %s16685_s6 }
0x26dc   :  { %v4537_v37 = vpop.xlane.xlu1 %4536 }
0x26dd   :  { %13954 = vrcp.f32 %v4537_v37  ;;  %v4534_v19 = vpop.xlane.xlu0 %4533 }
0x26de   :  { %13956 = vrcp.f32 %v4534_v19 }
0x26e0   :  { %v13394_v18 = vpop.permute.xlu1 %13393 }
0x26e1   :  { %v13396_v48 = vunpack.i.h.bf16 %v13394_v18  ;;  %v13395_v2 = vunpack.i.l.bf16 %v13394_v18  ;;  %v4540_v49 = vpop.xlane.xlu0 %4539 }
0x26e2   :  { %13958 = vrcp.f32 %v4540_v49 }
0x26e3   :  { %v12663_v51 = vpack.c.bf16 %v13396_v48, %v13395_v2 }
0x26e5   :  { %12665 = vmatprep.subr.msk.bf16.mxu0 %vm14356_vm3, %v12663_v51  ;;  %v13399_v61 = vpop.permute.xlu0 %13398 }
0x26e6   :  { %v13401_v43 = vunpack.i.h.bf16 %v13399_v61  ;;  %v13400_v24 = vunpack.i.l.bf16 %v13399_v61 }
0x26e7   :  { %v13955_v1 = vpop.eup %13954 }
0x26e8   :  { %v13957_v4 = vpop.eup %13956  ;;  %v4549_v52 = vmul.f32 %v13955_v1, %v13947_v22  ;;  %v12669_v6 = vpack.c.bf16 %v13401_v43, %v13400_v24 }
0x26e9   :  { %v4548_v5 = vmul.f32 %v13957_v4, %v13949_v25  ;;  %v4664_v32 = vpop.permute.xlu0 %4663 }
0x26eb   :  { %11793 = vmatprep.mubr.msk.f32.mxu0 %vm51_vm0, %v4548_v5 }
0x26ec   :  { %11794 = vmatmul.mubr.msk.f32.vlgmr.msra.gmra.mrb[60].mxu0 %vm51_vm0, %v4549_v52  ;;  %v13959_v7 = vpop.eup %13958 }
0x26ed   :  { %12668 = vmatpush3.bf16.xpose.msk.msra.mxu0 %vm14356_vm3, %v12663_v51  ;;  %v4550_v29 = vmul.f32 %v13959_v7, %v13951_v58  ;;  %v4668_v22 = vpop.permute.xlu0 %4667 }
0x26ee   :  { %12671 = vmatprep.subr.msk.bf16.mxu0 %vm14356_vm3, %v12669_v6 }
0x26ef   :  { %11796 = vmatprep.mubr.msk.f32.mxu0 %vm51_vm0, %v4550_v29 }
0x26f5   :  { %12674 = vmatpush3.bf16.xpose.msk.msra.mxu0 %vm14356_vm3, %v12669_v6 }
0x2711   :  { %v4543_v8 = vpop.xlane.xlu1 %4542 }
0x2712   :  { %13960 = vrcp.f32 %v4543_v8 }
0x2715   :  { %v4662_v10 = vpop.permute.xlu1 %4661 }
0x2719   :  { %v4666_v21 = vpop.permute.xlu1 %4665 }
0x271c   :  { %v13961_v9 = vpop.eup %13960 }
0x271d   :  { %v4551_v27 = vmul.f32 %v13961_v9, %v13953_v20 }
0x271f   :  { %11797 = vmatmul.mubr.msk.f32.gmra.mrb[62].mxu0 %vm51_vm0, %v4551_v27 }
0x2720   :  { %11807 = vmatprep.mubr.msk.f32.mxu0 %vm161_vm1, %v4662_v10 }
0x2723   :  { %11808 = vmatmul.mubr.msk.f32.vlgmr.msra.gmra.mrb[64].mxu0 %vm161_vm1, %v4664_v32 }
0x2724   :  { %11810 = vmatprep.mubr.msk.f32.mxu0 %vm161_vm1, %v4666_v21 }
0x2727   :  { %11811 = vmatmul.mubr.msk.f32.gmra.mrb[66].mxu0 %vm161_vm1, %v4668_v22 }
0x27bf   :  { %v15286_v23 = vpop.f32.mrb[60].mxu0 }
0x27c0   :  { %v4642_v25 = vpop.f32.mrb[61].mxu0 }
0x27f2   :  { %v15288_v0 = vpop.f32.mrb[62].mxu0 }
0x27f3   :  { %v15290_v57 = vpop.f32.mrb[63].mxu0 }
0x27f6   :  { %v11809_v58 = vpop.f32.mrb[64].mxu0 }
0x27f7   :  { %v4779_v63 = vmul.f32 0.5, %v11809_v58  ;;  %v4759_v59 = vpop.f32.mrb[65].mxu0 }
0x27f8   :  { %v4778_v60 = vmul.f32 0.5, %v4759_v59 }
0x27f9   :  { %v4783_v20 = vadd.f32 %v4779_v63, %v14375_v46 }
0x27fa   :  { %v4782_v36 = vadd.f32 %v4778_v60, %v14375_v46  ;;  %v11812_v37 = vpop.f32.mrb[66].mxu0 }
0x27fb   :  { %v4781_v19 = vmul.f32 0.5, %v11812_v37  ;;  %v4769_v18 = vpop.f32.mrb[67].mxu0  ;;  %v4789_v48 = vsel %vm51_vm0, %v4783_v20, -inf  ;;  %v2620_v37 = vld [vmem:[%s16644_s2 + $0x120] sm:$0xff] }
0x27fc   :  { %v4780_v2 = vmul.f32 0.5, %v4769_v18  ;;  %4790 = vmax.xlane.f32.xlu0 %v4789_v48  ;;  %v4786_v49 = vsel %vm51_vm0, %v4782_v36, -inf  ;;  %v5176_v18 = vld [vmem:[%s16644_s2 + $0x140] sm:$0xff]  ;;  %v5177_v48 = vld [vmem:[%s16644_s2 + $0x150] sm:$0xff] }
0x27fd   :  { %v4785_v51 = vadd.f32 %v4781_v19, %v14379_v54  ;;  %4787 = vmax.xlane.f32.xlu1 %v4786_v49  ;;  %v12691_v49 = vpack.c.bf16 %v5177_v48, %v5176_v18 }
0x27fe   :  { %v4784_v61 = vadd.f32 %v4780_v2, %v14379_v54 }
0x27ff   :  { %v4795_v1 = vsel %vm51_vm0, %v4785_v51, -inf  ;;  %12692 = vmatprep.subr.bf16.mxu0 %v12691_v49 }
0x2800   :  { %v4792_v4 = vsel %vm51_vm0, %v4784_v61, -inf  ;;  %12694 = vmatpush3.bf16.msra.mxu0 %v12691_v49  ;;  %v5178_v49 = vld [vmem:[%s16644_s2 + $0x160] sm:$0xff] }
0x2801   :  { %4796 = vmax.xlane.f32.xlu1 %v4795_v1  ;;  %4793 = vmax.xlane.f32.xlu0 %v4792_v4 }
0x2889   :  { %v4791_v43 = vpop.xlane.xlu0 %4790 }
0x288a   :  { %v4799_v24 = vsub.f32 %v4783_v20, %v4791_v43  ;;  %v4788_v5 = vpop.xlane.xlu1 %4787 }
0x288b   :  { %v4798_v52 = vsub.f32 %v4782_v36, %v4788_v5 }
0x288c   :  { %v4804_v6 = vmul.f32 1.442695, %v4799_v24 }
0x288d   :  { %v4802_v7 = vmul.f32 1.442695, %v4798_v52 }
0x288e   :  { %13962 = vpow2.f32 %v4804_v6  ;;  %v4797_v29 = vpop.xlane.xlu1 %4796  ;;  %v4794_v8 = vpop.xlane.xlu0 %4793 }
0x288f   :  { %13964 = vpow2.f32 %v4802_v7  ;;  %v4801_v9 = vsub.f32 %v4785_v51, %v4797_v29  ;;  %v4800_v10 = vsub.f32 %v4784_v61, %v4794_v8 }
0x2891   :  { %v4808_v27 = vmul.f32 1.442695, %v4801_v9  ;;  %v4806_v32 = vmul.f32 1.442695, %v4800_v10 }
0x2893   :  { %13966 = vpow2.f32 %v4808_v27 }
0x2894   :  { %13968 = vpow2.f32 %v4806_v32 }
0x2898   :  { %v13963_v21 = vpop.eup %13962 }
0x2899   :  { %v13965_v22 = vpop.eup %13964  ;;  %v4813_v58 = vsel %vm51_vm0, %v13963_v21, 0.0 }
0x289a   :  { %4814 = vadd.xlane.f32.xlu1 %v4813_v58  ;;  %v4810_v63 = vsel %vm51_vm0, %v13965_v22, 0.0 }
0x289b   :  { %4811 = vadd.xlane.f32.xlu0 %v4810_v63 }
0x289d   :  { %v13967_v59 = vpop.eup %13966 }
0x289e   :  { %v13969_v60 = vpop.eup %13968  ;;  %v4819_v20 = vsel %vm51_vm0, %v13967_v59, 0.0 }
0x289f   :  { %4820 = vadd.xlane.f32.xlu1 %v4819_v20  ;;  %v4816_v36 = vsel %vm51_vm0, %v13969_v60, 0.0 }
0x28a0   :  { %4817 = vadd.xlane.f32.xlu0 %v4816_v36 }
0x28b0   :  { %13408 = vrot.lane.b32.xlu1 %v14912_v53, %s16686_s10 }
0x28b4   :  { %4943 = vrot.lane.b32.xlu1 %v15028_v31, %s16687_s0 }
0x28b6   :  { %13403 = vrot.lane.b32.xlu0 %v14902_v44, %s16686_s10 }
0x28b8   :  { %4959 = vrot.lane.b32.xlu1 %v15080_v39, %s16688_s7 }
0x28ba   :  { %4945 = vrot.lane.b32.xlu0 %v15026_v12, %s16687_s0 }
0x28bc   :  { %4975 = vrot.lane.b32.xlu1 %v15132_v56, %s16689_s8 }
0x28be   :  { %4961 = vrot.lane.b32.xlu0 %v15078_v38, %s16688_s7 }
0x28c0   :  { %4991 = vrot.lane.b32.xlu1 %v15184_v11, %s16690_s30 }
0x28c2   :  { %4977 = vrot.lane.b32.xlu0 %v15130_v55, %s16689_s8 }
0x28c4   :  { %5007 = vrot.lane.b32.xlu1 %v15236_v50, %s16691_s29 }
0x28c6   :  { %4993 = vrot.lane.b32.xlu0 %v15182_v26, %s16690_s30 }
0x28c8   :  { %5023 = vrot.lane.b32.xlu1 %v4642_v25, %s14263_s9 }
0x28ca   :  { %5009 = vrot.lane.b32.xlu0 %v15234_v17, %s16691_s29 }
0x28cc   :  { %4947 = vrot.lane.b32.xlu1 %v15032_v14, %s16687_s0 }
0x28ce   :  { %5025 = vrot.lane.b32.xlu0 %v15286_v23, %s14263_s9  ;;  %v2619_v23 = vld [vmem:[%s16644_s2 + $0x110] sm:$0xff] }
0x28cf   :  { %v12687_v19 = vpack.c.bf16 %v2620_v37, %v2619_v23 }
0x28d0   :  { %4963 = vrot.lane.b32.xlu1 %v15084_v42, %s16688_s7 }
0x28d2   :  { %4949 = vrot.lane.b32.xlu0 %v15030_v13, %s16687_s0 }
0x28d4   :  { %4979 = vrot.lane.b32.xlu1 %v15136_v3, %s16689_s8 }
0x28d6   :  { %4965 = vrot.lane.b32.xlu0 %v15082_v41, %s16688_s7 }
0x28d8   :  { %4995 = vrot.lane.b32.xlu1 %v15188_v16, %s16690_s30 }
0x28da   :  { %4981 = vrot.lane.b32.xlu0 %v15134_v62, %s16689_s8 }
0x28dc   :  { %5011 = vrot.lane.b32.xlu1 %v15240_v47, %s16691_s29  ;;  %v2618_v47 = vld [vmem:[%s16644_s2 + $0x100] sm:$0xff] }
0x28de   :  { %4997 = vrot.lane.b32.xlu0 %v15186_v15, %s16690_s30 }
0x28e2   :  { %5013 = vrot.lane.b32.xlu0 %v15238_v45, %s16691_s29  ;;  %v2617_v45 = vld [vmem:[%s16644_s2 + $0xf0] sm:$0xff] }
0x28e3   :  { %v12683_v25 = vpack.c.bf16 %v2618_v47, %v2617_v45 }
0x2927   :  { %v4815_v44 = vpop.xlane.xlu1 %4814 }
0x2928   :  { %v4812_v53 = vpop.xlane.xlu0 %4811 }
0x2929   :  { %13970 = vrcp.f32 %v4812_v53 }
0x292a   :  { %13972 = vrcp.f32 %v4815_v44 }
0x292c   :  { %v4821_v12 = vpop.xlane.xlu1 %4820 }
0x292d   :  { %v4818_v31 = vpop.xlane.xlu0 %4817 }
0x292e   :  { %13974 = vrcp.f32 %v4818_v31 }
0x292f   :  { %13976 = vrcp.f32 %v4821_v12 }
0x2930   :  { %v13409_v13 = vpop.permute.xlu1 %13408 }
0x2931   :  { %v13404_v14 = vpop.permute.xlu0 %13403  ;;  %v13411_v38 = vunpack.i.h.bf16 %v13409_v13  ;;  %v13410_v39 = vunpack.i.l.bf16 %v13409_v13 }
0x2932   :  { %v13406_v41 = vunpack.i.h.bf16 %v13404_v14  ;;  %v13405_v42 = vunpack.i.l.bf16 %v13404_v14 }
0x2933   :  { %v13971_v55 = vpop.eup %13970  ;;  %v12679_v3 = vpack.c.bf16 %v13411_v38, %v13410_v39 }
0x2934   :  { %v12675_v56 = vpack.c.bf16 %v13406_v41, %v13405_v42  ;;  %v4826_v62 = vmul.f32 %v13971_v55, %v13965_v22  ;;  %v13973_v26 = vpop.eup %13972  ;;  %v4944_v43 = vpop.permute.xlu1 %4943 }
0x2935   :  { %v4827_v15 = vmul.f32 %v13973_v26, %v13963_v21  ;;  %v4946_v4 = vpop.permute.xlu0 %4945 }
0x2936   :  { %12676 = vmatprep.subr.bf16.mxu1 %v12675_v56  ;;  %11821 = vmatprep.mubr.msk.f32.mxu1 %vm51_vm0, %v4826_v62  ;;  %v5052_v36 = vsel %vm161_vm1, %v14974_v28, %v4946_v4 }
0x2937   :  { %12678 = vmatpush3.bf16.msra.mxu1 %v12675_v56 }
0x2938   :  { %12680 = vmatprep.subr.bf16.mxu1 %v12679_v3  ;;  %v13975_v11 = vpop.eup %13974  ;;  %v4960_v5 = vpop.permute.xlu1 %4959 }
0x2939   :  { %v13977_v16 = vpop.eup %13976  ;;  %v4828_v17 = vmul.f32 %v13975_v11, %v13969_v60  ;;  %v4962_v24 = vpop.permute.xlu0 %4961  ;;  %v5051_v60 = vsel %vm161_vm1, %v14976_v30, %v4944_v43 }
0x293a   :  { %v4829_v50 = vmul.f32 %v13977_v16, %v13967_v59  ;;  %v5055_v44 = vsel %vm2486_vm5, %v5051_v60, %v4960_v5  ;;  %v5056_v12 = vsel %vm2486_vm5, %v5052_v36, %v4962_v24 }
0x293b   :  { %12682 = vmatpush3.bf16.msra.mxu1 %v12679_v3 }
0x293c   :  { %12684 = vmatprep.subr.bf16.mxu1 %v12683_v25  ;;  %v4976_v6 = vpop.permute.xlu1 %4975 }
0x293d   :  { %v4978_v52 = vpop.permute.xlu0 %4977  ;;  %v5059_v31 = vsel %vm2491_vm6, %v5055_v44, %v4976_v6 }
0x293e   :  { %11822 = vmatmul.mubr.msk.f32.vlgmr.msra.gmra.mrb[68].mxu1 %vm51_vm0, %v4827_v15  ;;  %v5060_v13 = vsel %vm2491_vm6, %v5056_v12, %v4978_v52 }
0x293f   :  { %11824 = vmatprep.mubr.msk.f32.mxu1 %vm51_vm0, %v4828_v17  ;;  %12686 = vmatpush3.bf16.msra.mxu1 %v12683_v25 }
0x2940   :  { %12688 = vmatprep.subr.bf16.mxu1 %v12687_v19  ;;  %v4992_v29 = vpop.permute.xlu1 %4991 }
0x2941   :  { %v4994_v7 = vpop.permute.xlu0 %4993  ;;  %v5063_v14 = vsel %vm34_vm4, %v5059_v31, %v4992_v29 }
0x2942   :  { %11825 = vmatmul.mubr.msk.f32.gmra.mrb[70].mxu1 %vm51_vm0, %v4829_v50  ;;  %v5064_v38 = vsel %vm34_vm4, %v5060_v13, %v4994_v7 }
0x2943   :  { %12690 = vmatpush3.bf16.msra.mxu1 %v12687_v19 }
0x2944   :  { %v5008_v9 = vpop.permute.xlu1 %5007 }
0x2945   :  { %v5010_v8 = vpop.permute.xlu0 %5009  ;;  %v5067_v39 = vsel %vm2500_vm7, %v5063_v14, %v5008_v9 }
0x2946   :  { %v5068_v41 = vsel %vm2500_vm7, %v5064_v38, %v5010_v8  ;;  %v5180_v8 = vld [vmem:[%s16644_s2 + $0x180] ss:$0 sm:$0xff] }
0x2949   :  { %v5026_v10 = vpop.permute.xlu0 %5025 }
0x294a   :  { %v5072_v55 = vsel %vm2505_vm8, %v5068_v41, %v5026_v10 }
0x294d   :  { %v4950_v27 = vpop.permute.xlu0 %4949 }
0x294e   :  { %v5054_v11 = vsel %vm161_vm1, %v14978_v34, %v4950_v27 }
0x2951   :  { %v4966_v21 = vpop.permute.xlu0 %4965 }
0x2952   :  { %v5058_v17 = vsel %vm2486_vm5, %v5054_v11, %v4966_v21 }
0x2955   :  { %v4982_v22 = vpop.permute.xlu0 %4981 }
0x2956   :  { %v5062_v45 = vsel %vm2491_vm6, %v5058_v17, %v4982_v22 }
0x2959   :  { %v4998_v63 = vpop.permute.xlu0 %4997 }
0x295a   :  { %v5066_v23 = vsel %vm34_vm4, %v5062_v45, %v4998_v63 }
0x295d   :  { %v5014_v20 = vpop.permute.xlu0 %5013 }
0x295e   :  { %v5070_v37 = vsel %vm2500_vm7, %v5066_v23, %v5014_v20 }
0x2a11   :  { %v11823_v2 = vpop.f32.mrb[68].mxu1 }
0x2a12   :  { %5041 = vrot.lane.b32.xlu0 %v11823_v2, %s14264_s5  ;;  %v4920_v51 = vpop.f32.mrb[69].mxu1 }
0x2a13   :  { %5039 = vrot.lane.b32.xlu1 %v4920_v51, %s14264_s5  ;;  %v5179_v51 = vld [vmem:[%s16644_s2 + $0x170] sm:$0xff] }
0x2a15   :  { %v11826_v61 = vpop.f32.mrb[70].mxu1 }
0x2a16   :  { %5029 = vrot.lane.b32.xlu0 %v15288_v0, %s14263_s9  ;;  %v4930_v1 = vpop.f32.mrb[71].mxu1  ;;  %v5024_v0 = vpop.permute.xlu1 %5023 }
0x2a17   :  { %5027 = vrot.lane.b32.xlu1 %v15290_v57, %s14263_s9  ;;  %v5071_v28 = vsel %vm2505_vm8, %v5067_v39, %v5024_v0 }
0x2a1a   :  { %5045 = vrot.lane.b32.xlu0 %v11826_v61, %s14264_s5  ;;  %v4948_v32 = vpop.permute.xlu1 %4947  ;;  %v12695_v61 = vpack.c.bf16 %v5179_v51, %v5178_v49 }
0x2a1b   :  { %5043 = vrot.lane.b32.xlu1 %v4930_v1, %s14264_s5  ;;  %v5053_v3 = vsel %vm161_vm1, %v14980_v35, %v4948_v32  ;;  %v2621_v1 = vld [vmem:[%s16644_s2 + $0x130] ss:$0 sm:$0xff] }
0x2a1c   :  { %12696 = vmatprep.subr.bf16.mxu0 %v12695_v61 }
0x2a1d   :  { %12698 = vmatpush3.bf16.msra.mxu0 %v12695_v61 }
0x2a1e   :  { %v4964_v57 = vpop.permute.xlu1 %4963 }
0x2a1f   :  { %v5057_v15 = vsel %vm2486_vm5, %v5053_v3, %v4964_v57 }
0x2a22   :  { %v4980_v58 = vpop.permute.xlu1 %4979 }
0x2a23   :  { %v5061_v50 = vsel %vm2491_vm6, %v5057_v15, %v4980_v58 }
0x2a26   :  { %v4996_v59 = vpop.permute.xlu1 %4995 }
0x2a27   :  { %v5065_v47 = vsel %vm34_vm4, %v5061_v50, %v4996_v59 }
0x2a2a   :  { %v5012_v53 = vpop.permute.xlu1 %5011 }
0x2a2b   :  { %v5069_v35 = vsel %vm2500_vm7, %v5065_v47, %v5012_v53 }
0x2a84   :  { %v5042_v30 = vpop.permute.xlu0 %5041 }
0x2a85   :  { %v5040_v42 = vpop.permute.xlu1 %5039  ;;  %v5076_v62 = vsel %vm2510_vm9, %v5072_v55, %v5042_v30 }
0x2a86   :  { %v5075_v56 = vsel %vm2510_vm9, %v5071_v28, %v5040_v42 }
0x2a87   :  { %11835 = vmatprep.mubr.msk.f32.mxu1 %vm51_vm0, %v5075_v56 }
0x2a88   :  { %v5030_v26 = vpop.permute.xlu0 %5029  ;;  %11836 = vmatmul.mubr.msk.f32.vlgmr.msra.gmra.mrb[72].mxu1 %vm51_vm0, %v5076_v62 }
0x2a89   :  { %v5028_v16 = vpop.permute.xlu1 %5027  ;;  %v5074_v18 = vsel %vm2505_vm8, %v5070_v37, %v5030_v26 }
0x2a8a   :  { %v5073_v34 = vsel %vm2505_vm8, %v5069_v35, %v5028_v16 }
0x2a8c   :  { %v5046_v25 = vpop.permute.xlu0 %5045 }
0x2a8d   :  { %v5044_v19 = vpop.permute.xlu1 %5043  ;;  %v5078_v2 = vsel %vm2510_vm9, %v5074_v18, %v5046_v25 }
0x2a8e   :  { %v5077_v48 = vsel %vm2510_vm9, %v5073_v34, %v5044_v19 }
0x2a8f   :  { %11838 = vmatprep.mubr.msk.f32.mxu1 %vm51_vm0, %v5077_v48 }
0x2a90   :  { %11839 = vmatmul.mubr.msk.f32.gmra.mrb[74].mxu1 %vm51_vm0, %v5078_v2 }
0x2b5b   :  { %v11837_v4 = vpop.f32.mrb[72].mxu1 }
0x2b5c   :  { %v5157_v43 = vpop.f32.mrb[73].mxu1  ;;  %v5163_v5 = vadd.f32 %v11837_v4, %v2621_v1 }
0x2b5d   :  { %v5158_v24 = vadd.f32 %v5157_v43, %v2621_v1 }
0x2b5f   :  { %11849 = vmatprep.mubr.msk.f32.mxu0 %vm51_vm0, %v5158_v24 }
0x2b60   :  { %11850 = vmatmul.mubr.msk.f32.vlgmr.msra.gmra.mrb[68].mxu0 %vm51_vm0, %v5163_v5 }
0x2b63   :  { %v11840_v52 = vpop.f32.mrb[74].mxu1 }
0x2b64   :  { %v5167_v6 = vpop.f32.mrb[75].mxu1  ;;  %v5173_v29 = vadd.f32 %v11840_v52, %v2621_v1 }
0x2b65   :  { %v5168_v7 = vadd.f32 %v5167_v6, %v2621_v1 }
0x2b67   :  { %11852 = vmatprep.mubr.msk.f32.mxu0 %vm51_vm0, %v5168_v7 }
0x2b68   :  { %11853 = vmatmul.mubr.msk.f32.gmra.mrb[70].mxu0 %vm51_vm0, %v5173_v29 }
0x2c33   :  { %v11851_v9 = vpop.f32.mrb[68].mxu0 }
0x2c34   :  { %v15433_v10 = vadd.f32 %v11851_v9, %v5180_v8  ;;  %v5264_v0 = vpop.f32.mrb[69].mxu0 }
0x2c35   :  { %v15435_v27 = vadd.f32 %v5264_v0, %v5180_v8 }
0x2c37   :  { %11863 = vmatprep.mubr.msk.f32.mxu1 %vm161_vm1, %v15435_v27  ;;  %v15441_v32 = vpack.i.bf16 %v15433_v10, %v15435_v27 }
0x2c39   :  { %13413 = vrot.lane.b32.xlu1 %v15441_v32, %s14234_s1 }
0x2c3b   :  { %v11854_v21 = vpop.f32.mrb[70].mxu0 }
0x2c3c   :  { %v15445_v57 = vadd.f32 %v11854_v21, %v5180_v8  ;;  %v5274_v22 = vpop.f32.mrb[71].mxu0 }
0x2c3d   :  { %v15447_v58 = vadd.f32 %v5274_v22, %v5180_v8 }
0x2c3f   :  { %v15451_v63 = vpack.i.bf16 %v15445_v57, %v15447_v58 }
0x2c41   :  { %13418 = vrot.lane.b32.xlu0 %v15451_v63, %s14234_s1 }
0x2cab   :  { %v13414_v59 = vpop.permute.xlu1 %13413 }
0x2cac   :  { %v13416_v60 = vunpack.i.h.bf16 %v13414_v59  ;;  %v13415_v20 = vunpack.i.l.bf16 %v13414_v59 }
0x2cae   :  { %v12699_v36 = vpack.c.bf16 %v13416_v60, %v13415_v20 }
0x2cb0   :  { %12701 = vmatprep.subr.msk.bf16.mxu1 %vm14356_vm3, %v12699_v36 }
0x2cb1   :  { %12704 = vmatpush3.bf16.xpose.msk.msra.mxu1 %vm14356_vm3, %v12699_v36 }
0x2cb3   :  { %v13419_v44 = vpop.permute.xlu0 %13418 }
0x2cb4   :  { %v13421_v53 = vunpack.i.h.bf16 %v13419_v44  ;;  %v13420_v12 = vunpack.i.l.bf16 %v13419_v44 }
0x2cb6   :  { %v12705_v31 = vpack.c.bf16 %v13421_v53, %v13420_v12 }
0x2cb8   :  { %12707 = vmatprep.subr.msk.bf16.mxu1 %vm14356_vm3, %v12705_v31 }
0x2cb9   :  { %12710 = vmatpush3.bf16.xpose.msk.msra.mxu1 %vm14356_vm3, %v12705_v31 }
0x2cc0   :  { %11864 = vmatmul.mubr.msk.f32.vlgmr.msra.gmra.mrb[76].mxu1 %vm161_vm1, %v15433_v10 }
0x2cc1   :  { %11866 = vmatprep.mubr.msk.f32.mxu1 %vm161_vm1, %v15447_v58 }
0x2cc4   :  { %11867 = vmatmul.mubr.msk.f32.gmra.mrb[78].mxu1 %vm161_vm1, %v15445_v57 }
0x2d93   :  { %v11865_v13 = vpop.f32.mrb[76].mxu1 }
0x2d94   :  { %v5397_v14 = vmul.f32 0.5, %v11865_v13  ;;  %v5377_v38 = vpop.f32.mrb[77].mxu1 }
0x2d95   :  { %v5396_v39 = vmul.f32 0.5, %v5377_v38 }
0x2d96   :  { %v5401_v30 = vadd.f32 %v5397_v14, %v14375_v46 }
0x2d97   :  { %v5400_v41 = vadd.f32 %v5396_v39, %v14375_v46  ;;  %v11868_v28 = vpop.f32.mrb[78].mxu1 }
0x2d98   :  { %v5399_v42 = vmul.f32 0.5, %v11868_v28  ;;  %v5387_v55 = vpop.f32.mrb[79].mxu1  ;;  %v5407_v56 = vsel %vm51_vm0, %v5401_v30, -inf }
0x2d99   :  { %v5398_v62 = vmul.f32 0.5, %v5387_v55  ;;  %5408 = vmax.xlane.f32.xlu0 %v5407_v56  ;;  %v5404_v3 = vsel %vm51_vm0, %v5400_v41, -inf }
0x2d9a   :  { %v5403_v26 = vadd.f32 %v5399_v42, %v14379_v54  ;;  %5405 = vmax.xlane.f32.xlu1 %v5404_v3 }
0x2d9b   :  { %v5402_v11 = vadd.f32 %v5398_v62, %v14379_v54 }
0x2d9c   :  { %v5413_v15 = vsel %vm51_vm0, %v5403_v26, -inf }
0x2d9d   :  { %v5410_v16 = vsel %vm51_vm0, %v5402_v11, -inf }
0x2d9e   :  { %5414 = vmax.xlane.f32.xlu1 %v5413_v15  ;;  %5411 = vmax.xlane.f32.xlu0 %v5410_v16 }
0x2daf   :  { %13428 = vrot.lane.b32.xlu1 %v15451_v63, %s14237_s11 }
0x2db4   :  { %13423 = vrot.lane.b32.xlu0 %v15441_v32, %s14237_s11 }
0x2e26   :  { %v5409_v17 = vpop.xlane.xlu0 %5408 }
0x2e27   :  { %v5417_v50 = vsub.f32 %v5401_v30, %v5409_v17  ;;  %v5406_v45 = vpop.xlane.xlu1 %5405 }
0x2e28   :  { %v5416_v47 = vsub.f32 %v5400_v41, %v5406_v45 }
0x2e29   :  { %v5422_v23 = vmul.f32 1.442695, %v5417_v50 }
0x2e2a   :  { %v5420_v35 = vmul.f32 1.442695, %v5416_v47 }
0x2e2b   :  { %13978 = vpow2.f32 %v5422_v23  ;;  %v5415_v25 = vpop.xlane.xlu1 %5414  ;;  %v5412_v37 = vpop.xlane.xlu0 %5411 }
0x2e2c   :  { %13980 = vpow2.f32 %v5420_v35  ;;  %v5418_v34 = vsub.f32 %v5402_v11, %v5412_v37  ;;  %v5419_v29 = vsub.f32 %v5403_v26, %v5415_v25 }
0x2e2e   :  { %v5424_v19 = vmul.f32 1.442695, %v5418_v34  ;;  %v5426_v8 = vmul.f32 1.442695, %v5419_v29 }
0x2e2f   :  { %v13429_v18 = vpop.permute.xlu1 %13428  ;;  %v13424_v48 = vpop.permute.xlu0 %13423 }
0x2e30   :  { %v13426_v2 = vunpack.i.h.bf16 %v13424_v48  ;;  %13982 = vpow2.f32 %v5424_v19  ;;  %v13431_v49 = vunpack.i.h.bf16 %v13429_v18  ;;  %v13430_v51 = vunpack.i.l.bf16 %v13429_v18 }
0x2e31   :  { %v13425_v61 = vunpack.i.l.bf16 %v13424_v48  ;;  %13984 = vpow2.f32 %v5426_v8 }
0x2e32   :  { %v12715_v43 = vpack.c.bf16 %v13431_v49, %v13430_v51 }
0x2e33   :  { %v12711_v1 = vpack.c.bf16 %v13426_v2, %v13425_v61 }
0x2e35   :  { %v13979_v4 = vpop.eup %13978  ;;  %12712 = vmatprep.subr.bf16.mxu0 %v12711_v1 }
0x2e36   :  { %v13981_v24 = vpop.eup %13980  ;;  %12714 = vmatpush3.bf16.msra.mxu0 %v12711_v1  ;;  %v5431_v5 = vsel %vm51_vm0, %v13979_v4, 0.0 }
0x2e37   :  { %12716 = vmatprep.subr.bf16.mxu0 %v12715_v43  ;;  %5432 = vadd.xlane.f32.xlu1 %v5431_v5  ;;  %v5428_v52 = vsel %vm51_vm0, %v13981_v24, 0.0 }
0x2e38   :  { %5429 = vadd.xlane.f32.xlu0 %v5428_v52 }
0x2e3a   :  { %12718 = vmatpush3.bf16.msra.mxu0 %v12715_v43  ;;  %v13983_v6 = vpop.eup %13982 }
0x2e3b   :  { %v5434_v7 = vsel %vm51_vm0, %v13983_v6, 0.0  ;;  %v13985_v9 = vpop.eup %13984 }
0x2e3c   :  { %5435 = vadd.xlane.f32.xlu0 %v5434_v7  ;;  %v5437_v0 = vsel %vm51_vm0, %v13985_v9, 0.0 }
0x2e48   :  { %13433 = vrot.lane.b32.xlu1 %v15441_v32, %s14238_s12 }
0x2e52   :  { %13438 = vrot.lane.b32.xlu0 %v15451_v63, %s14238_s12  ;;  %s16692_s12 = smov 80  }
0x2e56   :  { %5559 = vrot.lane.b32.xlu0 %v15433_v10, %s14239_s13 }
0x2e5a   :  { %5563 = vrot.lane.b32.xlu0 %v15445_v57, %s14239_s13 }
0x2e6c   :  { %5438 = vadd.xlane.f32.xlu1 %v5437_v0 }
0x2e7d   :  { %5557 = vrot.lane.b32.xlu1 %v15435_v27, %s14239_s13 }
0x2e81   :  { %5561 = vrot.lane.b32.xlu1 %v15447_v58, %s14239_s13  ;;  %s16693_s13 = smov 112  }
0x2ec4   :  { %v5433_v21 = vpop.xlane.xlu1 %5432 }
0x2ec5   :  { %13986 = vrcp.f32 %v5433_v21  ;;  %v5430_v22 = vpop.xlane.xlu0 %5429 }
0x2ec6   :  { %13988 = vrcp.f32 %v5430_v22 }
0x2ec8   :  { %v13434_v59 = vpop.permute.xlu1 %13433 }
0x2ec9   :  { %v13436_v60 = vunpack.i.h.bf16 %v13434_v59  ;;  %v13435_v20 = vunpack.i.l.bf16 %v13434_v59  ;;  %v5436_v36 = vpop.xlane.xlu0 %5435 }
0x2eca   :  { %13990 = vrcp.f32 %v5436_v36 }
0x2ecb   :  { %v12719_v44 = vpack.c.bf16 %v13436_v60, %v13435_v20 }
0x2ecd   :  { %12721 = vmatprep.subr.msk.bf16.mxu0 %vm14356_vm3, %v12719_v44  ;;  %v13439_v53 = vpop.permute.xlu0 %13438 }
0x2ece   :  { %v13441_v13 = vunpack.i.h.bf16 %v13439_v53  ;;  %v13440_v14 = vunpack.i.l.bf16 %v13439_v53 }
0x2ecf   :  { %v13987_v12 = vpop.eup %13986 }
0x2ed0   :  { %v13989_v31 = vpop.eup %13988  ;;  %v5445_v39 = vmul.f32 %v13987_v12, %v13979_v4  ;;  %v12725_v30 = vpack.c.bf16 %v13441_v13, %v13440_v14 }
0x2ed1   :  { %v5444_v38 = vmul.f32 %v13989_v31, %v13981_v24  ;;  %v5560_v3 = vpop.permute.xlu0 %5559 }
0x2ed3   :  { %11877 = vmatprep.mubr.msk.f32.mxu0 %vm51_vm0, %v5444_v38 }
0x2ed4   :  { %11878 = vmatmul.mubr.msk.f32.vlgmr.msra.gmra.mrb[72].mxu0 %vm51_vm0, %v5445_v39  ;;  %v13991_v41 = vpop.eup %13990 }
0x2ed5   :  { %12724 = vmatpush3.bf16.xpose.msk.msra.mxu0 %vm14356_vm3, %v12719_v44  ;;  %v5446_v28 = vmul.f32 %v13991_v41, %v13983_v6  ;;  %v5564_v11 = vpop.permute.xlu0 %5563 }
0x2ed6   :  { %12727 = vmatprep.subr.msk.bf16.mxu0 %vm14356_vm3, %v12725_v30 }
0x2ed7   :  { %11880 = vmatprep.mubr.msk.f32.mxu0 %vm51_vm0, %v5446_v28 }
0x2edd   :  { %12730 = vmatpush3.bf16.xpose.msk.msra.mxu0 %vm14356_vm3, %v12725_v30 }
0x2ef9   :  { %v5439_v42 = vpop.xlane.xlu1 %5438 }
0x2efa   :  { %13992 = vrcp.f32 %v5439_v42 }
0x2efd   :  { %v5558_v56 = vpop.permute.xlu1 %5557 }
0x2f01   :  { %v5562_v26 = vpop.permute.xlu1 %5561 }
0x2f04   :  { %v13993_v55 = vpop.eup %13992 }
0x2f05   :  { %v5447_v62 = vmul.f32 %v13993_v55, %v13985_v9 }
0x2f07   :  { %11881 = vmatmul.mubr.msk.f32.gmra.mrb[74].mxu0 %vm51_vm0, %v5447_v62 }
0x2f08   :  { %11891 = vmatprep.mubr.msk.f32.mxu0 %vm161_vm1, %v5558_v56 }
0x2f0b   :  { %11892 = vmatmul.mubr.msk.f32.vlgmr.msra.gmra.mrb[76].mxu0 %vm161_vm1, %v5560_v3 }
0x2f0c   :  { %11894 = vmatprep.mubr.msk.f32.mxu0 %vm161_vm1, %v5562_v26 }
0x2f0f   :  { %11895 = vmatmul.mubr.msk.f32.gmra.mrb[78].mxu0 %vm161_vm1, %v5564_v11 }
0x2fa7   :  { %v15513_v15 = vpop.f32.mrb[72].mxu0 }
0x2fa8   :  { %v15515_v16 = vpop.f32.mrb[73].mxu0 }
0x2fda   :  { %v15517_v17 = vpop.f32.mrb[74].mxu0 }
0x2fdb   :  { %v15519_v50 = vpop.f32.mrb[75].mxu0 }
0x2fde   :  { %v11893_v45 = vpop.f32.mrb[76].mxu0 }
0x2fdf   :  { %v5675_v47 = vmul.f32 0.5, %v11893_v45  ;;  %v5655_v23 = vpop.f32.mrb[77].mxu0 }
0x2fe0   :  { %v5674_v35 = vmul.f32 0.5, %v5655_v23 }
0x2fe1   :  { %v5679_v25 = vadd.f32 %v5675_v47, %v14375_v46 }
0x2fe2   :  { %v5678_v37 = vadd.f32 %v5674_v35, %v14375_v46  ;;  %v11896_v34 = vpop.f32.mrb[78].mxu0 }
0x2fe3   :  { %v5677_v19 = vmul.f32 0.5, %v11896_v34  ;;  %v5665_v18 = vpop.f32.mrb[79].mxu0  ;;  %v5685_v48 = vsel %vm51_vm0, %v5679_v25, -inf }
0x2fe4   :  { %v5676_v2 = vmul.f32 0.5, %v5665_v18  ;;  %5686 = vmax.xlane.f32.xlu0 %v5685_v48  ;;  %v5682_v49 = vsel %vm51_vm0, %v5678_v37, -inf }
0x2fe5   :  { %v5681_v51 = vadd.f32 %v5677_v19, %v14379_v54  ;;  %5683 = vmax.xlane.f32.xlu1 %v5682_v49 }
0x2fe6   :  { %v5680_v61 = vadd.f32 %v5676_v2, %v14379_v54 }
0x2fe7   :  { %v5691_v1 = vsel %vm51_vm0, %v5681_v51, -inf }
0x2fe8   :  { %v5688_v4 = vsel %vm51_vm0, %v5680_v61, -inf }
0x2fe9   :  { %5692 = vmax.xlane.f32.xlu1 %v5691_v1  ;;  %5689 = vmax.xlane.f32.xlu0 %v5688_v4 }
0x2ffa   :  { %13448 = vrot.lane.b32.xlu1 %v15451_v63, %s14240_s14 }
0x2fff   :  { %13443 = vrot.lane.b32.xlu0 %v15441_v32, %s14240_s14  ;;  %s16694_s14 = smov 48  }
0x3071   :  { %v5687_v43 = vpop.xlane.xlu0 %5686 }
0x3072   :  { %v5695_v24 = vsub.f32 %v5679_v25, %v5687_v43  ;;  %v5684_v5 = vpop.xlane.xlu1 %5683 }
0x3073   :  { %v5694_v52 = vsub.f32 %v5678_v37, %v5684_v5 }
0x3074   :  { %v5700_v6 = vmul.f32 1.442695, %v5695_v24 }
0x3075   :  { %v5698_v7 = vmul.f32 1.442695, %v5694_v52 }
0x3076   :  { %13994 = vpow2.f32 %v5700_v6  ;;  %v5693_v29 = vpop.xlane.xlu1 %5692  ;;  %v5690_v8 = vpop.xlane.xlu0 %5689 }
0x3077   :  { %13996 = vpow2.f32 %v5698_v7  ;;  %v5696_v9 = vsub.f32 %v5680_v61, %v5690_v8  ;;  %v5697_v30 = vsub.f32 %v5681_v51, %v5693_v29 }
0x3079   :  { %v5702_v0 = vmul.f32 1.442695, %v5696_v9  ;;  %v5704_v41 = vmul.f32 1.442695, %v5697_v30 }
0x307a   :  { %v13449_v21 = vpop.permute.xlu1 %13448  ;;  %v13444_v22 = vpop.permute.xlu0 %13443 }
0x307b   :  { %v13446_v59 = vunpack.i.h.bf16 %v13444_v22  ;;  %13998 = vpow2.f32 %v5702_v0  ;;  %v13451_v60 = vunpack.i.h.bf16 %v13449_v21  ;;  %v13450_v20 = vunpack.i.l.bf16 %v13449_v21 }
0x307c   :  { %v13445_v36 = vunpack.i.l.bf16 %v13444_v22  ;;  %14000 = vpow2.f32 %v5704_v41 }
0x307d   :  { %v12735_v12 = vpack.c.bf16 %v13451_v60, %v13450_v20 }
0x307e   :  { %v12731_v44 = vpack.c.bf16 %v13446_v59, %v13445_v36 }
0x3080   :  { %v13995_v53 = vpop.eup %13994  ;;  %12732 = vmatprep.subr.bf16.mxu1 %v12731_v44 }
0x3081   :  { %v13997_v31 = vpop.eup %13996  ;;  %12734 = vmatpush3.bf16.msra.mxu1 %v12731_v44  ;;  %v5709_v13 = vsel %vm51_vm0, %v13995_v53, 0.0 }
0x3082   :  { %12736 = vmatprep.subr.bf16.mxu1 %v12735_v12  ;;  %5710 = vadd.xlane.f32.xlu1 %v5709_v13  ;;  %v5706_v14 = vsel %vm51_vm0, %v13997_v31, 0.0 }
0x3083   :  { %5707 = vadd.xlane.f32.xlu0 %v5706_v14 }
0x3085   :  { %12738 = vmatpush3.bf16.msra.mxu1 %v12735_v12  ;;  %v13999_v38 = vpop.eup %13998 }
0x3086   :  { %v5712_v39 = vsel %vm51_vm0, %v13999_v38, 0.0  ;;  %v14001_v28 = vpop.eup %14000 }
0x3087   :  { %5713 = vadd.xlane.f32.xlu0 %v5712_v39  ;;  %v5715_v42 = vsel %vm51_vm0, %v14001_v28, 0.0 }
0x3093   :  { %13453 = vrot.lane.b32.xlu1 %v15441_v32, %s14241_s15 }
0x309d   :  { %13458 = vrot.lane.b32.xlu0 %v15451_v63, %s14241_s15 }
0x30a1   :  { %5837 = vrot.lane.b32.xlu0 %v15433_v10, %s14242_s16 }
0x30a5   :  { %5841 = vrot.lane.b32.xlu0 %v15445_v57, %s14242_s16 }
0x30b7   :  { %5716 = vadd.xlane.f32.xlu1 %v5715_v42 }
0x30c8   :  { %5835 = vrot.lane.b32.xlu1 %v15435_v27, %s14242_s16 }
0x30cc   :  { %5839 = vrot.lane.b32.xlu1 %v15447_v58, %s14242_s16 }
0x310f   :  { %v5711_v55 = vpop.xlane.xlu1 %5710 }
0x3110   :  { %14002 = vrcp.f32 %v5711_v55  ;;  %v5708_v56 = vpop.xlane.xlu0 %5707 }
0x3111   :  { %14004 = vrcp.f32 %v5708_v56 }
0x3113   :  { %v13454_v62 = vpop.permute.xlu1 %13453 }
0x3114   :  { %v13456_v3 = vunpack.i.h.bf16 %v13454_v62  ;;  %v13455_v26 = vunpack.i.l.bf16 %v13454_v62  ;;  %v5714_v11 = vpop.xlane.xlu0 %5713 }
0x3115   :  { %14006 = vrcp.f32 %v5714_v11 }
0x3116   :  { %v12739_v45 = vpack.c.bf16 %v13456_v3, %v13455_v26 }
0x3118   :  { %12741 = vmatprep.subr.msk.bf16.mxu1 %vm14356_vm3, %v12739_v45  ;;  %v13459_v47 = vpop.permute.xlu0 %13458 }
0x3119   :  { %v13461_v25 = vunpack.i.h.bf16 %v13459_v47  ;;  %v13460_v37 = vunpack.i.l.bf16 %v13459_v47 }
0x311a   :  { %v14003_v23 = vpop.eup %14002 }
0x311b   :  { %v14005_v35 = vpop.eup %14004  ;;  %v5723_v19 = vmul.f32 %v14003_v23, %v13995_v53  ;;  %v12745_v18 = vpack.c.bf16 %v13461_v25, %v13460_v37 }
0x311c   :  { %v5722_v34 = vmul.f32 %v14005_v35, %v13997_v31  ;;  %v5838_v4 = vpop.permute.xlu0 %5837 }
0x311e   :  { %11905 = vmatprep.mubr.msk.f32.mxu1 %vm51_vm0, %v5722_v34 }
0x311f   :  { %11906 = vmatmul.mubr.msk.f32.vlgmr.msra.gmra.mrb[80].mxu1 %vm51_vm0, %v5723_v19  ;;  %v14007_v48 = vpop.eup %14006 }
0x3120   :  { %12744 = vmatpush3.bf16.xpose.msk.msra.mxu1 %vm14356_vm3, %v12739_v45  ;;  %v5724_v2 = vmul.f32 %v14007_v48, %v13999_v38  ;;  %v5842_v24 = vpop.permute.xlu0 %5841 }
0x3121   :  { %12747 = vmatprep.subr.msk.bf16.mxu1 %vm14356_vm3, %v12745_v18 }
0x3122   :  { %11908 = vmatprep.mubr.msk.f32.mxu1 %vm51_vm0, %v5724_v2 }
0x3128   :  { %12750 = vmatpush3.bf16.xpose.msk.msra.mxu1 %vm14356_vm3, %v12745_v18 }
0x3144   :  { %v5717_v49 = vpop.xlane.xlu1 %5716 }
0x3145   :  { %14008 = vrcp.f32 %v5717_v49 }
0x3148   :  { %v5836_v61 = vpop.permute.xlu1 %5835 }
0x314c   :  { %v5840_v43 = vpop.permute.xlu1 %5839 }
0x314f   :  { %v14009_v51 = vpop.eup %14008 }
0x3150   :  { %v5725_v1 = vmul.f32 %v14009_v51, %v14001_v28 }
0x3152   :  { %11909 = vmatmul.mubr.msk.f32.gmra.mrb[82].mxu1 %vm51_vm0, %v5725_v1 }
0x3153   :  { %11919 = vmatprep.mubr.msk.f32.mxu1 %vm161_vm1, %v5836_v61 }
0x3156   :  { %11920 = vmatmul.mubr.msk.f32.vlgmr.msra.gmra.mrb[84].mxu1 %vm161_vm1, %v5838_v4 }
0x3157   :  { %11922 = vmatprep.mubr.msk.f32.mxu1 %vm161_vm1, %v5840_v43 }
0x315a   :  { %11923 = vmatmul.mubr.msk.f32.gmra.mrb[86].mxu1 %vm161_vm1, %v5842_v24 }
0x31f2   :  { %v15565_v5 = vpop.f32.mrb[80].mxu1 }
0x31f3   :  { %v15567_v52 = vpop.f32.mrb[81].mxu1 }
0x3225   :  { %v15569_v6 = vpop.f32.mrb[82].mxu1 }
0x3226   :  { %v15571_v7 = vpop.f32.mrb[83].mxu1 }
0x3229   :  { %v11921_v29 = vpop.f32.mrb[84].mxu1 }
0x322a   :  { %v5953_v8 = vmul.f32 0.5, %v11921_v29  ;;  %v5933_v9 = vpop.f32.mrb[85].mxu1 }
0x322b   :  { %v5952_v0 = vmul.f32 0.5, %v5933_v9 }
0x322c   :  { %v5957_v21 = vadd.f32 %v5953_v8, %v14375_v46 }
0x322d   :  { %v5956_v22 = vadd.f32 %v5952_v0, %v14375_v46  ;;  %v11924_v59 = vpop.f32.mrb[86].mxu1 }
0x322e   :  { %v5955_v60 = vmul.f32 0.5, %v11924_v59  ;;  %v5943_v20 = vpop.f32.mrb[87].mxu1  ;;  %v5963_v36 = vsel %vm51_vm0, %v5957_v21, -inf }
0x322f   :  { %v5954_v44 = vmul.f32 0.5, %v5943_v20  ;;  %5964 = vmax.xlane.f32.xlu0 %v5963_v36  ;;  %v5960_v53 = vsel %vm51_vm0, %v5956_v22, -inf }
0x3230   :  { %v5959_v12 = vadd.f32 %v5955_v60, %v14379_v54  ;;  %5961 = vmax.xlane.f32.xlu1 %v5960_v53 }
0x3231   :  { %v5958_v31 = vadd.f32 %v5954_v44, %v14379_v54 }
0x3232   :  { %v5969_v13 = vsel %vm51_vm0, %v5959_v12, -inf }
0x3233   :  { %v5966_v14 = vsel %vm51_vm0, %v5958_v31, -inf }
0x3234   :  { %5970 = vmax.xlane.f32.xlu1 %v5969_v13  ;;  %5967 = vmax.xlane.f32.xlu0 %v5966_v14 }
0x3245   :  { %13468 = vrot.lane.b32.xlu1 %v15451_v63, %s14243_s17 }
0x324a   :  { %13463 = vrot.lane.b32.xlu0 %v15441_v32, %s14243_s17 }
0x32bc   :  { %v5965_v38 = vpop.xlane.xlu0 %5964 }
0x32bd   :  { %v5973_v39 = vsub.f32 %v5957_v21, %v5965_v38  ;;  %v5962_v30 = vpop.xlane.xlu1 %5961 }
0x32be   :  { %v5972_v41 = vsub.f32 %v5956_v22, %v5962_v30 }
0x32bf   :  { %v5978_v28 = vmul.f32 1.442695, %v5973_v39 }
0x32c0   :  { %v5976_v42 = vmul.f32 1.442695, %v5972_v41 }
0x32c1   :  { %14010 = vpow2.f32 %v5978_v28  ;;  %v5971_v55 = vpop.xlane.xlu1 %5970  ;;  %v5968_v56 = vpop.xlane.xlu0 %5967 }
0x32c2   :  { %14012 = vpow2.f32 %v5976_v42  ;;  %v5974_v62 = vsub.f32 %v5958_v31, %v5968_v56  ;;  %v5975_v51 = vsub.f32 %v5959_v12, %v5971_v55 }
0x32c4   :  { %v5980_v3 = vmul.f32 1.442695, %v5974_v62  ;;  %v5982_v61 = vmul.f32 1.442695, %v5975_v51 }
0x32c5   :  { %v13469_v26 = vpop.permute.xlu1 %13468  ;;  %v13464_v11 = vpop.permute.xlu0 %13463 }
0x32c6   :  { %v13466_v45 = vunpack.i.h.bf16 %v13464_v11  ;;  %14014 = vpow2.f32 %v5980_v3  ;;  %v13471_v47 = vunpack.i.h.bf16 %v13469_v26  ;;  %v13470_v23 = vunpack.i.l.bf16 %v13469_v26 }
0x32c7   :  { %v13465_v35 = vunpack.i.l.bf16 %v13464_v11  ;;  %14016 = vpow2.f32 %v5982_v61 }
0x32c8   :  { %v12755_v34 = vpack.c.bf16 %v13471_v47, %v13470_v23 }
0x32c9   :  { %v12751_v25 = vpack.c.bf16 %v13466_v45, %v13465_v35 }
0x32cb   :  { %v14011_v37 = vpop.eup %14010  ;;  %12752 = vmatprep.subr.bf16.mxu0 %v12751_v25 }
0x32cc   :  { %v14013_v19 = vpop.eup %14012  ;;  %12754 = vmatpush3.bf16.msra.mxu0 %v12751_v25  ;;  %v5987_v18 = vsel %vm51_vm0, %v14011_v37, 0.0 }
0x32cd   :  { %12756 = vmatprep.subr.bf16.mxu0 %v12755_v34  ;;  %5988 = vadd.xlane.f32.xlu1 %v5987_v18  ;;  %v5984_v48 = vsel %vm51_vm0, %v14013_v19, 0.0 }
0x32ce   :  { %5985 = vadd.xlane.f32.xlu0 %v5984_v48 }
0x32d0   :  { %12758 = vmatpush3.bf16.msra.mxu0 %v12755_v34  ;;  %v14015_v2 = vpop.eup %14014 }
0x32d1   :  { %v5990_v49 = vsel %vm51_vm0, %v14015_v2, 0.0  ;;  %v14017_v1 = vpop.eup %14016 }
0x32d2   :  { %5991 = vadd.xlane.f32.xlu0 %v5990_v49  ;;  %v5993_v4 = vsel %vm51_vm0, %v14017_v1, 0.0 }
0x32de   :  { %13473 = vrot.lane.b32.xlu1 %v15441_v32, %s14244_s18 }
0x32e8   :  { %13478 = vrot.lane.b32.xlu0 %v15451_v63, %s14244_s18  ;;  %s16695_s18 = smov 76  }
0x32ec   :  { %6115 = vrot.lane.b32.xlu0 %v15433_v10, %s14245_s19 }
0x32f0   :  { %6119 = vrot.lane.b32.xlu0 %v15445_v57, %s14245_s19 }
0x3302   :  { %5994 = vadd.xlane.f32.xlu1 %v5993_v4 }
0x3313   :  { %6113 = vrot.lane.b32.xlu1 %v15435_v27, %s14245_s19 }
0x3317   :  { %6117 = vrot.lane.b32.xlu1 %v15447_v58, %s14245_s19  ;;  %s16696_s19 = smov 108  }
0x335a   :  { %v5989_v43 = vpop.xlane.xlu1 %5988 }
0x335b   :  { %14018 = vrcp.f32 %v5989_v43  ;;  %v5986_v24 = vpop.xlane.xlu0 %5985 }
0x335c   :  { %14020 = vrcp.f32 %v5986_v24 }
0x335e   :  { %v13474_v29 = vpop.permute.xlu1 %13473 }
0x335f   :  { %v13476_v8 = vunpack.i.h.bf16 %v13474_v29  ;;  %v13475_v9 = vunpack.i.l.bf16 %v13474_v29  ;;  %v5992_v0 = vpop.xlane.xlu0 %5991 }
0x3360   :  { %14022 = vrcp.f32 %v5992_v0 }
0x3361   :  { %v12759_v21 = vpack.c.bf16 %v13476_v8, %v13475_v9 }
0x3363   :  { %12761 = vmatprep.subr.msk.bf16.mxu0 %vm14356_vm3, %v12759_v21  ;;  %v13479_v22 = vpop.permute.xlu0 %13478 }
0x3364   :  { %v13481_v20 = vunpack.i.h.bf16 %v13479_v22  ;;  %v13480_v36 = vunpack.i.l.bf16 %v13479_v22 }
0x3365   :  { %v14019_v59 = vpop.eup %14018 }
0x3366   :  { %v14021_v60 = vpop.eup %14020  ;;  %v6001_v53 = vmul.f32 %v14019_v59, %v14011_v37  ;;  %v12765_v12 = vpack.c.bf16 %v13481_v20, %v13480_v36 }
0x3367   :  { %v6000_v44 = vmul.f32 %v14021_v60, %v14013_v19  ;;  %v6116_v41 = vpop.permute.xlu0 %6115 }
0x3369   :  { %11933 = vmatprep.mubr.msk.f32.mxu0 %vm51_vm0, %v6000_v44 }
0x336a   :  { %11934 = vmatmul.mubr.msk.f32.vlgmr.msra.gmra.mrb[80].mxu0 %vm51_vm0, %v6001_v53  ;;  %v14023_v31 = vpop.eup %14022 }
0x336b   :  { %12764 = vmatpush3.bf16.xpose.msk.msra.mxu0 %vm14356_vm3, %v12759_v21  ;;  %v6002_v13 = vmul.f32 %v14023_v31, %v14015_v2  ;;  %v6120_v42 = vpop.permute.xlu0 %6119 }
0x336c   :  { %12767 = vmatprep.subr.msk.bf16.mxu0 %vm14356_vm3, %v12765_v12 }
0x336d   :  { %11936 = vmatprep.mubr.msk.f32.mxu0 %vm51_vm0, %v6002_v13 }
0x3373   :  { %12770 = vmatpush3.bf16.xpose.msk.msra.mxu0 %vm14356_vm3, %v12765_v12 }
0x338f   :  { %v5995_v14 = vpop.xlane.xlu1 %5994 }
0x3390   :  { %14024 = vrcp.f32 %v5995_v14 }
0x3393   :  { %v6114_v39 = vpop.permute.xlu1 %6113 }
0x3397   :  { %v6118_v28 = vpop.permute.xlu1 %6117 }
0x339a   :  { %v14025_v38 = vpop.eup %14024 }
0x339b   :  { %v6003_v30 = vmul.f32 %v14025_v38, %v14017_v1 }
0x339d   :  { %11937 = vmatmul.mubr.msk.f32.gmra.mrb[82].mxu0 %vm51_vm0, %v6003_v30 }
0x339e   :  { %11947 = vmatprep.mubr.msk.f32.mxu0 %vm161_vm1, %v6114_v39 }
0x33a1   :  { %11948 = vmatmul.mubr.msk.f32.vlgmr.msra.gmra.mrb[84].mxu0 %vm161_vm1, %v6116_v41 }
0x33a2   :  { %11950 = vmatprep.mubr.msk.f32.mxu0 %vm161_vm1, %v6118_v28 }
0x33a5   :  { %11951 = vmatmul.mubr.msk.f32.gmra.mrb[86].mxu0 %vm161_vm1, %v6120_v42 }
0x343d   :  { %v15617_v55 = vpop.f32.mrb[80].mxu0 }
0x343e   :  { %v15619_v56 = vpop.f32.mrb[81].mxu0 }
0x3470   :  { %v15621_v62 = vpop.f32.mrb[82].mxu0 }
0x3471   :  { %v15623_v3 = vpop.f32.mrb[83].mxu0 }
0x3474   :  { %v11949_v26 = vpop.f32.mrb[84].mxu0 }
0x3475   :  { %v6231_v11 = vmul.f32 0.5, %v11949_v26  ;;  %v6211_v45 = vpop.f32.mrb[85].mxu0 }
0x3476   :  { %v6230_v47 = vmul.f32 0.5, %v6211_v45 }
0x3477   :  { %v6235_v23 = vadd.f32 %v6231_v11, %v14375_v46 }
0x3478   :  { %v6234_v35 = vadd.f32 %v6230_v47, %v14375_v46  ;;  %v11952_v25 = vpop.f32.mrb[86].mxu0 }
0x3479   :  { %v6233_v37 = vmul.f32 0.5, %v11952_v25  ;;  %v6221_v34 = vpop.f32.mrb[87].mxu0  ;;  %v6241_v19 = vsel %vm51_vm0, %v6235_v23, -inf }
0x347a   :  { %v6232_v18 = vmul.f32 0.5, %v6221_v34  ;;  %6242 = vmax.xlane.f32.xlu0 %v6241_v19  ;;  %v6238_v48 = vsel %vm51_vm0, %v6234_v35, -inf }
0x347b   :  { %v6237_v2 = vadd.f32 %v6233_v37, %v14379_v54  ;;  %6239 = vmax.xlane.f32.xlu1 %v6238_v48 }
0x347c   :  { %v6236_v49 = vadd.f32 %v6232_v18, %v14379_v54 }
0x347d   :  { %v6247_v51 = vsel %vm51_vm0, %v6237_v2, -inf }
0x347e   :  { %v6244_v61 = vsel %vm51_vm0, %v6236_v49, -inf }
0x347f   :  { %6248 = vmax.xlane.f32.xlu1 %v6247_v51  ;;  %6245 = vmax.xlane.f32.xlu0 %v6244_v61 }
0x3490   :  { %13488 = vrot.lane.b32.xlu1 %v15451_v63, %s14246_s20 }
0x3495   :  { %13483 = vrot.lane.b32.xlu0 %v15441_v32, %s14246_s20  ;;  %s16697_s20 = smov 44  }
0x3507   :  { %v6243_v1 = vpop.xlane.xlu0 %6242 }
0x3508   :  { %v6251_v4 = vsub.f32 %v6235_v23, %v6243_v1  ;;  %v6240_v43 = vpop.xlane.xlu1 %6239 }
0x3509   :  { %v6250_v24 = vsub.f32 %v6234_v35, %v6240_v43 }
0x350a   :  { %v6256_v29 = vmul.f32 1.442695, %v6251_v4 }
0x350b   :  { %v6254_v8 = vmul.f32 1.442695, %v6250_v24 }
0x350c   :  { %14026 = vpow2.f32 %v6256_v29  ;;  %v6249_v9 = vpop.xlane.xlu1 %6248  ;;  %v6246_v0 = vpop.xlane.xlu0 %6245 }
0x350d   :  { %14028 = vpow2.f32 %v6254_v8  ;;  %v6252_v21 = vsub.f32 %v6236_v49, %v6246_v0  ;;  %v6253_v28 = vsub.f32 %v6237_v2, %v6249_v9 }
0x350f   :  { %v6258_v22 = vmul.f32 1.442695, %v6252_v21  ;;  %v6260_v42 = vmul.f32 1.442695, %v6253_v28 }
0x3510   :  { %v13489_v59 = vpop.permute.xlu1 %13488  ;;  %v13484_v60 = vpop.permute.xlu0 %13483 }
0x3511   :  { %v13486_v20 = vunpack.i.h.bf16 %v13484_v60  ;;  %14030 = vpow2.f32 %v6258_v22  ;;  %v13491_v36 = vunpack.i.h.bf16 %v13489_v59  ;;  %v13490_v44 = vunpack.i.l.bf16 %v13489_v59 }
0x3512   :  { %v13485_v53 = vunpack.i.l.bf16 %v13484_v60  ;;  %14032 = vpow2.f32 %v6260_v42 }
0x3513   :  { %v12775_v13 = vpack.c.bf16 %v13491_v36, %v13490_v44 }
0x3514   :  { %v12771_v12 = vpack.c.bf16 %v13486_v20, %v13485_v53 }
0x3516   :  { %v14027_v31 = vpop.eup %14026  ;;  %12772 = vmatprep.subr.bf16.mxu1 %v12771_v12 }
0x3517   :  { %v14029_v14 = vpop.eup %14028  ;;  %12774 = vmatpush3.bf16.msra.mxu1 %v12771_v12  ;;  %v6265_v38 = vsel %vm51_vm0, %v14027_v31, 0.0 }
0x3518   :  { %12776 = vmatprep.subr.bf16.mxu1 %v12775_v13  ;;  %6266 = vadd.xlane.f32.xlu1 %v6265_v38  ;;  %v6262_v39 = vsel %vm51_vm0, %v14029_v14, 0.0 }
0x3519   :  { %6263 = vadd.xlane.f32.xlu0 %v6262_v39 }
0x351b   :  { %12778 = vmatpush3.bf16.msra.mxu1 %v12775_v13  ;;  %v14031_v30 = vpop.eup %14030 }
0x351c   :  { %v6268_v41 = vsel %vm51_vm0, %v14031_v30, 0.0  ;;  %v14033_v26 = vpop.eup %14032 }
0x351d   :  { %6269 = vadd.xlane.f32.xlu0 %v6268_v41  ;;  %v6271_v11 = vsel %vm51_vm0, %v14033_v26, 0.0 }
0x3529   :  { %13493 = vrot.lane.b32.xlu1 %v15441_v32, %s16692_s12 }
0x3533   :  { %13498 = vrot.lane.b32.xlu0 %v15451_v63, %s16692_s12 }
0x3537   :  { %6393 = vrot.lane.b32.xlu0 %v15433_v10, %s16693_s13 }
0x353b   :  { %6397 = vrot.lane.b32.xlu0 %v15445_v57, %s16693_s13 }
0x354d   :  { %6272 = vadd.xlane.f32.xlu1 %v6271_v11 }
0x355e   :  { %6391 = vrot.lane.b32.xlu1 %v15435_v27, %s16693_s13 }
0x3562   :  { %6395 = vrot.lane.b32.xlu1 %v15447_v58, %s16693_s13 }
0x35a5   :  { %v6267_v45 = vpop.xlane.xlu1 %6266 }
0x35a6   :  { %14034 = vrcp.f32 %v6267_v45  ;;  %v6264_v47 = vpop.xlane.xlu0 %6263 }
0x35a7   :  { %14036 = vrcp.f32 %v6264_v47 }
0x35a9   :  { %v13494_v23 = vpop.permute.xlu1 %13493 }
0x35aa   :  { %v13496_v35 = vunpack.i.h.bf16 %v13494_v23  ;;  %v13495_v25 = vunpack.i.l.bf16 %v13494_v23  ;;  %v6270_v37 = vpop.xlane.xlu0 %6269 }
0x35ab   :  { %14038 = vrcp.f32 %v6270_v37 }
0x35ac   :  { %v12779_v34 = vpack.c.bf16 %v13496_v35, %v13495_v25 }
0x35ae   :  { %12781 = vmatprep.subr.msk.bf16.mxu1 %vm14356_vm3, %v12779_v34  ;;  %v13499_v19 = vpop.permute.xlu0 %13498 }
0x35af   :  { %v13501_v2 = vunpack.i.h.bf16 %v13499_v19  ;;  %v13500_v49 = vunpack.i.l.bf16 %v13499_v19 }
0x35b0   :  { %v14035_v18 = vpop.eup %14034 }
0x35b1   :  { %v14037_v48 = vpop.eup %14036  ;;  %v6279_v61 = vmul.f32 %v14035_v18, %v14027_v31  ;;  %v12785_v1 = vpack.c.bf16 %v13501_v2, %v13500_v49 }
0x35b2   :  { %v6278_v51 = vmul.f32 %v14037_v48, %v14029_v14  ;;  %v6394_v0 = vpop.permute.xlu0 %6393 }
0x35b4   :  { %11961 = vmatprep.mubr.msk.f32.mxu1 %vm51_vm0, %v6278_v51 }
0x35b5   :  { %11962 = vmatmul.mubr.msk.f32.vlgmr.msra.gmra.mrb[88].mxu1 %vm51_vm0, %v6279_v61  ;;  %v14039_v4 = vpop.eup %14038 }
0x35b6   :  { %12784 = vmatpush3.bf16.xpose.msk.msra.mxu1 %vm14356_vm3, %v12779_v34  ;;  %v6280_v43 = vmul.f32 %v14039_v4, %v14031_v30  ;;  %v6398_v22 = vpop.permute.xlu0 %6397 }
0x35b7   :  { %12787 = vmatprep.subr.msk.bf16.mxu1 %vm14356_vm3, %v12785_v1 }
0x35b8   :  { %11964 = vmatprep.mubr.msk.f32.mxu1 %vm51_vm0, %v6280_v43 }
0x35be   :  { %12790 = vmatpush3.bf16.xpose.msk.msra.mxu1 %vm14356_vm3, %v12785_v1 }
0x35da   :  { %v6273_v24 = vpop.xlane.xlu1 %6272 }
0x35db   :  { %14040 = vrcp.f32 %v6273_v24 }
0x35de   :  { %v6392_v8 = vpop.permute.xlu1 %6391 }
0x35e2   :  { %v6396_v21 = vpop.permute.xlu1 %6395 }
0x35e5   :  { %v14041_v29 = vpop.eup %14040 }
0x35e6   :  { %v6281_v9 = vmul.f32 %v14041_v29, %v14033_v26 }
0x35e8   :  { %11965 = vmatmul.mubr.msk.f32.gmra.mrb[90].mxu1 %vm51_vm0, %v6281_v9 }
0x35e9   :  { %11975 = vmatprep.mubr.msk.f32.mxu1 %vm161_vm1, %v6392_v8 }
0x35ec   :  { %11976 = vmatmul.mubr.msk.f32.vlgmr.msra.gmra.mrb[92].mxu1 %vm161_vm1, %v6394_v0 }
0x35ed   :  { %11978 = vmatprep.mubr.msk.f32.mxu1 %vm161_vm1, %v6396_v21 }
0x35f0   :  { %11979 = vmatmul.mubr.msk.f32.gmra.mrb[94].mxu1 %vm161_vm1, %v6398_v22 }
0x3688   :  { %v15669_v59 = vpop.f32.mrb[88].mxu1 }
0x3689   :  { %v15671_v60 = vpop.f32.mrb[89].mxu1 }
0x36bb   :  { %v15673_v20 = vpop.f32.mrb[90].mxu1 }
0x36bc   :  { %v15675_v36 = vpop.f32.mrb[91].mxu1 }
0x36bf   :  { %v11977_v44 = vpop.f32.mrb[92].mxu1 }
0x36c0   :  { %v6509_v53 = vmul.f32 0.5, %v11977_v44  ;;  %v6489_v12 = vpop.f32.mrb[93].mxu1 }
0x36c1   :  { %v6508_v31 = vmul.f32 0.5, %v6489_v12 }
0x36c2   :  { %v6513_v13 = vadd.f32 %v6509_v53, %v14375_v46 }
0x36c3   :  { %v6512_v14 = vadd.f32 %v6508_v31, %v14375_v46  ;;  %v11980_v38 = vpop.f32.mrb[94].mxu1 }
0x36c4   :  { %v6511_v39 = vmul.f32 0.5, %v11980_v38  ;;  %v6499_v30 = vpop.f32.mrb[95].mxu1  ;;  %v6519_v41 = vsel %vm51_vm0, %v6513_v13, -inf }
0x36c5   :  { %v6510_v28 = vmul.f32 0.5, %v6499_v30  ;;  %6520 = vmax.xlane.f32.xlu0 %v6519_v41  ;;  %v6516_v42 = vsel %vm51_vm0, %v6512_v14, -inf }
0x36c6   :  { %v6515_v26 = vadd.f32 %v6511_v39, %v14379_v54  ;;  %6517 = vmax.xlane.f32.xlu1 %v6516_v42 }
0x36c7   :  { %v6514_v11 = vadd.f32 %v6510_v28, %v14379_v54 }
0x36c8   :  { %v6525_v45 = vsel %vm51_vm0, %v6515_v26, -inf }
0x36c9   :  { %v6522_v47 = vsel %vm51_vm0, %v6514_v11, -inf }
0x36ca   :  { %6526 = vmax.xlane.f32.xlu1 %v6525_v45  ;;  %6523 = vmax.xlane.f32.xlu0 %v6522_v47 }
0x36db   :  { %13508 = vrot.lane.b32.xlu1 %v15451_v63, %s16694_s14 }
0x36e0   :  { %13503 = vrot.lane.b32.xlu0 %v15441_v32, %s16694_s14 }
0x3752   :  { %v6521_v23 = vpop.xlane.xlu0 %6520 }
0x3753   :  { %v6529_v35 = vsub.f32 %v6513_v13, %v6521_v23  ;;  %v6518_v25 = vpop.xlane.xlu1 %6517 }
0x3754   :  { %v6528_v37 = vsub.f32 %v6512_v14, %v6518_v25 }
0x3755   :  { %v6534_v34 = vmul.f32 1.442695, %v6529_v35 }
0x3756   :  { %v6532_v19 = vmul.f32 1.442695, %v6528_v37 }
0x3757   :  { %14042 = vpow2.f32 %v6534_v34  ;;  %v6527_v18 = vpop.xlane.xlu1 %6526  ;;  %v6524_v48 = vpop.xlane.xlu0 %6523 }
0x3758   :  { %14044 = vpow2.f32 %v6532_v19  ;;  %v6530_v2 = vsub.f32 %v6514_v11, %v6524_v48  ;;  %v6531_v12 = vsub.f32 %v6515_v26, %v6527_v18 }
0x375a   :  { %v6536_v49 = vmul.f32 1.442695, %v6530_v2  ;;  %v6538_v31 = vmul.f32 1.442695, %v6531_v12 }
0x375b   :  { %v13509_v51 = vpop.permute.xlu1 %13508  ;;  %v13504_v61 = vpop.permute.xlu0 %13503 }
0x375c   :  { %v13506_v1 = vunpack.i.h.bf16 %v13504_v61  ;;  %14046 = vpow2.f32 %v6536_v49  ;;  %v13511_v4 = vunpack.i.h.bf16 %v13509_v51  ;;  %v13510_v43 = vunpack.i.l.bf16 %v13509_v51 }
0x375d   :  { %v13505_v24 = vunpack.i.l.bf16 %v13504_v61  ;;  %14048 = vpow2.f32 %v6538_v31 }
0x375e   :  { %v12795_v9 = vpack.c.bf16 %v13511_v4, %v13510_v43 }
0x375f   :  { %v12791_v29 = vpack.c.bf16 %v13506_v1, %v13505_v24 }
0x3761   :  { %v14043_v8 = vpop.eup %14042  ;;  %12792 = vmatprep.subr.bf16.mxu0 %v12791_v29 }
0x3762   :  { %v14045_v0 = vpop.eup %14044  ;;  %12794 = vmatpush3.bf16.msra.mxu0 %v12791_v29  ;;  %v6543_v21 = vsel %vm51_vm0, %v14043_v8, 0.0 }
0x3763   :  { %12796 = vmatprep.subr.bf16.mxu0 %v12795_v9  ;;  %6544 = vadd.xlane.f32.xlu1 %v6543_v21  ;;  %v6540_v22 = vsel %vm51_vm0, %v14045_v0, 0.0 }
0x3764   :  { %6541 = vadd.xlane.f32.xlu0 %v6540_v22 }
0x3766   :  { %12798 = vmatpush3.bf16.msra.mxu0 %v12795_v9  ;;  %v14047_v44 = vpop.eup %14046 }
0x3767   :  { %v6546_v53 = vsel %vm51_vm0, %v14047_v44, 0.0  ;;  %v14049_v13 = vpop.eup %14048 }
0x3768   :  { %6547 = vadd.xlane.f32.xlu0 %v6546_v53  ;;  %v6549_v14 = vsel %vm51_vm0, %v14049_v13, 0.0 }
0x3774   :  { %13513 = vrot.lane.b32.xlu1 %v15441_v32, %s16695_s18 }
0x377e   :  { %13518 = vrot.lane.b32.xlu0 %v15451_v63, %s16695_s18 }
0x3782   :  { %6671 = vrot.lane.b32.xlu0 %v15433_v10, %s16696_s19 }
0x3786   :  { %6675 = vrot.lane.b32.xlu0 %v15445_v57, %s16696_s19 }
0x3798   :  { %6550 = vadd.xlane.f32.xlu1 %v6549_v14 }
0x37a9   :  { %6669 = vrot.lane.b32.xlu1 %v15435_v27, %s16696_s19 }
0x37ad   :  { %6673 = vrot.lane.b32.xlu1 %v15447_v58, %s16696_s19 }
0x37f0   :  { %v6545_v38 = vpop.xlane.xlu1 %6544 }
0x37f1   :  { %14050 = vrcp.f32 %v6545_v38  ;;  %v6542_v39 = vpop.xlane.xlu0 %6541 }
0x37f2   :  { %14052 = vrcp.f32 %v6542_v39 }
0x37f4   :  { %v13514_v30 = vpop.permute.xlu1 %13513 }
0x37f5   :  { %v13516_v41 = vunpack.i.h.bf16 %v13514_v30  ;;  %v13515_v28 = vunpack.i.l.bf16 %v13514_v30  ;;  %v6548_v42 = vpop.xlane.xlu0 %6547 }
0x37f6   :  { %14054 = vrcp.f32 %v6548_v42 }
0x37f7   :  { %v12799_v26 = vpack.c.bf16 %v13516_v41, %v13515_v28 }
0x37f9   :  { %12801 = vmatprep.subr.msk.bf16.mxu0 %vm14356_vm3, %v12799_v26  ;;  %v13519_v11 = vpop.permute.xlu0 %13518 }
0x37fa   :  { %v13521_v23 = vunpack.i.h.bf16 %v13519_v11  ;;  %v13520_v35 = vunpack.i.l.bf16 %v13519_v11 }
0x37fb   :  { %v14051_v45 = vpop.eup %14050 }
0x37fc   :  { %v14053_v47 = vpop.eup %14052  ;;  %v6557_v37 = vmul.f32 %v14051_v45, %v14043_v8  ;;  %v12805_v34 = vpack.c.bf16 %v13521_v23, %v13520_v35 }
0x37fd   :  { %v6556_v25 = vmul.f32 %v14053_v47, %v14045_v0  ;;  %v6672_v61 = vpop.permute.xlu0 %6671 }
0x37ff   :  { %11989 = vmatprep.mubr.msk.f32.mxu0 %vm51_vm0, %v6556_v25 }
0x3800   :  { %11990 = vmatmul.mubr.msk.f32.vlgmr.msra.gmra.mrb[88].mxu0 %vm51_vm0, %v6557_v37  ;;  %v14055_v19 = vpop.eup %14054 }
0x3801   :  { %12804 = vmatpush3.bf16.xpose.msk.msra.mxu0 %vm14356_vm3, %v12799_v26  ;;  %v6558_v18 = vmul.f32 %v14055_v19, %v14047_v44  ;;  %v6676_v4 = vpop.permute.xlu0 %6675 }
0x3802   :  { %12807 = vmatprep.subr.msk.bf16.mxu0 %vm14356_vm3, %v12805_v34 }
0x3803   :  { %11992 = vmatprep.mubr.msk.f32.mxu0 %vm51_vm0, %v6558_v18 }
0x3809   :  { %12810 = vmatpush3.bf16.xpose.msk.msra.mxu0 %vm14356_vm3, %v12805_v34 }
0x3825   :  { %v6551_v48 = vpop.xlane.xlu1 %6550 }
0x3826   :  { %14056 = vrcp.f32 %v6551_v48 }
0x3829   :  { %v6670_v49 = vpop.permute.xlu1 %6669 }
0x382d   :  { %v6674_v1 = vpop.permute.xlu1 %6673 }
0x3830   :  { %v14057_v2 = vpop.eup %14056 }
0x3831   :  { %v6559_v51 = vmul.f32 %v14057_v2, %v14049_v13 }
0x3833   :  { %11993 = vmatmul.mubr.msk.f32.gmra.mrb[90].mxu0 %vm51_vm0, %v6559_v51 }
0x3834   :  { %12003 = vmatprep.mubr.msk.f32.mxu0 %vm161_vm1, %v6670_v49 }
0x3837   :  { %12004 = vmatmul.mubr.msk.f32.vlgmr.msra.gmra.mrb[92].mxu0 %vm161_vm1, %v6672_v61 }
0x3838   :  { %12006 = vmatprep.mubr.msk.f32.mxu0 %vm161_vm1, %v6674_v1 }
0x383b   :  { %12007 = vmatmul.mubr.msk.f32.gmra.mrb[94].mxu0 %vm161_vm1, %v6676_v4 }
0x38d3   :  { %v15721_v43 = vpop.f32.mrb[88].mxu0 }
0x38d4   :  { %v15723_v24 = vpop.f32.mrb[89].mxu0 }
0x3906   :  { %v15725_v29 = vpop.f32.mrb[90].mxu0 }
0x3907   :  { %v15727_v8 = vpop.f32.mrb[91].mxu0 }
0x390a   :  { %v12005_v9 = vpop.f32.mrb[92].mxu0 }
0x390b   :  { %v6787_v0 = vmul.f32 0.5, %v12005_v9  ;;  %v6767_v21 = vpop.f32.mrb[93].mxu0 }
0x390c   :  { %v6786_v22 = vmul.f32 0.5, %v6767_v21 }
0x390d   :  { %v6791_v44 = vadd.f32 %v6787_v0, %v14375_v46 }
0x390e   :  { %v6790_v53 = vadd.f32 %v6786_v22, %v14375_v46  ;;  %v12008_v12 = vpop.f32.mrb[94].mxu0 }
0x390f   :  { %v6789_v31 = vmul.f32 0.5, %v12008_v12  ;;  %v6777_v13 = vpop.f32.mrb[95].mxu0  ;;  %v6797_v14 = vsel %vm51_vm0, %v6791_v44, -inf }
0x3910   :  { %v6788_v38 = vmul.f32 0.5, %v6777_v13  ;;  %6798 = vmax.xlane.f32.xlu0 %v6797_v14  ;;  %v6794_v39 = vsel %vm51_vm0, %v6790_v53, -inf }
0x3911   :  { %v6793_v30 = vadd.f32 %v6789_v31, %v14379_v54  ;;  %6795 = vmax.xlane.f32.xlu1 %v6794_v39 }
0x3912   :  { %v6792_v41 = vadd.f32 %v6788_v38, %v14379_v54 }
0x3913   :  { %v6803_v28 = vsel %vm51_vm0, %v6793_v30, -inf }
0x3914   :  { %v6800_v42 = vsel %vm51_vm0, %v6792_v41, -inf }
0x3915   :  { %6804 = vmax.xlane.f32.xlu1 %v6803_v28  ;;  %6801 = vmax.xlane.f32.xlu0 %v6800_v42 }
0x3926   :  { %13528 = vrot.lane.b32.xlu1 %v15451_v63, %s16697_s20 }
0x392b   :  { %13523 = vrot.lane.b32.xlu0 %v15441_v32, %s16697_s20 }
0x399d   :  { %v6799_v26 = vpop.xlane.xlu0 %6798 }
0x399e   :  { %v6807_v11 = vsub.f32 %v6791_v44, %v6799_v26  ;;  %v6796_v45 = vpop.xlane.xlu1 %6795 }
0x399f   :  { %v6806_v47 = vsub.f32 %v6790_v53, %v6796_v45 }
0x39a0   :  { %v6812_v23 = vmul.f32 1.442695, %v6807_v11 }
0x39a1   :  { %v6810_v35 = vmul.f32 1.442695, %v6806_v47 }
0x39a2   :  { %14058 = vpow2.f32 %v6812_v23  ;;  %v6805_v25 = vpop.xlane.xlu1 %6804  ;;  %v6802_v37 = vpop.xlane.xlu0 %6801 }
0x39a3   :  { %14060 = vpow2.f32 %v6810_v35  ;;  %v6808_v34 = vsub.f32 %v6792_v41, %v6802_v37  ;;  %v6809_v12 = vsub.f32 %v6793_v30, %v6805_v25 }
0x39a5   :  { %v6814_v19 = vmul.f32 1.442695, %v6808_v34  ;;  %v6816_v31 = vmul.f32 1.442695, %v6809_v12 }
0x39a6   :  { %v13529_v18 = vpop.permute.xlu1 %13528  ;;  %v13524_v48 = vpop.permute.xlu0 %13523 }
0x39a7   :  { %v13526_v2 = vunpack.i.h.bf16 %v13524_v48  ;;  %14062 = vpow2.f32 %v6814_v19  ;;  %v13531_v49 = vunpack.i.h.bf16 %v13529_v18  ;;  %v13530_v51 = vunpack.i.l.bf16 %v13529_v18 }
0x39a8   :  { %v13525_v61 = vunpack.i.l.bf16 %v13524_v48  ;;  %14064 = vpow2.f32 %v6816_v31 }
0x39a9   :  { %v12815_v9 = vpack.c.bf16 %v13531_v49, %v13530_v51 }
0x39aa   :  { %v12811_v1 = vpack.c.bf16 %v13526_v2, %v13525_v61 }
0x39ac   :  { %v14059_v4 = vpop.eup %14058  ;;  %12812 = vmatprep.subr.bf16.mxu1 %v12811_v1 }
0x39ad   :  { %v14061_v0 = vpop.eup %14060  ;;  %12814 = vmatpush3.bf16.msra.mxu1 %v12811_v1  ;;  %v6821_v21 = vsel %vm51_vm0, %v14059_v4, 0.0 }
0x39ae   :  { %12816 = vmatprep.subr.bf16.mxu1 %v12815_v9  ;;  %6822 = vadd.xlane.f32.xlu1 %v6821_v21  ;;  %v6818_v22 = vsel %vm51_vm0, %v14061_v0, 0.0 }
0x39af   :  { %6819 = vadd.xlane.f32.xlu0 %v6818_v22 }
0x39b1   :  { %12818 = vmatpush3.bf16.msra.mxu1 %v12815_v9  ;;  %v14063_v44 = vpop.eup %14062 }
0x39b2   :  { %v6824_v53 = vsel %vm51_vm0, %v14063_v44, 0.0  ;;  %v14065_v13 = vpop.eup %14064 }
0x39b3   :  { %6825 = vadd.xlane.f32.xlu0 %v6824_v53  ;;  %v6827_v14 = vsel %vm51_vm0, %v14065_v13, 0.0 }
0x39bf   :  { %13533 = vrot.lane.b32.xlu1 %v15441_v32, %s16698_s21 }
0x39c9   :  { %13538 = vrot.lane.b32.xlu0 %v15451_v63, %s16698_s21 }
0x39cd   :  { %6949 = vrot.lane.b32.xlu0 %v15433_v10, %s16699_s22 }
0x39d1   :  { %6953 = vrot.lane.b32.xlu0 %v15445_v57, %s16699_s22 }
0x39e3   :  { %6828 = vadd.xlane.f32.xlu1 %v6827_v14 }
0x39f4   :  { %6947 = vrot.lane.b32.xlu1 %v15435_v27, %s16699_s22 }
0x39f8   :  { %6951 = vrot.lane.b32.xlu1 %v15447_v58, %s16699_s22 }
0x3a3b   :  { %v6823_v38 = vpop.xlane.xlu1 %6822 }
0x3a3c   :  { %14066 = vrcp.f32 %v6823_v38  ;;  %v6820_v39 = vpop.xlane.xlu0 %6819 }
0x3a3d   :  { %14068 = vrcp.f32 %v6820_v39 }
0x3a3f   :  { %v13534_v30 = vpop.permute.xlu1 %13533 }
0x3a40   :  { %v13536_v41 = vunpack.i.h.bf16 %v13534_v30  ;;  %v13535_v28 = vunpack.i.l.bf16 %v13534_v30  ;;  %v6826_v42 = vpop.xlane.xlu0 %6825 }
0x3a41   :  { %14070 = vrcp.f32 %v6826_v42 }
0x3a42   :  { %v12819_v26 = vpack.c.bf16 %v13536_v41, %v13535_v28 }
0x3a44   :  { %12821 = vmatprep.subr.msk.bf16.mxu1 %vm14356_vm3, %v12819_v26  ;;  %v13539_v11 = vpop.permute.xlu0 %13538 }
0x3a45   :  { %v13541_v23 = vunpack.i.h.bf16 %v13539_v11  ;;  %v13540_v35 = vunpack.i.l.bf16 %v13539_v11 }
0x3a46   :  { %v14067_v45 = vpop.eup %14066 }
0x3a47   :  { %v14069_v47 = vpop.eup %14068  ;;  %v6835_v37 = vmul.f32 %v14067_v45, %v14059_v4  ;;  %v12825_v34 = vpack.c.bf16 %v13541_v23, %v13540_v35 }
0x3a48   :  { %v6834_v25 = vmul.f32 %v14069_v47, %v14061_v0  ;;  %v6950_v61 = vpop.permute.xlu0 %6949 }
0x3a4a   :  { %12017 = vmatprep.mubr.msk.f32.mxu1 %vm51_vm0, %v6834_v25 }
0x3a4b   :  { %12018 = vmatmul.mubr.msk.f32.vlgmr.msra.gmra.mrb[96].mxu1 %vm51_vm0, %v6835_v37  ;;  %v14071_v19 = vpop.eup %14070 }
0x3a4c   :  { %12824 = vmatpush3.bf16.xpose.msk.msra.mxu1 %vm14356_vm3, %v12819_v26  ;;  %v6836_v18 = vmul.f32 %v14071_v19, %v14063_v44  ;;  %v6954_v4 = vpop.permute.xlu0 %6953 }
0x3a4d   :  { %12827 = vmatprep.subr.msk.bf16.mxu1 %vm14356_vm3, %v12825_v34 }
0x3a4e   :  { %12020 = vmatprep.mubr.msk.f32.mxu1 %vm51_vm0, %v6836_v18 }
0x3a54   :  { %12830 = vmatpush3.bf16.xpose.msk.msra.mxu1 %vm14356_vm3, %v12825_v34 }
0x3a70   :  { %v6829_v48 = vpop.xlane.xlu1 %6828 }
0x3a71   :  { %14072 = vrcp.f32 %v6829_v48 }
0x3a74   :  { %v6948_v49 = vpop.permute.xlu1 %6947 }
0x3a78   :  { %v6952_v1 = vpop.permute.xlu1 %6951 }
0x3a7b   :  { %v14073_v2 = vpop.eup %14072 }
0x3a7c   :  { %v6837_v51 = vmul.f32 %v14073_v2, %v14065_v13 }
0x3a7e   :  { %12021 = vmatmul.mubr.msk.f32.gmra.mrb[98].mxu1 %vm51_vm0, %v6837_v51 }
0x3a7f   :  { %12031 = vmatprep.mubr.msk.f32.mxu1 %vm161_vm1, %v6948_v49 }
0x3a82   :  { %12032 = vmatmul.mubr.msk.f32.vlgmr.msra.gmra.mrb[100].mxu1 %vm161_vm1, %v6950_v61 }
0x3a83   :  { %12034 = vmatprep.mubr.msk.f32.mxu1 %vm161_vm1, %v6952_v1 }
0x3a86   :  { %12035 = vmatmul.mubr.msk.f32.gmra.mrb[102].mxu1 %vm161_vm1, %v6954_v4 }
0x3b1e   :  { %v15773_v9 = vpop.f32.mrb[96].mxu1 }
0x3b1f   :  { %v15775_v0 = vpop.f32.mrb[97].mxu1 }
0x3b51   :  { %v15777_v21 = vpop.f32.mrb[98].mxu1 }
0x3b52   :  { %v15779_v22 = vpop.f32.mrb[99].mxu1 }
0x3b55   :  { %v12033_v44 = vpop.f32.mrb[100].mxu1 }
0x3b56   :  { %v7065_v53 = vmul.f32 0.5, %v12033_v44  ;;  %v7045_v12 = vpop.f32.mrb[101].mxu1 }
0x3b57   :  { %v7064_v31 = vmul.f32 0.5, %v7045_v12 }
0x3b58   :  { %v7069_v13 = vadd.f32 %v7065_v53, %v14375_v46 }
0x3b59   :  { %v7068_v14 = vadd.f32 %v7064_v31, %v14375_v46  ;;  %v12036_v38 = vpop.f32.mrb[102].mxu1 }
0x3b5a   :  { %v7067_v39 = vmul.f32 0.5, %v12036_v38  ;;  %v7055_v30 = vpop.f32.mrb[103].mxu1  ;;  %v7075_v41 = vsel %vm51_vm0, %v7069_v13, -inf }
0x3b5b   :  { %v7066_v28 = vmul.f32 0.5, %v7055_v30  ;;  %7076 = vmax.xlane.f32.xlu0 %v7075_v41  ;;  %v7072_v42 = vsel %vm51_vm0, %v7068_v14, -inf }
0x3b5c   :  { %v7071_v26 = vadd.f32 %v7067_v39, %v14379_v54  ;;  %7073 = vmax.xlane.f32.xlu1 %v7072_v42 }
0x3b5d   :  { %v7070_v11 = vadd.f32 %v7066_v28, %v14379_v54 }
0x3b5e   :  { %v7081_v45 = vsel %vm51_vm0, %v7071_v26, -inf }
0x3b5f   :  { %v7078_v47 = vsel %vm51_vm0, %v7070_v11, -inf }
0x3b60   :  { %7082 = vmax.xlane.f32.xlu1 %v7081_v45  ;;  %7079 = vmax.xlane.f32.xlu0 %v7078_v47 }
0x3b71   :  { %13548 = vrot.lane.b32.xlu1 %v15451_v63, %s16700_s23 }
0x3b76   :  { %13543 = vrot.lane.b32.xlu0 %v15441_v32, %s16700_s23 }
0x3be8   :  { %v7077_v23 = vpop.xlane.xlu0 %7076 }
0x3be9   :  { %v7085_v35 = vsub.f32 %v7069_v13, %v7077_v23  ;;  %v7074_v25 = vpop.xlane.xlu1 %7073 }
0x3bea   :  { %v7084_v37 = vsub.f32 %v7068_v14, %v7074_v25 }
0x3beb   :  { %v7090_v34 = vmul.f32 1.442695, %v7085_v35 }
0x3bec   :  { %v7088_v19 = vmul.f32 1.442695, %v7084_v37 }
0x3bed   :  { %14074 = vpow2.f32 %v7090_v34  ;;  %v7083_v18 = vpop.xlane.xlu1 %7082  ;;  %v7080_v48 = vpop.xlane.xlu0 %7079 }
0x3bee   :  { %14076 = vpow2.f32 %v7088_v19  ;;  %v7086_v2 = vsub.f32 %v7070_v11, %v7080_v48  ;;  %v7087_v28 = vsub.f32 %v7071_v26, %v7083_v18 }
0x3bf0   :  { %v7092_v49 = vmul.f32 1.442695, %v7086_v2  ;;  %v7094_v42 = vmul.f32 1.442695, %v7087_v28 }
0x3bf1   :  { %v13549_v51 = vpop.permute.xlu1 %13548  ;;  %v13544_v61 = vpop.permute.xlu0 %13543 }
0x3bf2   :  { %v13546_v1 = vunpack.i.h.bf16 %v13544_v61  ;;  %14078 = vpow2.f32 %v7092_v49  ;;  %v13551_v4 = vunpack.i.h.bf16 %v13549_v51  ;;  %v13550_v44 = vunpack.i.l.bf16 %v13549_v51 }
0x3bf3   :  { %v13545_v53 = vunpack.i.l.bf16 %v13544_v61  ;;  %14080 = vpow2.f32 %v7094_v42 }
0x3bf4   :  { %v12835_v13 = vpack.c.bf16 %v13551_v4, %v13550_v44 }
0x3bf5   :  { %v12831_v12 = vpack.c.bf16 %v13546_v1, %v13545_v53 }
0x3bf7   :  { %v14075_v31 = vpop.eup %14074  ;;  %12832 = vmatprep.subr.bf16.mxu0 %v12831_v12 }
0x3bf8   :  { %v14077_v14 = vpop.eup %14076  ;;  %12834 = vmatpush3.bf16.msra.mxu0 %v12831_v12  ;;  %v7099_v38 = vsel %vm51_vm0, %v14075_v31, 0.0 }
0x3bf9   :  { %12836 = vmatprep.subr.bf16.mxu0 %v12835_v13  ;;  %7100 = vadd.xlane.f32.xlu1 %v7099_v38  ;;  %v7096_v39 = vsel %vm51_vm0, %v14077_v14, 0.0 }
0x3bfa   :  { %7097 = vadd.xlane.f32.xlu0 %v7096_v39 }
0x3bfc   :  { %12838 = vmatpush3.bf16.msra.mxu0 %v12835_v13  ;;  %v14079_v30 = vpop.eup %14078 }
0x3bfd   :  { %v7102_v41 = vsel %vm51_vm0, %v14079_v30, 0.0  ;;  %v14081_v11 = vpop.eup %14080 }
0x3bfe   :  { %7103 = vadd.xlane.f32.xlu0 %v7102_v41  ;;  %v7105_v45 = vsel %vm51_vm0, %v14081_v11, 0.0 }
0x3c0a   :  { %13553 = vrot.lane.b32.xlu1 %v15441_v32, %s16684_s4 }
0x3c14   :  { %13558 = vrot.lane.b32.xlu0 %v15451_v63, %s16684_s4 }
0x3c18   :  { %7227 = vrot.lane.b32.xlu0 %v15433_v10, %s16685_s6 }
0x3c1c   :  { %7231 = vrot.lane.b32.xlu0 %v15445_v57, %s16685_s6 }
0x3c2e   :  { %7106 = vadd.xlane.f32.xlu1 %v7105_v45 }
0x3c3f   :  { %7225 = vrot.lane.b32.xlu1 %v15435_v27, %s16685_s6 }
0x3c43   :  { %7229 = vrot.lane.b32.xlu1 %v15447_v58, %s16685_s6 }
0x3c86   :  { %v7101_v47 = vpop.xlane.xlu1 %7100 }
0x3c87   :  { %14082 = vrcp.f32 %v7101_v47  ;;  %v7098_v26 = vpop.xlane.xlu0 %7097 }
0x3c88   :  { %14084 = vrcp.f32 %v7098_v26 }
0x3c8a   :  { %v13554_v10 = vpop.permute.xlu1 %13553 }
0x3c8b   :  { %v13556_v23 = vunpack.i.h.bf16 %v13554_v10  ;;  %v13555_v35 = vunpack.i.l.bf16 %v13554_v10  ;;  %v7104_v25 = vpop.xlane.xlu0 %7103 }
0x3c8c   :  { %14086 = vrcp.f32 %v7104_v25 }
0x3c8d   :  { %v12839_v57 = vpack.c.bf16 %v13556_v23, %v13555_v35 }
0x3c8f   :  { %12841 = vmatprep.subr.msk.bf16.mxu0 %vm14356_vm3, %v12839_v57  ;;  %v13559_v37 = vpop.permute.xlu0 %13558 }
0x3c90   :  { %v13561_v27 = vunpack.i.h.bf16 %v13559_v37  ;;  %v13560_v18 = vunpack.i.l.bf16 %v13559_v37 }
0x3c91   :  { %v14083_v34 = vpop.eup %14082 }
0x3c92   :  { %v14085_v19 = vpop.eup %14084  ;;  %v7113_v58 = vmul.f32 %v14083_v34, %v14075_v31  ;;  %v12845_v2 = vpack.c.bf16 %v13561_v27, %v13560_v18 }
0x3c93   :  { %v7112_v48 = vmul.f32 %v14085_v19, %v14077_v14  ;;  %v7228_v53 = vpop.permute.xlu0 %7227 }
0x3c95   :  { %12045 = vmatprep.mubr.msk.f32.mxu0 %vm51_vm0, %v7112_v48 }
0x3c96   :  { %12046 = vmatmul.mubr.msk.f32.vlgmr.msra.gmra.mrb[96].mxu0 %vm51_vm0, %v7113_v58  ;;  %v14087_v49 = vpop.eup %14086 }
0x3c97   :  { %12844 = vmatpush3.bf16.xpose.msk.msra.mxu0 %vm14356_vm3, %v12839_v57  ;;  %v7114_v51 = vmul.f32 %v14087_v49, %v14079_v30  ;;  %v7232_v31 = vpop.permute.xlu0 %7231 }
0x3c98   :  { %12847 = vmatprep.subr.msk.bf16.mxu0 %vm14356_vm3, %v12845_v2 }
0x3c99   :  { %12048 = vmatprep.mubr.msk.f32.mxu0 %vm51_vm0, %v7114_v51 }
0x3c9f   :  { %12850 = vmatpush3.bf16.xpose.msk.msra.mxu0 %vm14356_vm3, %v12845_v2 }
0x3cbb   :  { %v7107_v61 = vpop.xlane.xlu1 %7106 }
0x3cbc   :  { %14088 = vrcp.f32 %v7107_v61 }
0x3cbf   :  { %v7226_v4 = vpop.permute.xlu1 %7225 }
0x3cc3   :  { %v7230_v12 = vpop.permute.xlu1 %7229 }
0x3cc6   :  { %v14089_v1 = vpop.eup %14088 }
0x3cc7   :  { %v7115_v44 = vmul.f32 %v14089_v1, %v14081_v11 }
0x3cc9   :  { %12049 = vmatmul.mubr.msk.f32.gmra.mrb[98].mxu0 %vm51_vm0, %v7115_v44 }
0x3cca   :  { %12059 = vmatprep.mubr.msk.f32.mxu0 %vm161_vm1, %v7226_v4 }
0x3ccd   :  { %12060 = vmatmul.mubr.msk.f32.vlgmr.msra.gmra.mrb[100].mxu0 %vm161_vm1, %v7228_v53 }
0x3cce   :  { %12062 = vmatprep.mubr.msk.f32.mxu0 %vm161_vm1, %v7230_v12 }
0x3cd1   :  { %12063 = vmatmul.mubr.msk.f32.gmra.mrb[102].mxu0 %vm161_vm1, %v7232_v31 }
0x3d69   :  { %v15825_v40 = vpop.f32.mrb[96].mxu0 }
0x3d6a   :  { %v7206_v13 = vpop.f32.mrb[97].mxu0 }
0x3d9c   :  { %v15827_v14 = vpop.f32.mrb[98].mxu0 }
0x3d9d   :  { %v15829_v38 = vpop.f32.mrb[99].mxu0 }
0x3da0   :  { %v12061_v39 = vpop.f32.mrb[100].mxu0 }
0x3da1   :  { %v7343_v30 = vmul.f32 0.5, %v12061_v39  ;;  %v7323_v41 = vpop.f32.mrb[101].mxu0 }
0x3da2   :  { %v7342_v28 = vmul.f32 0.5, %v7323_v41 }
0x3da3   :  { %v7347_v42 = vadd.f32 %v7343_v30, %v14375_v46 }
0x3da4   :  { %v7346_v11 = vadd.f32 %v7342_v28, %v14375_v46  ;;  %v12064_v45 = vpop.f32.mrb[102].mxu0 }
0x3da5   :  { %v7345_v47 = vmul.f32 0.5, %v12064_v45  ;;  %v7333_v26 = vpop.f32.mrb[103].mxu0  ;;  %v7353_v10 = vsel %vm51_vm0, %v7347_v42, -inf }
0x3da6   :  { %v7344_v23 = vmul.f32 0.5, %v7333_v26  ;;  %7354 = vmax.xlane.f32.xlu0 %v7353_v10  ;;  %v7350_v35 = vsel %vm51_vm0, %v7346_v11, -inf  ;;  %v7743_v26 = vld [vmem:[%s16644_s2 + $0x1f8] sm:$0xff]  ;;  %v7740_v10 = vld [vmem:[%s16644_s2 + $0x1e0] sm:$0xff] }
0x3da7   :  { %v7349_v25 = vadd.f32 %v7345_v47, %v14379_v54  ;;  %7351 = vmax.xlane.f32.xlu1 %v7350_v35  ;;  %v7741_v47 = vld [vmem:[%s16644_s2 + $0x1e8] sm:$0xff] }
0x3da8   :  { %v7348_v57 = vadd.f32 %v7344_v23, %v14379_v54  ;;  %v12867_v35 = vpack.c.bf16 %v7743_v26, %v7741_v47 }
0x3da9   :  { %v7359_v37 = vsel %vm51_vm0, %v7349_v25, -inf }
0x3daa   :  { %v7356_v34 = vsel %vm51_vm0, %v7348_v57, -inf  ;;  %12868 = vmatprep.subr.bf16.mxu0 %v12867_v35 }
0x3dab   :  { %7360 = vmax.xlane.f32.xlu1 %v7359_v37  ;;  %7357 = vmax.xlane.f32.xlu0 %v7356_v34  ;;  %v7747_v37 = vld [vmem:[%s16644_s2 + $0x218] sm:$0xff] }
0x3e33   :  { %v7355_v19 = vpop.xlane.xlu0 %7354 }
0x3e34   :  { %v7363_v27 = vsub.f32 %v7347_v42, %v7355_v19  ;;  %v7352_v18 = vpop.xlane.xlu1 %7351 }
0x3e35   :  { %v7362_v48 = vsub.f32 %v7346_v11, %v7352_v18  ;;  %v5184_v11 = vld [vmem:[%s16644_s2 + $0x1c0] sm:$0xff] }
0x3e36   :  { %v7368_v58 = vmul.f32 1.442695, %v7363_v27  ;;  %v7744_v18 = vld [vmem:[%s16644_s2 + $0x200] sm:$0xff] }
0x3e37   :  { %v7366_v2 = vmul.f32 1.442695, %v7362_v48  ;;  %v7746_v48 = vld [vmem:[%s16644_s2 + $0x210] sm:$0xff] }
0x3e38   :  { %14090 = vpow2.f32 %v7368_v58  ;;  %v7361_v49 = vpop.xlane.xlu1 %7360  ;;  %v7358_v51 = vpop.xlane.xlu0 %7357  ;;  %v7749_v58 = vld [vmem:[%s16644_s2 + $0x228] sm:$0xff] }
0x3e39   :  { %14092 = vpow2.f32 %v7366_v2  ;;  %v7365_v61 = vsub.f32 %v7349_v25, %v7361_v49  ;;  %v7364_v1 = vsub.f32 %v7348_v57, %v7358_v51  ;;  %v7742_v25 = vld [vmem:[%s16644_s2 + $0x1f0] sm:$0xff]  ;;  %v7745_v57 = vld [vmem:[%s16644_s2 + $0x208] sm:$0xff]  ;;  %v7751_v2 = vld [vmem:[%s16644_s2 + $0x238] sm:$0xff]  ;;  %v12873_v49 = vpack.c.bf16 %v7746_v48, %v7744_v18 }
0x3e3a   :  { %v12869_v19 = vpack.c.bf16 %v7742_v25, %v7740_v10  ;;  %v12871_v27 = vpack.c.bf16 %v7747_v37, %v7745_v57 }
0x3e3b   :  { %v7372_v4 = vmul.f32 1.442695, %v7365_v61  ;;  %v7370_v44 = vmul.f32 1.442695, %v7364_v1  ;;  %v12875_v61 = vpack.c.bf16 %v7751_v2, %v7749_v58  ;;  %v7748_v1 = vld [vmem:[%s16644_s2 + $0x220] sm:$0xff] }
0x3e3c   :  { %12870 = vmatpush1.bf16.msra.mxu0 %v12869_v19 }
0x3e3d   :  { %14094 = vpow2.f32 %v7372_v4  ;;  %12872 = vmatprep.subr.bf16.mxu0 %v12871_v27  ;;  %v7750_v4 = vld [vmem:[%s16644_s2 + $0x230] sm:$0xff] }
0x3e3e   :  { %14096 = vpow2.f32 %v7370_v44 }
0x3e40   :  { %12874 = vmatpush1.bf16.msra.mxu0 %v12873_v49 }
0x3e41   :  { %12876 = vmatprep.subr.bf16.mxu0 %v12875_v61  ;;  %v7753_v61 = vld [vmem:[%s16644_s2 + $0x248] sm:$0xff] }
0x3e42   :  { %v14091_v53 = vpop.eup %14090 }
0x3e43   :  { %v14093_v12 = vpop.eup %14092  ;;  %v7377_v31 = vsel %vm51_vm0, %v14091_v53, 0.0 }
0x3e44   :  { %7378 = vadd.xlane.f32.xlu1 %v7377_v31  ;;  %v7374_v39 = vsel %vm51_vm0, %v14093_v12, 0.0 }
0x3e45   :  { %7375 = vadd.xlane.f32.xlu0 %v7374_v39 }
0x3e47   :  { %v14095_v30 = vpop.eup %14094 }
0x3e48   :  { %v14097_v41 = vpop.eup %14096  ;;  %v7383_v28 = vsel %vm51_vm0, %v14095_v30, 0.0 }
0x3e49   :  { %7384 = vadd.xlane.f32.xlu1 %v7383_v28  ;;  %v7380_v42 = vsel %vm51_vm0, %v14097_v41, 0.0 }
0x3e4a   :  { %7381 = vadd.xlane.f32.xlu0 %v7380_v42 }
0x3e5a   :  { %13568 = vrot.lane.b32.xlu1 %v15451_v63, %s16686_s10 }
0x3e5e   :  { %7507 = vrot.lane.b32.xlu1 %v15567_v52, %s16687_s0 }
0x3e60   :  { %13563 = vrot.lane.b32.xlu0 %v15441_v32, %s16686_s10 }
0x3e62   :  { %7523 = vrot.lane.b32.xlu1 %v15619_v56, %s16688_s7 }
0x3e64   :  { %7509 = vrot.lane.b32.xlu0 %v15565_v5, %s16687_s0 }
0x3e66   :  { %7539 = vrot.lane.b32.xlu1 %v15671_v60, %s16689_s8 }
0x3e68   :  { %7525 = vrot.lane.b32.xlu0 %v15617_v55, %s16688_s7 }
0x3e6a   :  { %7555 = vrot.lane.b32.xlu1 %v15723_v24, %s16690_s30 }
0x3e6c   :  { %7541 = vrot.lane.b32.xlu0 %v15669_v59, %s16689_s8 }
0x3e6e   :  { %7571 = vrot.lane.b32.xlu1 %v15775_v0, %s16691_s29 }
0x3e70   :  { %7557 = vrot.lane.b32.xlu0 %v15721_v43, %s16690_s30 }
0x3e72   :  { %7587 = vrot.lane.b32.xlu1 %v7206_v13, %s14263_s9 }
0x3e74   :  { %7573 = vrot.lane.b32.xlu0 %v15773_v9, %s16691_s29 }
0x3e76   :  { %7511 = vrot.lane.b32.xlu1 %v15571_v7, %s16687_s0 }
0x3e78   :  { %7589 = vrot.lane.b32.xlu0 %v15825_v40, %s14263_s9  ;;  %v5183_v40 = vld [vmem:[%s16644_s2 + $0x1b0] sm:$0xff] }
0x3e79   :  { %v12863_v45 = vpack.c.bf16 %v5184_v11, %v5183_v40 }
0x3e7a   :  { %7527 = vrot.lane.b32.xlu1 %v15623_v3, %s16688_s7 }
0x3e7c   :  { %7513 = vrot.lane.b32.xlu0 %v15569_v6, %s16687_s0 }
0x3e7e   :  { %7543 = vrot.lane.b32.xlu1 %v15675_v36, %s16689_s8 }
0x3e80   :  { %7529 = vrot.lane.b32.xlu0 %v15621_v62, %s16688_s7 }
0x3e82   :  { %7559 = vrot.lane.b32.xlu1 %v15727_v8, %s16690_s30 }
0x3e84   :  { %7545 = vrot.lane.b32.xlu0 %v15673_v20, %s16689_s8 }
0x3e86   :  { %7575 = vrot.lane.b32.xlu1 %v15779_v22, %s16691_s29  ;;  %v5182_v22 = vld [vmem:[%s16644_s2 + $0x1a0] sm:$0xff] }
0x3e88   :  { %7561 = vrot.lane.b32.xlu0 %v15725_v29, %s16690_s30 }
0x3e8c   :  { %7577 = vrot.lane.b32.xlu0 %v15777_v21, %s16691_s29  ;;  %v5181_v21 = vld [vmem:[%s16644_s2 + $0x190] sm:$0xff] }
0x3e8d   :  { %v12859_v13 = vpack.c.bf16 %v5182_v22, %v5181_v21 }
0x3ed1   :  { %v7379_v32 = vpop.xlane.xlu1 %7378 }
0x3ed2   :  { %v7376_v63 = vpop.xlane.xlu0 %7375 }
0x3ed3   :  { %14098 = vrcp.f32 %v7376_v63 }
0x3ed4   :  { %14100 = vrcp.f32 %v7379_v32 }
0x3ed6   :  { %v7385_v5 = vpop.xlane.xlu1 %7384 }
0x3ed7   :  { %v7382_v52 = vpop.xlane.xlu0 %7381 }
0x3ed8   :  { %14102 = vrcp.f32 %v7382_v52 }
0x3ed9   :  { %14104 = vrcp.f32 %v7385_v5 }
0x3eda   :  { %v13569_v6 = vpop.permute.xlu1 %13568 }
0x3edb   :  { %v13564_v7 = vpop.permute.xlu0 %13563  ;;  %v13571_v55 = vunpack.i.h.bf16 %v13569_v6  ;;  %v13570_v56 = vunpack.i.l.bf16 %v13569_v6 }
0x3edc   :  { %v13566_v62 = vunpack.i.h.bf16 %v13564_v7  ;;  %v13565_v3 = vunpack.i.l.bf16 %v13564_v7 }
0x3edd   :  { %v14099_v59 = vpop.eup %14098  ;;  %v12855_v36 = vpack.c.bf16 %v13571_v55, %v13570_v56 }
0x3ede   :  { %v12851_v60 = vpack.c.bf16 %v13566_v62, %v13565_v3  ;;  %v7390_v20 = vmul.f32 %v14099_v59, %v14093_v12  ;;  %v14101_v43 = vpop.eup %14100  ;;  %v7508_v31 = vpop.permute.xlu1 %7507 }
0x3edf   :  { %v7391_v29 = vmul.f32 %v14101_v43, %v14091_v53  ;;  %v12877_v53 = vpack.c.bf16 %v7750_v4, %v7748_v1  ;;  %v7510_v12 = vpop.permute.xlu0 %7509  ;;  %v7755_v1 = vld [vmem:[%s16644_s2 + $0x258] sm:$0xff] }
0x3ee0   :  { %12852 = vmatprep.subr.bf16.mxu1 %v12851_v60  ;;  %12073 = vmatprep.mubr.msk.f32.mxu1 %vm51_vm0, %v7390_v20  ;;  %v12879_v4 = vpack.c.bf16 %v7755_v1, %v7753_v61 }
0x3ee1   :  { %12854 = vmatpush3.bf16.msra.mxu1 %v12851_v60  ;;  %12878 = vmatpush1.bf16.msra.mxu0 %v12877_v53  ;;  %v7615_v60 = vsel %vm161_vm1, %v15515_v16, %v7508_v31  ;;  %v7754_v53 = vld [vmem:[%s16644_s2 + $0x250] sm:$0xff]  ;;  %v14265_v31 = vmov 0.0  }
0x3ee2   :  { %12856 = vmatprep.subr.bf16.mxu1 %v12855_v36  ;;  %v14103_v24 = vpop.eup %14102  ;;  %7855 = vmatprep.mubr.f32.mxu0 %v14265_v31 }
0x3ee3   :  { %v14105_v8 = vpop.eup %14104  ;;  %v7392_v9 = vmul.f32 %v14103_v24, %v14097_v41  ;;  %v7526_v39 = vpop.permute.xlu0 %7525  ;;  %12880 = vmatprep.subr.bf16.mxu0 %v12879_v4 }
0x3ee4   :  { %v7393_v0 = vmul.f32 %v14105_v8, %v14095_v30  ;;  %v7524_v30 = vpop.permute.xlu1 %7523 }
0x3ee5   :  { %12858 = vmatpush3.bf16.msra.mxu1 %v12855_v36  ;;  %v7616_v36 = vsel %vm161_vm1, %v15513_v15, %v7510_v12  ;;  %v7619_v43 = vsel %vm2486_vm5, %v7615_v60, %v7524_v30 }
0x3ee6   :  { %12860 = vmatprep.subr.bf16.mxu1 %v12859_v13 }
0x3ee7   :  { %v7542_v41 = vpop.permute.xlu0 %7541 }
0x3ee8   :  { %12074 = vmatmul.mubr.msk.f32.vlgmr.msra.gmra.mrb[104].mxu1 %vm51_vm0, %v7391_v29  ;;  %v7540_v28 = vpop.permute.xlu1 %7539  ;;  %v7620_v29 = vsel %vm2486_vm5, %v7616_v36, %v7526_v39  ;;  %v5185_v39 = vld [vmem:[%s16644_s2 + $0x1d0] ss:$0 sm:$0xff] }
0x3ee9   :  { %12076 = vmatprep.mubr.msk.f32.mxu1 %vm51_vm0, %v7392_v9  ;;  %12862 = vmatpush3.bf16.msra.mxu1 %v12859_v13  ;;  %v7623_v8 = vsel %vm2491_vm6, %v7619_v43, %v7540_v28  ;;  %v7624_v9 = vsel %vm2491_vm6, %v7620_v29, %v7542_v41 }
0x3eea   :  { %12864 = vmatprep.subr.bf16.mxu1 %v12863_v45 }
0x3eeb   :  { %v7558_v42 = vpop.permute.xlu0 %7557 }
0x3eec   :  { %12077 = vmatmul.mubr.msk.f32.gmra.mrb[106].mxu1 %vm51_vm0, %v7393_v0  ;;  %v7628_v21 = vsel %vm34_vm4, %v7624_v9, %v7558_v42 }
0x3eed   :  { %12866 = vmatpush3.bf16.msra.mxu1 %v12863_v45 }
0x3eef   :  { %v7574_v32 = vpop.permute.xlu0 %7573 }
0x3ef0   :  { %v7632_v40 = vsel %vm2500_vm7, %v7628_v21, %v7574_v32 }
0x3ef3   :  { %v7590_v5 = vpop.permute.xlu0 %7589 }
0x3ef4   :  { %v7636_v11 = vsel %vm2505_vm8, %v7632_v40, %v7590_v5 }
0x3ef7   :  { %v7514_v52 = vpop.permute.xlu0 %7513 }
0x3efb   :  { %v7530_v7 = vpop.permute.xlu0 %7529 }
0x3eff   :  { %v7546_v56 = vpop.permute.xlu0 %7545 }
0x3f03   :  { %v7562_v3 = vpop.permute.xlu0 %7561 }
0x3f07   :  { %v7578_v20 = vpop.permute.xlu0 %7577 }
0x3fbb   :  { %v12075_v23 = vpop.f32.mrb[104].mxu1 }
0x3fbc   :  { %7605 = vrot.lane.b32.xlu0 %v12075_v23, %s14264_s5  ;;  %v7484_v34 = vpop.f32.mrb[105].mxu1  ;;  %v7618_v23 = vsel %vm161_vm1, %v15517_v17, %v7514_v52 }
0x3fbd   :  { %7603 = vrot.lane.b32.xlu1 %v7484_v34, %s14264_s5  ;;  %v7622_v57 = vsel %vm2486_vm5, %v7618_v23, %v7530_v7  ;;  %v10660_v7 = vld [vmem:[%s16644_s2 + $0x260] ss:$8 sm:$0x3] }
0x3fbe   :  { %v7626_v34 = vsel %vm2491_vm6, %v7622_v57, %v7546_v56 }
0x3fbf   :  { %v12078_v51 = vpop.f32.mrb[106].mxu1  ;;  %v7630_v27 = vsel %vm34_vm4, %v7626_v34, %v7562_v3 }
0x3fc0   :  { %7593 = vrot.lane.b32.xlu0 %v15827_v14, %s14263_s9  ;;  %v7494_v44 = vpop.f32.mrb[107].mxu1  ;;  %v7556_v14 = vpop.permute.xlu1 %7555  ;;  %v7634_v48 = vsel %vm2500_vm7, %v7630_v27, %v7578_v20 }
0x3fc1   :  { %7591 = vrot.lane.b32.xlu1 %v15829_v38, %s14263_s9  ;;  %v7627_v0 = vsel %vm34_vm4, %v7623_v8, %v7556_v14 }
0x3fc4   :  { %7609 = vrot.lane.b32.xlu0 %v12078_v51, %s14264_s5  ;;  %v7572_v63 = vpop.permute.xlu1 %7571 }
0x3fc5   :  { %7607 = vrot.lane.b32.xlu1 %v7494_v44, %s14264_s5  ;;  %v7631_v22 = vsel %vm2500_vm7, %v7627_v0, %v7572_v63  ;;  %v7752_v44 = vld [vmem:[%s16644_s2 + $0x240] sm:$0xff] }
0x3fc6   :  { %v12881_v12 = vpack.c.bf16 %v7754_v53, %v7752_v44 }
0x3fc8   :  { %v7588_v38 = vpop.permute.xlu1 %7587  ;;  %12882 = vmatpush1.bf16.msra.mxu0 %v12881_v12 }
0x3fc9   :  { %v7635_v15 = vsel %vm2505_vm8, %v7631_v22, %v7588_v38  ;;  %v7769_v38 = vshrl.u32 %v30_v33, 7 }
0x3fcb   :  { %v7770_v52 = vsub.s32 0, %v7769_v38 }
0x3fcc   :  { %v7512_v6 = vpop.permute.xlu1 %7511 }
0x3fcd   :  { %v7617_v26 = vsel %vm161_vm1, %v15519_v50, %v7512_v6  ;;  %v7774_v6 = vsub.s32 1, %v7769_v38 }
0x3fcf   :  { %v7775_v56 = vrot.slane %v10660_v7, %v7774_v6 }
0x3fd0   :  { %v7528_v55 = vpop.permute.xlu1 %7527 }
0x3fd1   :  { %v7621_v35 = vsel %vm2486_vm5, %v7617_v26, %v7528_v55  ;;  %v7771_v55 = vrot.slane %v10660_v7, %v7770_v52 }
0x3fd4   :  { %v7544_v62 = vpop.permute.xlu1 %7543 }
0x3fd5   :  { %v7625_v37 = vsel %vm2491_vm6, %v7621_v35, %v7544_v62 }
0x3fd8   :  { %v7560_v59 = vpop.permute.xlu1 %7559 }
0x3fd9   :  { %v7629_v19 = vsel %vm34_vm4, %v7625_v37, %v7560_v59 }
0x3fdc   :  { %v7576_v24 = vpop.permute.xlu1 %7575 }
0x3fdd   :  { %v7633_v50 = vsel %vm2500_vm7, %v7629_v19, %v7576_v24 }
0x402e   :  { %v7606_v16 = vpop.permute.xlu0 %7605 }
0x402f   :  { %v7604_v13 = vpop.permute.xlu1 %7603  ;;  %v7640_v47 = vsel %vm2510_vm9, %v7636_v11, %v7606_v16 }
0x4030   :  { %v7639_v45 = vsel %vm2510_vm9, %v7635_v15, %v7604_v13 }
0x4031   :  { %12087 = vmatprep.mubr.msk.f32.mxu1 %vm51_vm0, %v7639_v45 }
0x4032   :  { %v7594_v10 = vpop.permute.xlu0 %7593  ;;  %12088 = vmatmul.mubr.msk.f32.vlgmr.msra.gmra.mrb[108].mxu1 %vm51_vm0, %v7640_v47 }
0x4033   :  { %v7592_v25 = vpop.permute.xlu1 %7591  ;;  %v7638_v2 = vsel %vm2505_vm8, %v7634_v48, %v7594_v10 }
0x4034   :  { %v7637_v17 = vsel %vm2505_vm8, %v7633_v50, %v7592_v25 }
0x4036   :  { %v7610_v18 = vpop.permute.xlu0 %7609 }
0x4037   :  { %v7608_v58 = vpop.permute.xlu1 %7607  ;;  %v7642_v51 = vsel %vm2510_vm9, %v7638_v2, %v7610_v18 }
0x4038   :  { %v7641_v49 = vsel %vm2510_vm9, %v7637_v17, %v7608_v58 }
0x4039   :  { %12090 = vmatprep.mubr.msk.f32.mxu1 %vm51_vm0, %v7641_v49 }
0x403a   :  { %12091 = vmatmul.mubr.msk.f32.gmra.mrb[110].mxu1 %vm51_vm0, %v7642_v51 }
0x4105   :  { %v12089_v30 = vpop.f32.mrb[108].mxu1 }
0x4106   :  { %v7721_v41 = vpop.f32.mrb[109].mxu1  ;;  %v7727_v42 = vadd.f32 %v12089_v30, %v5185_v39 }
0x4107   :  { %v7722_v28 = vadd.f32 %v7721_v41, %v5185_v39 }
0x4109   :  { %10661 = vmatmul.mubr.msk.f32.vlgmr.msra.gmra.mrb[104].mxu0 %vm7778_vm10, %v7722_v28 }
0x410a   :  { %7861 = vmatprep.mubr.f32.mxu0 %v14265_v31 }
0x410d   :  { %v12092_v14 = vpop.f32.mrb[110].mxu1  ;;  %10662 = vmatmul.mubr.msk.f32.gmra.mrb[106].mxu0 %vm7778_vm10, %v7727_v42 }
0x410e   :  { %v7731_v32 = vpop.f32.mrb[111].mxu1  ;;  %7867 = vmatprep.mubr.f32.mxu0 %v14265_v31  ;;  %v7737_v5 = vadd.f32 %v12092_v14, %v5185_v39 }
0x410f   :  { %v7732_v63 = vadd.f32 %v7731_v32, %v5185_v39 }
0x4111   :  { %10663 = vmatmul.mubr.msk.f32.gmra.mrb[108].mxu0 %vm7778_vm10, %v7732_v63 }
0x4112   :  { %7873 = vmatprep.mubr.f32.mxu0 %v14265_v31 }
0x4115   :  { %10664 = vmatmul.mubr.msk.f32.gmra.mrb[110].mxu0 %vm7778_vm10, %v7737_v5 }
0x41dc   :  { %v7857_v62 = vpop.f32.mrb[104].mxu0 }
0x41dd   :  { %v16009_v3 = vadd.f32 %v7857_v62, %v7771_v55  ;;  %v7859_v59 = vpop.f32.mrb[105].mxu0 }
0x41de   :  { %v7860_v60 = vadd.f32 %v7859_v59, %v7775_v56 }
0x41df   :  { %12101 = vmatprep.mubr.msk.f32.mxu1 %vm2486_vm5, %v16009_v3 }
0x41e0   :  { %v7863_v20 = vpop.f32.mrb[106].mxu0 }
0x41e1   :  { %v16013_v36 = vadd.f32 %v7863_v20, %v7771_v55  ;;  %v7865_v33 = vpop.f32.mrb[107].mxu0 }
0x41e2   :  { %v7866_v43 = vadd.f32 %v7865_v33, %v7775_v56 }
0x41e3   :  { %v16017_v24 = vpack.i.bf16 %v16013_v36, %v16009_v3 }
0x41e4   :  { %v7869_v29 = vpop.f32.mrb[108].mxu0  ;;  %v16019_v8 = vpack.i.bf16 %v7866_v43, %v7860_v60  ;;  %v16021_v9 = vpack.c.bf16 %v7866_v43, %v7860_v60 }
0x41e5   :  { %v16023_v0 = vadd.f32 %v7869_v29, %v7771_v55  ;;  %v7871_v21 = vpop.f32.mrb[109].mxu0  ;;  %13578 = vrot.lane.b32.xlu0 %v16017_v24, %s14243_s17  ;;  %13573 = vrot.lane.b32.xlu1 %v16017_v24, %s14237_s11 }
0x41e6   :  { %v7872_v22 = vadd.f32 %v7871_v21, %v7775_v56 }
0x41e8   :  { %v7875_v16 = vpop.f32.mrb[110].mxu0 }
0x41e9   :  { %v16029_v40 = vadd.f32 %v7875_v16, %v7771_v55  ;;  %v7877_v15 = vpop.f32.mrb[111].mxu0 }
0x41ea   :  { %v7878_v13 = vadd.f32 %v7877_v15, %v7775_v56 }
0x41eb   :  { %v16033_v11 = vpack.i.bf16 %v16029_v40, %v16023_v0 }
0x41ec   :  { %v16035_v45 = vpack.i.bf16 %v7878_v13, %v7872_v22  ;;  %v16037_v47 = vpack.c.bf16 %v7878_v13, %v7872_v22 }
0x41ed   :  { %13588 = vrot.lane.b32.xlu0 %v16033_v11, %s14243_s17  ;;  %13583 = vrot.lane.b32.xlu1 %v16033_v11, %s14237_s11 }
0x41f1   :  { %8142 = vrot.lane.b32.xlu0 %v16009_v3, %s14242_s16  ;;  %13593 = vrot.lane.b32.xlu1 %v16017_v24, %s16694_s14 }
0x41f5   :  { %13598 = vrot.lane.b32.xlu0 %v16033_v11, %s16694_s14  ;;  %8144 = vrot.lane.b32.xlu1 %v16013_v36, %s14242_s16 }
0x41f9   :  { %8148 = vrot.lane.b32.xlu0 %v16029_v40, %s14242_s16  ;;  %8146 = vrot.lane.b32.xlu1 %v16023_v0, %s14242_s16 }
0x41fd   :  { %8426 = vrot.lane.b32.xlu0 %v16013_v36, %s16693_s13  ;;  %8424 = vrot.lane.b32.xlu1 %v16009_v3, %s16693_s13 }
0x4201   :  { %8430 = vrot.lane.b32.xlu0 %v16029_v40, %s16693_s13  ;;  %8428 = vrot.lane.b32.xlu1 %v16023_v0, %s16693_s13 }
0x4205   :  { %13603 = vrot.lane.b32.xlu0 %v16019_v8, %s14242_s16  ;;  %13608 = vrot.lane.b32.xlu1 %v16035_v45, %s14242_s16  ;;  %s14266_s16 = smov 32  }
0x4257   :  { %v13579_v26 = vpop.permute.xlu0 %13578  ;;  %v13574_v10 = vpop.permute.xlu1 %13573 }
0x4258   :  { %v13581_v23 = vunpack.i.h.bf16 %v13579_v26  ;;  %v13580_v35 = vunpack.i.l.bf16 %v13579_v26  ;;  %v13576_v25 = vunpack.i.h.bf16 %v13574_v10  ;;  %v13575_v57 = vunpack.i.l.bf16 %v13574_v10 }
0x425a   :  { %v12903_v34 = vpack.c.bf16 %v13581_v23, %v13580_v35  ;;  %v12883_v19 = vpack.c.bf16 %v13576_v25, %v13575_v57 }
0x425c   :  { %12885 = vmatprep.subr.msk.bf16.mxu1 %vm16069_vm11, %v12883_v19  ;;  %12905 = vmatprep.subr.msk.bf16.mxu0 %vm16069_vm11, %v12903_v34 }
0x425d   :  { %12888 = vmatpush3.bf16.xpose.msk.msra.mxu1 %vm16069_vm11, %v12883_v19  ;;  %12908 = vmatpush3.bf16.xpose.msk.msra.mxu0 %vm16069_vm11, %v12903_v34 }
0x425f   :  { %v13589_v27 = vpop.permute.xlu0 %13588  ;;  %v13584_v50 = vpop.permute.xlu1 %13583 }
0x4260   :  { %v13591_v18 = vunpack.i.h.bf16 %v13589_v27  ;;  %v13590_v48 = vunpack.i.l.bf16 %v13589_v27  ;;  %v13586_v17 = vunpack.i.h.bf16 %v13584_v50  ;;  %v13585_v58 = vunpack.i.l.bf16 %v13584_v50 }
0x4262   :  { %v12909_v2 = vpack.c.bf16 %v13591_v18, %v13590_v48  ;;  %v12889_v49 = vpack.c.bf16 %v13586_v17, %v13585_v58 }
0x4263   :  { %v8143_v51 = vpop.permute.xlu0 %8142  ;;  %v13594_v61 = vpop.permute.xlu1 %13593 }
0x4264   :  { %v13596_v1 = vunpack.i.h.bf16 %v13594_v61  ;;  %v13595_v4 = vunpack.i.l.bf16 %v13594_v61  ;;  %12891 = vmatprep.subr.msk.bf16.mxu1 %vm16069_vm11, %v12889_v49  ;;  %12911 = vmatprep.subr.msk.bf16.mxu0 %vm16069_vm11, %v12909_v2 }
0x4265   :  { %12129 = vmatprep.mubr.msk.f32.mxu0 %vm2486_vm5, %v8143_v51  ;;  %12894 = vmatpush3.bf16.xpose.msk.msra.mxu1 %vm16069_vm11, %v12889_v49 }
0x4266   :  { %v12923_v44 = vpack.c.bf16 %v13596_v1, %v13595_v4  ;;  %12914 = vmatpush3.bf16.xpose.msk.msra.mxu0 %vm16069_vm11, %v12909_v2  ;;  %12896 = vmatprep.subr.bf16.mxu1 %v16021_v9 }
0x4267   :  { %v13599_v53 = vpop.permute.xlu0 %13598  ;;  %v8145_v12 = vpop.permute.xlu1 %8144 }
0x4268   :  { %12925 = vmatprep.subr.msk.bf16.mxu0 %vm16069_vm11, %v12923_v44  ;;  %v13601_v31 = vunpack.i.h.bf16 %v13599_v53  ;;  %v13600_v39 = vunpack.i.l.bf16 %v13599_v53 }
0x426a   :  { %v12929_v28 = vpack.c.bf16 %v13601_v31, %v13600_v39 }
0x426b   :  { %v8149_v30 = vpop.permute.xlu0 %8148  ;;  %v8147_v41 = vpop.permute.xlu1 %8146 }
0x426c   :  { %12102 = vmatmul.mubr.msk.f32.vlgmr.msra.gmra.mrb[112].mxu1 %vm2486_vm5, %v16013_v36 }
0x426d   :  { %12130 = vmatmul.mubr.msk.f32.vlgmr.msra.gmra.mrb[112].mxu0 %vm2486_vm5, %v8145_v12  ;;  %12104 = vmatprep.mubr.msk.f32.mxu1 %vm2486_vm5, %v16023_v0 }
0x426e   :  { %12898 = vmatpush3.bf16.msra.mxu1 %v16021_v9  ;;  %12132 = vmatprep.mubr.msk.f32.mxu0 %vm2486_vm5, %v8147_v41 }
0x426f   :  { %12928 = vmatpush3.bf16.xpose.msk.msra.mxu0 %vm16069_vm11, %v12923_v44  ;;  %12900 = vmatprep.subr.bf16.mxu1 %v16037_v47  ;;  %v8427_v42 = vpop.permute.xlu0 %8426  ;;  %v8425_v14 = vpop.permute.xlu1 %8424 }
0x4270   :  { %12931 = vmatprep.subr.msk.bf16.mxu0 %vm16069_vm11, %v12929_v28  ;;  %12105 = vmatmul.mubr.msk.f32.gmra.mrb[114].mxu1 %vm2486_vm5, %v16029_v40 }
0x4271   :  { %12133 = vmatmul.mubr.msk.f32.gmra.mrb[114].mxu0 %vm2486_vm5, %v8149_v30 }
0x4272   :  { %12902 = vmatpush3.bf16.msra.mxu1 %v16037_v47  ;;  %12157 = vmatprep.mubr.msk.f32.mxu0 %vm2486_vm5, %v8425_v14 }
0x4273   :  { %v8431_v32 = vpop.permute.xlu0 %8430  ;;  %v8429_v6 = vpop.permute.xlu1 %8428 }
0x4277   :  { %12934 = vmatpush3.bf16.xpose.msk.msra.mxu0 %vm16069_vm11, %v12929_v28  ;;  %v13604_v63 = vpop.permute.xlu0 %13603 }
0x4278   :  { %v13606_v5 = vunpack.i.h.bf16 %v13604_v63  ;;  %v13605_v38 = vunpack.i.l.bf16 %v13604_v63  ;;  %v16161_v63 = vpop.permute.xlu1 %13608 }
0x427a   :  { %v16112_v52 = vpack.c.bf16 %v13606_v5, %v13605_v38 }
0x427c   :  { %12916 = vmatprep.subr.bf16.mxu1 %v16112_v52 }
0x427e   :  { %12158 = vmatmul.mubr.msk.f32.vlgmr.msra.gmra.mrb[116].mxu0 %vm2486_vm5, %v8427_v42 }
0x427f   :  { %12160 = vmatprep.mubr.msk.f32.mxu0 %vm2486_vm5, %v8429_v6 }
0x4282   :  { %12161 = vmatmul.mubr.msk.f32.gmra.mrb[118].mxu0 %vm2486_vm5, %v8431_v32 }
0x433f   :  { %v12103_v7 = vpop.f32.mrb[112].mxu1 }
0x4340   :  { %v7994_v55 = vmul.f32 0.35355338, %v12103_v7  ;;  %v12131_v56 = vpop.f32.mrb[112].mxu0  ;;  %v7974_v62 = vpop.f32.mrb[113].mxu1 }
0x4341   :  { %v8260_v59 = vmul.f32 0.35355338, %v12131_v56  ;;  %v7993_v60 = vmul.f32 0.35355338, %v7974_v62  ;;  %v8240_v20 = vpop.f32.mrb[113].mxu0 }
0x4342   :  { %v7998_v33 = vadd.f32 %v7994_v55, %v14375_v46  ;;  %v8259_v43 = vmul.f32 0.35355338, %v8240_v20 }
0x4343   :  { %v8264_v29 = vadd.f32 %v8260_v59, %v14375_v46  ;;  %v12106_v9 = vpop.f32.mrb[114].mxu1  ;;  %v7997_v13 = vadd.f32 %v7993_v60, %v14375_v46 }
0x4344   :  { %v16121_v21 = vadd.f32 %v8259_v43, %v14375_v46  ;;  %v12134_v22 = vpop.f32.mrb[114].mxu0  ;;  %v7984_v16 = vpop.f32.mrb[115].mxu1  ;;  %v8004_v15 = vsel %vm51_vm0, %v7998_v33, -inf  ;;  %v7996_v47 = vmul.f32 0.35355338, %v12106_v9 }
0x4345   :  { %v7995_v26 = vmul.f32 0.35355338, %v7984_v16  ;;  %v8250_v10 = vpop.f32.mrb[115].mxu0  ;;  %v8270_v23 = vsel %vm51_vm0, %v8264_v29, -inf  ;;  %8005 = vmax.xlane.f32.xlu0 %v8004_v15  ;;  %v8262_v19 = vmul.f32 0.35355338, %v12134_v22 }
0x4346   :  { %8271 = vmax.xlane.f32.xlu1 %v8270_v23  ;;  %v8261_v25 = vmul.f32 0.35355338, %v8250_v10  ;;  %v8267_v57 = vsel %vm51_vm0, %v16121_v21, -inf  ;;  %v8000_v34 = vadd.f32 %v7996_v47, %v14379_v54  ;;  %v8001_v27 = vsel %vm51_vm0, %v7997_v13, -inf }
0x4347   :  { %v7999_v35 = vadd.f32 %v7995_v26, %v14379_v54  ;;  %v8266_v48 = vadd.f32 %v8262_v19, %v14379_v54 }
0x4348   :  { %v16132_v50 = vadd.f32 %v8261_v25, %v14379_v54  ;;  %v8010_v17 = vsel %vm51_vm0, %v8000_v34, -inf }
0x4349   :  { %8268 = vmax.xlane.f32.xlu0 %v8267_v57  ;;  %v8007_v18 = vsel %vm51_vm0, %v7999_v35, -inf  ;;  %v8276_v49 = vsel %vm51_vm0, %v8266_v48, -inf }
0x434a   :  { %8002 = vmax.xlane.f32.xlu1 %v8001_v27  ;;  %v8273_v58 = vsel %vm51_vm0, %v16132_v50, -inf }
0x434d   :  { %8008 = vmax.xlane.f32.xlu0 %v8007_v18 }
0x434e   :  { %8011 = vmax.xlane.f32.xlu1 %v8010_v17 }
0x4351   :  { %v12159_v2 = vpop.f32.mrb[116].mxu0  ;;  %8274 = vmax.xlane.f32.xlu0 %v8273_v58 }
0x4352   :  { %v8542_v51 = vmul.f32 0.35355338, %v12159_v2  ;;  %v8522_v61 = vpop.f32.mrb[117].mxu0  ;;  %8277 = vmax.xlane.f32.xlu1 %v8276_v49 }
0x4353   :  { %v8541_v1 = vmul.f32 0.35355338, %v8522_v61 }
0x4354   :  { %v8546_v4 = vadd.f32 %v8542_v51, %v14375_v46 }
0x4355   :  { %v16142_v44 = vadd.f32 %v8541_v1, %v14375_v46  ;;  %v12162_v53 = vpop.f32.mrb[118].mxu0 }
0x4356   :  { %v8544_v12 = vmul.f32 0.35355338, %v12162_v53  ;;  %v8532_v31 = vpop.f32.mrb[119].mxu0  ;;  %v8552_v39 = vsel %vm51_vm0, %v8546_v4, -inf }
0x4357   :  { %v8543_v30 = vmul.f32 0.35355338, %v8532_v31  ;;  %8553 = vmax.xlane.f32.xlu1 %v8552_v39  ;;  %v8549_v41 = vsel %vm51_vm0, %v16142_v44, -inf }
0x4358   :  { %v16148_v28 = vadd.f32 %v8544_v12, %v14379_v54  ;;  %8550 = vmax.xlane.f32.xlu0 %v8549_v41 }
0x4359   :  { %v16151_v42 = vadd.f32 %v8543_v30, %v14379_v54 }
0x435a   :  { %v8558_v14 = vsel %vm51_vm0, %v16148_v28, -inf }
0x435b   :  { %8559 = vmax.xlane.f32.xlu1 %v8558_v14  ;;  %v8555_v32 = vsel %vm51_vm0, %v16151_v42, -inf }
0x435c   :  { %8556 = vmax.xlane.f32.xlu0 %v8555_v32 }
0x436c   :  { %13618 = vrot.lane.b32.xlu1 %v16035_v45, %s16693_s13 }
0x4372   :  { %13613 = vrot.lane.b32.xlu0 %v16019_v8, %s16693_s13 }
0x43d2   :  { %v8006_v5 = vpop.xlane.xlu0 %8005 }
0x43d3   :  { %v8272_v38 = vpop.xlane.xlu1 %8271  ;;  %v8014_v6 = vsub.f32 %v7998_v33, %v8006_v5 }
0x43d4   :  { %v8280_v7 = vsub.f32 %v8264_v29, %v8272_v38 }
0x43d5   :  { %v8019_v55 = vmul.f32 1.442695, %v8014_v6 }
0x43d6   :  { %v8285_v56 = vmul.f32 1.442695, %v8280_v7  ;;  %v8269_v62 = vpop.xlane.xlu0 %8268 }
0x43d7   :  { %14106 = vpow2.f32 %v8019_v55  ;;  %v8279_v59 = vsub.f32 %v16121_v21, %v8269_v62  ;;  %v8003_v60 = vpop.xlane.xlu1 %8002 }
0x43d8   :  { %v8013_v20 = vsub.f32 %v7997_v13, %v8003_v60  ;;  %14108 = vpow2.f32 %v8285_v56 }
0x43d9   :  { %v8283_v43 = vmul.f32 1.442695, %v8279_v59 }
0x43da   :  { %v8017_v9 = vmul.f32 1.442695, %v8013_v20  ;;  %v8009_v22 = vpop.xlane.xlu0 %8008 }
0x43db   :  { %v8012_v16 = vpop.xlane.xlu1 %8011  ;;  %v8015_v15 = vsub.f32 %v7999_v35, %v8009_v22 }
0x43dc   :  { %14110 = vpow2.f32 %v8017_v9  ;;  %v8016_v47 = vsub.f32 %v8000_v34, %v8012_v16 }
0x43dd   :  { %14112 = vpow2.f32 %v8283_v43  ;;  %v8021_v33 = vmul.f32 1.442695, %v8015_v15 }
0x43de   :  { %v8023_v26 = vmul.f32 1.442695, %v8016_v47  ;;  %v8275_v29 = vpop.xlane.xlu0 %8274 }
0x43df   :  { %v8278_v10 = vpop.xlane.xlu1 %8277  ;;  %v8281_v23 = vsub.f32 %v16132_v50, %v8275_v29 }
0x43e0   :  { %14114 = vpow2.f32 %v8023_v26  ;;  %v8282_v25 = vsub.f32 %v8266_v48, %v8278_v10  ;;  %v13611_v10 = vunpack.i.h.bf16 %v16161_v63 }
0x43e1   :  { %v16165_v21 = vpop.eup %14106  ;;  %14116 = vpow2.f32 %v8021_v33  ;;  %v8287_v57 = vmul.f32 1.442695, %v8281_v23  ;;  %v13610_v23 = vunpack.i.l.bf16 %v16161_v63 }
0x43e2   :  { %v8289_v13 = vmul.f32 1.442695, %v8282_v25  ;;  %v8028_v19 = vsel %vm51_vm0, %v16165_v21, 0.0  ;;  %v16169_v35 = vpop.eup %14108 }
0x43e3   :  { %8029 = vadd.xlane.f32.xlu1 %v8028_v19  ;;  %v8294_v48 = vsel %vm51_vm0, %v16169_v35, 0.0 }
0x43e4   :  { %14118 = vpow2.f32 %v8289_v13  ;;  %v8554_v34 = vpop.xlane.xlu1 %8553 }
0x43e5   :  { %v8562_v27 = vsub.f32 %v8546_v4, %v8554_v34  ;;  %v8551_v18 = vpop.xlane.xlu0 %8550  ;;  %14120 = vpow2.f32 %v8287_v57 }
0x43e6   :  { %v16171_v17 = vpop.eup %14110  ;;  %v8561_v50 = vsub.f32 %v16142_v44, %v8551_v18  ;;  %v12919_v18 = vpack.c.bf16 %v13611_v10, %v13610_v23 }
0x43e7   :  { %v8567_v58 = vmul.f32 1.442695, %v8562_v27  ;;  %8295 = vadd.xlane.f32.xlu1 %v8294_v48  ;;  %v8025_v2 = vsel %vm51_vm0, %v16171_v17, 0.0  ;;  %v16178_v49 = vpop.eup %14112 }
0x43e8   :  { %v8565_v51 = vmul.f32 1.442695, %v8561_v50  ;;  %8026 = vadd.xlane.f32.xlu0 %v8025_v2  ;;  %v8291_v4 = vsel %vm51_vm0, %v16178_v49, 0.0  ;;  %v8560_v6 = vpop.xlane.xlu1 %8559 }
0x43e9   :  { %14122 = vpow2.f32 %v8567_v58  ;;  %v8557_v38 = vpop.xlane.xlu0 %8556  ;;  %v8564_v55 = vsub.f32 %v16148_v28, %v8560_v6 }
0x43ea   :  { %v16180_v61 = vpop.eup %14114  ;;  %14124 = vpow2.f32 %v8565_v51  ;;  %v8563_v7 = vsub.f32 %v16151_v42, %v8557_v38 }
0x43eb   :  { %v8034_v1 = vsel %vm51_vm0, %v16180_v61, 0.0  ;;  %v16186_v44 = vpop.eup %14116  ;;  %v8571_v62 = vmul.f32 1.442695, %v8564_v55 }
0x43ec   :  { %8035 = vadd.xlane.f32.xlu1 %v8034_v1  ;;  %8292 = vadd.xlane.f32.xlu0 %v8291_v4  ;;  %v8031_v31 = vsel %vm51_vm0, %v16186_v44, 0.0  ;;  %v8569_v56 = vmul.f32 1.442695, %v8563_v7  ;;  %v13619_v28 = vpop.permute.xlu1 %13618 }
0x43ed   :  { %v13614_v9 = vpop.permute.xlu0 %13613 }
0x43ee   :  { %v16188_v53 = vpop.eup %14118  ;;  %14126 = vpow2.f32 %v8569_v56  ;;  %v13616_v34 = vunpack.i.h.bf16 %v13614_v9  ;;  %v13615_v27 = vunpack.i.l.bf16 %v13614_v9 }
0x43ef   :  { %v8300_v12 = vsel %vm51_vm0, %v16188_v53, 0.0  ;;  %v16194_v39 = vpop.eup %14120  ;;  %14128 = vpow2.f32 %v8571_v62 }
0x43f0   :  { %8301 = vadd.xlane.f32.xlu1 %v8300_v12  ;;  %8032 = vadd.xlane.f32.xlu0 %v8031_v31  ;;  %v8297_v41 = vsel %vm51_vm0, %v16194_v39, 0.0  ;;  %v12935_v58 = vpack.c.bf16 %v13616_v34, %v13615_v27  ;;  %v13621_v12 = vunpack.i.h.bf16 %v13619_v28  ;;  %v13620_v31 = vunpack.i.l.bf16 %v13619_v28 }
0x43f2   :  { %v12939_v7 = vpack.c.bf16 %v13621_v12, %v13620_v31 }
0x43f3   :  { %v16196_v30 = vpop.eup %14122 }
0x43f4   :  { %v16200_v14 = vpop.eup %14124  ;;  %v8576_v32 = vsel %vm51_vm0, %v16196_v30, 0.0  ;;  %8298 = vadd.xlane.f32.xlu0 %v8297_v41 }
0x43f5   :  { %8577 = vadd.xlane.f32.xlu1 %v8576_v32  ;;  %v8573_v5 = vsel %vm51_vm0, %v16200_v14, 0.0 }
0x43f8   :  { %8574 = vadd.xlane.f32.xlu0 %v8573_v5  ;;  %v16212_v59 = vpop.eup %14126 }
0x43f9   :  { %v16214_v60 = vpop.eup %14128  ;;  %v8579_v20 = vsel %vm51_vm0, %v16212_v59, 0.0 }
0x43fa   :  { %v8582_v43 = vsel %vm51_vm0, %v16214_v60, 0.0 }
0x4406   :  { %13623 = vrot.lane.b32.xlu1 %v16017_v24, %s16700_s23 }
0x440e   :  { %13628 = vrot.lane.b32.xlu0 %v16033_v11, %s16700_s23 }
0x442a   :  { %8580 = vadd.xlane.f32.xlu1 %v8579_v20 }
0x442d   :  { %8583 = vadd.xlane.f32.xlu0 %v8582_v43 }
0x443b   :  { %8702 = vrot.lane.b32.xlu1 %v16009_v3, %s16699_s22 }
0x443f   :  { %8706 = vrot.lane.b32.xlu1 %v16023_v0, %s16699_s22 }
0x4443   :  { %8704 = vrot.lane.b32.xlu0 %v16013_v36, %s16699_s22 }
0x4447   :  { %8708 = vrot.lane.b32.xlu0 %v16029_v40, %s16699_s22 }
0x4470   :  { %v8030_v42 = vpop.xlane.xlu1 %8029 }
0x4471   :  { %14130 = vrcp.f32 %v8030_v42 }
0x4474   :  { %v8296_v22 = vpop.xlane.xlu1 %8295 }
0x4475   :  { %v8027_v16 = vpop.xlane.xlu0 %8026 }
0x4476   :  { %14132 = vrcp.f32 %v8027_v16 }
0x4479   :  { %v8293_v15 = vpop.xlane.xlu0 %8292  ;;  %v8036_v47 = vpop.xlane.xlu1 %8035 }
0x447a   :  { %14134 = vrcp.f32 %v8036_v47 }
0x447b   :  { %14136 = vrcp.f32 %v8293_v15  ;;  %v14131_v33 = vpop.eup %14130 }
0x447c   :  { %v8042_v19 = vmul.f32 %v14131_v33, %v16165_v21 }
0x447d   :  { %v8033_v26 = vpop.xlane.xlu0 %8032  ;;  %v8302_v25 = vpop.xlane.xlu1 %8301 }
0x447e   :  { %14138 = vrcp.f32 %v8033_v26 }
0x447f   :  { %14140 = vrcp.f32 %v8296_v22 }
0x4480   :  { %v14133_v29 = vpop.eup %14132 }
0x4481   :  { %v8299_v13 = vpop.xlane.xlu0 %8298  ;;  %v8041_v57 = vmul.f32 %v14133_v29, %v16171_v17 }
0x4482   :  { %14142 = vrcp.f32 %v8299_v13  ;;  %v8578_v48 = vpop.xlane.xlu1 %8577 }
0x4483   :  { %12115 = vmatprep.mubr.msk.f32.mxu1 %vm51_vm0, %v8041_v57  ;;  %14144 = vrcp.f32 %v8302_v25 }
0x4484   :  { %12116 = vmatmul.mubr.msk.f32.vlgmr.msra.gmra.mrb[116].mxu1 %vm51_vm0, %v8042_v19  ;;  %v14135_v63 = vpop.eup %14134 }
0x4485   :  { %12918 = vmatpush3.bf16.msra.mxu1 %v16112_v52  ;;  %v8575_v50 = vpop.xlane.xlu0 %8574  ;;  %v14137_v17 = vpop.eup %14136  ;;  %v8044_v51 = vmul.f32 %v14135_v63, %v16180_v61 }
0x4486   :  { %12920 = vmatprep.subr.bf16.mxu1 %v12919_v18  ;;  %14146 = vrcp.f32 %v8575_v50  ;;  %v8307_v52 = vmul.f32 %v14137_v17, %v16178_v49  ;;  %v13624_v41 = vpop.permute.xlu1 %13623 }
0x4487   :  { %14148 = vrcp.f32 %v8578_v48  ;;  %v13626_v61 = vunpack.i.h.bf16 %v13624_v41  ;;  %v13625_v6 = vunpack.i.l.bf16 %v13624_v41 }
0x4488   :  { %v14139_v21 = vpop.eup %14138 }
0x4489   :  { %12922 = vmatpush3.bf16.msra.mxu1 %v12919_v18  ;;  %v8043_v2 = vmul.f32 %v14139_v21, %v16186_v44  ;;  %v14141_v1 = vpop.eup %14140  ;;  %v12943_v62 = vpack.c.bf16 %v13626_v61, %v13625_v6 }
0x448a   :  { %12936 = vmatprep.subr.bf16.mxu1 %v12935_v58  ;;  %v8308_v32 = vmul.f32 %v14141_v1, %v16169_v35 }
0x448b   :  { %12118 = vmatprep.mubr.msk.f32.mxu1 %vm51_vm0, %v8043_v2 }
0x448c   :  { %v14143_v4 = vpop.eup %14142  ;;  %12119 = vmatmul.mubr.msk.f32.gmra.mrb[118].mxu1 %vm51_vm0, %v8044_v51 }
0x448d   :  { %12143 = vmatprep.mubr.msk.f32.mxu1 %vm51_vm0, %v8307_v52  ;;  %v14145_v5 = vpop.eup %14144  ;;  %v8309_v44 = vmul.f32 %v14143_v4, %v16194_v39  ;;  %v13629_v39 = vpop.permute.xlu0 %13628 }
0x448e   :  { %v8310_v49 = vmul.f32 %v14145_v5, %v16188_v53  ;;  %v13631_v20 = vunpack.i.h.bf16 %v13629_v39  ;;  %v13630_v43 = vunpack.i.l.bf16 %v13629_v39 }
0x4490   :  { %v14147_v38 = vpop.eup %14146  ;;  %12144 = vmatmul.mubr.msk.f32.vlgmr.msra.gmra.mrb[120].mxu1 %vm51_vm0, %v8308_v32  ;;  %v12949_v53 = vpack.c.bf16 %v13631_v20, %v13630_v43 }
0x4491   :  { %12938 = vmatpush3.bf16.msra.mxu1 %v12935_v58  ;;  %12146 = vmatprep.mubr.msk.f32.mxu1 %vm51_vm0, %v8309_v44  ;;  %v14149_v55 = vpop.eup %14148  ;;  %v8589_v56 = vmul.f32 %v14147_v38, %v16200_v14 }
0x4492   :  { %12940 = vmatprep.subr.bf16.mxu1 %v12939_v7  ;;  %v8590_v35 = vmul.f32 %v14149_v55, %v16196_v30 }
0x4494   :  { %12147 = vmatmul.mubr.msk.f32.gmra.mrb[122].mxu1 %vm51_vm0, %v8310_v49 }
0x4495   :  { %12942 = vmatpush3.bf16.msra.mxu1 %v12939_v7  ;;  %12171 = vmatprep.mubr.msk.f32.mxu1 %vm51_vm0, %v8589_v56 }
0x4496   :  { %12945 = vmatprep.subr.msk.bf16.mxu1 %vm16069_vm11, %v12943_v62 }
0x4498   :  { %12172 = vmatmul.mubr.msk.f32.vlgmr.msra.gmra.mrb[124].mxu1 %vm51_vm0, %v8590_v35 }
0x449e   :  { %12948 = vmatpush3.bf16.xpose.msk.msra.mxu1 %vm16069_vm11, %v12943_v62 }
0x449f   :  { %12951 = vmatprep.subr.msk.bf16.mxu1 %vm16069_vm11, %v12949_v53 }
0x44a6   :  { %12954 = vmatpush3.bf16.xpose.msk.msra.mxu1 %vm16069_vm11, %v12949_v53 }
0x44b7   :  { %v8581_v14 = vpop.xlane.xlu1 %8580 }
0x44b8   :  { %14150 = vrcp.f32 %v8581_v14 }
0x44ba   :  { %v8584_v30 = vpop.xlane.xlu0 %8583 }
0x44bb   :  { %14152 = vrcp.f32 %v8584_v30  ;;  %v8703_v22 = vpop.permute.xlu1 %8702 }
0x44be   :  { %v8705_v15 = vpop.permute.xlu0 %8704 }
0x44bf   :  { %v8707_v47 = vpop.permute.xlu1 %8706 }
0x44c2   :  { %v14151_v28 = vpop.eup %14150  ;;  %v8709_v26 = vpop.permute.xlu0 %8708 }
0x44c3   :  { %v8591_v42 = vmul.f32 %v14151_v28, %v16212_v59 }
0x44c5   :  { %v14153_v9 = vpop.eup %14152  ;;  %12174 = vmatprep.mubr.msk.f32.mxu1 %vm51_vm0, %v8591_v42 }
0x44c6   :  { %v8592_v16 = vmul.f32 %v14153_v9, %v16214_v60 }
0x44c8   :  { %12175 = vmatmul.mubr.msk.f32.gmra.mrb[126].mxu1 %vm51_vm0, %v8592_v16 }
0x44c9   :  { %12185 = vmatprep.mubr.msk.f32.mxu1 %vm2486_vm5, %v8703_v22 }
0x44cc   :  { %12186 = vmatmul.mubr.msk.f32.vlgmr.msra.gmra.mrb[128].mxu1 %vm2486_vm5, %v8705_v15 }
0x44cd   :  { %12188 = vmatprep.mubr.msk.f32.mxu1 %vm2486_vm5, %v8707_v47 }
0x44d0   :  { %12189 = vmatmul.mubr.msk.f32.gmra.mrb[130].mxu1 %vm2486_vm5, %v8709_v26 }
0x4557   :  { %v16267_v59 = vpop.f32.mrb[116].mxu1 }
0x4558   :  { %v16269_v33 = vpop.f32.mrb[117].mxu1 }
0x455f   :  { %v16271_v29 = vpop.f32.mrb[118].mxu1 }
0x4560   :  { %v16273_v60 = vpop.f32.mrb[119].mxu1 }
0x4563   :  { %v16275_v10 = vpop.f32.mrb[120].mxu1 }
0x4564   :  { %v16277_v23 = vpop.f32.mrb[121].mxu1 }
0x4567   :  { %v16279_v25 = vpop.f32.mrb[122].mxu1 }
0x4568   :  { %v16281_v13 = vpop.f32.mrb[123].mxu1 }
0x456b   :  { %v16283_v57 = vpop.f32.mrb[124].mxu1 }
0x456c   :  { %v16285_v19 = vpop.f32.mrb[125].mxu1 }
0x459b   :  { %v16287_v34 = vpop.f32.mrb[126].mxu1 }
0x459c   :  { %v16289_v27 = vpop.f32.mrb[127].mxu1 }
0x459f   :  { %v12187_v18 = vpop.f32.mrb[128].mxu1 }
0x45a0   :  { %v8820_v50 = vmul.f32 0.35355338, %v12187_v18  ;;  %v8800_v63 = vpop.f32.mrb[129].mxu1 }
0x45a1   :  { %v8819_v48 = vmul.f32 0.35355338, %v8800_v63 }
0x45a2   :  { %v8824_v17 = vadd.f32 %v8820_v50, %v14375_v46 }
0x45a3   :  { %v8823_v58 = vadd.f32 %v8819_v48, %v14375_v46  ;;  %v12190_v21 = vpop.f32.mrb[130].mxu1 }
0x45a4   :  { %v8822_v2 = vmul.f32 0.35355338, %v12190_v21  ;;  %v8810_v51 = vpop.f32.mrb[131].mxu1  ;;  %v8830_v1 = vsel %vm51_vm0, %v8824_v17, -inf }
0x45a5   :  { %v8821_v52 = vmul.f32 0.35355338, %v8810_v51  ;;  %8831 = vmax.xlane.f32.xlu0 %v8830_v1  ;;  %v8827_v4 = vsel %vm51_vm0, %v8823_v58, -inf }
0x45a6   :  { %v8826_v12 = vadd.f32 %v8822_v2, %v14379_v54  ;;  %8828 = vmax.xlane.f32.xlu1 %v8827_v4 }
0x45a7   :  { %v8825_v31 = vadd.f32 %v8821_v52, %v14379_v54 }
0x45a8   :  { %v8836_v41 = vsel %vm51_vm0, %v8826_v12, -inf }
0x45a9   :  { %v8833_v32 = vsel %vm51_vm0, %v8825_v31, -inf }
0x45aa   :  { %8837 = vmax.xlane.f32.xlu1 %v8836_v41  ;;  %8834 = vmax.xlane.f32.xlu0 %v8833_v32 }
0x45bb   :  { %13638 = vrot.lane.b32.xlu1 %v16035_v45, %s16699_s22 }
0x45c0   :  { %13633 = vrot.lane.b32.xlu0 %v16019_v8, %s16699_s22 }
0x4632   :  { %v8832_v5 = vpop.xlane.xlu0 %8831 }
0x4633   :  { %v8840_v44 = vsub.f32 %v8824_v17, %v8832_v5  ;;  %v8829_v38 = vpop.xlane.xlu1 %8828 }
0x4634   :  { %v8839_v61 = vsub.f32 %v8823_v58, %v8829_v38 }
0x4635   :  { %v8845_v6 = vmul.f32 1.442695, %v8840_v44 }
0x4636   :  { %v8843_v7 = vmul.f32 1.442695, %v8839_v61 }
0x4637   :  { %14154 = vpow2.f32 %v8845_v6  ;;  %v8838_v49 = vpop.xlane.xlu1 %8837  ;;  %v8835_v55 = vpop.xlane.xlu0 %8834 }
0x4638   :  { %14156 = vpow2.f32 %v8843_v7  ;;  %v8841_v56 = vsub.f32 %v8825_v31, %v8835_v55  ;;  %v8842_v26 = vsub.f32 %v8826_v12, %v8838_v49 }
0x463a   :  { %v8847_v62 = vmul.f32 1.442695, %v8841_v56  ;;  %v8849_v18 = vmul.f32 1.442695, %v8842_v26 }
0x463b   :  { %v13639_v35 = vpop.permute.xlu1 %13638  ;;  %v13634_v39 = vpop.permute.xlu0 %13633 }
0x463c   :  { %v13636_v20 = vunpack.i.h.bf16 %v13634_v39  ;;  %14158 = vpow2.f32 %v8847_v62  ;;  %v13641_v43 = vunpack.i.h.bf16 %v13639_v35  ;;  %v13640_v53 = vunpack.i.l.bf16 %v13639_v35 }
0x463d   :  { %v13635_v14 = vunpack.i.l.bf16 %v13634_v39  ;;  %14160 = vpow2.f32 %v8849_v18 }
0x463e   :  { %v12959_v42 = vpack.c.bf16 %v13641_v43, %v13640_v53 }
0x463f   :  { %v12955_v30 = vpack.c.bf16 %v13636_v20, %v13635_v14 }
0x4641   :  { %v14155_v28 = vpop.eup %14154  ;;  %12956 = vmatprep.subr.bf16.mxu0 %v12955_v30 }
0x4642   :  { %v14157_v9 = vpop.eup %14156  ;;  %12958 = vmatpush3.bf16.msra.mxu0 %v12955_v30  ;;  %v8854_v22 = vsel %vm51_vm0, %v14155_v28, 0.0 }
0x4643   :  { %12960 = vmatprep.subr.bf16.mxu0 %v12959_v42  ;;  %8855 = vadd.xlane.f32.xlu1 %v8854_v22  ;;  %v8851_v16 = vsel %vm51_vm0, %v14157_v9, 0.0 }
0x4644   :  { %8852 = vadd.xlane.f32.xlu0 %v8851_v16 }
0x4646   :  { %12962 = vmatpush3.bf16.msra.mxu0 %v12959_v42  ;;  %v14159_v15 = vpop.eup %14158 }
0x4647   :  { %v8857_v47 = vsel %vm51_vm0, %v14159_v15, 0.0  ;;  %v14161_v50 = vpop.eup %14160 }
0x4648   :  { %8858 = vadd.xlane.f32.xlu0 %v8857_v47  ;;  %v8860_v63 = vsel %vm51_vm0, %v14161_v50, 0.0 }
0x4654   :  { %13643 = vrot.lane.b32.xlu1 %v16017_v24, %s14266_s16 }
0x465e   :  { %13648 = vrot.lane.b32.xlu0 %v16033_v11, %s14266_s16 }
0x4662   :  { %8982 = vrot.lane.b32.xlu0 %v16013_v36, %s14234_s1 }
0x4666   :  { %8986 = vrot.lane.b32.xlu0 %v16029_v40, %s14234_s1 }
0x4678   :  { %8861 = vadd.xlane.f32.xlu1 %v8860_v63 }
0x4689   :  { %8980 = vrot.lane.b32.xlu1 %v16009_v3, %s14234_s1 }
0x468d   :  { %8984 = vrot.lane.b32.xlu1 %v16023_v0, %s14234_s1 }
0x46d0   :  { %v8856_v48 = vpop.xlane.xlu1 %8855 }
0x46d1   :  { %14162 = vrcp.f32 %v8856_v48  ;;  %v8853_v17 = vpop.xlane.xlu0 %8852 }
0x46d2   :  { %14164 = vrcp.f32 %v8853_v17 }
0x46d4   :  { %v13644_v58 = vpop.permute.xlu1 %13643 }
0x46d5   :  { %v13646_v21 = vunpack.i.h.bf16 %v13644_v58  ;;  %v13645_v2 = vunpack.i.l.bf16 %v13644_v58  ;;  %v8859_v51 = vpop.xlane.xlu0 %8858 }
0x46d6   :  { %14166 = vrcp.f32 %v8859_v51 }
0x46d7   :  { %v12963_v1 = vpack.c.bf16 %v13646_v21, %v13645_v2 }
0x46d9   :  { %12965 = vmatprep.subr.msk.bf16.mxu0 %vm16069_vm11, %v12963_v1  ;;  %v13649_v52 = vpop.permute.xlu0 %13648 }
0x46da   :  { %v13651_v31 = vunpack.i.h.bf16 %v13649_v52  ;;  %v13650_v41 = vunpack.i.l.bf16 %v13649_v52 }
0x46db   :  { %v14163_v4 = vpop.eup %14162 }
0x46dc   :  { %v14165_v12 = vpop.eup %14164  ;;  %v8868_v5 = vmul.f32 %v14163_v4, %v14155_v28  ;;  %v12969_v44 = vpack.c.bf16 %v13651_v31, %v13650_v41 }
0x46dd   :  { %v8867_v32 = vmul.f32 %v14165_v12, %v14157_v9  ;;  %v8983_v56 = vpop.permute.xlu0 %8982 }
0x46df   :  { %12199 = vmatprep.mubr.msk.f32.mxu0 %vm51_vm0, %v8867_v32 }
0x46e0   :  { %12200 = vmatmul.mubr.msk.f32.vlgmr.msra.gmra.mrb[120].mxu0 %vm51_vm0, %v8868_v5  ;;  %v14167_v38 = vpop.eup %14166 }
0x46e1   :  { %12968 = vmatpush3.bf16.xpose.msk.msra.mxu0 %vm16069_vm11, %v12963_v1  ;;  %v8869_v61 = vmul.f32 %v14167_v38, %v14159_v15  ;;  %v8987_v35 = vpop.permute.xlu0 %8986 }
0x46e2   :  { %12971 = vmatprep.subr.msk.bf16.mxu0 %vm16069_vm11, %v12969_v44 }
0x46e3   :  { %12202 = vmatprep.mubr.msk.f32.mxu0 %vm51_vm0, %v8869_v61 }
0x46e9   :  { %12974 = vmatpush3.bf16.xpose.msk.msra.mxu0 %vm16069_vm11, %v12969_v44 }
0x4705   :  { %v8862_v6 = vpop.xlane.xlu1 %8861 }
0x4706   :  { %14168 = vrcp.f32 %v8862_v6 }
0x4709   :  { %v8981_v49 = vpop.permute.xlu1 %8980 }
0x470d   :  { %v8985_v62 = vpop.permute.xlu1 %8984 }
0x4710   :  { %v14169_v7 = vpop.eup %14168 }
0x4711   :  { %v8870_v55 = vmul.f32 %v14169_v7, %v14161_v50 }
0x4713   :  { %12203 = vmatmul.mubr.msk.f32.gmra.mrb[122].mxu0 %vm51_vm0, %v8870_v55 }
0x4714   :  { %12213 = vmatprep.mubr.msk.f32.mxu0 %vm2486_vm5, %v8981_v49 }
0x4717   :  { %12214 = vmatmul.mubr.msk.f32.vlgmr.msra.gmra.mrb[124].mxu0 %vm2486_vm5, %v8983_v56 }
0x4718   :  { %12216 = vmatprep.mubr.msk.f32.mxu0 %vm2486_vm5, %v8985_v62 }
0x471b   :  { %12217 = vmatmul.mubr.msk.f32.gmra.mrb[126].mxu0 %vm2486_vm5, %v8987_v35 }
0x47b3   :  { %v16335_v39 = vpop.f32.mrb[120].mxu0 }
0x47b4   :  { %v16337_v20 = vpop.f32.mrb[121].mxu0 }
0x47e6   :  { %v16339_v43 = vpop.f32.mrb[122].mxu0 }
0x47e7   :  { %v16341_v53 = vpop.f32.mrb[123].mxu0 }
0x47ea   :  { %v12215_v14 = vpop.f32.mrb[124].mxu0 }
0x47eb   :  { %v9098_v30 = vmul.f32 0.35355338, %v12215_v14  ;;  %v9078_v28 = vpop.f32.mrb[125].mxu0 }
0x47ec   :  { %v9097_v42 = vmul.f32 0.35355338, %v9078_v28 }
0x47ed   :  { %v9102_v9 = vadd.f32 %v9098_v30, %v14375_v46 }
0x47ee   :  { %v9101_v22 = vadd.f32 %v9097_v42, %v14375_v46  ;;  %v12218_v16 = vpop.f32.mrb[126].mxu0 }
0x47ef   :  { %v9100_v15 = vmul.f32 0.35355338, %v12218_v16  ;;  %v9088_v47 = vpop.f32.mrb[127].mxu0  ;;  %v9108_v26 = vsel %vm51_vm0, %v9102_v9, -inf }
0x47f0   :  { %v9099_v18 = vmul.f32 0.35355338, %v9088_v47  ;;  %9109 = vmax.xlane.f32.xlu0 %v9108_v26  ;;  %v9105_v50 = vsel %vm51_vm0, %v9101_v22, -inf }
0x47f1   :  { %v9104_v63 = vadd.f32 %v9100_v15, %v14379_v54  ;;  %9106 = vmax.xlane.f32.xlu1 %v9105_v50 }
0x47f2   :  { %v9103_v48 = vadd.f32 %v9099_v18, %v14379_v54 }
0x47f3   :  { %v9114_v17 = vsel %vm51_vm0, %v9104_v63, -inf }
0x47f4   :  { %v9111_v58 = vsel %vm51_vm0, %v9103_v48, -inf }
0x47f5   :  { %9115 = vmax.xlane.f32.xlu1 %v9114_v17  ;;  %9112 = vmax.xlane.f32.xlu0 %v9111_v58 }
0x4806   :  { %13658 = vrot.lane.b32.xlu1 %v16035_v45, %s14234_s1 }
0x480b   :  { %13653 = vrot.lane.b32.xlu0 %v16019_v8, %s14234_s1 }
0x487d   :  { %v9110_v21 = vpop.xlane.xlu0 %9109 }
0x487e   :  { %v9118_v2 = vsub.f32 %v9102_v9, %v9110_v21  ;;  %v9107_v51 = vpop.xlane.xlu1 %9106 }
0x487f   :  { %v9117_v1 = vsub.f32 %v9101_v22, %v9107_v51 }
0x4880   :  { %v9123_v52 = vmul.f32 1.442695, %v9118_v2 }
0x4881   :  { %v9121_v4 = vmul.f32 1.442695, %v9117_v1 }
0x4882   :  { %14170 = vpow2.f32 %v9123_v52  ;;  %v9116_v12 = vpop.xlane.xlu1 %9115  ;;  %v9113_v31 = vpop.xlane.xlu0 %9112 }
0x4883   :  { %14172 = vpow2.f32 %v9121_v4  ;;  %v9119_v41 = vsub.f32 %v9103_v48, %v9113_v31  ;;  %v9120_v42 = vsub.f32 %v9104_v63, %v9116_v12 }
0x4885   :  { %v9125_v32 = vmul.f32 1.442695, %v9119_v41  ;;  %v9127_v9 = vmul.f32 1.442695, %v9120_v42 }
0x4886   :  { %v13659_v5 = vpop.permute.xlu1 %13658  ;;  %v13654_v44 = vpop.permute.xlu0 %13653 }
0x4887   :  { %v13656_v38 = vunpack.i.h.bf16 %v13654_v44  ;;  %14174 = vpow2.f32 %v9125_v32  ;;  %v13661_v61 = vunpack.i.h.bf16 %v13659_v5  ;;  %v13660_v6 = vunpack.i.l.bf16 %v13659_v5 }
0x4888   :  { %v13655_v7 = vunpack.i.l.bf16 %v13654_v44  ;;  %14176 = vpow2.f32 %v9127_v9 }
0x4889   :  { %v12979_v56 = vpack.c.bf16 %v13661_v61, %v13660_v6 }
0x488a   :  { %v12975_v49 = vpack.c.bf16 %v13656_v38, %v13655_v7 }
0x488c   :  { %v14171_v55 = vpop.eup %14170  ;;  %12976 = vmatprep.subr.bf16.mxu1 %v12975_v49 }
0x488d   :  { %v14173_v62 = vpop.eup %14172  ;;  %12978 = vmatpush3.bf16.msra.mxu1 %v12975_v49  ;;  %v9132_v35 = vsel %vm51_vm0, %v14171_v55, 0.0 }
0x488e   :  { %12980 = vmatprep.subr.bf16.mxu1 %v12979_v56  ;;  %9133 = vadd.xlane.f32.xlu1 %v9132_v35  ;;  %v9129_v14 = vsel %vm51_vm0, %v14173_v62, 0.0 }
0x488f   :  { %9130 = vadd.xlane.f32.xlu0 %v9129_v14 }
0x4891   :  { %12982 = vmatpush3.bf16.msra.mxu1 %v12979_v56  ;;  %v14175_v30 = vpop.eup %14174 }
0x4892   :  { %v9135_v28 = vsel %vm51_vm0, %v14175_v30, 0.0  ;;  %v14177_v22 = vpop.eup %14176 }
0x4893   :  { %9136 = vadd.xlane.f32.xlu0 %v9135_v28  ;;  %v9138_v16 = vsel %vm51_vm0, %v14177_v22, 0.0 }
0x489f   :  { %13663 = vrot.lane.b32.xlu1 %v16017_v24, %s14263_s9 }
0x48a9   :  { %13668 = vrot.lane.b32.xlu0 %v16033_v11, %s14263_s9 }
0x48ad   :  { %9260 = vrot.lane.b32.xlu0 %v16013_v36, %s14241_s15 }
0x48b1   :  { %9264 = vrot.lane.b32.xlu0 %v16029_v40, %s14241_s15 }
0x48c3   :  { %9139 = vadd.xlane.f32.xlu1 %v9138_v16 }
0x48d4   :  { %9258 = vrot.lane.b32.xlu1 %v16009_v3, %s14241_s15 }
0x48d8   :  { %9262 = vrot.lane.b32.xlu1 %v16023_v0, %s14241_s15 }
0x491b   :  { %v9134_v15 = vpop.xlane.xlu1 %9133 }
0x491c   :  { %14178 = vrcp.f32 %v9134_v15  ;;  %v9131_v47 = vpop.xlane.xlu0 %9130 }
0x491d   :  { %14180 = vrcp.f32 %v9131_v47 }
0x491f   :  { %v13664_v26 = vpop.permute.xlu1 %13663 }
0x4920   :  { %v13666_v18 = vunpack.i.h.bf16 %v13664_v26  ;;  %v13665_v50 = vunpack.i.l.bf16 %v13664_v26  ;;  %v9137_v63 = vpop.xlane.xlu0 %9136 }
0x4921   :  { %14182 = vrcp.f32 %v9137_v63 }
0x4922   :  { %v12983_v48 = vpack.c.bf16 %v13666_v18, %v13665_v50 }
0x4924   :  { %12985 = vmatprep.subr.msk.bf16.mxu1 %vm16069_vm11, %v12983_v48  ;;  %v13669_v17 = vpop.permute.xlu0 %13668 }
0x4925   :  { %v13671_v2 = vunpack.i.h.bf16 %v13669_v17  ;;  %v13670_v51 = vunpack.i.l.bf16 %v13669_v17 }
0x4926   :  { %v14179_v58 = vpop.eup %14178 }
0x4927   :  { %v14181_v21 = vpop.eup %14180  ;;  %v9146_v52 = vmul.f32 %v14179_v58, %v14171_v55  ;;  %v12989_v4 = vpack.c.bf16 %v13671_v2, %v13670_v51 }
0x4928   :  { %v9145_v1 = vmul.f32 %v14181_v21, %v14173_v62  ;;  %v9261_v38 = vpop.permute.xlu0 %9260 }
0x492a   :  { %12227 = vmatprep.mubr.msk.f32.mxu1 %vm51_vm0, %v9145_v1 }
0x492b   :  { %12228 = vmatmul.mubr.msk.f32.vlgmr.msra.gmra.mrb[132].mxu1 %vm51_vm0, %v9146_v52  ;;  %v14183_v12 = vpop.eup %14182 }
0x492c   :  { %12988 = vmatpush3.bf16.xpose.msk.msra.mxu1 %vm16069_vm11, %v12983_v48  ;;  %v9147_v31 = vmul.f32 %v14183_v12, %v14175_v30  ;;  %v9265_v6 = vpop.permute.xlu0 %9264 }
0x492d   :  { %12991 = vmatprep.subr.msk.bf16.mxu1 %vm16069_vm11, %v12989_v4 }
0x492e   :  { %12230 = vmatprep.mubr.msk.f32.mxu1 %vm51_vm0, %v9147_v31 }
0x4934   :  { %12994 = vmatpush3.bf16.xpose.msk.msra.mxu1 %vm16069_vm11, %v12989_v4 }
0x4950   :  { %v9140_v41 = vpop.xlane.xlu1 %9139 }
0x4951   :  { %14184 = vrcp.f32 %v9140_v41 }
0x4954   :  { %v9259_v5 = vpop.permute.xlu1 %9258 }
0x4958   :  { %v9263_v61 = vpop.permute.xlu1 %9262 }
0x495b   :  { %v14185_v32 = vpop.eup %14184 }
0x495c   :  { %v9148_v44 = vmul.f32 %v14185_v32, %v14177_v22 }
0x495e   :  { %12231 = vmatmul.mubr.msk.f32.gmra.mrb[134].mxu1 %vm51_vm0, %v9148_v44 }
0x495f   :  { %12241 = vmatprep.mubr.msk.f32.mxu1 %vm2486_vm5, %v9259_v5 }
0x4962   :  { %12242 = vmatmul.mubr.msk.f32.vlgmr.msra.gmra.mrb[136].mxu1 %vm2486_vm5, %v9261_v38 }
0x4963   :  { %12244 = vmatprep.mubr.msk.f32.mxu1 %vm2486_vm5, %v9263_v61 }
0x4966   :  { %12245 = vmatmul.mubr.msk.f32.gmra.mrb[138].mxu1 %vm2486_vm5, %v9265_v6 }
0x49fe   :  { %v16387_v7 = vpop.f32.mrb[132].mxu1 }
0x49ff   :  { %v16389_v49 = vpop.f32.mrb[133].mxu1 }
0x4a31   :  { %v16391_v55 = vpop.f32.mrb[134].mxu1 }
0x4a32   :  { %v16393_v56 = vpop.f32.mrb[135].mxu1 }
0x4a35   :  { %v12243_v62 = vpop.f32.mrb[136].mxu1 }
0x4a36   :  { %v9376_v35 = vmul.f32 0.35355338, %v12243_v62  ;;  %v9356_v14 = vpop.f32.mrb[137].mxu1 }
0x4a37   :  { %v9375_v30 = vmul.f32 0.35355338, %v9356_v14 }
0x4a38   :  { %v9380_v28 = vadd.f32 %v9376_v35, %v14375_v46 }
0x4a39   :  { %v9379_v42 = vadd.f32 %v9375_v30, %v14375_v46  ;;  %v12246_v9 = vpop.f32.mrb[138].mxu1 }
0x4a3a   :  { %v9378_v22 = vmul.f32 0.35355338, %v12246_v9  ;;  %v9366_v16 = vpop.f32.mrb[139].mxu1  ;;  %v9386_v15 = vsel %vm51_vm0, %v9380_v28, -inf }
0x4a3b   :  { %v9377_v47 = vmul.f32 0.35355338, %v9366_v16  ;;  %9387 = vmax.xlane.f32.xlu0 %v9386_v15  ;;  %v9383_v26 = vsel %vm51_vm0, %v9379_v42, -inf }
0x4a3c   :  { %v9382_v18 = vadd.f32 %v9378_v22, %v14379_v54  ;;  %9384 = vmax.xlane.f32.xlu1 %v9383_v26 }
0x4a3d   :  { %v9381_v50 = vadd.f32 %v9377_v47, %v14379_v54 }
0x4a3e   :  { %v9392_v63 = vsel %vm51_vm0, %v9382_v18, -inf }
0x4a3f   :  { %v9389_v48 = vsel %vm51_vm0, %v9381_v50, -inf }
0x4a40   :  { %9393 = vmax.xlane.f32.xlu1 %v9392_v63  ;;  %9390 = vmax.xlane.f32.xlu0 %v9389_v48 }
0x4a51   :  { %13678 = vrot.lane.b32.xlu1 %v16035_v45, %s14241_s15 }
0x4a56   :  { %13673 = vrot.lane.b32.xlu0 %v16019_v8, %s14241_s15 }
0x4ac8   :  { %v9388_v17 = vpop.xlane.xlu0 %9387 }
0x4ac9   :  { %v9396_v58 = vsub.f32 %v9380_v28, %v9388_v17  ;;  %v9385_v21 = vpop.xlane.xlu1 %9384 }
0x4aca   :  { %v9395_v2 = vsub.f32 %v9379_v42, %v9385_v21 }
0x4acb   :  { %v9401_v51 = vmul.f32 1.442695, %v9396_v58 }
0x4acc   :  { %v9399_v1 = vmul.f32 1.442695, %v9395_v2 }
0x4acd   :  { %14186 = vpow2.f32 %v9401_v51  ;;  %v9394_v52 = vpop.xlane.xlu1 %9393  ;;  %v9391_v4 = vpop.xlane.xlu0 %9390 }
0x4ace   :  { %14188 = vpow2.f32 %v9399_v1  ;;  %v9397_v12 = vsub.f32 %v9381_v50, %v9391_v4  ;;  %v9398_v22 = vsub.f32 %v9382_v18, %v9394_v52 }
0x4ad0   :  { %v9403_v31 = vmul.f32 1.442695, %v9397_v12  ;;  %v9405_v16 = vmul.f32 1.442695, %v9398_v22 }
0x4ad1   :  { %v13679_v41 = vpop.permute.xlu1 %13678  ;;  %v13674_v32 = vpop.permute.xlu0 %13673 }
0x4ad2   :  { %v13676_v5 = vunpack.i.h.bf16 %v13674_v32  ;;  %14190 = vpow2.f32 %v9403_v31  ;;  %v13681_v44 = vunpack.i.h.bf16 %v13679_v41  ;;  %v13680_v38 = vunpack.i.l.bf16 %v13679_v41 }
0x4ad3   :  { %v13675_v61 = vunpack.i.l.bf16 %v13674_v32  ;;  %14192 = vpow2.f32 %v9405_v16 }
0x4ad4   :  { %v12999_v35 = vpack.c.bf16 %v13681_v44, %v13680_v38 }
0x4ad5   :  { %v12995_v6 = vpack.c.bf16 %v13676_v5, %v13675_v61 }
0x4ad7   :  { %v14187_v62 = vpop.eup %14186  ;;  %12996 = vmatprep.subr.bf16.mxu0 %v12995_v6 }
0x4ad8   :  { %v14189_v14 = vpop.eup %14188  ;;  %12998 = vmatpush3.bf16.msra.mxu0 %v12995_v6  ;;  %v9410_v30 = vsel %vm51_vm0, %v14187_v62, 0.0 }
0x4ad9   :  { %13000 = vmatprep.subr.bf16.mxu0 %v12999_v35  ;;  %9411 = vadd.xlane.f32.xlu1 %v9410_v30  ;;  %v9407_v28 = vsel %vm51_vm0, %v14189_v14, 0.0 }
0x4ada   :  { %9408 = vadd.xlane.f32.xlu0 %v9407_v28 }
0x4adc   :  { %13002 = vmatpush3.bf16.msra.mxu0 %v12999_v35  ;;  %v14191_v42 = vpop.eup %14190 }
0x4add   :  { %v9413_v9 = vsel %vm51_vm0, %v14191_v42, 0.0  ;;  %v14193_v15 = vpop.eup %14192 }
0x4ade   :  { %9414 = vadd.xlane.f32.xlu0 %v9413_v9  ;;  %v9416_v47 = vsel %vm51_vm0, %v14193_v15, 0.0 }
0x4aea   :  { %13683 = vrot.lane.b32.xlu1 %v16017_v24, %s16690_s30 }
0x4af4   :  { %13688 = vrot.lane.b32.xlu0 %v16033_v11, %s16690_s30 }
0x4af8   :  { %9538 = vrot.lane.b32.xlu0 %v16013_v36, %s16692_s12 }
0x4afc   :  { %9542 = vrot.lane.b32.xlu0 %v16029_v40, %s16692_s12 }
0x4b0e   :  { %9417 = vadd.xlane.f32.xlu1 %v9416_v47 }
0x4b1f   :  { %9536 = vrot.lane.b32.xlu1 %v16009_v3, %s16692_s12 }
0x4b23   :  { %9540 = vrot.lane.b32.xlu1 %v16023_v0, %s16692_s12 }
0x4b66   :  { %v9412_v26 = vpop.xlane.xlu1 %9411 }
0x4b67   :  { %14194 = vrcp.f32 %v9412_v26  ;;  %v9409_v18 = vpop.xlane.xlu0 %9408 }
0x4b68   :  { %14196 = vrcp.f32 %v9409_v18 }
0x4b6a   :  { %v13684_v50 = vpop.permute.xlu1 %13683 }
0x4b6b   :  { %v13686_v63 = vunpack.i.h.bf16 %v13684_v50  ;;  %v13685_v48 = vunpack.i.l.bf16 %v13684_v50  ;;  %v9415_v17 = vpop.xlane.xlu0 %9414 }
0x4b6c   :  { %14198 = vrcp.f32 %v9415_v17 }
0x4b6d   :  { %v13003_v58 = vpack.c.bf16 %v13686_v63, %v13685_v48 }
0x4b6f   :  { %13005 = vmatprep.subr.msk.bf16.mxu0 %vm16069_vm11, %v13003_v58  ;;  %v13689_v21 = vpop.permute.xlu0 %13688 }
0x4b70   :  { %v13691_v1 = vunpack.i.h.bf16 %v13689_v21  ;;  %v13690_v52 = vunpack.i.l.bf16 %v13689_v21 }
0x4b71   :  { %v14195_v2 = vpop.eup %14194 }
0x4b72   :  { %v14197_v51 = vpop.eup %14196  ;;  %v9424_v12 = vmul.f32 %v14195_v2, %v14187_v62  ;;  %v13009_v31 = vpack.c.bf16 %v13691_v1, %v13690_v52 }
0x4b73   :  { %v9423_v4 = vmul.f32 %v14197_v51, %v14189_v14  ;;  %v9539_v6 = vpop.permute.xlu0 %9538 }
0x4b75   :  { %12255 = vmatprep.mubr.msk.f32.mxu0 %vm51_vm0, %v9423_v4 }
0x4b76   :  { %12256 = vmatmul.mubr.msk.f32.vlgmr.msra.gmra.mrb[128].mxu0 %vm51_vm0, %v9424_v12  ;;  %v14199_v41 = vpop.eup %14198 }
0x4b77   :  { %13008 = vmatpush3.bf16.xpose.msk.msra.mxu0 %vm16069_vm11, %v13003_v58  ;;  %v9425_v32 = vmul.f32 %v14199_v41, %v14191_v42  ;;  %v9543_v35 = vpop.permute.xlu0 %9542 }
0x4b78   :  { %13011 = vmatprep.subr.msk.bf16.mxu0 %vm16069_vm11, %v13009_v31 }
0x4b79   :  { %12258 = vmatprep.mubr.msk.f32.mxu0 %vm51_vm0, %v9425_v32 }
0x4b7f   :  { %13014 = vmatpush3.bf16.xpose.msk.msra.mxu0 %vm16069_vm11, %v13009_v31 }
0x4b9b   :  { %v9418_v5 = vpop.xlane.xlu1 %9417 }
0x4b9c   :  { %14200 = vrcp.f32 %v9418_v5 }
0x4b9f   :  { %v9537_v38 = vpop.permute.xlu1 %9536 }
0x4ba3   :  { %v9541_v62 = vpop.permute.xlu1 %9540 }
0x4ba6   :  { %v14201_v44 = vpop.eup %14200 }
0x4ba7   :  { %v9426_v61 = vmul.f32 %v14201_v44, %v14193_v15 }
0x4ba9   :  { %12259 = vmatmul.mubr.msk.f32.gmra.mrb[130].mxu0 %vm51_vm0, %v9426_v61 }
0x4baa   :  { %12269 = vmatprep.mubr.msk.f32.mxu0 %vm2486_vm5, %v9537_v38 }
0x4bad   :  { %12270 = vmatmul.mubr.msk.f32.vlgmr.msra.gmra.mrb[132].mxu0 %vm2486_vm5, %v9539_v6 }
0x4bae   :  { %12272 = vmatprep.mubr.msk.f32.mxu0 %vm2486_vm5, %v9541_v62 }
0x4bb1   :  { %12273 = vmatmul.mubr.msk.f32.gmra.mrb[134].mxu0 %vm2486_vm5, %v9543_v35 }
0x4c49   :  { %v16439_v14 = vpop.f32.mrb[128].mxu0 }
0x4c4a   :  { %v16441_v30 = vpop.f32.mrb[129].mxu0 }
0x4c7c   :  { %v16443_v28 = vpop.f32.mrb[130].mxu0 }
0x4c7d   :  { %v16445_v42 = vpop.f32.mrb[131].mxu0 }
0x4c80   :  { %v12271_v9 = vpop.f32.mrb[132].mxu0 }
0x4c81   :  { %v9654_v22 = vmul.f32 0.35355338, %v12271_v9  ;;  %v9634_v16 = vpop.f32.mrb[133].mxu0 }
0x4c82   :  { %v9653_v15 = vmul.f32 0.35355338, %v9634_v16 }
0x4c83   :  { %v9658_v47 = vadd.f32 %v9654_v22, %v14375_v46 }
0x4c84   :  { %v9657_v26 = vadd.f32 %v9653_v15, %v14375_v46  ;;  %v12274_v18 = vpop.f32.mrb[134].mxu0 }
0x4c85   :  { %v9656_v50 = vmul.f32 0.35355338, %v12274_v18  ;;  %v9644_v63 = vpop.f32.mrb[135].mxu0  ;;  %v9664_v48 = vsel %vm51_vm0, %v9658_v47, -inf }
0x4c86   :  { %v9655_v17 = vmul.f32 0.35355338, %v9644_v63  ;;  %9665 = vmax.xlane.f32.xlu0 %v9664_v48  ;;  %v9661_v58 = vsel %vm51_vm0, %v9657_v26, -inf }
0x4c87   :  { %v9660_v21 = vadd.f32 %v9656_v50, %v14379_v54  ;;  %9662 = vmax.xlane.f32.xlu1 %v9661_v58 }
0x4c88   :  { %v9659_v2 = vadd.f32 %v9655_v17, %v14379_v54 }
0x4c89   :  { %v9670_v51 = vsel %vm51_vm0, %v9660_v21, -inf }
0x4c8a   :  { %v9667_v1 = vsel %vm51_vm0, %v9659_v2, -inf }
0x4c8b   :  { %9671 = vmax.xlane.f32.xlu1 %v9670_v51  ;;  %9668 = vmax.xlane.f32.xlu0 %v9667_v1 }
0x4c9c   :  { %13698 = vrot.lane.b32.xlu1 %v16035_v45, %s16692_s12 }
0x4ca1   :  { %13693 = vrot.lane.b32.xlu0 %v16019_v8, %s16692_s12 }
0x4d13   :  { %v9666_v52 = vpop.xlane.xlu0 %9665 }
0x4d14   :  { %v9674_v4 = vsub.f32 %v9658_v47, %v9666_v52  ;;  %v9663_v12 = vpop.xlane.xlu1 %9662 }
0x4d15   :  { %v9673_v31 = vsub.f32 %v9657_v26, %v9663_v12 }
0x4d16   :  { %v9679_v41 = vmul.f32 1.442695, %v9674_v4 }
0x4d17   :  { %v9677_v32 = vmul.f32 1.442695, %v9673_v31 }
0x4d18   :  { %14202 = vpow2.f32 %v9679_v41  ;;  %v9672_v5 = vpop.xlane.xlu1 %9671  ;;  %v9669_v44 = vpop.xlane.xlu0 %9668 }
0x4d19   :  { %14204 = vpow2.f32 %v9677_v32  ;;  %v9675_v38 = vsub.f32 %v9659_v2, %v9669_v44  ;;  %v9676_v58 = vsub.f32 %v9660_v21, %v9672_v5 }
0x4d1b   :  { %v9681_v61 = vmul.f32 1.442695, %v9675_v38  ;;  %v9683_v2 = vmul.f32 1.442695, %v9676_v58 }
0x4d1c   :  { %v13699_v6 = vpop.permute.xlu1 %13698  ;;  %v13694_v62 = vpop.permute.xlu0 %13693 }
0x4d1d   :  { %v13696_v35 = vunpack.i.h.bf16 %v13694_v62  ;;  %14206 = vpow2.f32 %v9681_v61  ;;  %v13701_v9 = vunpack.i.h.bf16 %v13699_v6  ;;  %v13700_v22 = vunpack.i.l.bf16 %v13699_v6 }
0x4d1e   :  { %v13695_v16 = vunpack.i.l.bf16 %v13694_v62  ;;  %14208 = vpow2.f32 %v9683_v2 }
0x4d1f   :  { %v13019_v47 = vpack.c.bf16 %v13701_v9, %v13700_v22 }
0x4d20   :  { %v13015_v15 = vpack.c.bf16 %v13696_v35, %v13695_v16 }
0x4d22   :  { %v14203_v18 = vpop.eup %14202  ;;  %13016 = vmatprep.subr.bf16.mxu1 %v13015_v15 }
0x4d23   :  { %v14205_v26 = vpop.eup %14204  ;;  %13018 = vmatpush3.bf16.msra.mxu1 %v13015_v15  ;;  %v9688_v50 = vsel %vm51_vm0, %v14203_v18, 0.0 }
0x4d24   :  { %13020 = vmatprep.subr.bf16.mxu1 %v13019_v47  ;;  %9689 = vadd.xlane.f32.xlu1 %v9688_v50  ;;  %v9685_v63 = vsel %vm51_vm0, %v14205_v26, 0.0 }
0x4d25   :  { %9686 = vadd.xlane.f32.xlu0 %v9685_v63 }
0x4d27   :  { %13022 = vmatpush3.bf16.msra.mxu1 %v13019_v47  ;;  %v14207_v48 = vpop.eup %14206 }
0x4d28   :  { %v9691_v17 = vsel %vm51_vm0, %v14207_v48, 0.0  ;;  %v14209_v51 = vpop.eup %14208 }
0x4d29   :  { %9692 = vadd.xlane.f32.xlu0 %v9691_v17  ;;  %v9694_v1 = vsel %vm51_vm0, %v14209_v51, 0.0 }
0x4d35   :  { %13703 = vrot.lane.b32.xlu1 %v16017_v24, %s16688_s7 }
0x4d3f   :  { %13708 = vrot.lane.b32.xlu0 %v16033_v11, %s16688_s7 }
0x4d43   :  { %9816 = vrot.lane.b32.xlu0 %v16013_v36, %s16698_s21 }
0x4d47   :  { %9820 = vrot.lane.b32.xlu0 %v16029_v40, %s16698_s21 }
0x4d59   :  { %9695 = vadd.xlane.f32.xlu1 %v9694_v1 }
0x4d6a   :  { %9814 = vrot.lane.b32.xlu1 %v16009_v3, %s16698_s21 }
0x4d6e   :  { %9818 = vrot.lane.b32.xlu1 %v16023_v0, %s16698_s21 }
0x4db1   :  { %v9690_v24 = vpop.xlane.xlu1 %9689 }
0x4db2   :  { %14210 = vrcp.f32 %v9690_v24  ;;  %v9687_v11 = vpop.xlane.xlu0 %9686 }
0x4db3   :  { %14212 = vrcp.f32 %v9687_v11 }
0x4db5   :  { %v13704_v36 = vpop.permute.xlu1 %13703 }
0x4db6   :  { %v13706_v21 = vunpack.i.h.bf16 %v13704_v36  ;;  %v13705_v52 = vunpack.i.l.bf16 %v13704_v36  ;;  %v9693_v4 = vpop.xlane.xlu0 %9692 }
0x4db7   :  { %14214 = vrcp.f32 %v9693_v4 }
0x4db8   :  { %v13023_v40 = vpack.c.bf16 %v13706_v21, %v13705_v52 }
0x4dba   :  { %13025 = vmatprep.subr.msk.bf16.mxu1 %vm16069_vm11, %v13023_v40  ;;  %v13709_v12 = vpop.permute.xlu0 %13708 }
0x4dbb   :  { %v13711_v3 = vunpack.i.h.bf16 %v13709_v12  ;;  %v13710_v32 = vunpack.i.l.bf16 %v13709_v12 }
0x4dbc   :  { %v14211_v31 = vpop.eup %14210 }
0x4dbd   :  { %v14213_v41 = vpop.eup %14212  ;;  %v9702_v0 = vmul.f32 %v14211_v31, %v14203_v18  ;;  %v13029_v44 = vpack.c.bf16 %v13711_v3, %v13710_v32 }
0x4dbe   :  { %v9701_v5 = vmul.f32 %v14213_v41, %v14205_v26  ;;  %v9817_v22 = vpop.permute.xlu0 %9816 }
0x4dc0   :  { %12283 = vmatprep.mubr.msk.f32.mxu1 %vm51_vm0, %v9701_v5 }
0x4dc1   :  { %12284 = vmatmul.mubr.msk.f32.vlgmr.msra.gmra.mrb[140].mxu1 %vm51_vm0, %v9702_v0  ;;  %v14215_v38 = vpop.eup %14214 }
0x4dc2   :  { %13028 = vmatpush3.bf16.xpose.msk.msra.mxu1 %vm16069_vm11, %v13023_v40  ;;  %v9703_v61 = vmul.f32 %v14215_v38, %v14207_v48  ;;  %v9821_v15 = vpop.permute.xlu0 %9820 }
0x4dc3   :  { %13031 = vmatprep.subr.msk.bf16.mxu1 %vm16069_vm11, %v13029_v44 }
0x4dc4   :  { %12286 = vmatprep.mubr.msk.f32.mxu1 %vm51_vm0, %v9703_v61 }
0x4dca   :  { %13034 = vmatpush3.bf16.xpose.msk.msra.mxu1 %vm16069_vm11, %v13029_v44 }
0x4de6   :  { %v9696_v6 = vpop.xlane.xlu1 %9695 }
0x4de7   :  { %14216 = vrcp.f32 %v9696_v6 }
0x4dea   :  { %v9815_v35 = vpop.permute.xlu1 %9814 }
0x4dee   :  { %v9819_v16 = vpop.permute.xlu1 %9818 }
0x4df1   :  { %v14217_v62 = vpop.eup %14216 }
0x4df2   :  { %v9704_v9 = vmul.f32 %v14217_v62, %v14209_v51 }
0x4df4   :  { %12287 = vmatmul.mubr.msk.f32.gmra.mrb[142].mxu1 %vm51_vm0, %v9704_v9 }
0x4df5   :  { %12297 = vmatprep.mubr.msk.f32.mxu1 %vm2486_vm5, %v9815_v35 }
0x4df8   :  { %12298 = vmatmul.mubr.msk.f32.vlgmr.msra.gmra.mrb[144].mxu1 %vm2486_vm5, %v9817_v22 }
0x4df9   :  { %12300 = vmatprep.mubr.msk.f32.mxu1 %vm2486_vm5, %v9819_v16 }
0x4dfc   :  { %12301 = vmatmul.mubr.msk.f32.gmra.mrb[146].mxu1 %vm2486_vm5, %v9821_v15 }
0x4e94   :  { %v16491_v37 = vpop.f32.mrb[140].mxu1 }
0x4e95   :  { %v16493_v18 = vpop.f32.mrb[141].mxu1 }
0x4ec7   :  { %v16495_v47 = vpop.f32.mrb[142].mxu1 }
0x4ec8   :  { %v16497_v26 = vpop.f32.mrb[143].mxu1 }
0x4ecb   :  { %v12299_v50 = vpop.f32.mrb[144].mxu1 }
0x4ecc   :  { %v9932_v63 = vmul.f32 0.35355338, %v12299_v50  ;;  %v9912_v48 = vpop.f32.mrb[145].mxu1 }
0x4ecd   :  { %v9931_v17 = vmul.f32 0.35355338, %v9912_v48 }
0x4ece   :  { %v9936_v58 = vadd.f32 %v9932_v63, %v14375_v46 }
0x4ecf   :  { %v9935_v2 = vadd.f32 %v9931_v17, %v14375_v46  ;;  %v12302_v51 = vpop.f32.mrb[146].mxu1  ;;  %v7762_v17 = vld [vmem:[%s16644_s2 + $0x2b0] sm:$0xff] }
0x4ed0   :  { %v9934_v1 = vmul.f32 0.35355338, %v12302_v51  ;;  %v9922_v24 = vpop.f32.mrb[147].mxu1  ;;  %v9942_v11 = vsel %vm51_vm0, %v9936_v58, -inf  ;;  %v7764_v51 = vld [vmem:[%s16644_s2 + $0x2d0] sm:$0xff] }
0x4ed1   :  { %v9933_v36 = vmul.f32 0.35355338, %v9922_v24  ;;  %9943 = vmax.xlane.f32.xlu0 %v9942_v11  ;;  %v9939_v21 = vsel %vm51_vm0, %v9935_v2, -inf }
0x4ed2   :  { %v9938_v52 = vadd.f32 %v9934_v1, %v14379_v54  ;;  %9940 = vmax.xlane.f32.xlu1 %v9939_v21  ;;  %v7765_v1 = vld [vmem:[%s16644_s2 + $0x2e0] sm:$0xff] }
0x4ed3   :  { %v9937_v4 = vadd.f32 %v9933_v36, %v14379_v54  ;;  %v13055_v24 = vpack.c.bf16 %v7765_v1, %v7764_v51 }
0x4ed4   :  { %v9948_v40 = vsel %vm51_vm0, %v9938_v52, -inf }
0x4ed5   :  { %v9945_v12 = vsel %vm51_vm0, %v9937_v4, -inf }
0x4ed6   :  { %9949 = vmax.xlane.f32.xlu1 %v9948_v40  ;;  %9946 = vmax.xlane.f32.xlu0 %v9945_v12 }
0x4f5e   :  { %v9944_v46 = vpop.xlane.xlu0 %9943 }
0x4f5f   :  { %v9952_v31 = vsub.f32 %v9936_v58, %v9944_v46  ;;  %v9941_v41 = vpop.xlane.xlu1 %9940  ;;  %v7763_v58 = vld [vmem:[%s16644_s2 + $0x2c0] sm:$0xff] }
0x4f60   :  { %v9951_v3 = vsub.f32 %v9935_v2, %v9941_v41  ;;  %v13051_v2 = vpack.c.bf16 %v7763_v58, %v7762_v17 }
0x4f61   :  { %v9957_v32 = vmul.f32 1.442695, %v9952_v31 }
0x4f62   :  { %v9955_v5 = vmul.f32 1.442695, %v9951_v3 }
0x4f63   :  { %14218 = vpow2.f32 %v9957_v32  ;;  %v9950_v0 = vpop.xlane.xlu1 %9949  ;;  %v9947_v44 = vpop.xlane.xlu0 %9946 }
0x4f64   :  { %14220 = vpow2.f32 %v9955_v5  ;;  %v9954_v38 = vsub.f32 %v9938_v52, %v9950_v0  ;;  %v9953_v61 = vsub.f32 %v9937_v4, %v9947_v44 }
0x4f66   :  { %v9961_v6 = vmul.f32 1.442695, %v9954_v38  ;;  %v9959_v54 = vmul.f32 1.442695, %v9953_v61 }
0x4f68   :  { %14222 = vpow2.f32 %v9961_v6 }
0x4f69   :  { %14224 = vpow2.f32 %v9959_v54 }
0x4f6d   :  { %v14219_v62 = vpop.eup %14218 }
0x4f6e   :  { %v14221_v35 = vpop.eup %14220  ;;  %v9966_v9 = vsel %vm51_vm0, %v14219_v62, 0.0 }
0x4f6f   :  { %9967 = vadd.xlane.f32.xlu1 %v9966_v9  ;;  %v9963_v22 = vsel %vm51_vm0, %v14221_v35, 0.0 }
0x4f70   :  { %9964 = vadd.xlane.f32.xlu0 %v9963_v22 }
0x4f72   :  { %v14223_v16 = vpop.eup %14222 }
0x4f73   :  { %v14225_v15 = vpop.eup %14224  ;;  %v9972_v50 = vsel %vm51_vm0, %v14223_v16, 0.0 }
0x4f74   :  { %9973 = vadd.xlane.f32.xlu1 %v9972_v50  ;;  %v9969_v63 = vsel %vm51_vm0, %v14225_v15, 0.0 }
0x4f75   :  { %9970 = vadd.xlane.f32.xlu0 %v9969_v63 }
0x4f85   :  { %13718 = vrot.lane.b32.xlu1 %v16035_v45, %s16698_s21 }
0x4f89   :  { %10096 = vrot.lane.b32.xlu1 %v16277_v23, %s16688_s7 }
0x4f8b   :  { %13713 = vrot.lane.b32.xlu0 %v16019_v8, %s16698_s21 }
0x4f8d   :  { %10112 = vrot.lane.b32.xlu1 %v16285_v19, %s16690_s30 }
0x4f8f   :  { %10098 = vrot.lane.b32.xlu0 %v16275_v10, %s16688_s7 }
0x4f91   :  { %10128 = vrot.lane.b32.xlu1 %v16337_v20, %s14263_s9 }
0x4f93   :  { %10114 = vrot.lane.b32.xlu0 %v16283_v57, %s16690_s30 }
0x4f95   :  { %10144 = vrot.lane.b32.xlu1 %v16389_v49, %s14266_s16 }
0x4f97   :  { %10130 = vrot.lane.b32.xlu0 %v16335_v39, %s14263_s9 }
0x4f99   :  { %10146 = vrot.lane.b32.xlu1 %v16387_v7, %s14266_s16 }
0x4f9b   :  { %10100 = vrot.lane.b32.xlu0 %v16281_v13, %s16688_s7 }
0x4f9d   :  { %10102 = vrot.lane.b32.xlu1 %v16279_v25, %s16688_s7 }
0x4f9f   :  { %10160 = vrot.lane.b32.xlu0 %v16441_v30, %s16700_s23 }
0x4fa1   :  { %10162 = vrot.lane.b32.xlu1 %v16439_v14, %s16700_s23 }
0x4fa3   :  { %10116 = vrot.lane.b32.xlu0 %v16289_v27, %s16690_s30 }
0x4fa5   :  { %10118 = vrot.lane.b32.xlu1 %v16287_v34, %s16690_s30 }
0x4fa7   :  { %10176 = vrot.lane.b32.xlu0 %v16493_v18, %s16694_s14 }
0x4fa9   :  { %10178 = vrot.lane.b32.xlu1 %v16491_v37, %s16694_s14  ;;  %v7760_v37 = vld [vmem:[%s16644_s2 + $0x290] sm:$0xff] }
0x4fab   :  { %10132 = vrot.lane.b32.xlu0 %v16341_v53, %s14263_s9 }
0x4fad   :  { %10134 = vrot.lane.b32.xlu1 %v16339_v43, %s14263_s9 }
0x4faf   :  { %10148 = vrot.lane.b32.xlu0 %v16393_v56, %s14266_s16 }
0x4fb1   :  { %10164 = vrot.lane.b32.xlu1 %v16445_v42, %s16700_s23  ;;  %v7759_v42 = vld [vmem:[%s16644_s2 + $0x280] sm:$0xff] }
0x4fb3   :  { %10150 = vrot.lane.b32.xlu0 %v16391_v55, %s14266_s16 }
0x4fb5   :  { %10180 = vrot.lane.b32.xlu1 %v16497_v26, %s16694_s14  ;;  %v7761_v26 = vld [vmem:[%s16644_s2 + $0x2a0] sm:$0xff] }
0x4fb6   :  { %v13047_v48 = vpack.c.bf16 %v7761_v26, %v7760_v37 }
0x4fb7   :  { %10166 = vrot.lane.b32.xlu0 %v16443_v28, %s16700_s23  ;;  %v7758_v28 = vld [vmem:[%s16644_s2 + $0x270] sm:$0xff] }
0x4fb8   :  { %v13043_v18 = vpack.c.bf16 %v7759_v42, %v7758_v28 }
0x4ffc   :  { %v9968_v8 = vpop.xlane.xlu1 %9967 }
0x4ffd   :  { %v9965_v45 = vpop.xlane.xlu0 %9964 }
0x4ffe   :  { %14226 = vrcp.f32 %v9965_v45 }
0x4fff   :  { %14228 = vrcp.f32 %v9968_v8 }
0x5001   :  { %v9974_v10 = vpop.xlane.xlu1 %9973 }
0x5002   :  { %v9971_v23 = vpop.xlane.xlu0 %9970 }
0x5003   :  { %14230 = vrcp.f32 %v9971_v23 }
0x5004   :  { %14232 = vrcp.f32 %v9974_v10 }
0x5005   :  { %v13719_v25 = vpop.permute.xlu1 %13718 }
0x5006   :  { %v13714_v13 = vpop.permute.xlu0 %13713  ;;  %v13721_v57 = vunpack.i.h.bf16 %v13719_v25  ;;  %v13720_v19 = vunpack.i.l.bf16 %v13719_v25 }
0x5007   :  { %v13716_v34 = vunpack.i.h.bf16 %v13714_v13  ;;  %v13715_v27 = vunpack.i.l.bf16 %v13714_v13 }
0x5008   :  { %v14227_v39 = vpop.eup %14226  ;;  %v13039_v53 = vpack.c.bf16 %v13721_v57, %v13720_v19 }
0x5009   :  { %v13035_v20 = vpack.c.bf16 %v13716_v34, %v13715_v27  ;;  %v9979_v43 = vmul.f32 %v14227_v39, %v14221_v35  ;;  %v14229_v7 = vpop.eup %14228  ;;  %v10097_v4 = vpop.permute.xlu1 %10096 }
0x500a   :  { %v9980_v55 = vmul.f32 %v14229_v7, %v14219_v62  ;;  %v10099_v12 = vpop.permute.xlu0 %10098 }
0x500b   :  { %13036 = vmatprep.subr.bf16.mxu0 %v13035_v20  ;;  %12311 = vmatprep.mubr.msk.f32.mxu0 %vm51_vm0, %v9979_v43  ;;  %v10205_v63 = vsel %vm2486_vm5, %v16267_v59, %v10099_v12 }
0x500c   :  { %13038 = vmatpush3.bf16.msra.mxu0 %v13035_v20 }
0x500d   :  { %13040 = vmatprep.subr.bf16.mxu0 %v13039_v53  ;;  %v14231_v49 = vpop.eup %14230  ;;  %v10113_v40 = vpop.permute.xlu1 %10112 }
0x500e   :  { %v14233_v56 = vpop.eup %14232  ;;  %v9981_v14 = vmul.f32 %v14231_v49, %v14225_v15  ;;  %v10115_v31 = vpop.permute.xlu0 %10114  ;;  %v10204_v15 = vsel %vm2486_vm5, %v16269_v33, %v10097_v4 }
0x500f   :  { %v9982_v30 = vmul.f32 %v14233_v56, %v14223_v16  ;;  %v10208_v8 = vsel %vm34_vm4, %v10204_v15, %v10113_v40  ;;  %v10209_v10 = vsel %vm34_vm4, %v10205_v63, %v10115_v31 }
0x5010   :  { %13042 = vmatpush3.bf16.msra.mxu0 %v13039_v53 }
0x5011   :  { %13044 = vmatprep.subr.bf16.mxu0 %v13043_v18  ;;  %v10129_v46 = vpop.permute.xlu1 %10128 }
0x5012   :  { %v10131_v3 = vpop.permute.xlu0 %10130  ;;  %v10212_v23 = vsel %vm2505_vm8, %v10208_v8, %v10129_v46 }
0x5013   :  { %12312 = vmatmul.mubr.msk.f32.vlgmr.msra.gmra.mrb[136].mxu0 %vm51_vm0, %v9980_v55  ;;  %v10213_v25 = vsel %vm2505_vm8, %v10209_v10, %v10131_v3 }
0x5014   :  { %12314 = vmatprep.mubr.msk.f32.mxu0 %vm51_vm0, %v9981_v14  ;;  %13046 = vmatpush3.bf16.msra.mxu0 %v13043_v18 }
0x5015   :  { %13048 = vmatprep.subr.bf16.mxu0 %v13047_v48  ;;  %v10145_v41 = vpop.permute.xlu1 %10144 }
0x5016   :  { %v10101_v5 = vpop.permute.xlu0 %10100  ;;  %v10216_v13 = vsel %vm51_vm0, %v10212_v23, %v10145_v41 }
0x5017   :  { %12315 = vmatmul.mubr.msk.f32.gmra.mrb[138].mxu0 %vm51_vm0, %v9982_v30  ;;  %v10206_v33 = vsel %vm2486_vm5, %v16273_v60, %v10101_v5 }
0x5018   :  { %13050 = vmatpush3.bf16.msra.mxu0 %v13047_v48 }
0x5019   :  { %13052 = vmatprep.subr.bf16.mxu0 %v13051_v2  ;;  %v10147_v32 = vpop.permute.xlu1 %10146 }
0x501a   :  { %v10161_v44 = vpop.permute.xlu0 %10160  ;;  %v10217_v57 = vsel %vm51_vm0, %v10213_v25, %v10147_v32 }
0x501b   :  { %v10221_v59 = vsel %vm10220_vm12, %v10216_v13, %v10161_v44 }
0x501c   :  { %13054 = vmatpush3.bf16.msra.mxu0 %v13051_v2  ;;  %v7766_v2 = vld [vmem:[%s16644_s2 + $0x2f0] ss:$0 sm:$0xff] }
0x501d   :  { %13056 = vmatprep.subr.bf16.mxu0 %v13055_v24  ;;  %v10103_v0 = vpop.permute.xlu1 %10102 }
0x501e   :  { %v10117_v61 = vpop.permute.xlu0 %10116  ;;  %v10207_v43 = vsel %vm2486_vm5, %v16271_v29, %v10103_v0 }
0x501f   :  { %v10210_v34 = vsel %vm34_vm4, %v10206_v33, %v10117_v61 }
0x5020   :  { %13058 = vmatpush3.bf16.msra.mxu0 %v13055_v24 }
0x5021   :  { %v10163_v38 = vpop.permute.xlu1 %10162 }
0x5022   :  { %v10177_v54 = vpop.permute.xlu0 %10176  ;;  %v10222_v27 = vsel %vm10220_vm12, %v10217_v57, %v10163_v38 }
0x5023   :  { %v10226_v39 = vsel %vm10225_vm13, %v10221_v59, %v10177_v54 }
0x5025   :  { %v10119_v6 = vpop.permute.xlu1 %10118 }
0x5026   :  { %v10133_v62 = vpop.permute.xlu0 %10132  ;;  %v10211_v49 = vsel %vm34_vm4, %v10207_v43, %v10119_v6 }
0x5027   :  { %v10214_v53 = vsel %vm2505_vm8, %v10210_v34, %v10133_v62 }
0x502a   :  { %v10149_v9 = vpop.permute.xlu0 %10148 }
0x502b   :  { %v10218_v55 = vsel %vm51_vm0, %v10214_v53, %v10149_v9 }
0x502e   :  { %v10151_v16 = vpop.permute.xlu0 %10150 }
0x5032   :  { %v10167_v45 = vpop.permute.xlu0 %10166 }
0x50e6   :  { %v12313_v11 = vpop.f32.mrb[136].mxu0 }
0x50e7   :  { %10194 = vrot.lane.b32.xlu1 %v12313_v11, %s14243_s17  ;;  %v10073_v36 = vpop.f32.mrb[137].mxu0 }
0x50e8   :  { %10192 = vrot.lane.b32.xlu0 %v10073_v36, %s14243_s17 }
0x50ea   :  { %v12316_v21 = vpop.f32.mrb[138].mxu0 }
0x50eb   :  { %v10083_v52 = vpop.f32.mrb[139].mxu0 }
0x50ec   :  { %10182 = vrot.lane.b32.xlu0 %v16495_v47, %s16694_s14  ;;  %10196 = vrot.lane.b32.xlu1 %v10083_v52, %s14243_s17  ;;  %v10179_v47 = vpop.permute.xlu1 %10178 }
0x50ed   :  { %v10227_v7 = vsel %vm10225_vm13, %v10222_v27, %v10179_v47 }
0x50f0   :  { %10198 = vrot.lane.b32.xlu0 %v12316_v21, %s14243_s17  ;;  %v10135_v35 = vpop.permute.xlu1 %10134 }
0x50f1   :  { %v10215_v14 = vsel %vm2505_vm8, %v10211_v49, %v10135_v35 }
0x50f2   :  { %v10219_v18 = vsel %vm51_vm0, %v10215_v14, %v10151_v16 }
0x50f3   :  { %v10224_v26 = vsel %vm10220_vm12, %v10219_v18, %v10167_v45 }
0x50f4   :  { %v10165_v22 = vpop.permute.xlu1 %10164 }
0x50f5   :  { %v10223_v30 = vsel %vm10220_vm12, %v10218_v55, %v10165_v22 }
0x50f8   :  { %v10181_v50 = vpop.permute.xlu1 %10180 }
0x50f9   :  { %v10228_v29 = vsel %vm10225_vm13, %v10223_v30, %v10181_v50 }
0x5159   :  { %v10195_v19 = vpop.permute.xlu1 %10194 }
0x515a   :  { %v10193_v20 = vpop.permute.xlu0 %10192  ;;  %v10232_v56 = vsel %vm10230_vm14, %v10227_v7, %v10195_v19 }
0x515b   :  { %v10231_v60 = vsel %vm10230_vm14, %v10226_v39, %v10193_v20 }
0x515c   :  { %12333 = vmatprep.mubr.msk.f32.mxu0 %vm7778_vm10, %v10231_v60 }
0x515d   :  { %12334 = vmatmul.mubr.msk.f32.vlgmr.msra.gmra.mrb[140].mxu0 %vm7778_vm10, %v10232_v56 }
0x515e   :  { %v10183_v28 = vpop.permute.xlu0 %10182  ;;  %v10197_v42 = vpop.permute.xlu1 %10196 }
0x515f   :  { %v10233_v37 = vsel %vm10230_vm14, %v10228_v29, %v10197_v42  ;;  %v10229_v48 = vsel %vm10225_vm13, %v10224_v26, %v10183_v28 }
0x5160   :  { %12336 = vmatprep.mubr.msk.f32.mxu0 %vm7778_vm10, %v10233_v37 }
0x5162   :  { %v10199_v17 = vpop.permute.xlu0 %10198 }
0x5163   :  { %v10234_v58 = vsel %vm10230_vm14, %v10229_v48, %v10199_v17 }
0x5164   :  { %12337 = vmatmul.mubr.msk.f32.gmra.mrb[142].mxu0 %vm7778_vm10, %v10234_v58 }
0x5230   :  { %v12335_v51 = vpop.f32.mrb[140].mxu0 }
0x5231   :  { %v10319_v1 = vadd.f32 %v12335_v51, %v7766_v2  ;;  %v10313_v24 = vpop.f32.mrb[141].mxu0 }
0x5232   :  { %v10314_v11 = vadd.f32 %v10313_v24, %v7766_v2 }
0x5237   :  { %v12338_v36 = vpop.f32.mrb[142].mxu0 }
0x5238   :  { %v10329_v21 = vadd.f32 %v12338_v36, %v7766_v2  ;;  %v10323_v52 = vpop.f32.mrb[143].mxu0 }
0x5239   :  { %v10324_v4 = vadd.f32 %v10323_v52, %v7766_v2 }
0x523a   :  { %10336 = vrot.lane.b32.xlu0 %v10329_v21, %s14237_s11 }
0x523b   :  { %10334 = vrot.lane.b32.xlu1 %v10324_v4, %s14237_s11 }
0x52ac   :  { %v10337_v40 = vpop.permute.xlu0 %10336 }
0x52ad   :  { %v10341_v12 = vsel %vm7778_vm10, %v10319_v1, %v10337_v40  ;;  %v10335_v46 = vpop.permute.xlu1 %10334 }
0x52ae   :  { %10343 = vst [vmem:[%s16647_s3 + $0x8] sm:$0xff] %v10341_v12  ;;  %v10340_v31 = vsel %vm7778_vm10, %v10314_v11, %v10335_v46 }
0x52af   :  { %10342 = vst [vmem:[%s16647_s3] sm:$0xff] %v10340_v31 }

</bundles_post_ra>
